<compile_context>
chip_gen: v7x
topology: tpu7x:2x2x1
jax: 0.10.0
libtpu: 0.0.40
codegen_flags: <defaults>
</compile_context>

<pallas_src>
import functools

import jax
import jax.numpy as jnp
from jax.experimental import pallas as pl
from jax.experimental.pallas import tpu as pltpu

_EPS = 1e-5     # torch nn.LayerNorm default eps
_LANE = 128     # TPU lane width


def _round_up(x, m):
    return (x + m - 1) // m * m


def _cdiv(a, b):
    return (a + b - 1) // b


def _block_geometry(in_channels, growth_rate, num_blocks, lane=_LANE):
    """Packed-layout geometry per block.

    Returns (cur, cur_pad, grp_start, grp_end) per block where
      cur       = real channel count entering block i  (C0 + i*G)
      cur_pad   = round_up(cur, 128)  -> width of the LN/matmul prefix
      grp_start = 128-aligned start of the lane group(s) holding the new slab
      grp_end   = 128-aligned end of that group range
    """
    geo = []
    cur = in_channels
    for _ in range(num_blocks):
        cur_pad = _round_up(cur, lane)
        grp_start = (cur // lane) * lane
        grp_end = _round_up(cur + growth_rate, lane)
        geo.append((cur, cur_pad, grp_start, grp_end))
        cur += growth_rate
    return geo


def _make_dense_stage_kernel(geometry, c0_pad, c_total_pad, eps):
    """Fused stage kernel.

    Refs: x_ref (tm, c0_pad) f32; then per block: gamma,beta (1,cur_pad) f32,
    w1 (cur_pad,cur_pad) bf16, b1 (1,cur_pad) f32, w2 (cur_pad,cur_pad) bf16,
    b2 (1,cur_pad) f32, wa_emb (cur_pad, grp_end-grp_start) bf16;
    then out_ref (tm, c_total_pad) bf16 and feat scratch (tm, c_total_pad) f32.
    feat is the VMEM-resident, PACKED concatenated-feature working buffer.
    """

    def kernel(x_ref, *rest):
        feat = rest[-1]       # f32 VMEM working buffer
        out_ref = rest[-2]    # bf16 HBM output block
        w_refs = rest[:-2]
        tm = feat.shape[0]

        xv = x_ref[...]                                   # (tm, c0_pad), zero beyond C0
        feat[:, :c0_pad] = xv
        if c_total_pad > c0_pad:
            feat[:, c0_pad:] = jnp.zeros((tm, c_total_pad - c0_pad), jnp.float32)

        # Running LayerNorm statistics over the real channels (padded lanes = 0).
        # Updated with only the NEW growth slab each block.
        s = jnp.sum(xv, axis=-1, keepdims=True)
        ss = jnp.sum(xv * xv, axis=-1, keepdims=True)

        for i, (cur, cur_pad, ga, gb) in enumerate(geometry):
            gamma, beta, w1, b1, w2, b2, wa = w_refs[7 * i: 7 * (i + 1)]

            x = feat[:, :cur_pad]                          # packed real prefix + zero lanes
            inv_c = 1.0 / float(cur)
            mean = s * inv_c
            # TODO(synk): one-pass E[x^2]-mean^2 variance matches the JAX ref but is
            # less robust than torch's two-pass LayerNorm for very large means.
            var = jnp.maximum(ss * inv_c - mean * mean, 0.0)
            xn = (x - mean) * jax.lax.rsqrt(var + eps)
            xn = xn * gamma[...] + beta[...]               # padded lanes stay exactly 0

            # Pre-norm residual MLP (drop_path == identity at inference).
            # bf16 MXU operands, f32 accumulation; elementwise math stays f32.
            h = jnp.dot(xn.astype(jnp.bfloat16), w1[...],
                        preferred_element_type=jnp.float32) + b1[...]
            h = jax.nn.gelu(h, approximate=True)  # TODO(synk): torch default GELU is exact erf
            h = jnp.dot(h.astype(jnp.bfloat16), w2[...],
                        preferred_element_type=jnp.float32) + b2[...]
            h = h + x

            # 1x1 align conv (bias=False) == channel matmul.  The real G output
            # columns are pre-embedded at lane offset (cur - ga) inside wa, so the
            # packed (non-128-aligned) slab lands via a 128-aligned add.
            o = jnp.dot(h.astype(jnp.bfloat16), wa[...],
                        preferred_element_type=jnp.float32)   # (tm, gb - ga)
            feat[:, ga:gb] = feat[:, ga:gb] + o

            # Update running stats (embedded zero columns contribute exactly 0).
            s = s + jnp.sum(o, axis=-1, keepdims=True)
            ss = ss + jnp.sum(o * o, axis=-1, keepdims=True)

        # Single lane-dense bf16 store of the packed concat result.
        out_ref[...] = feat[...].astype(out_ref.dtype)

    return kernel


def init_dense_stage_params(key, in_channels, growth_rate, num_blocks,
                            dtype=jnp.float32):
    """Real (unpadded) parameters, matching the module's channel growth."""
    params = []
    cur = in_channels
    for _ in range(num_blocks):
        key, k1, k2, k3, k4, k5, k6, k7 = jax.random.split(key, 8)
        params.append({
            "gamma": 1.0 + 0.02 * jax.random.normal(k4, (1, cur), dtype),
            "beta": 0.02 * jax.random.normal(k5, (1, cur), dtype),
            "w1": 0.02 * jax.random.normal(k1, (cur, cur), dtype),
            "b1": 0.02 * jax.random.normal(k6, (1, cur), dtype),
            "w2": 0.02 * jax.random.normal(k2, (cur, cur), dtype),
            "b2": 0.02 * jax.random.normal(k7, (1, cur), dtype),
            # torch Conv2d 1x1 weight is (growth, cur, 1, 1); stored as (cur, growth).
            "wa": 0.02 * jax.random.normal(k3, (cur, growth_rate), dtype),
        })
        cur += growth_rate
    return params, cur  # cur == out_channels


def _embed(w, rows, cols, dtype, row_off=0, col_off=0):
    out = jnp.zeros((rows, cols), dtype)
    return out.at[row_off:row_off + w.shape[0],
                  col_off:col_off + w.shape[1]].set(w.astype(dtype))


def pad_params_for_kernel(params, in_channels, growth_rate, lane=_LANE):
    """Zero-pad per-block tensors to the PACKED-prefix geometry.

    Only the running channel prefix is padded to a 128-lane multiple; growth
    slabs stay packed.  wa is embedded into its 128-aligned lane group at column
    offset (cur - grp_start) so the kernel's slab write is fully aligned.
    Zero padding keeps the padded computation numerically identical.
    """
    geo = _block_geometry(in_channels, growth_rate, len(params), lane)
    flat = []
    for p, (cur, cur_pad, ga, gb) in zip(params, geo):
        flat += [
            _embed(p["gamma"], 1, cur_pad, jnp.float32),
            _embed(p["beta"], 1, cur_pad, jnp.float32),
            _embed(p["w1"], cur_pad, cur_pad, jnp.bfloat16),
            _embed(p["b1"], 1, cur_pad, jnp.float32),
            _embed(p["w2"], cur_pad, cur_pad, jnp.bfloat16),
            _embed(p["b2"], 1, cur_pad, jnp.float32),
            _embed(p["wa"], cur_pad, gb - ga, jnp.bfloat16, col_off=cur - ga),
        ]
    return tuple(flat)


def _pick_tile_and_vmem():
    """Per-generation row tile / VMEM budget (conservative default fits v7x 64 MiB)."""
    tm, vmem = 256, 48 * 1024 * 1024
    try:
        info = pltpu.get_tpu_info()
        if getattr(info, "vmem_capacity_bytes", 0) >= 100 * 1024 * 1024:
            tm, vmem = 512, 100 * 1024 * 1024      # v5e / v6e: 128 MiB physical VMEM
    except Exception:
        pass
    return tm, vmem


@functools.partial(
    jax.jit,
    static_argnames=("in_channels", "growth_rate", "num_blocks", "tm",
                     "vmem_limit_bytes"))
def _dense_stage_forward_impl(x_nchw, flat_padded_params, *, in_channels,
                              growth_rate, num_blocks, tm, vmem_limit_bytes):
    B, C0, H, W = x_nchw.shape
    assert C0 == in_channels
    assert len(flat_padded_params) == 7 * num_blocks

    G = growth_rate
    c0p = _round_up(C0, _LANE)
    c_out = C0 + num_blocks * G
    c_total_pad = _round_up(c_out, _LANE)
    geometry = _block_geometry(C0, G, num_blocks)

    # NCHW -> NHWC -> flat rows (channel math becomes per-row ops / matmuls).
    # TODO(synk): accepting NHWC + padded channels at the model boundary would
    # remove this transpose/pad prologue and the final transpose entirely.
    N = B * H * W
    x = jnp.transpose(x_nchw.astype(jnp.float32), (0, 2, 3, 1)).reshape(N, C0)

    # Row tiling: keep >= 2 and an EVEN number of row tiles where possible so
    # both TensorCores of a v7x chip get balanced work.
    grid_rows = _cdiv(N, tm)
    if N >= 16:
        if grid_rows < 2:
            tm = max(8, _round_up(_cdiv(N, 2), 8))
        elif grid_rows % 2 == 1:
            tm = max(8, _round_up(_cdiv(N, grid_rows + 1), 8))
        grid_rows = _cdiv(N, tm)
    n_pad = grid_rows * tm

    x_p = jnp.pad(x, ((0, n_pad - N), (0, c0p - C0)))   # fused transpose+pad pass

    kernel = _make_dense_stage_kernel(geometry, c0p, c_total_pad, _EPS)

    # Row tiles are pipelined; weight/affine inputs have constant index maps so
    # they are fetched once and stay VMEM-resident for the whole grid.
    # TODO(synk): for deep stages on v7x (64 MiB VMEM), stream per-block weights
    # with an inner pipeline instead of keeping them all resident.
    in_specs = [pl.BlockSpec((tm, c0p), lambda r: (r, 0))]
    for arr in flat_padded_params:
        in_specs.append(pl.BlockSpec(arr.shape, lambda r: (0, 0)))

    # Advisory cost estimate so XLA schedules the prologue/epilogue well.
    flops = 0
    trans = 0
    for (cur, cur_pad, ga, gb) in geometry:
        flops += 2 * n_pad * (2 * cur_pad * cur_pad + cur_pad * (gb - ga))
        trans += n_pad * cur_pad
    wbytes = sum(int(a.size) * a.dtype.itemsize for a in flat_padded_params)
    bytes_accessed = x_p.size * 4 + wbytes + n_pad * c_total_pad * 2

    out_p = pl.pallas_call(
        kernel,
        out_shape=jax.ShapeDtypeStruct((n_pad, c_total_pad), jnp.bfloat16),
        grid=(grid_rows,),
        in_specs=in_specs,
        out_specs=pl.BlockSpec((tm, c_total_pad), lambda r: (r, 0)),
        scratch_shapes=[pltpu.VMEM((tm, c_total_pad), jnp.float32)],
        compiler_params=pltpu.CompilerParams(
            dimension_semantics=("parallel",),
            vmem_limit_bytes=vmem_limit_bytes),
        cost_estimate=pl.CostEstimate(flops=flops, transcendentals=trans,
                                      bytes_accessed=int(bytes_accessed)),
    )(x_p, *flat_padded_params)

    # Packed layout == the module's channel order: just strip padding, reshape,
    # and go back to NCHW (no concat epilogue).
    out = out_p[:N, :c_out].reshape(B, H, W, c_out)
    return jnp.transpose(out, (0, 3, 1, 2)).astype(x_nchw.dtype)


def dense_stage_forward(x_nchw, flat_padded_params, *, in_channels, growth_rate,
                        num_blocks, tm=None, vmem_limit_bytes=None):
    """DenseStage.forward: (B, C_in, H, W) -> (B, C_in + num_blocks*G, H, W)."""
    if tm is None or vmem_limit_bytes is None:
        d_tm, d_vmem = _pick_tile_and_vmem()
        tm = d_tm if tm is None else tm
        vmem_limit_bytes = d_vmem if vmem_limit_bytes is None else vmem_limit_bytes
    return _dense_stage_forward_impl(
        x_nchw, flat_padded_params, in_channels=in_channels,
        growth_rate=growth_rate, num_blocks=num_blocks, tm=tm,
        vmem_limit_bytes=vmem_limit_bytes)


def ref_dense_stage(x_nchw, params, eps=_EPS):
    """Pure-JAX reference with matching numerics (bf16 matmul operands, f32 accum)."""
    B, C0, H, W = x_nchw.shape
    x = jnp.transpose(x_nchw.astype(jnp.float32), (0, 2, 3, 1)).reshape(-1, C0)
    feats = [x]
    for p in params:
        cat = jnp.concatenate(feats, axis=-1)
        c = cat.shape[-1]
        mean = jnp.sum(cat, -1, keepdims=True) / c
        var = jnp.maximum(jnp.sum(cat * cat, -1, keepdims=True) / c - mean * mean, 0.0)
        xn = (cat - mean) * jax.lax.rsqrt(var + eps)
        xn = xn * p["gamma"] + p["beta"]
        h = jnp.dot(xn.astype(jnp.bfloat16), p["w1"].astype(jnp.bfloat16),
                    preferred_element_type=jnp.float32) + p["b1"]
        h = jax.nn.gelu(h, approximate=True)
        h = jnp.dot(h.astype(jnp.bfloat16), p["w2"].astype(jnp.bfloat16),
                    preferred_element_type=jnp.float32) + p["b2"]
        h = h + cat
        o = jnp.dot(h.astype(jnp.bfloat16), p["wa"].astype(jnp.bfloat16),
                    preferred_element_type=jnp.float32)
        feats.append(o)
    out = jnp.concatenate(feats, axis=-1)
    c_out = out.shape[-1]
    return jnp.transpose(out.reshape(B, H, W, c_out), (0, 3, 1, 2))


if __name__ == "__main__":
    # Small shapes consistent with the module (NCHW input).
    B, C_in, H, W = 2, 16, 16, 16
    growth_rate, num_blocks = 32, 3
    # drop_path_rates would be e.g. [0.0, 0.05, 0.1]; identity at inference -> unused.

    key = jax.random.PRNGKey(0)
    key, kx, kp = jax.random.split(key, 3)
    x = jax.random.normal(kx, (B, C_in, H, W), jnp.float32)

    params, out_channels = init_dense_stage_params(kp, C_in, growth_rate, num_blocks)
    flat_padded = pad_params_for_kernel(params, C_in, growth_rate)

    y = dense_stage_forward(x, flat_padded, in_channels=C_in,
                            growth_rate=growth_rate, num_blocks=num_blocks)
    y = jax.block_until_ready(y)

    assert y.shape == (B, out_channels, H, W), y.shape
    assert out_channels == C_in + growth_rate * num_blocks
    assert bool(jnp.all(jnp.isfinite(y)))

    y_ref = ref_dense_stage(x, params)
    max_err = float(jnp.max(jnp.abs(y - y_ref)))
    assert jnp.allclose(y, y_ref, atol=2e-2, rtol=2e-2), max_err

    print("KERNEL_OK")
</pallas_src>

<mosaic_0001>
module attributes {stable_mosaic.version = 11 : i64} {
  func.func @kernel(%arg0: i32, %arg1: memref<256x128xf32, #tpu.memory_space<vmem>>, %arg2: memref<1x128xf32, #tpu.memory_space<vmem>>, %arg3: memref<1x128xf32, #tpu.memory_space<vmem>>, %arg4: memref<128x128xbf16, #tpu.memory_space<vmem>>, %arg5: memref<1x128xf32, #tpu.memory_space<vmem>>, %arg6: memref<128x128xbf16, #tpu.memory_space<vmem>>, %arg7: memref<1x128xf32, #tpu.memory_space<vmem>>, %arg8: memref<128x128xbf16, #tpu.memory_space<vmem>>, %arg9: memref<1x128xf32, #tpu.memory_space<vmem>>, %arg10: memref<1x128xf32, #tpu.memory_space<vmem>>, %arg11: memref<128x128xbf16, #tpu.memory_space<vmem>>, %arg12: memref<1x128xf32, #tpu.memory_space<vmem>>, %arg13: memref<128x128xbf16, #tpu.memory_space<vmem>>, %arg14: memref<1x128xf32, #tpu.memory_space<vmem>>, %arg15: memref<128x128xbf16, #tpu.memory_space<vmem>>, %arg16: memref<1x128xf32, #tpu.memory_space<vmem>>, %arg17: memref<1x128xf32, #tpu.memory_space<vmem>>, %arg18: memref<128x128xbf16, #tpu.memory_space<vmem>>, %arg19: memref<1x128xf32, #tpu.memory_space<vmem>>, %arg20: memref<128x128xbf16, #tpu.memory_space<vmem>>, %arg21: memref<1x128xf32, #tpu.memory_space<vmem>>, %arg22: memref<128x128xbf16, #tpu.memory_space<vmem>>, %arg23: memref<256x128xbf16, #tpu.memory_space<vmem>>, %arg24: memref<256x128xf32, #tpu.memory_space<vmem>>) attributes {dimension_semantics = [#tpu.dimension_semantics<parallel>], iteration_bounds = array<i64: 2>, scalar_prefetch = 0 : i64, scratch_operands = 1 : i64, tpu.core_type = #tpu.core_type<tc>, window_params = [{transform_indices = @transform_0, window_bounds = array<i64: 256, 128>}, {pipeline_mode = #tpu.pipeline_mode<synchronous>, transform_indices = @transform_1, window_bounds = array<i64: 1, 128>}, {pipeline_mode = #tpu.pipeline_mode<synchronous>, transform_indices = @transform_2, window_bounds = array<i64: 1, 128>}, {pipeline_mode = #tpu.pipeline_mode<synchronous>, transform_indices = @transform_3, window_bounds = array<i64: 128, 128>}, {pipeline_mode = #tpu.pipeline_mode<synchronous>, transform_indices = @transform_4, window_bounds = array<i64: 1, 128>}, {pipeline_mode = #tpu.pipeline_mode<synchronous>, transform_indices = @transform_5, window_bounds = array<i64: 128, 128>}, {pipeline_mode = #tpu.pipeline_mode<synchronous>, transform_indices = @transform_6, window_bounds = array<i64: 1, 128>}, {pipeline_mode = #tpu.pipeline_mode<synchronous>, transform_indices = @transform_7, window_bounds = array<i64: 128, 128>}, {pipeline_mode = #tpu.pipeline_mode<synchronous>, transform_indices = @transform_8, window_bounds = array<i64: 1, 128>}, {pipeline_mode = #tpu.pipeline_mode<synchronous>, transform_indices = @transform_9, window_bounds = array<i64: 1, 128>}, {pipeline_mode = #tpu.pipeline_mode<synchronous>, transform_indices = @transform_10, window_bounds = array<i64: 128, 128>}, {pipeline_mode = #tpu.pipeline_mode<synchronous>, transform_indices = @transform_11, window_bounds = array<i64: 1, 128>}, {pipeline_mode = #tpu.pipeline_mode<synchronous>, transform_indices = @transform_12, window_bounds = array<i64: 128, 128>}, {pipeline_mode = #tpu.pipeline_mode<synchronous>, transform_indices = @transform_13, window_bounds = array<i64: 1, 128>}, {pipeline_mode = #tpu.pipeline_mode<synchronous>, transform_indices = @transform_14, window_bounds = array<i64: 128, 128>}, {pipeline_mode = #tpu.pipeline_mode<synchronous>, transform_indices = @transform_15, window_bounds = array<i64: 1, 128>}, {pipeline_mode = #tpu.pipeline_mode<synchronous>, transform_indices = @transform_16, window_bounds = array<i64: 1, 128>}, {pipeline_mode = #tpu.pipeline_mode<synchronous>, transform_indices = @transform_17, window_bounds = array<i64: 128, 128>}, {pipeline_mode = #tpu.pipeline_mode<synchronous>, transform_indices = @transform_18, window_bounds = array<i64: 1, 128>}, {pipeline_mode = #tpu.pipeline_mode<synchronous>, transform_indices = @transform_19, window_bounds = array<i64: 128, 128>}, {pipeline_mode = #tpu.pipeline_mode<synchronous>, transform_indices = @transform_20, window_bounds = array<i64: 1, 128>}, {pipeline_mode = #tpu.pipeline_mode<synchronous>, transform_indices = @transform_21, window_bounds = array<i64: 128, 128>}, {transform_indices = @transform_22, window_bounds = array<i64: 256, 128>}]} {
    %c0 = arith.constant 0 : index
    %c0_0 = arith.constant 0 : index
    %0 = vector.load %arg1[%c0, %c0_0] : memref<256x128xf32, #tpu.memory_space<vmem>>, vector<256x128xf32>
    %c0_1 = arith.constant 0 : index
    %c0_2 = arith.constant 0 : index
    %1 = vector.load %arg24[%c0_1, %c0_2] : memref<256x128xf32, #tpu.memory_space<vmem>>, vector<256x128xf32>
    tpu.vector_store %arg24[%c0_1, %c0_2], %0 {strides = array<i32>} : memref<256x128xf32, #tpu.memory_space<vmem>>, vector<256x128xf32>,
    %cst = arith.constant dense<0.000000e+00> : vector<256xf32>
    %2 = vector.multi_reduction <add>, %0, %cst [1] : vector<256x128xf32> to vector<256xf32>
    %3 = vector.shape_cast %2 : vector<256xf32> to vector<256x1xf32>
    %4 = arith.mulf %0, %0 : vector<256x128xf32>
    %cst_3 = arith.constant dense<0.000000e+00> : vector<256xf32>
    %5 = vector.multi_reduction <add>, %4, %cst_3 [1] : vector<256x128xf32> to vector<256xf32>
    %6 = vector.shape_cast %5 : vector<256xf32> to vector<256x1xf32>
    %c0_4 = arith.constant 0 : index
    %c0_5 = arith.constant 0 : index
    %7 = vector.load %arg24[%c0_4, %c0_5] : memref<256x128xf32, #tpu.memory_space<vmem>>, vector<256x128xf32>
    %cst_6 = arith.constant 6.250000e-02 : f32
    %8 = vector.broadcast %cst_6 : f32 to vector<256x1xf32>
    %9 = arith.mulf %3, %8 : vector<256x1xf32>
    %cst_7 = arith.constant 6.250000e-02 : f32
    %10 = vector.broadcast %cst_7 : f32 to vector<256x1xf32>
    %11 = arith.mulf %6, %10 : vector<256x1xf32>
    %12 = arith.mulf %9, %9 : vector<256x1xf32>
    %13 = arith.subf %11, %12 : vector<256x1xf32>
    %cst_8 = arith.constant 0.000000e+00 : f32
    %14 = vector.broadcast %cst_8 : f32 to vector<256x1xf32>
    %15 = arith.maximumf %13, %14 : vector<256x1xf32>
    %16 = vector.broadcast %9 : vector<256x1xf32> to vector<256x128xf32>
    %17 = arith.subf %7, %16 : vector<256x128xf32>
    %cst_9 = arith.constant 9.99999974E-6 : f32
    %18 = vector.broadcast %cst_9 : f32 to vector<256x1xf32>
    %19 = arith.addf %15, %18 : vector<256x1xf32>
    %20 = math.rsqrt %19 : vector<256x1xf32>
    %21 = vector.broadcast %20 : vector<256x1xf32> to vector<256x128xf32>
    %22 = arith.mulf %17, %21 : vector<256x128xf32>
    %c0_10 = arith.constant 0 : index
    %c0_11 = arith.constant 0 : index
    %23 = vector.load %arg2[%c0_10, %c0_11] : memref<1x128xf32, #tpu.memory_space<vmem>>, vector<1x128xf32>
    %24 = vector.broadcast %23 : vector<1x128xf32> to vector<256x128xf32>
    %25 = arith.mulf %22, %24 : vector<256x128xf32>
    %c0_12 = arith.constant 0 : index
    %c0_13 = arith.constant 0 : index
    %26 = vector.load %arg3[%c0_12, %c0_13] : memref<1x128xf32, #tpu.memory_space<vmem>>, vector<1x128xf32>
    %27 = vector.broadcast %26 : vector<1x128xf32> to vector<256x128xf32>
    %28 = arith.addf %25, %27 : vector<256x128xf32>
    %29 = arith.truncf %28 : vector<256x128xf32> to vector<256x128xbf16>
    %c0_14 = arith.constant 0 : index
    %c0_15 = arith.constant 0 : index
    %30 = vector.load %arg4[%c0_14, %c0_15] : memref<128x128xbf16, #tpu.memory_space<vmem>>, vector<128x128xbf16>
    %cst_16 = arith.constant dense<0.000000e+00> : vector<256x128xf32>
    %31 = tpu.matmul %29, %30, %cst_16 {dimension_numbers = #tpu.dot_dimension_numbers<[1], [0], [0], [1], [0, 0, 1, 1], [], []>} : vector<256x128xbf16>, vector<128x128xbf16>, vector<256x128xf32> -> vector<256x128xf32>
    %c0_17 = arith.constant 0 : index
    %c0_18 = arith.constant 0 : index
    %32 = vector.load %arg5[%c0_17, %c0_18] : memref<1x128xf32, #tpu.memory_space<vmem>>, vector<1x128xf32>
    %33 = vector.broadcast %32 : vector<1x128xf32> to vector<256x128xf32>
    %34 = arith.addf %31, %33 : vector<256x128xf32>
    %35 = arith.mulf %34, %34 : vector<256x128xf32>
    %36 = arith.mulf %34, %35 : vector<256x128xf32>
    %cst_19 = arith.constant 4.471500e-02 : f32
    %37 = vector.broadcast %cst_19 : f32 to vector<256x128xf32>
    %38 = arith.mulf %37, %36 : vector<256x128xf32>
    %39 = arith.addf %34, %38 : vector<256x128xf32>
    %cst_20 = arith.constant 0.797884583 : f32
    %40 = vector.broadcast %cst_20 : f32 to vector<256x128xf32>
    %41 = arith.mulf %40, %39 : vector<256x128xf32>
    %42 = math.tanh %41 : vector<256x128xf32>
    %cst_21 = arith.constant 1.000000e+00 : f32
    %43 = vector.broadcast %cst_21 : f32 to vector<256x128xf32>
    %44 = arith.addf %43, %42 : vector<256x128xf32>
    %cst_22 = arith.constant 5.000000e-01 : f32
    %45 = vector.broadcast %cst_22 : f32 to vector<256x128xf32>
    %46 = arith.mulf %45, %44 : vector<256x128xf32>
    %47 = arith.mulf %34, %46 : vector<256x128xf32>
    %48 = arith.truncf %47 : vector<256x128xf32> to vector<256x128xbf16>
    %c0_23 = arith.constant 0 : index
    %c0_24 = arith.constant 0 : index
    %49 = vector.load %arg6[%c0_23, %c0_24] : memref<128x128xbf16, #tpu.memory_space<vmem>>, vector<128x128xbf16>
    %cst_25 = arith.constant dense<0.000000e+00> : vector<256x128xf32>
    %50 = tpu.matmul %48, %49, %cst_25 {dimension_numbers = #tpu.dot_dimension_numbers<[1], [0], [0], [1], [0, 0, 1, 1], [], []>} : vector<256x128xbf16>, vector<128x128xbf16>, vector<256x128xf32> -> vector<256x128xf32>
    %c0_26 = arith.constant 0 : index
    %c0_27 = arith.constant 0 : index
    %51 = vector.load %arg7[%c0_26, %c0_27] : memref<1x128xf32, #tpu.memory_space<vmem>>, vector<1x128xf32>
    %52 = vector.broadcast %51 : vector<1x128xf32> to vector<256x128xf32>
    %53 = arith.addf %50, %52 : vector<256x128xf32>
    %54 = arith.addf %53, %7 : vector<256x128xf32>
    %55 = arith.truncf %54 : vector<256x128xf32> to vector<256x128xbf16>
    %c0_28 = arith.constant 0 : index
    %c0_29 = arith.constant 0 : index
    %56 = vector.load %arg8[%c0_28, %c0_29] : memref<128x128xbf16, #tpu.memory_space<vmem>>, vector<128x128xbf16>
    %cst_30 = arith.constant dense<0.000000e+00> : vector<256x128xf32>
    %57 = tpu.matmul %55, %56, %cst_30 {dimension_numbers = #tpu.dot_dimension_numbers<[1], [0], [0], [1], [0, 0, 1, 1], [], []>} : vector<256x128xbf16>, vector<128x128xbf16>, vector<256x128xf32> -> vector<256x128xf32>
    %c0_31 = arith.constant 0 : index
    %c0_32 = arith.constant 0 : index
    %58 = vector.load %arg24[%c0_31, %c0_32] : memref<256x128xf32, #tpu.memory_space<vmem>>, vector<256x128xf32>
    %59 = arith.addf %58, %57 : vector<256x128xf32>
    %c0_33 = arith.constant 0 : index
    %c0_34 = arith.constant 0 : index
    %60 = vector.load %arg24[%c0_33, %c0_34] : memref<256x128xf32, #tpu.memory_space<vmem>>, vector<256x128xf32>
    tpu.vector_store %arg24[%c0_33, %c0_34], %59 {strides = array<i32>} : memref<256x128xf32, #tpu.memory_space<vmem>>, vector<256x128xf32>,
    %cst_35 = arith.constant dense<0.000000e+00> : vector<256xf32>
    %61 = vector.multi_reduction <add>, %57, %cst_35 [1] : vector<256x128xf32> to vector<256xf32>
    %62 = vector.shape_cast %61 : vector<256xf32> to vector<256x1xf32>
    %63 = arith.addf %3, %62 : vector<256x1xf32>
    %64 = arith.mulf %57, %57 : vector<256x128xf32>
    %cst_36 = arith.constant dense<0.000000e+00> : vector<256xf32>
    %65 = vector.multi_reduction <add>, %64, %cst_36 [1] : vector<256x128xf32> to vector<256xf32>
    %66 = vector.shape_cast %65 : vector<256xf32> to vector<256x1xf32>
    %67 = arith.addf %6, %66 : vector<256x1xf32>
    %c0_37 = arith.constant 0 : index
    %c0_38 = arith.constant 0 : index
    %68 = vector.load %arg24[%c0_37, %c0_38] : memref<256x128xf32, #tpu.memory_space<vmem>>, vector<256x128xf32>
    %cst_39 = arith.constant 0.020833334 : f32
    %69 = vector.broadcast %cst_39 : f32 to vector<256x1xf32>
    %70 = arith.mulf %63, %69 : vector<256x1xf32>
    %cst_40 = arith.constant 0.020833334 : f32
    %71 = vector.broadcast %cst_40 : f32 to vector<256x1xf32>
    %72 = arith.mulf %67, %71 : vector<256x1xf32>
    %73 = arith.mulf %70, %70 : vector<256x1xf32>
    %74 = arith.subf %72, %73 : vector<256x1xf32>
    %cst_41 = arith.constant 0.000000e+00 : f32
    %75 = vector.broadcast %cst_41 : f32 to vector<256x1xf32>
    %76 = arith.maximumf %74, %75 : vector<256x1xf32>
    %77 = vector.broadcast %70 : vector<256x1xf32> to vector<256x128xf32>
    %78 = arith.subf %68, %77 : vector<256x128xf32>
    %cst_42 = arith.constant 9.99999974E-6 : f32
    %79 = vector.broadcast %cst_42 : f32 to vector<256x1xf32>
    %80 = arith.addf %76, %79 : vector<256x1xf32>
    %81 = math.rsqrt %80 : vector<256x1xf32>
    %82 = vector.broadcast %81 : vector<256x1xf32> to vector<256x128xf32>
    %83 = arith.mulf %78, %82 : vector<256x128xf32>
    %c0_43 = arith.constant 0 : index
    %c0_44 = arith.constant 0 : index
    %84 = vector.load %arg9[%c0_43, %c0_44] : memref<1x128xf32, #tpu.memory_space<vmem>>, vector<1x128xf32>
    %85 = vector.broadcast %84 : vector<1x128xf32> to vector<256x128xf32>
    %86 = arith.mulf %83, %85 : vector<256x128xf32>
    %c0_45 = arith.constant 0 : index
    %c0_46 = arith.constant 0 : index
    %87 = vector.load %arg10[%c0_45, %c0_46] : memref<1x128xf32, #tpu.memory_space<vmem>>, vector<1x128xf32>
    %88 = vector.broadcast %87 : vector<1x128xf32> to vector<256x128xf32>
    %89 = arith.addf %86, %88 : vector<256x128xf32>
    %90 = arith.truncf %89 : vector<256x128xf32> to vector<256x128xbf16>
    %c0_47 = arith.constant 0 : index
    %c0_48 = arith.constant 0 : index
    %91 = vector.load %arg11[%c0_47, %c0_48] : memref<128x128xbf16, #tpu.memory_space<vmem>>, vector<128x128xbf16>
    %cst_49 = arith.constant dense<0.000000e+00> : vector<256x128xf32>
    %92 = tpu.matmul %90, %91, %cst_49 {dimension_numbers = #tpu.dot_dimension_numbers<[1], [0], [0], [1], [0, 0, 1, 1], [], []>} : vector<256x128xbf16>, vector<128x128xbf16>, vector<256x128xf32> -> vector<256x128xf32>
    %c0_50 = arith.constant 0 : index
    %c0_51 = arith.constant 0 : index
    %93 = vector.load %arg12[%c0_50, %c0_51] : memref<1x128xf32, #tpu.memory_space<vmem>>, vector<1x128xf32>
    %94 = vector.broadcast %93 : vector<1x128xf32> to vector<256x128xf32>
    %95 = arith.addf %92, %94 : vector<256x128xf32>
    %96 = arith.mulf %95, %95 : vector<256x128xf32>
    %97 = arith.mulf %95, %96 : vector<256x128xf32>
    %cst_52 = arith.constant 4.471500e-02 : f32
    %98 = vector.broadcast %cst_52 : f32 to vector<256x128xf32>
    %99 = arith.mulf %98, %97 : vector<256x128xf32>
    %100 = arith.addf %95, %99 : vector<256x128xf32>
    %cst_53 = arith.constant 0.797884583 : f32
    %101 = vector.broadcast %cst_53 : f32 to vector<256x128xf32>
    %102 = arith.mulf %101, %100 : vector<256x128xf32>
    %103 = math.tanh %102 : vector<256x128xf32>
    %cst_54 = arith.constant 1.000000e+00 : f32
    %104 = vector.broadcast %cst_54 : f32 to vector<256x128xf32>
    %105 = arith.addf %104, %103 : vector<256x128xf32>
    %cst_55 = arith.constant 5.000000e-01 : f32
    %106 = vector.broadcast %cst_55 : f32 to vector<256x128xf32>
    %107 = arith.mulf %106, %105 : vector<256x128xf32>
    %108 = arith.mulf %95, %107 : vector<256x128xf32>
    %109 = arith.truncf %108 : vector<256x128xf32> to vector<256x128xbf16>
    %c0_56 = arith.constant 0 : index
    %c0_57 = arith.constant 0 : index
    %110 = vector.load %arg13[%c0_56, %c0_57] : memref<128x128xbf16, #tpu.memory_space<vmem>>, vector<128x128xbf16>
    %cst_58 = arith.constant dense<0.000000e+00> : vector<256x128xf32>
    %111 = tpu.matmul %109, %110, %cst_58 {dimension_numbers = #tpu.dot_dimension_numbers<[1], [0], [0], [1], [0, 0, 1, 1], [], []>} : vector<256x128xbf16>, vector<128x128xbf16>, vector<256x128xf32> -> vector<256x128xf32>
    %c0_59 = arith.constant 0 : index
    %c0_60 = arith.constant 0 : index
    %112 = vector.load %arg14[%c0_59, %c0_60] : memref<1x128xf32, #tpu.memory_space<vmem>>, vector<1x128xf32>
    %113 = vector.broadcast %112 : vector<1x128xf32> to vector<256x128xf32>
    %114 = arith.addf %111, %113 : vector<256x128xf32>
    %115 = arith.addf %114, %68 : vector<256x128xf32>
    %116 = arith.truncf %115 : vector<256x128xf32> to vector<256x128xbf16>
    %c0_61 = arith.constant 0 : index
    %c0_62 = arith.constant 0 : index
    %117 = vector.load %arg15[%c0_61, %c0_62] : memref<128x128xbf16, #tpu.memory_space<vmem>>, vector<128x128xbf16>
    %cst_63 = arith.constant dense<0.000000e+00> : vector<256x128xf32>
    %118 = tpu.matmul %116, %117, %cst_63 {dimension_numbers = #tpu.dot_dimension_numbers<[1], [0], [0], [1], [0, 0, 1, 1], [], []>} : vector<256x128xbf16>, vector<128x128xbf16>, vector<256x128xf32> -> vector<256x128xf32>
    %c0_64 = arith.constant 0 : index
    %c0_65 = arith.constant 0 : index
    %119 = vector.load %arg24[%c0_64, %c0_65] : memref<256x128xf32, #tpu.memory_space<vmem>>, vector<256x128xf32>
    %120 = arith.addf %119, %118 : vector<256x128xf32>
    %c0_66 = arith.constant 0 : index
    %c0_67 = arith.constant 0 : index
    %121 = vector.load %arg24[%c0_66, %c0_67] : memref<256x128xf32, #tpu.memory_space<vmem>>, vector<256x128xf32>
    tpu.vector_store %arg24[%c0_66, %c0_67], %120 {strides = array<i32>} : memref<256x128xf32, #tpu.memory_space<vmem>>, vector<256x128xf32>,
    %cst_68 = arith.constant dense<0.000000e+00> : vector<256xf32>
    %122 = vector.multi_reduction <add>, %118, %cst_68 [1] : vector<256x128xf32> to vector<256xf32>
    %123 = vector.shape_cast %122 : vector<256xf32> to vector<256x1xf32>
    %124 = arith.addf %63, %123 : vector<256x1xf32>
    %125 = arith.mulf %118, %118 : vector<256x128xf32>
    %cst_69 = arith.constant dense<0.000000e+00> : vector<256xf32>
    %126 = vector.multi_reduction <add>, %125, %cst_69 [1] : vector<256x128xf32> to vector<256xf32>
    %127 = vector.shape_cast %126 : vector<256xf32> to vector<256x1xf32>
    %128 = arith.addf %67, %127 : vector<256x1xf32>
    %c0_70 = arith.constant 0 : index
    %c0_71 = arith.constant 0 : index
    %129 = vector.load %arg24[%c0_70, %c0_71] : memref<256x128xf32, #tpu.memory_space<vmem>>, vector<256x128xf32>
    %cst_72 = arith.constant 1.250000e-02 : f32
    %130 = vector.broadcast %cst_72 : f32 to vector<256x1xf32>
    %131 = arith.mulf %124, %130 : vector<256x1xf32>
    %cst_73 = arith.constant 1.250000e-02 : f32
    %132 = vector.broadcast %cst_73 : f32 to vector<256x1xf32>
    %133 = arith.mulf %128, %132 : vector<256x1xf32>
    %134 = arith.mulf %131, %131 : vector<256x1xf32>
    %135 = arith.subf %133, %134 : vector<256x1xf32>
    %cst_74 = arith.constant 0.000000e+00 : f32
    %136 = vector.broadcast %cst_74 : f32 to vector<256x1xf32>
    %137 = arith.maximumf %135, %136 : vector<256x1xf32>
    %138 = vector.broadcast %131 : vector<256x1xf32> to vector<256x128xf32>
    %139 = arith.subf %129, %138 : vector<256x128xf32>
    %cst_75 = arith.constant 9.99999974E-6 : f32
    %140 = vector.broadcast %cst_75 : f32 to vector<256x1xf32>
    %141 = arith.addf %137, %140 : vector<256x1xf32>
    %142 = math.rsqrt %141 : vector<256x1xf32>
    %143 = vector.broadcast %142 : vector<256x1xf32> to vector<256x128xf32>
    %144 = arith.mulf %139, %143 : vector<256x128xf32>
    %c0_76 = arith.constant 0 : index
    %c0_77 = arith.constant 0 : index
    %145 = vector.load %arg16[%c0_76, %c0_77] : memref<1x128xf32, #tpu.memory_space<vmem>>, vector<1x128xf32>
    %146 = vector.broadcast %145 : vector<1x128xf32> to vector<256x128xf32>
    %147 = arith.mulf %144, %146 : vector<256x128xf32>
    %c0_78 = arith.constant 0 : index
    %c0_79 = arith.constant 0 : index
    %148 = vector.load %arg17[%c0_78, %c0_79] : memref<1x128xf32, #tpu.memory_space<vmem>>, vector<1x128xf32>
    %149 = vector.broadcast %148 : vector<1x128xf32> to vector<256x128xf32>
    %150 = arith.addf %147, %149 : vector<256x128xf32>
    %151 = arith.truncf %150 : vector<256x128xf32> to vector<256x128xbf16>
    %c0_80 = arith.constant 0 : index
    %c0_81 = arith.constant 0 : index
    %152 = vector.load %arg18[%c0_80, %c0_81] : memref<128x128xbf16, #tpu.memory_space<vmem>>, vector<128x128xbf16>
    %cst_82 = arith.constant dense<0.000000e+00> : vector<256x128xf32>
    %153 = tpu.matmul %151, %152, %cst_82 {dimension_numbers = #tpu.dot_dimension_numbers<[1], [0], [0], [1], [0, 0, 1, 1], [], []>} : vector<256x128xbf16>, vector<128x128xbf16>, vector<256x128xf32> -> vector<256x128xf32>
    %c0_83 = arith.constant 0 : index
    %c0_84 = arith.constant 0 : index
    %154 = vector.load %arg19[%c0_83, %c0_84] : memref<1x128xf32, #tpu.memory_space<vmem>>, vector<1x128xf32>
    %155 = vector.broadcast %154 : vector<1x128xf32> to vector<256x128xf32>
    %156 = arith.addf %153, %155 : vector<256x128xf32>
    %157 = arith.mulf %156, %156 : vector<256x128xf32>
    %158 = arith.mulf %156, %157 : vector<256x128xf32>
    %cst_85 = arith.constant 4.471500e-02 : f32
    %159 = vector.broadcast %cst_85 : f32 to vector<256x128xf32>
    %160 = arith.mulf %159, %158 : vector<256x128xf32>
    %161 = arith.addf %156, %160 : vector<256x128xf32>
    %cst_86 = arith.constant 0.797884583 : f32
    %162 = vector.broadcast %cst_86 : f32 to vector<256x128xf32>
    %163 = arith.mulf %162, %161 : vector<256x128xf32>
    %164 = math.tanh %163 : vector<256x128xf32>
    %cst_87 = arith.constant 1.000000e+00 : f32
    %165 = vector.broadcast %cst_87 : f32 to vector<256x128xf32>
    %166 = arith.addf %165, %164 : vector<256x128xf32>
    %cst_88 = arith.constant 5.000000e-01 : f32
    %167 = vector.broadcast %cst_88 : f32 to vector<256x128xf32>
    %168 = arith.mulf %167, %166 : vector<256x128xf32>
    %169 = arith.mulf %156, %168 : vector<256x128xf32>
    %170 = arith.truncf %169 : vector<256x128xf32> to vector<256x128xbf16>
    %c0_89 = arith.constant 0 : index
    %c0_90 = arith.constant 0 : index
    %171 = vector.load %arg20[%c0_89, %c0_90] : memref<128x128xbf16, #tpu.memory_space<vmem>>, vector<128x128xbf16>
    %cst_91 = arith.constant dense<0.000000e+00> : vector<256x128xf32>
    %172 = tpu.matmul %170, %171, %cst_91 {dimension_numbers = #tpu.dot_dimension_numbers<[1], [0], [0], [1], [0, 0, 1, 1], [], []>} : vector<256x128xbf16>, vector<128x128xbf16>, vector<256x128xf32> -> vector<256x128xf32>
    %c0_92 = arith.constant 0 : index
    %c0_93 = arith.constant 0 : index
    %173 = vector.load %arg21[%c0_92, %c0_93] : memref<1x128xf32, #tpu.memory_space<vmem>>, vector<1x128xf32>
    %174 = vector.broadcast %173 : vector<1x128xf32> to vector<256x128xf32>
    %175 = arith.addf %172, %174 : vector<256x128xf32>
    %176 = arith.addf %175, %129 : vector<256x128xf32>
    %177 = arith.truncf %176 : vector<256x128xf32> to vector<256x128xbf16>
    %c0_94 = arith.constant 0 : index
    %c0_95 = arith.constant 0 : index
    %178 = vector.load %arg22[%c0_94, %c0_95] : memref<128x128xbf16, #tpu.memory_space<vmem>>, vector<128x128xbf16>
    %cst_96 = arith.constant dense<0.000000e+00> : vector<256x128xf32>
    %179 = tpu.matmul %177, %178, %cst_96 {dimension_numbers = #tpu.dot_dimension_numbers<[1], [0], [0], [1], [0, 0, 1, 1], [], []>} : vector<256x128xbf16>, vector<128x128xbf16>, vector<256x128xf32> -> vector<256x128xf32>
    %c0_97 = arith.constant 0 : index
    %c0_98 = arith.constant 0 : index
    %180 = vector.load %arg24[%c0_97, %c0_98] : memref<256x128xf32, #tpu.memory_space<vmem>>, vector<256x128xf32>
    %181 = arith.addf %180, %179 : vector<256x128xf32>
    %c0_99 = arith.constant 0 : index
    %c0_100 = arith.constant 0 : index
    %182 = vector.load %arg24[%c0_99, %c0_100] : memref<256x128xf32, #tpu.memory_space<vmem>>, vector<256x128xf32>
    tpu.vector_store %arg24[%c0_99, %c0_100], %181 {strides = array<i32>} : memref<256x128xf32, #tpu.memory_space<vmem>>, vector<256x128xf32>,
    %c0_101 = arith.constant 0 : index
    %c0_102 = arith.constant 0 : index
    %183 = vector.load %arg24[%c0_101, %c0_102] : memref<256x128xf32, #tpu.memory_space<vmem>>, vector<256x128xf32>
    %184 = arith.truncf %183 : vector<256x128xf32> to vector<256x128xbf16>
    %c0_103 = arith.constant 0 : index
    %c0_104 = arith.constant 0 : index
    %185 = vector.load %arg23[%c0_103, %c0_104] : memref<256x128xbf16, #tpu.memory_space<vmem>>, vector<256x128xbf16>
    tpu.vector_store %arg23[%c0_103, %c0_104], %184 {strides = array<i32>} : memref<256x128xbf16, #tpu.memory_space<vmem>>, vector<256x128xbf16>,
    return
  }
  func.func @transform_0(%arg0: i32) -> (i32, i32) {
    %c0_i32 = arith.constant 0 : i32
    %c0_i32_0 = arith.constant 0 : i32
    return %arg0, %c0_i32 : i32, i32
  }
  func.func @transform_1(%arg0: i32) -> (i32, i32) {
    %c0_i32 = arith.constant 0 : i32
    %c0_i32_0 = arith.constant 0 : i32
    %c0_i32_1 = arith.constant 0 : i32
    return %c0_i32, %c0_i32_0 : i32, i32
  }
  func.func @transform_2(%arg0: i32) -> (i32, i32) {
    %c0_i32 = arith.constant 0 : i32
    %c0_i32_0 = arith.constant 0 : i32
    %c0_i32_1 = arith.constant 0 : i32
    return %c0_i32, %c0_i32_0 : i32, i32
  }
  func.func @transform_3(%arg0: i32) -> (i32, i32) {
    %c0_i32 = arith.constant 0 : i32
    %c0_i32_0 = arith.constant 0 : i32
    %c0_i32_1 = arith.constant 0 : i32
    return %c0_i32, %c0_i32_0 : i32, i32
  }
  func.func @transform_4(%arg0: i32) -> (i32, i32) {
    %c0_i32 = arith.constant 0 : i32
    %c0_i32_0 = arith.constant 0 : i32
    %c0_i32_1 = arith.constant 0 : i32
    return %c0_i32, %c0_i32_0 : i32, i32
  }
  func.func @transform_5(%arg0: i32) -> (i32, i32) {
    %c0_i32 = arith.constant 0 : i32
    %c0_i32_0 = arith.constant 0 : i32
    %c0_i32_1 = arith.constant 0 : i32
    return %c0_i32, %c0_i32_0 : i32, i32
  }
  func.func @transform_6(%arg0: i32) -> (i32, i32) {
    %c0_i32 = arith.constant 0 : i32
    %c0_i32_0 = arith.constant 0 : i32
    %c0_i32_1 = arith.constant 0 : i32
    return %c0_i32, %c0_i32_0 : i32, i32
  }
  func.func @transform_7(%arg0: i32) -> (i32, i32) {
    %c0_i32 = arith.constant 0 : i32
    %c0_i32_0 = arith.constant 0 : i32
    %c0_i32_1 = arith.constant 0 : i32
    return %c0_i32, %c0_i32_0 : i32, i32
  }
  func.func @transform_8(%arg0: i32) -> (i32, i32) {
    %c0_i32 = arith.constant 0 : i32
    %c0_i32_0 = arith.constant 0 : i32
    %c0_i32_1 = arith.constant 0 : i32
    return %c0_i32, %c0_i32_0 : i32, i32
  }
  func.func @transform_9(%arg0: i32) -> (i32, i32) {
    %c0_i32 = arith.constant 0 : i32
    %c0_i32_0 = arith.constant 0 : i32
    %c0_i32_1 = arith.constant 0 : i32
    return %c0_i32, %c0_i32_0 : i32, i32
  }
  func.func @transform_10(%arg0: i32) -> (i32, i32) {
    %c0_i32 = arith.constant 0 : i32
    %c0_i32_0 = arith.constant 0 : i32
    %c0_i32_1 = arith.constant 0 : i32
    return %c0_i32, %c0_i32_0 : i32, i32
  }
  func.func @transform_11(%arg0: i32) -> (i32, i32) {
    %c0_i32 = arith.constant 0 : i32
    %c0_i32_0 = arith.constant 0 : i32
    %c0_i32_1 = arith.constant 0 : i32
    return %c0_i32, %c0_i32_0 : i32, i32
  }
  func.func @transform_12(%arg0: i32) -> (i32, i32) {
    %c0_i32 = arith.constant 0 : i32
    %c0_i32_0 = arith.constant 0 : i32
    %c0_i32_1 = arith.constant 0 : i32
    return %c0_i32, %c0_i32_0 : i32, i32
  }
  func.func @transform_13(%arg0: i32) -> (i32, i32) {
    %c0_i32 = arith.constant 0 : i32
    %c0_i32_0 = arith.constant 0 : i32
    %c0_i32_1 = arith.constant 0 : i32
    return %c0_i32, %c0_i32_0 : i32, i32
  }
  func.func @transform_14(%arg0: i32) -> (i32, i32) {
    %c0_i32 = arith.constant 0 : i32
    %c0_i32_0 = arith.constant 0 : i32
    %c0_i32_1 = arith.constant 0 : i32
    return %c0_i32, %c0_i32_0 : i32, i32
  }
  func.func @transform_15(%arg0: i32) -> (i32, i32) {
    %c0_i32 = arith.constant 0 : i32
    %c0_i32_0 = arith.constant 0 : i32
    %c0_i32_1 = arith.constant 0 : i32
    return %c0_i32, %c0_i32_0 : i32, i32
  }
  func.func @transform_16(%arg0: i32) -> (i32, i32) {
    %c0_i32 = arith.constant 0 : i32
    %c0_i32_0 = arith.constant 0 : i32
    %c0_i32_1 = arith.constant 0 : i32
    return %c0_i32, %c0_i32_0 : i32, i32
  }
  func.func @transform_17(%arg0: i32) -> (i32, i32) {
    %c0_i32 = arith.constant 0 : i32
    %c0_i32_0 = arith.constant 0 : i32
    %c0_i32_1 = arith.constant 0 : i32
    return %c0_i32, %c0_i32_0 : i32, i32
  }
  func.func @transform_18(%arg0: i32) -> (i32, i32) {
    %c0_i32 = arith.constant 0 : i32
    %c0_i32_0 = arith.constant 0 : i32
    %c0_i32_1 = arith.constant 0 : i32
    return %c0_i32, %c0_i32_0 : i32, i32
  }
  func.func @transform_19(%arg0: i32) -> (i32, i32) {
    %c0_i32 = arith.constant 0 : i32
    %c0_i32_0 = arith.constant 0 : i32
    %c0_i32_1 = arith.constant 0 : i32
    return %c0_i32, %c0_i32_0 : i32, i32
  }
  func.func @transform_20(%arg0: i32) -> (i32, i32) {
    %c0_i32 = arith.constant 0 : i32
    %c0_i32_0 = arith.constant 0 : i32
    %c0_i32_1 = arith.constant 0 : i32
    return %c0_i32, %c0_i32_0 : i32, i32
  }
  func.func @transform_21(%arg0: i32) -> (i32, i32) {
    %c0_i32 = arith.constant 0 : i32
    %c0_i32_0 = arith.constant 0 : i32
    %c0_i32_1 = arith.constant 0 : i32
    return %c0_i32, %c0_i32_0 : i32, i32
  }
  func.func @transform_22(%arg0: i32) -> (i32, i32) {
    %c0_i32 = arith.constant 0 : i32
    %c0_i32_0 = arith.constant 0 : i32
    return %arg0, %c0_i32 : i32, i32
  }
}

</mosaic_0001>

<bundles_post_ra>
// kernel: _dense_stage_forward_impl.1
= control target key start
LH: loop header
LB: loop body
LE: loop exit
PB: predicated region body
PF: predicated region fallthrough
CT: control target
= control target key end

     0   :  { %s11110_s0 = inlined_call_operand.vmem [shape: f32[512,128], index: 0, kind: input, shape index: {}]   ;;  %s11111_s1 = inlined_call_operand.vmem [shape: f32[1,128], index: 1, kind: input, shape index: {}]   ;;  %s11112_s2 = inlined_call_operand.vmem [shape: f32[1,128], index: 2, kind: input, shape index: {}]   ;;  %s11113_s3 = inlined_call_operand.vmem [shape: bf16[128,128], index: 3, kind: input, shape index: {}]   ;;  %s11114_s4 = inlined_call_operand.vmem [shape: f32[1,128], index: 4, kind: input, shape index: {}]   ;;  %s11115_s5 = inlined_call_operand.vmem [shape: bf16[128,128], index: 5, kind: input, shape index: {}]   ;;  %s11116_s6 = inlined_call_operand.vmem [shape: f32[1,128], index: 6, kind: input, shape index: {}]   ;;  %s11117_s7 = inlined_call_operand.vmem [shape: bf16[128,128], index: 7, kind: input, shape index: {}]   ;;  %s11118_s8 = inlined_call_operand.vmem [shape: f32[1,128], index: 8, kind: input, shape index: {}]   ;;  %s11119_s9 = inlined_call_operand.vmem [shape: f32[1,128], index: 9, kind: input, shape index: {}]   ;;  %s11120_s10 = inlined_call_operand.vmem [shape: bf16[128,128], index: 10, kind: input, shape index: {}]   ;;  %s11121_s11 = inlined_call_operand.vmem [shape: f32[1,128], index: 11, kind: input, shape index: {}]   ;;  %s11122_s12 = inlined_call_operand.vmem [shape: bf16[128,128], index: 12, kind: input, shape index: {}]   ;;  %s11123_s13 = inlined_call_operand.vmem [shape: f32[1,128], index: 13, kind: input, shape index: {}]   ;;  %s11124_s14 = inlined_call_operand.vmem [shape: bf16[128,128], index: 14, kind: input, shape index: {}]   ;;  %s11125_s15 = inlined_call_operand.vmem [shape: f32[1,128], index: 15, kind: input, shape index: {}]   ;;  %s11126_s16 = inlined_call_operand.vmem [shape: f32[1,128], index: 16, kind: input, shape index: {}]   ;;  %s11127_s17 = inlined_call_operand.vmem [shape: bf16[128,128], index: 17, kind: input, shape index: {}]   ;;  %s11128_s18 = inlined_call_operand.vmem [shape: f32[1,128], index: 18, kind: input, shape index: {}]   ;;  %s11129_s19 = inlined_call_operand.vmem [shape: bf16[128,128], index: 19, kind: input, shape index: {}]   ;;  %s11130_s20 = inlined_call_operand.vmem [shape: f32[1,128], index: 20, kind: input, shape index: {}]   ;;  %s11131_s21 = inlined_call_operand.vmem [shape: bf16[128,128], index: 21, kind: input, shape index: {}]   ;;  %s11132_s22 = inlined_call_operand.vmem [shape: bf16[512,128], index: 22, kind: output, shape index: {}]  }
   0x1   :  { %11297 = sst [smem:[#allocation95_spill]] %s11110_s0 }
   0x2   :  { %11298 = sst [smem:[#allocation96_spill]] %s11111_s1 }
   0x3   :  { %11299 = sst [smem:[#allocation97_spill]] %s11112_s2 }
   0x4   :  { %11300 = sst [smem:[#allocation98_spill]] %s11113_s3  ;;  %s7722_s3 = smov 0  }
   0x5   :  { %11301 = sst [smem:[#allocation99_spill]] %s11114_s4 }
   0x6   :  { %11302 = sst [smem:[#allocation100_spill]] %s11115_s5 }
   0x7   :  { %11303 = sst [smem:[#allocation101_spill]] %s11116_s6 }
   0x8 LB: > { %s6165_s28 = sadd.s32 4294967295, %s7605_s3   ;;  %p6169_p0 = scmp.ge.s32.totalorder %s7605_s3, 1  ;;  %s7605_s3 = sphi %s7722_s3, %s32_s3  }
   0x9   : > { %p613_p1 = scmp.lt.s32.totalorder %s7605_s3, 3 }
   0xb   : > { %p614_p2 = pnand %p6169_p0, %p613_p1 }
   0xd   : > { %617 = sbr.rel (%p614_p2) target bundleno = 2744 (0xab8), region = 108 }
  0x14   : > { %s6170_s29 = sshll.u32 %s6165_s28, 5  ;;  %s11304_s23 = sld [smem:[#allocation95_spill]] }
  0x15   : > { %p676_p3 = scmp.lt.s32.totalorder %s6170_s29, 63  ;;  %s11305_s6 = sld [smem:[#allocation98_spill]] }
  0x16   : > { %s11356_s25 = sld [smem:[#allocation100_spill]]  ;;  %s11357_s0 = sld [smem:[#allocation99_spill]] }
  0x17   : > { %s11632_s29 = smov (!%p676_p3, %s6170_s29), 63  ;;  %s11358_s4 = sld [smem:[#allocation101_spill]] }
  0x18   : > { %s6171_s30 = sshll.u32 %s11632_s29, 3  ;;  %s6173_s26 = sshll.u32 %s11632_s29, 2 }
  0x19   : > { %s11060_s28 = scalar_lea.vmem %s11132_s22, %s6173_s26 }
  0x1a   : > { %s7736_s1 = scalar_lea.vmem %s11304_s23, %s6171_s30  ;;  %s11316_s30 = sld [smem:[#allocation96_spill]] }
  0x1b   : > { %v7739_v0 = vld [vmem:[%s7736_s1 + $0x10] sm:$0xff]  ;;  %v7742_v1 = vld [vmem:[%s7736_s1] sm:$0xff]  ;;  %v7747_v2 = vld [vmem:[%s7736_s1 + $0x18] sm:$0xff]  ;;  %s11319_s23 = sld [smem:[#allocation97_spill]] }
  0x1c   : > { %756 = vadd.xlane.f32.xlu1 %v7739_v0  ;;  %752 = vadd.xlane.f32.xlu0 %v7742_v1  ;;  %v7750_v3 = vld [vmem:[%s7736_s1 + $0x8] sm:$0xff]  ;;  %v816_v5 = vmul.f32 %v7742_v1, %v7742_v1  ;;  %v819_v6 = vmul.f32 %v7747_v2, %v7747_v2  ;;  %v818_v7 = vmul.f32 %v7739_v0, %v7739_v0  ;;  %v7766_v9 = vld [vmem:[%s7736_s1 + $0x20] sm:$0xff]  ;;  %v7769_v10 = vld [vmem:[%s7736_s1 + $0x38] sm:$0xff] }
  0x1d   : > { %v817_v4 = vmul.f32 %v7750_v3, %v7750_v3  ;;  %v7763_v8 = vld [vmem:[%s7736_s1 + $0x28] sm:$0xff]  ;;  %v7772_v11 = vld [vmem:[%s7736_s1 + $0x30] sm:$0xff]  ;;  %v7091_v12 = vld [vmem:[%s11305_s6] sm:$0xff]   ;;  %v820_v14 = vmul.f32 %v7766_v9, %v7766_v9  ;;  %v823_v15 = vmul.f32 %v7769_v10, %v7769_v10 }
  0x1e   : > { %v821_v13 = vmul.f32 %v7763_v8, %v7763_v8  ;;  %6635 = vmatprep.subr.bf16.mxu0 %v7091_v12  ;;  %7067 = vmatprep.subr.bf16.mxu1 %v7091_v12  ;;  %v822_v16 = vmul.f32 %v7772_v11, %v7772_v11  ;;  %v7092_v17 = vld [vmem:[%s11305_s6 + $0x8] sm:$0xff]   ;;  %v7796_v19 = vld [vmem:[%s7736_s1 + $0x40] sm:$0xff]  ;;  %v7093_v20 = vld [vmem:[%s11305_s6 + $0x10] sm:$0xff]  }
  0x1f   : > { %6636 = vmatpush3.bf16.msra.mxu0 %v7091_v12  ;;  %7075 = vmatpush3.bf16.msra.mxu1 %v7091_v12  ;;  %v7793_v18 = vld [vmem:[%s7736_s1 + $0x48] sm:$0xff]  ;;  %v7802_v21 = vld [vmem:[%s7736_s1 + $0x58] sm:$0xff]  ;;  %v7805_v22 = vld [vmem:[%s7736_s1 + $0x50] sm:$0xff]  ;;  %v824_v25 = vmul.f32 %v7796_v19, %v7796_v19 }
  0x20   : > { %758 = vadd.xlane.f32.xlu1 %v7747_v2  ;;  %754 = vadd.xlane.f32.xlu0 %v7750_v3  ;;  %v7094_v23 = vld [vmem:[%s11305_s6 + $0x18] sm:$0xff]   ;;  %v825_v24 = vmul.f32 %v7793_v18, %v7793_v18  ;;  %v7095_v26 = vld [vmem:[%s11305_s6 + $0x20] sm:$0xff]   ;;  %v827_v27 = vmul.f32 %v7802_v21, %v7802_v21  ;;  %v826_v28 = vmul.f32 %v7805_v22, %v7805_v22  ;;  %v7096_v29 = vld [vmem:[%s11305_s6 + $0x28] sm:$0xff]  }
  0x21   : > { %6637 = vmatprep.subr.bf16.mxu0 %v7092_v17  ;;  %7068 = vmatprep.subr.bf16.mxu1 %v7092_v17  ;;  %v7829_v30 = vld [vmem:[%s7736_s1 + $0x68] sm:$0xff]  ;;  %v7832_v31 = vld [vmem:[%s7736_s1 + $0x60] sm:$0xff]  ;;  %v7097_v32 = vld [vmem:[%s11305_s6 + $0x30] sm:$0xff]  }
  0x22   : > { %v7838_v33 = vld [vmem:[%s7736_s1 + $0x78] sm:$0xff]  ;;  %v7841_v34 = vld [vmem:[%s7736_s1 + $0x70] sm:$0xff]  ;;  %v829_v36 = vmul.f32 %v7829_v30, %v7829_v30  ;;  %v828_v37 = vmul.f32 %v7832_v31, %v7832_v31  ;;  %v7859_v40 = vld [vmem:[%s7736_s1 + $0x88] sm:$0xff] }
  0x23   : > { %6638 = vmatpush3.bf16.msra.mxu0 %v7092_v17  ;;  %7076 = vmatpush3.bf16.msra.mxu1 %v7092_v17  ;;  %v7098_v35 = vld [vmem:[%s11305_s6 + $0x38] sm:$0xff]   ;;  %v831_v38 = vmul.f32 %v7838_v33, %v7838_v33  ;;  %v830_v39 = vmul.f32 %v7841_v34, %v7841_v34  ;;  %v7862_v41 = vld [vmem:[%s7736_s1 + $0x80] sm:$0xff]  ;;  %v7870_v43 = vld [vmem:[%s7736_s1 + $0x90] sm:$0xff]  ;;  %v833_v44 = vmul.f32 %v7859_v40, %v7859_v40 }
  0x24   : > { %850 = vadd.xlane.f32.xlu1 %v817_v4  ;;  %848 = vadd.xlane.f32.xlu0 %v816_v5  ;;  %v7867_v42 = vld [vmem:[%s7736_s1 + $0x98] sm:$0xff]  ;;  %v832_v45 = vmul.f32 %v7862_v41, %v7862_v41  ;;  %v834_v47 = vmul.f32 %v7870_v43, %v7870_v43  ;;  %v7883_v48 = vld [vmem:[%s7736_s1 + $0xa8] sm:$0xff]  ;;  %v7886_v49 = vld [vmem:[%s7736_s1 + $0xa0] sm:$0xff] }
  0x25   : > { %6639 = vmatprep.subr.bf16.mxu0 %v7093_v20  ;;  %7069 = vmatprep.subr.bf16.mxu1 %v7093_v20  ;;  %v835_v46 = vmul.f32 %v7867_v42, %v7867_v42  ;;  %v7891_v50 = vld [vmem:[%s7736_s1 + $0xb8] sm:$0xff]  ;;  %v7894_v51 = vld [vmem:[%s7736_s1 + $0xb0] sm:$0xff]  ;;  %v837_v52 = vmul.f32 %v7883_v48, %v7883_v48  ;;  %v836_v53 = vmul.f32 %v7886_v49, %v7886_v49  ;;  %v7907_v56 = vld [vmem:[%s7736_s1 + $0xc8] sm:$0xff] }
  0x26   : > { %v839_v54 = vmul.f32 %v7891_v50, %v7891_v50  ;;  %v838_v55 = vmul.f32 %v7894_v51, %v7894_v51  ;;  %v7910_v57 = vld [vmem:[%s7736_s1 + $0xc0] sm:$0xff]  ;;  %v7915_v58 = vld [vmem:[%s7736_s1 + $0xd8] sm:$0xff]  ;;  %v7918_v59 = vld [vmem:[%s7736_s1 + $0xd0] sm:$0xff]  ;;  %v841_v60 = vmul.f32 %v7907_v56, %v7907_v56 }
  0x27   : > { %6640 = vmatpush3.bf16.msra.mxu0 %v7093_v20  ;;  %7077 = vmatpush3.bf16.msra.mxu1 %v7093_v20  ;;  %v840_v61 = vmul.f32 %v7910_v57, %v7910_v57  ;;  %v843_v62 = vmul.f32 %v7915_v58, %v7915_v58  ;;  %v842_v63 = vmul.f32 %v7918_v59, %v7918_v59  ;;  %v7931_v4 = vld [vmem:[%s7736_s1 + $0xe8] sm:$0xff]  ;;  %v7934_v5 = vld [vmem:[%s7736_s1 + $0xe0] sm:$0xff] }
  0x28   : > { %854 = vadd.xlane.f32.xlu1 %v819_v6  ;;  %852 = vadd.xlane.f32.xlu0 %v818_v7  ;;  %v7939_v6 = vld [vmem:[%s7736_s1 + $0xf8] sm:$0xff]  ;;  %v7942_v7 = vld [vmem:[%s7736_s1 + $0xf0] sm:$0xff]  ;;  %v845_v12 = vmul.f32 %v7931_v4, %v7931_v4 }
  0x29   : > { %6641 = vmatprep.subr.bf16.mxu0 %v7094_v23  ;;  %7070 = vmatprep.subr.bf16.mxu1 %v7094_v23 }
  0x2b   : > { %6642 = vmatpush3.bf16.msra.mxu0 %v7094_v23  ;;  %7078 = vmatpush3.bf16.msra.mxu1 %v7094_v23 }
  0x2c   : > { %762 = vadd.xlane.f32.xlu1 %v7763_v8  ;;  %760 = vadd.xlane.f32.xlu0 %v7766_v9 }
  0x2d   : > { %6643 = vmatprep.subr.bf16.mxu0 %v7095_v26  ;;  %7071 = vmatprep.subr.bf16.mxu1 %v7095_v26 }
  0x2f   : > { %6644 = vmatpush3.bf16.msra.mxu0 %v7095_v26  ;;  %7079 = vmatpush3.bf16.msra.mxu1 %v7095_v26 }
  0x30   : > { %766 = vadd.xlane.f32.xlu1 %v7769_v10  ;;  %764 = vadd.xlane.f32.xlu0 %v7772_v11 }
  0x31   : > { %6645 = vmatprep.subr.bf16.mxu0 %v7096_v29  ;;  %7072 = vmatprep.subr.bf16.mxu1 %v7096_v29 }
  0x33   : > { %6646 = vmatpush3.bf16.msra.mxu0 %v7096_v29  ;;  %7080 = vmatpush3.bf16.msra.mxu1 %v7096_v29 }
  0x34   : > { %858 = vadd.xlane.f32.xlu1 %v821_v13  ;;  %856 = vadd.xlane.f32.xlu0 %v820_v14  ;;  %v844_v13 = vmul.f32 %v7934_v5, %v7934_v5  ;;  %v847_v14 = vmul.f32 %v7939_v6, %v7939_v6 }
  0x35   : > { %6647 = vmatprep.subr.bf16.mxu0 %v7097_v32  ;;  %7073 = vmatprep.subr.bf16.mxu1 %v7097_v32 }
  0x37   : > { %6648 = vmatpush3.bf16.msra.mxu0 %v7097_v32  ;;  %7081 = vmatpush3.bf16.msra.mxu1 %v7097_v32 }
  0x38   : > { %862 = vadd.xlane.f32.xlu1 %v823_v15  ;;  %860 = vadd.xlane.f32.xlu0 %v822_v16  ;;  %v846_v15 = vmul.f32 %v7942_v7, %v7942_v7 }
  0x39   : > { %6649 = vmatprep.subr.bf16.mxu0 %v7098_v35  ;;  %7074 = vmatprep.subr.bf16.mxu1 %v7098_v35 }
  0x3b   : > { %6650 = vmatpush3.bf16.msra.mxu0 %v7098_v35  ;;  %7082 = vmatpush3.bf16.msra.mxu1 %v7098_v35 }
  0x3c   : > { %770 = vadd.xlane.f32.xlu1 %v7793_v18  ;;  %768 = vadd.xlane.f32.xlu0 %v7796_v19 }
  0x40   : > { %774 = vadd.xlane.f32.xlu1 %v7802_v21  ;;  %772 = vadd.xlane.f32.xlu0 %v7805_v22 }
  0x44   : > { %866 = vadd.xlane.f32.xlu1 %v825_v24  ;;  %864 = vadd.xlane.f32.xlu0 %v824_v25 }
  0x48   : > { %870 = vadd.xlane.f32.xlu1 %v827_v27  ;;  %868 = vadd.xlane.f32.xlu0 %v826_v28 }
  0x4c   : > { %778 = vadd.xlane.f32.xlu1 %v7829_v30  ;;  %776 = vadd.xlane.f32.xlu0 %v7832_v31 }
  0x50   : > { %782 = vadd.xlane.f32.xlu1 %v7838_v33  ;;  %780 = vadd.xlane.f32.xlu0 %v7841_v34 }
  0x54   : > { %874 = vadd.xlane.f32.xlu1 %v829_v36  ;;  %872 = vadd.xlane.f32.xlu0 %v828_v37 }
  0x58   : > { %878 = vadd.xlane.f32.xlu1 %v831_v38  ;;  %876 = vadd.xlane.f32.xlu0 %v830_v39 }
  0x5c   : > { %786 = vadd.xlane.f32.xlu1 %v7859_v40  ;;  %784 = vadd.xlane.f32.xlu0 %v7862_v41 }
  0x60   : > { %790 = vadd.xlane.f32.xlu1 %v7867_v42  ;;  %788 = vadd.xlane.f32.xlu0 %v7870_v43 }
  0x64   : > { %882 = vadd.xlane.f32.xlu1 %v833_v44  ;;  %880 = vadd.xlane.f32.xlu0 %v832_v45 }
  0x68   : > { %886 = vadd.xlane.f32.xlu1 %v835_v46  ;;  %884 = vadd.xlane.f32.xlu0 %v834_v47 }
  0x6c   : > { %794 = vadd.xlane.f32.xlu1 %v7883_v48  ;;  %792 = vadd.xlane.f32.xlu0 %v7886_v49 }
  0x70   : > { %798 = vadd.xlane.f32.xlu1 %v7891_v50  ;;  %796 = vadd.xlane.f32.xlu0 %v7894_v51 }
  0x74   : > { %890 = vadd.xlane.f32.xlu1 %v837_v52  ;;  %888 = vadd.xlane.f32.xlu0 %v836_v53 }
  0x78   : > { %894 = vadd.xlane.f32.xlu1 %v839_v54  ;;  %892 = vadd.xlane.f32.xlu0 %v838_v55 }
  0x7c   : > { %802 = vadd.xlane.f32.xlu1 %v7907_v56  ;;  %800 = vadd.xlane.f32.xlu0 %v7910_v57 }
  0x80   : > { %806 = vadd.xlane.f32.xlu1 %v7915_v58  ;;  %804 = vadd.xlane.f32.xlu0 %v7918_v59 }
  0x84   : > { %898 = vadd.xlane.f32.xlu1 %v841_v60  ;;  %896 = vadd.xlane.f32.xlu0 %v840_v61 }
  0x88   : > { %902 = vadd.xlane.f32.xlu1 %v843_v62  ;;  %900 = vadd.xlane.f32.xlu0 %v842_v63 }
  0x8c   : > { %810 = vadd.xlane.f32.xlu1 %v7931_v4  ;;  %808 = vadd.xlane.f32.xlu0 %v7934_v5 }
  0x90   : > { %814 = vadd.xlane.f32.xlu1 %v7939_v6  ;;  %812 = vadd.xlane.f32.xlu0 %v7942_v7 }
  0x94   : > { %906 = vadd.xlane.f32.xlu1 %v845_v12  ;;  %904 = vadd.xlane.f32.xlu0 %v844_v13 }
  0x98   : > { %910 = vadd.xlane.f32.xlu1 %v847_v14  ;;  %908 = vadd.xlane.f32.xlu0 %v846_v15 }
  0xa9   : > { %v7954_v16 = vpop.xlane.xlu1 %756  ;;  %v7956_v17 = vpop.xlane.xlu0 %752 }
  0xaa   : > { %v7963_v24 = vmul.f32 0.0625, %v7956_v17  ;;  %v7967_v26 = vmul.f32 0.0625, %v7954_v16 }
  0xac   : > { %v1008_v32 = vmul.f32 %v7963_v24, %v7963_v24  ;;  %v1010_v44 = vmul.f32 %v7967_v26, %v7967_v26 }
  0xad   : > { %v7958_v20 = vpop.xlane.xlu1 %758  ;;  %v7960_v23 = vpop.xlane.xlu0 %754 }
  0xae   : > { %v945_v25 = vmul.f32 0.0625, %v7960_v23  ;;  %v7970_v27 = vmul.f32 0.0625, %v7958_v20 }
  0xb0   : > { %v1009_v35 = vmul.f32 %v945_v25, %v945_v25  ;;  %v1011_v45 = vmul.f32 %v7970_v27, %v7970_v27 }
  0xb1   : > { %v7972_v28 = vpop.xlane.xlu1 %850  ;;  %v7974_v29 = vpop.xlane.xlu0 %848 }
  0xb2   : > { %11306 = vst [vmem:[#allocation3_spill] sm:$0xff] %v7972_v28  ;;  %11307 = vst [vmem:[#allocation4_spill] sm:$0xff] %v7974_v29  ;;  %v977_v36 = vmul.f32 0.0625, %v7972_v28  ;;  %v976_v37 = vmul.f32 0.0625, %v7974_v29 }
  0xb4   : > { %v1041_v38 = vsub.f32 %v977_v36, %v1009_v35  ;;  %v1040_v39 = vsub.f32 %v976_v37, %v1008_v32 }
  0xb5   : > { %v7984_v46 = vpop.xlane.xlu1 %854  ;;  %v7986_v47 = vpop.xlane.xlu0 %852 }
  0xb6   : > { %11308 = vst [vmem:[#allocation5_spill] sm:$0xff] %v7984_v46  ;;  %11309 = vst [vmem:[#allocation6_spill] sm:$0xff] %v7986_v47  ;;  %v1073_v52 = vmax.f32 %v1041_v38, 0.0  ;;  %v1072_v53 = vmax.f32 %v1040_v39, 0.0  ;;  %v979_v54 = vmul.f32 0.0625, %v7984_v46  ;;  %v978_v55 = vmul.f32 0.0625, %v7986_v47 }
  0xb8   : > { %v1137_v60 = vadd.f32 1e-05, %v1073_v52  ;;  %v1136_v61 = vadd.f32 1e-05, %v1072_v53  ;;  %v1043_v62 = vsub.f32 %v979_v54, %v1011_v45  ;;  %v1042_v63 = vsub.f32 %v978_v55, %v1010_v44 }
  0xb9   : > { %v7990_v12 = vpop.xlane.xlu1 %762  ;;  %v7992_v13 = vpop.xlane.xlu0 %760 }
  0xba   : > { %11310 = vst [vmem:[#allocation7_spill] sm:$0xff] %v7990_v12  ;;  %11311 = vst [vmem:[#allocation8_spill] sm:$0xff] %v7992_v13  ;;  %7163 = vrsqrt.f32 %v1137_v60  ;;  %v1075_v14 = vmax.f32 %v1043_v62, 0.0  ;;  %v1074_v15 = vmax.f32 %v1042_v63, 0.0  ;;  %v7999_v38 = vmul.f32 0.0625, %v7990_v12 }
  0xbb   : > { %7165 = vrsqrt.f32 %v1136_v61  ;;  %v8002_v39 = vmul.f32 0.0625, %v7992_v13  ;;  %v1105_v62 = vsub.f32 %v7750_v3, %v945_v25  ;;  %v1104_v12 = vsub.f32 %v7742_v1, %v7963_v24  ;;  %v8041_v1 = vld [vmem:[%s11319_s23] ss:$0 sm:$0xff] }
  0xbc   : > { %v1139_v32 = vadd.f32 1e-05, %v1075_v14  ;;  %v1138_v35 = vadd.f32 1e-05, %v1074_v15  ;;  %v1013_v54 = vmul.f32 %v7999_v38, %v7999_v38  ;;  %v1107_v24 = vsub.f32 %v7747_v2, %v7970_v27 }
  0xbd   : > { %v7994_v36 = vpop.xlane.xlu1 %766  ;;  %v7996_v37 = vpop.xlane.xlu0 %764  ;;  %v1012_v55 = vmul.f32 %v8002_v39, %v8002_v39 }
  0xbe   : > { %11312 = vst [vmem:[#allocation9_spill] sm:$0xff] %v7994_v36  ;;  %11313 = vst [vmem:[#allocation10_spill] sm:$0xff] %v7996_v37  ;;  %7167 = vrsqrt.f32 %v1139_v32  ;;  %v8005_v44 = vmul.f32 0.0625, %v7994_v36  ;;  %v8008_v45 = vmul.f32 0.0625, %v7996_v37  ;;  %v8024_v32 = vld [vmem:[%s11316_s30] ss:$0 sm:$0xff] }
  0xbf   : > { %7169 = vrsqrt.f32 %v1138_v35 }
  0xc0   : > { %v1015_v13 = vmul.f32 %v8005_v44, %v8005_v44 }
  0xc1   : > { %v8010_v52 = vpop.xlane.xlu1 %858  ;;  %v8012_v53 = vpop.xlane.xlu0 %856 }
  0xc2   : > { %11314 = vst [vmem:[#allocation11_spill] sm:$0xff] %v8010_v52  ;;  %11315 = vst [vmem:[#allocation12_spill] sm:$0xff] %v8012_v53  ;;  %v981_v60 = vmul.f32 0.0625, %v8010_v52  ;;  %v980_v61 = vmul.f32 0.0625, %v8012_v53  ;;  %v1014_v52 = vmul.f32 %v8008_v45, %v8008_v45 }
  0xc4   : > { %v7164_v63 = vpop.eup %7163  ;;  %v1045_v14 = vsub.f32 %v981_v60, %v1013_v54  ;;  %v1044_v15 = vsub.f32 %v980_v61, %v1012_v55 }
  0xc5   : > { %v7166_v35 = vpop.eup %7165  ;;  %v8032_v53 = vpop.xlane.xlu1 %862  ;;  %v1201_v25 = vmul.f32 %v7164_v63, %v1105_v62 }
  0xc6   : > { %11317 = vst [vmem:[#allocation13_spill] sm:$0xff] %v8032_v53  ;;  %v8034_v3 = vpop.xlane.xlu0 %860  ;;  %v1077_v54 = vmax.f32 %v1045_v14, 0.0  ;;  %v1076_v55 = vmax.f32 %v1044_v15, 0.0  ;;  %v983_v60 = vmul.f32 0.0625, %v8032_v53  ;;  %v1200_v36 = vmul.f32 %v7166_v35, %v1104_v12 }
  0xc7   : > { %11318 = vst [vmem:[#allocation14_spill] sm:$0xff] %v8034_v3  ;;  %v982_v61 = vmul.f32 0.0625, %v8034_v3  ;;  %v1240_v37 = vmul.f32 %v8024_v32, %v1201_v25  ;;  %v1106_v53 = vsub.f32 %v7739_v0, %v7967_v26 }
  0xc8   : > { %v7168_v28 = vpop.eup %7167  ;;  %v1141_v29 = vadd.f32 1e-05, %v1077_v54  ;;  %v1140_v62 = vadd.f32 1e-05, %v1076_v55  ;;  %v1047_v63 = vsub.f32 %v983_v60, %v1015_v13  ;;  %v1239_v47 = vmul.f32 %v8024_v32, %v1200_v36 }
  0xc9   : > { %v1046_v14 = vsub.f32 %v982_v61, %v1014_v52  ;;  %v7170_v15 = vpop.eup %7169  ;;  %v8048_v3 = vpop.xlane.xlu1 %770  ;;  %v1279_v2 = vadd.f32 %v8041_v1, %v1240_v37  ;;  %v1203_v35 = vmul.f32 %v7168_v28, %v1107_v24 }
  0xca   : > { %11320 = vst [vmem:[#allocation15_spill] sm:$0xff] %v8048_v3  ;;  %v8050_v46 = vpop.xlane.xlu0 %768  ;;  %7171 = vrsqrt.f32 %v1141_v29  ;;  %v1079_v27 = vmax.f32 %v1047_v63, 0.0  ;;  %v1278_v13 = vadd.f32 %v8041_v1, %v1239_v47  ;;  %v1202_v52 = vmul.f32 %v7170_v15, %v1106_v53 }
  0xcb   : > { %11321 = vst [vmem:[#allocation16_spill] sm:$0xff] %v8050_v46  ;;  %v1078_v12 = vmax.f32 %v1046_v14, 0.0  ;;  %7173 = vrsqrt.f32 %v1140_v62  ;;  %v8061_v36 = vmul.f32 0.0625, %v8048_v3  ;;  %v8064_v29 = vmul.f32 0.0625, %v8050_v46 }
  0xcc   : > { %v1143_v25 = vadd.f32 1e-05, %v1079_v27  ;;  %v1310_v0 = vpack.c.bf16 %v1279_v2, %v1278_v13  ;;  %v1241_v60 = vmul.f32 %v8024_v32, %v1202_v52  ;;  %v1242_v28 = vmul.f32 %v8024_v32, %v1203_v35 }
  0xcd   : > { %v1142_v54 = vadd.f32 1e-05, %v1078_v12  ;;  %v8055_v55 = vpop.xlane.xlu1 %774  ;;  %v1017_v63 = vmul.f32 %v8061_v36, %v8061_v36  ;;  %v1016_v14 = vmul.f32 %v8064_v29, %v8064_v29  ;;  %v1109_v27 = vsub.f32 %v7763_v8, %v7999_v38 }
  0xce   : > { %v8057_v26 = vpop.xlane.xlu0 %772  ;;  %7175 = vrsqrt.f32 %v1143_v25  ;;  %6651 = vmatprep.mubr.bf16.mxu0 %v1310_v0  ;;  %v1280_v47 = vadd.f32 %v8041_v1, %v1241_v60  ;;  %v8069_v37 = vmul.f32 0.0625, %v8055_v55  ;;  %v1281_v24 = vadd.f32 %v8041_v1, %v1242_v28 }
  0xcf   : > { %7177 = vrsqrt.f32 %v1142_v54  ;;  %v8072_v53 = vmul.f32 0.0625, %v8057_v26  ;;  %v1108_v54 = vsub.f32 %v7766_v9, %v8002_v39  ;;  %v1111_v9 = vsub.f32 %v7769_v10, %v8005_v44 }
  0xd0   : > { %v1311_v12 = vpack.c.bf16 %v1281_v24, %v1280_v47  ;;  %v1019_v0 = vmul.f32 %v8069_v37, %v8069_v37 }
  0xd1   : > { %v8074_v61 = vpop.xlane.xlu1 %866  ;;  %v1018_v60 = vmul.f32 %v8072_v53, %v8072_v53 }
  0xd2   : > { %11322 = vst [vmem:[#allocation17_spill] sm:$0xff] %v8074_v61  ;;  %v8077_v62 = vpop.xlane.xlu0 %864  ;;  %v985_v15 = vmul.f32 0.0625, %v8074_v61  ;;  %6652 = vmatmul.mubr.bf16.vlgmr.msra.gmra.mrb[0].mxu0 %v1311_v12 }
  0xd3   : > { %11323 = vst [vmem:[#allocation18_spill] sm:$0xff] %v8077_v62  ;;  %v984_v2 = vmul.f32 0.0625, %v8077_v62 }
  0xd4   : > { %v7172_v35 = vpop.eup %7171  ;;  %v1049_v13 = vsub.f32 %v985_v15, %v1017_v63 }
  0xd5   : > { %v1048_v52 = vsub.f32 %v984_v2, %v1016_v14  ;;  %v7174_v25 = vpop.eup %7173  ;;  %v8093_v28 = vpop.xlane.xlu1 %870  ;;  %v1205_v8 = vmul.f32 %v7172_v35, %v1109_v27  ;;  %v1110_v27 = vsub.f32 %v7772_v11, %v8008_v45 }
  0xd6   : > { %v8095_v61 = vpop.xlane.xlu0 %868  ;;  %v1081_v38 = vmax.f32 %v1049_v13, 0.0  ;;  %v987_v24 = vmul.f32 0.0625, %v8093_v28  ;;  %v1204_v39 = vmul.f32 %v7174_v25, %v1108_v54 }
  0xd7   : > { %v1080_v47 = vmax.f32 %v1048_v52, 0.0  ;;  %v986_v63 = vmul.f32 0.0625, %v8095_v61  ;;  %v1244_v14 = vmul.f32 %v8024_v32, %v1205_v8 }
  0xd8   : > { %v7176_v15 = vpop.eup %7175  ;;  %v1145_v2 = vadd.f32 1e-05, %v1081_v38  ;;  %v1051_v62 = vsub.f32 %v987_v24, %v1019_v0  ;;  %v1243_v52 = vmul.f32 %v8024_v32, %v1204_v39 }
  0xd9   : > { %v1144_v12 = vadd.f32 1e-05, %v1080_v47  ;;  %v1050_v3 = vsub.f32 %v986_v63, %v1018_v60  ;;  %v7178_v46 = vpop.eup %7177  ;;  %v8104_v35 = vpop.xlane.xlu1 %778  ;;  %v1283_v10 = vadd.f32 %v8041_v1, %v1244_v14  ;;  %v1207_v54 = vmul.f32 %v7176_v15, %v1111_v9 }
  0xda   : > { %11324 = vst [vmem:[#allocation19_spill] sm:$0xff] %v8104_v35  ;;  %v8106_v13 = vpop.xlane.xlu0 %776  ;;  %7179 = vrsqrt.f32 %v1145_v2  ;;  %v1083_v44 = vmax.f32 %v1051_v62, 0.0  ;;  %v1282_v0 = vadd.f32 %v8041_v1, %v1243_v52  ;;  %v1206_v60 = vmul.f32 %v7178_v46, %v1110_v27 }
  0xdb   : > { %11325 = vst [vmem:[#allocation20_spill] sm:$0xff] %v8106_v13  ;;  %v1082_v25 = vmax.f32 %v1050_v3, 0.0  ;;  %7181 = vrsqrt.f32 %v1144_v12  ;;  %v8117_v63 = vmul.f32 0.0625, %v8104_v35  ;;  %v8120_v3 = vmul.f32 0.0625, %v8106_v13 }
  0xdc   : > { %v1147_v8 = vadd.f32 1e-05, %v1083_v44  ;;  %v1312_v11 = vpack.c.bf16 %v1283_v10, %v1282_v0  ;;  %v1245_v24 = vmul.f32 %v8024_v32, %v1206_v60  ;;  %v1246_v62 = vmul.f32 %v8024_v32, %v1207_v54 }
  0xdd   : > { %v1146_v38 = vadd.f32 1e-05, %v1082_v25  ;;  %v8111_v47 = vpop.xlane.xlu1 %782  ;;  %v1021_v12 = vmul.f32 %v8117_v63, %v8117_v63  ;;  %v1020_v27 = vmul.f32 %v8120_v3, %v8120_v3  ;;  %v1113_v44 = vsub.f32 %v7793_v18, %v8061_v36 }
  0xde   : > { %v8113_v45 = vpop.xlane.xlu0 %780  ;;  %7183 = vrsqrt.f32 %v1147_v8  ;;  %6655 = vmatprep.mubr.bf16.mxu0 %v1312_v11  ;;  %v1284_v46 = vadd.f32 %v8041_v1, %v1245_v24  ;;  %v8125_v9 = vmul.f32 0.0625, %v8111_v47  ;;  %v1285_v15 = vadd.f32 %v8041_v1, %v1246_v62 }
  0xdf   : > { %7185 = vrsqrt.f32 %v1146_v38  ;;  %v8128_v39 = vmul.f32 0.0625, %v8113_v45  ;;  %v1112_v38 = vsub.f32 %v7796_v19, %v8064_v29  ;;  %v1115_v19 = vsub.f32 %v7802_v21, %v8069_v37 }
  0xe0   : > { %v1313_v25 = vpack.c.bf16 %v1285_v15, %v1284_v46  ;;  %v1023_v11 = vmul.f32 %v8125_v9, %v8125_v9 }
  0xe1   : > { %v8130_v14 = vpop.xlane.xlu1 %874  ;;  %v1022_v24 = vmul.f32 %v8128_v39, %v8128_v39 }
  0xe2   : > { %11326 = vst [vmem:[#allocation21_spill] sm:$0xff] %v8130_v14  ;;  %v8133_v2 = vpop.xlane.xlu0 %872  ;;  %v989_v52 = vmul.f32 0.0625, %v8130_v14  ;;  %6656 = vmatmul.mubr.bf16.gmra.mrb[4].mxu0 %v1313_v25 }
  0xe3   : > { %11327 = vst [vmem:[#allocation22_spill] sm:$0xff] %v8133_v2  ;;  %v988_v10 = vmul.f32 0.0625, %v8133_v2 }
  0xe4   : > { %v7180_v54 = vpop.eup %7179  ;;  %v1053_v0 = vsub.f32 %v989_v52, %v1021_v12 }
  0xe5   : > { %v1052_v60 = vsub.f32 %v988_v10, %v1020_v27  ;;  %v7182_v8 = vpop.eup %7181  ;;  %v8149_v62 = vpop.xlane.xlu1 %878  ;;  %v1209_v18 = vmul.f32 %v7180_v54, %v1113_v44  ;;  %v1114_v44 = vsub.f32 %v7805_v22, %v8072_v53 }
  0xe6   : > { %v8151_v14 = vpop.xlane.xlu0 %876  ;;  %v1085_v36 = vmax.f32 %v1053_v0, 0.0  ;;  %v991_v15 = vmul.f32 0.0625, %v8149_v62  ;;  %v1208_v29 = vmul.f32 %v7182_v8, %v1112_v38 }
  0xe7   : > { %v1084_v46 = vmax.f32 %v1052_v60, 0.0  ;;  %v990_v12 = vmul.f32 0.0625, %v8151_v14  ;;  %v1248_v27 = vmul.f32 %v8024_v32, %v1209_v18 }
  0xe8   : > { %v7184_v52 = vpop.eup %7183  ;;  %v1149_v10 = vadd.f32 1e-05, %v1085_v36  ;;  %v1055_v2 = vsub.f32 %v991_v15, %v1023_v11  ;;  %v1247_v60 = vmul.f32 %v8024_v32, %v1208_v29 }
  0xe9   : > { %v1148_v25 = vadd.f32 1e-05, %v1084_v46  ;;  %v1054_v35 = vsub.f32 %v990_v12, %v1022_v24  ;;  %v7186_v13 = vpop.eup %7185  ;;  %v8160_v54 = vpop.xlane.xlu1 %786  ;;  %v1287_v21 = vadd.f32 %v8041_v1, %v1248_v27  ;;  %v1211_v38 = vmul.f32 %v7184_v52, %v1115_v19 }
  0xea   : > { %11328 = vst [vmem:[#allocation23_spill] sm:$0xff] %v8160_v54  ;;  %v8162_v0 = vpop.xlane.xlu0 %784  ;;  %7187 = vrsqrt.f32 %v1149_v10  ;;  %v1087_v37 = vmax.f32 %v1055_v2, 0.0  ;;  %v1286_v11 = vadd.f32 %v8041_v1, %v1247_v60  ;;  %v1210_v24 = vmul.f32 %v7186_v13, %v1114_v44 }
  0xeb   : > { %11329 = vst [vmem:[#allocation24_spill] sm:$0xff] %v8162_v0  ;;  %v1086_v8 = vmax.f32 %v1054_v35, 0.0  ;;  %7189 = vrsqrt.f32 %v1148_v25  ;;  %v8173_v12 = vmul.f32 0.0625, %v8160_v54  ;;  %v8176_v35 = vmul.f32 0.0625, %v8162_v0 }
  0xec   : > { %v1151_v18 = vadd.f32 1e-05, %v1087_v37  ;;  %v1314_v22 = vpack.c.bf16 %v1287_v21, %v1286_v11  ;;  %v1249_v15 = vmul.f32 %v8024_v32, %v1210_v24  ;;  %v1250_v2 = vmul.f32 %v8024_v32, %v1211_v38 }
  0xed   : > { %v1150_v36 = vadd.f32 1e-05, %v1086_v8  ;;  %v8167_v46 = vpop.xlane.xlu1 %790  ;;  %v1025_v25 = vmul.f32 %v8173_v12, %v8173_v12  ;;  %v1024_v44 = vmul.f32 %v8176_v35, %v8176_v35  ;;  %v1117_v37 = vsub.f32 %v7829_v30, %v8117_v63 }
  0xee   : > { %v8169_v53 = vpop.xlane.xlu0 %788  ;;  %7191 = vrsqrt.f32 %v1151_v18  ;;  %6659 = vmatprep.mubr.bf16.mxu0 %v1314_v22  ;;  %v1288_v13 = vadd.f32 %v8041_v1, %v1249_v15  ;;  %v8181_v19 = vmul.f32 0.0625, %v8167_v46  ;;  %v1289_v52 = vadd.f32 %v8041_v1, %v1250_v2 }
  0xef   : > { %7193 = vrsqrt.f32 %v1150_v36  ;;  %v8184_v29 = vmul.f32 0.0625, %v8169_v53  ;;  %v1116_v36 = vsub.f32 %v7832_v31, %v8120_v3  ;;  %v1119_v31 = vsub.f32 %v7838_v33, %v8125_v9 }
  0xf0   : > { %v1315_v8 = vpack.c.bf16 %v1289_v52, %v1288_v13  ;;  %v1027_v22 = vmul.f32 %v8181_v19, %v8181_v19 }
  0xf1   : > { %v8186_v27 = vpop.xlane.xlu1 %882  ;;  %v1026_v15 = vmul.f32 %v8184_v29, %v8184_v29 }
  0xf2   : > { %11330 = vst [vmem:[#allocation25_spill] sm:$0xff] %v8186_v27  ;;  %v8189_v10 = vpop.xlane.xlu0 %880  ;;  %v993_v60 = vmul.f32 0.0625, %v8186_v27  ;;  %6660 = vmatmul.mubr.bf16.gmra.mrb[8].mxu0 %v1315_v8 }
  0xf3   : > { %11331 = vst [vmem:[#allocation26_spill] sm:$0xff] %v8189_v10  ;;  %v992_v21 = vmul.f32 0.0625, %v8189_v10 }
  0xf4   : > { %v7188_v38 = vpop.eup %7187  ;;  %v1057_v11 = vsub.f32 %v993_v60, %v1025_v25 }
  0xf5   : > { %v1056_v24 = vsub.f32 %v992_v21, %v1024_v44  ;;  %v7190_v18 = vpop.eup %7189  ;;  %v8205_v2 = vpop.xlane.xlu1 %886  ;;  %v1213_v30 = vmul.f32 %v7188_v38, %v1117_v37  ;;  %v1118_v37 = vsub.f32 %v7841_v34, %v8128_v39 }
  0xf6   : > { %v8207_v27 = vpop.xlane.xlu0 %884  ;;  %v1089_v63 = vmax.f32 %v1057_v11, 0.0  ;;  %v995_v52 = vmul.f32 0.0625, %v8205_v2  ;;  %v1212_v3 = vmul.f32 %v7190_v18, %v1116_v36 }
  0xf7   : > { %v1088_v13 = vmax.f32 %v1056_v24, 0.0  ;;  %v994_v25 = vmul.f32 0.0625, %v8207_v27  ;;  %v1252_v44 = vmul.f32 %v8024_v32, %v1213_v30 }
  0xf8   : > { %v7192_v60 = vpop.eup %7191  ;;  %v1153_v21 = vadd.f32 1e-05, %v1089_v63  ;;  %v1059_v10 = vsub.f32 %v995_v52, %v1027_v22  ;;  %v1251_v24 = vmul.f32 %v8024_v32, %v1212_v3 }
  0xf9   : > { %v1152_v8 = vadd.f32 1e-05, %v1088_v13  ;;  %v1058_v54 = vsub.f32 %v994_v25, %v1026_v15  ;;  %v7194_v0 = vpop.eup %7193  ;;  %v8216_v38 = vpop.xlane.xlu1 %794  ;;  %v1291_v33 = vadd.f32 %v8041_v1, %v1252_v44  ;;  %v1215_v36 = vmul.f32 %v7192_v60, %v1119_v31 }
  0xfa   : > { %11332 = vst [vmem:[#allocation27_spill] sm:$0xff] %v8216_v38  ;;  %v8218_v11 = vpop.xlane.xlu0 %792  ;;  %7195 = vrsqrt.f32 %v1153_v21  ;;  %v1091_v9 = vmax.f32 %v1059_v10, 0.0  ;;  %v1290_v22 = vadd.f32 %v8041_v1, %v1251_v24  ;;  %v1214_v15 = vmul.f32 %v7194_v0, %v1118_v37 }
  0xfb   : > { %11333 = vst [vmem:[#allocation28_spill] sm:$0xff] %v8218_v11  ;;  %v1090_v18 = vmax.f32 %v1058_v54, 0.0  ;;  %7197 = vrsqrt.f32 %v1152_v8  ;;  %v8229_v25 = vmul.f32 0.0625, %v8216_v38  ;;  %v8232_v54 = vmul.f32 0.0625, %v8218_v11 }
  0xfc   : > { %v1155_v30 = vadd.f32 1e-05, %v1091_v9  ;;  %v1316_v34 = vpack.c.bf16 %v1291_v33, %v1290_v22  ;;  %v1253_v52 = vmul.f32 %v8024_v32, %v1214_v15  ;;  %v1254_v10 = vmul.f32 %v8024_v32, %v1215_v36 }
  0xfd   : > { %v1154_v63 = vadd.f32 1e-05, %v1090_v18  ;;  %v8223_v13 = vpop.xlane.xlu1 %798  ;;  %v1029_v8 = vmul.f32 %v8229_v25, %v8229_v25  ;;  %v1028_v37 = vmul.f32 %v8232_v54, %v8232_v54  ;;  %v1121_v9 = vsub.f32 %v7859_v40, %v8173_v12 }
  0xfe   : > { %11334 = vst [vmem:[#allocation29_spill] sm:$0xff] %v8223_v13  ;;  %v8225_v39 = vpop.xlane.xlu0 %796  ;;  %7199 = vrsqrt.f32 %v1155_v30  ;;  %6663 = vmatprep.mubr.bf16.mxu0 %v1316_v34  ;;  %v1292_v0 = vadd.f32 %v8041_v1, %v1253_v52  ;;  %v8237_v31 = vmul.f32 0.0625, %v8223_v13  ;;  %v1293_v60 = vadd.f32 %v8041_v1, %v1254_v10 }
  0xff   : > { %11335 = vst [vmem:[#allocation30_spill] sm:$0xff] %v8225_v39  ;;  %7201 = vrsqrt.f32 %v1154_v63  ;;  %v8240_v3 = vmul.f32 0.0625, %v8225_v39  ;;  %v1120_v63 = vsub.f32 %v7862_v41, %v8176_v35  ;;  %v1123_v41 = vsub.f32 %v7867_v42, %v8181_v19 }
 0x100   : > { %v1317_v18 = vpack.c.bf16 %v1293_v60, %v1292_v0  ;;  %v1031_v34 = vmul.f32 %v8237_v31, %v8237_v31 }
 0x101   : > { %v8242_v44 = vpop.xlane.xlu1 %890  ;;  %v1030_v52 = vmul.f32 %v8240_v3, %v8240_v3 }
 0x102   : > { %11336 = vst [vmem:[#allocation31_spill] sm:$0xff] %v8242_v44  ;;  %v8245_v21 = vpop.xlane.xlu0 %888  ;;  %v997_v24 = vmul.f32 0.0625, %v8242_v44  ;;  %6664 = vmatmul.mubr.bf16.gmra.mrb[12].mxu0 %v1317_v18 }
 0x103   : > { %11337 = vst [vmem:[#allocation32_spill] sm:$0xff] %v8245_v21  ;;  %v996_v33 = vmul.f32 0.0625, %v8245_v21 }
 0x104   : > { %v7196_v36 = vpop.eup %7195  ;;  %v1061_v22 = vsub.f32 %v997_v24, %v1029_v8 }
 0x105   : > { %v1060_v15 = vsub.f32 %v996_v33, %v1028_v37  ;;  %v7198_v30 = vpop.eup %7197  ;;  %v8261_v10 = vpop.xlane.xlu1 %894  ;;  %v1217_v40 = vmul.f32 %v7196_v36, %v1121_v9  ;;  %v1122_v9 = vsub.f32 %v7870_v43, %v8184_v29 }
 0x106   : > { %11338 = vst [vmem:[#allocation33_spill] sm:$0xff] %v8261_v10  ;;  %v8263_v44 = vpop.xlane.xlu0 %892  ;;  %v1093_v12 = vmax.f32 %v1061_v22, 0.0  ;;  %v999_v60 = vmul.f32 0.0625, %v8261_v10  ;;  %v1216_v35 = vmul.f32 %v7198_v30, %v1120_v63 }
 0x107   : > { %11339 = vst [vmem:[#allocation34_spill] sm:$0xff] %v8263_v44  ;;  %v1092_v0 = vmax.f32 %v1060_v15, 0.0  ;;  %v998_v8 = vmul.f32 0.0625, %v8263_v44  ;;  %v1256_v37 = vmul.f32 %v8024_v32, %v1217_v40 }
 0x108   : > { %v7200_v24 = vpop.eup %7199  ;;  %v1157_v33 = vadd.f32 1e-05, %v1093_v12  ;;  %v1063_v21 = vsub.f32 %v999_v60, %v1031_v34  ;;  %v1255_v15 = vmul.f32 %v8024_v32, %v1216_v35 }
 0x109   : > { %v1156_v18 = vadd.f32 1e-05, %v1092_v0  ;;  %v1062_v38 = vsub.f32 %v998_v8, %v1030_v52  ;;  %v7202_v11 = vpop.eup %7201  ;;  %v8272_v36 = vpop.xlane.xlu1 %802  ;;  %v1295_v42 = vadd.f32 %v8041_v1, %v1256_v37  ;;  %v1219_v63 = vmul.f32 %v7200_v24, %v1123_v41 }
 0x10a   : > { %11340 = vst [vmem:[#allocation35_spill] sm:$0xff] %v8272_v36  ;;  %v8274_v22 = vpop.xlane.xlu0 %800  ;;  %7203 = vrsqrt.f32 %v1157_v33  ;;  %v1095_v19 = vmax.f32 %v1063_v21, 0.0  ;;  %v1294_v34 = vadd.f32 %v8041_v1, %v1255_v15  ;;  %v1218_v52 = vmul.f32 %v7202_v11, %v1122_v9 }
 0x10b   : > { %11341 = vst [vmem:[#allocation36_spill] sm:$0xff] %v8274_v22  ;;  %v1094_v30 = vmax.f32 %v1062_v38, 0.0  ;;  %7205 = vrsqrt.f32 %v1156_v18  ;;  %v8285_v8 = vmul.f32 0.0625, %v8272_v36  ;;  %v8288_v38 = vmul.f32 0.0625, %v8274_v22 }
 0x10c   : > { %v1159_v40 = vadd.f32 1e-05, %v1095_v19  ;;  %v1318_v43 = vpack.c.bf16 %v1295_v42, %v1294_v34  ;;  %v1257_v60 = vmul.f32 %v8024_v32, %v1218_v52  ;;  %v1258_v21 = vmul.f32 %v8024_v32, %v1219_v63 }
 0x10d   : > { %v1158_v12 = vadd.f32 1e-05, %v1094_v30  ;;  %v8279_v0 = vpop.xlane.xlu1 %806  ;;  %v1033_v18 = vmul.f32 %v8285_v8, %v8285_v8  ;;  %v1032_v9 = vmul.f32 %v8288_v38, %v8288_v38  ;;  %v1125_v19 = vsub.f32 %v7883_v48, %v8229_v25 }
 0x10e   : > { %11342 = vst [vmem:[#allocation37_spill] sm:$0xff] %v8279_v0  ;;  %v8281_v29 = vpop.xlane.xlu0 %804  ;;  %7207 = vrsqrt.f32 %v1159_v40  ;;  %6667 = vmatprep.mubr.bf16.mxu1 %v1318_v43  ;;  %v1296_v11 = vadd.f32 %v8041_v1, %v1257_v60  ;;  %v8293_v41 = vmul.f32 0.0625, %v8279_v0  ;;  %v1297_v24 = vadd.f32 %v8041_v1, %v1258_v21 }
 0x10f   : > { %11343 = vst [vmem:[#allocation38_spill] sm:$0xff] %v8281_v29  ;;  %7209 = vrsqrt.f32 %v1158_v12  ;;  %v8296_v35 = vmul.f32 0.0625, %v8281_v29  ;;  %v1124_v12 = vsub.f32 %v7886_v49, %v8232_v54  ;;  %v1127_v49 = vsub.f32 %v7891_v50, %v8237_v31 }
 0x110   : > { %v1319_v30 = vpack.c.bf16 %v1297_v24, %v1296_v11  ;;  %v1035_v43 = vmul.f32 %v8293_v41, %v8293_v41 }
 0x111   : > { %v8298_v37 = vpop.xlane.xlu1 %898  ;;  %v1034_v60 = vmul.f32 %v8296_v35, %v8296_v35 }
 0x112   : > { %11344 = vst [vmem:[#allocation39_spill] sm:$0xff] %v8298_v37  ;;  %v8301_v33 = vpop.xlane.xlu0 %896  ;;  %v1001_v15 = vmul.f32 0.0625, %v8298_v37  ;;  %6668 = vmatmul.mubr.bf16.vlgmr.msra.gmra.mrb[0].mxu1 %v1319_v30 }
 0x113   : > { %11345 = vst [vmem:[#allocation40_spill] sm:$0xff] %v8301_v33  ;;  %v1000_v42 = vmul.f32 0.0625, %v8301_v33 }
 0x114   : > { %v7204_v63 = vpop.eup %7203  ;;  %v1065_v34 = vsub.f32 %v1001_v15, %v1033_v18 }
 0x115   : > { %v1064_v52 = vsub.f32 %v1000_v42, %v1032_v9  ;;  %v7206_v40 = vpop.eup %7205  ;;  %v8317_v21 = vpop.xlane.xlu1 %902  ;;  %v1221_v48 = vmul.f32 %v7204_v63, %v1125_v19  ;;  %v1126_v19 = vsub.f32 %v7894_v51, %v8240_v3 }
 0x116   : > { %11346 = vst [vmem:[#allocation41_spill] sm:$0xff] %v8317_v21  ;;  %v8319_v37 = vpop.xlane.xlu0 %900  ;;  %v1097_v25 = vmax.f32 %v1065_v34, 0.0  ;;  %v1003_v24 = vmul.f32 0.0625, %v8317_v21  ;;  %v1220_v54 = vmul.f32 %v7206_v40, %v1124_v12 }
 0x117   : > { %11347 = vst [vmem:[#allocation42_spill] sm:$0xff] %v8319_v37  ;;  %v1096_v11 = vmax.f32 %v1064_v52, 0.0  ;;  %v1002_v18 = vmul.f32 0.0625, %v8319_v37  ;;  %v1260_v9 = vmul.f32 %v8024_v32, %v1221_v48 }
 0x118   : > { %v7208_v15 = vpop.eup %7207  ;;  %v1161_v42 = vadd.f32 1e-05, %v1097_v25  ;;  %v1067_v33 = vsub.f32 %v1003_v24, %v1035_v43  ;;  %v1259_v52 = vmul.f32 %v8024_v32, %v1220_v54 }
 0x119   : > { %v1160_v30 = vadd.f32 1e-05, %v1096_v11  ;;  %v1066_v36 = vsub.f32 %v1002_v18, %v1034_v60  ;;  %v7210_v22 = vpop.eup %7209  ;;  %v8328_v63 = vpop.xlane.xlu1 %810  ;;  %v1299_v50 = vadd.f32 %v8041_v1, %v1260_v9  ;;  %v1223_v12 = vmul.f32 %v7208_v15, %v1127_v49 }
 0x11a   : > { %11348 = vst [vmem:[#allocation43_spill] sm:$0xff] %v8328_v63  ;;  %v8330_v34 = vpop.xlane.xlu0 %808  ;;  %7211 = vrsqrt.f32 %v1161_v42  ;;  %v1099_v31 = vmax.f32 %v1067_v33, 0.0  ;;  %v1298_v43 = vadd.f32 %v8041_v1, %v1259_v52  ;;  %v1222_v60 = vmul.f32 %v7210_v22, %v1126_v19 }
 0x11b   : > { %11349 = vst [vmem:[#allocation44_spill] sm:$0xff] %v8330_v34  ;;  %v1098_v40 = vmax.f32 %v1066_v36, 0.0  ;;  %7213 = vrsqrt.f32 %v1160_v30  ;;  %v8341_v18 = vmul.f32 0.0625, %v8328_v63  ;;  %v8344_v36 = vmul.f32 0.0625, %v8330_v34 }
 0x11c   : > { %v1163_v48 = vadd.f32 1e-05, %v1099_v31  ;;  %v1320_v51 = vpack.c.bf16 %v1299_v50, %v1298_v43  ;;  %v1261_v24 = vmul.f32 %v8024_v32, %v1222_v60  ;;  %v1262_v33 = vmul.f32 %v8024_v32, %v1223_v12 }
 0x11d   : > { %v1162_v25 = vadd.f32 1e-05, %v1098_v40  ;;  %v8335_v11 = vpop.xlane.xlu1 %814  ;;  %v1037_v30 = vmul.f32 %v8341_v18, %v8341_v18  ;;  %v1036_v19 = vmul.f32 %v8344_v36, %v8344_v36  ;;  %v1129_v31 = vsub.f32 %v7907_v56, %v8285_v8 }
 0x11e   : > { %11350 = vst [vmem:[#allocation45_spill] sm:$0xff] %v8335_v11  ;;  %v8337_v3 = vpop.xlane.xlu0 %812  ;;  %7215 = vrsqrt.f32 %v1163_v48  ;;  %6671 = vmatprep.mubr.bf16.mxu1 %v1320_v51  ;;  %v1300_v22 = vadd.f32 %v8041_v1, %v1261_v24  ;;  %v8349_v49 = vmul.f32 0.0625, %v8335_v11  ;;  %v1301_v15 = vadd.f32 %v8041_v1, %v1262_v33 }
 0x11f   : > { %11351 = vst [vmem:[#allocation46_spill] sm:$0xff] %v8337_v3  ;;  %7217 = vrsqrt.f32 %v1162_v25  ;;  %v8352_v54 = vmul.f32 0.0625, %v8337_v3  ;;  %v1128_v25 = vsub.f32 %v7910_v57, %v8288_v38  ;;  %v1131_v57 = vsub.f32 %v7915_v58, %v8293_v41 }
 0x120   : > { %v1321_v40 = vpack.c.bf16 %v1301_v15, %v1300_v22  ;;  %v1039_v51 = vmul.f32 %v8349_v49, %v8349_v49  ;;  %v1130_v38 = vsub.f32 %v7918_v59, %v8296_v35  ;;  %v7099_v59 = vld [vmem:[%s11356_s25] sm:$0xff]  }
 0x121   : > { %v8354_v9 = vpop.xlane.xlu1 %906  ;;  %v1038_v24 = vmul.f32 %v8352_v54, %v8352_v54  ;;  %6683 = vmatprep.subr.bf16.mxu1 %v7099_v59 }
 0x122   : > { %11352 = vst [vmem:[#allocation47_spill] sm:$0xff] %v8354_v9  ;;  %v8357_v42 = vpop.xlane.xlu0 %904  ;;  %v1005_v52 = vmul.f32 0.0625, %v8354_v9  ;;  %6672 = vmatmul.mubr.bf16.gmra.mrb[4].mxu1 %v1321_v40 }
 0x123   : > { %11353 = vst [vmem:[#allocation48_spill] sm:$0xff] %v8357_v42  ;;  %v1004_v50 = vmul.f32 0.0625, %v8357_v42  ;;  %6684 = vmatpush3.bf16.msra.mxu1 %v7099_v59  ;;  %v7104_v59 = vld [vmem:[%s11356_s25 + $0x28] sm:$0xff]  }
 0x124   : > { %v7212_v12 = vpop.eup %7211  ;;  %v1069_v43 = vsub.f32 %v1005_v52, %v1037_v30 }
 0x125   : > { %v1068_v60 = vsub.f32 %v1004_v50, %v1036_v19  ;;  %v7214_v48 = vpop.eup %7213  ;;  %v8373_v33 = vpop.xlane.xlu1 %910  ;;  %v1225_v56 = vmul.f32 %v7212_v12, %v1129_v31 }
 0x126   : > { %11354 = vst [vmem:[#allocation49_spill] sm:$0xff] %v8373_v33  ;;  %v8375_v9 = vpop.xlane.xlu0 %908  ;;  %v1101_v8 = vmax.f32 %v1069_v43, 0.0  ;;  %v1007_v15 = vmul.f32 0.0625, %v8373_v33  ;;  %v1224_v19 = vmul.f32 %v7214_v48, %v1128_v25 }
 0x127   : > { %11355 = vst [vmem:[#allocation50_spill] sm:$0xff] %v8375_v9  ;;  %v1100_v22 = vmax.f32 %v1068_v60, 0.0  ;;  %v1006_v30 = vmul.f32 0.0625, %v8375_v9  ;;  %v1264_v52 = vmul.f32 %v8024_v32, %v1225_v56 }
 0x128   : > { %v7216_v50 = vpop.eup %7215  ;;  %v1165_v40 = vadd.f32 1e-05, %v1101_v8  ;;  %v1071_v11 = vsub.f32 %v1007_v15, %v1039_v51  ;;  %v1263_v43 = vmul.f32 %v8024_v32, %v1224_v19 }
 0x129   : > { %v1164_v42 = vadd.f32 1e-05, %v1100_v22  ;;  %v1070_v31 = vsub.f32 %v1006_v30, %v1038_v24  ;;  %v7218_v12 = vpop.eup %7217  ;;  %v1303_v60 = vadd.f32 %v8041_v1, %v1264_v52  ;;  %v1227_v33 = vmul.f32 %v7216_v50, %v1131_v57  ;;  %v7102_v52 = vld [vmem:[%s11356_s25 + $0x18] sm:$0xff]  }
 0x12a   : > { %7219 = vrsqrt.f32 %v1165_v40  ;;  %v1103_v9 = vmax.f32 %v1071_v11, 0.0  ;;  %v1226_v41 = vmul.f32 %v7218_v12, %v1130_v38  ;;  %v1302_v35 = vadd.f32 %v8041_v1, %v1263_v43 }
 0x12b   : > { %v1102_v58 = vmax.f32 %v1070_v31, 0.0  ;;  %7221 = vrsqrt.f32 %v1164_v42  ;;  %v1266_v48 = vmul.f32 %v8024_v32, %v1227_v33  ;;  %v7100_v42 = vld [vmem:[%s11356_s25 + $0x8] sm:$0xff]   ;;  %v1133_v33 = vsub.f32 %v7931_v4, %v8341_v18 }
 0x12c   : > { %v1167_v25 = vadd.f32 1e-05, %v1103_v9  ;;  %v1265_v24 = vmul.f32 %v8024_v32, %v1226_v41  ;;  %v1322_v56 = vpack.c.bf16 %v1303_v60, %v1302_v35  ;;  %6685 = vmatprep.subr.bf16.mxu1 %v7100_v42  ;;  %v7101_v9 = vld [vmem:[%s11356_s25 + $0x10] sm:$0xff]   ;;  %v1132_v30 = vsub.f32 %v7934_v5, %v8344_v36 }
 0x12d   : > { %v1166_v51 = vadd.f32 1e-05, %v1102_v58  ;;  %v1305_v8 = vadd.f32 %v8041_v1, %v1266_v48  ;;  %6686 = vmatpush3.bf16.msra.mxu1 %v7100_v42  ;;  %v1135_v50 = vsub.f32 %v7939_v6, %v8349_v49  ;;  %v1134_v4 = vsub.f32 %v7942_v7, %v8352_v54  ;;  %v7103_v6 = vld [vmem:[%s11356_s25 + $0x20] sm:$0xff]   ;;  %v7105_v48 = vld [vmem:[%s11356_s25 + $0x30] sm:$0xff]  }
 0x12e   : > { %7223 = vrsqrt.f32 %v1167_v25  ;;  %v1304_v11 = vadd.f32 %v8041_v1, %v1265_v24  ;;  %6675 = vmatprep.mubr.bf16.mxu1 %v1322_v56  ;;  %6687 = vmatprep.subr.bf16.mxu1 %v7101_v9 }
 0x12f   : > { %7225 = vrsqrt.f32 %v1166_v51 }
 0x130   : > { %v1323_v22 = vpack.c.bf16 %v1305_v8, %v1304_v11 }
 0x131   : > { %6688 = vmatpush3.bf16.msra.mxu1 %v7101_v9 }
 0x132   : > { %6676 = vmatmul.mubr.bf16.gmra.mrb[8].mxu1 %v1323_v22  ;;  %6689 = vmatprep.subr.bf16.mxu1 %v7102_v52 }
 0x134   : > { %v7220_v15 = vpop.eup %7219 }
 0x135   : > { %v7222_v57 = vpop.eup %7221  ;;  %v1229_v38 = vmul.f32 %v7220_v15, %v1133_v33  ;;  %6690 = vmatpush3.bf16.msra.mxu1 %v7102_v52 }
 0x136   : > { %v1228_v19 = vmul.f32 %v7222_v57, %v1132_v30  ;;  %6691 = vmatprep.subr.bf16.mxu1 %v7103_v6 }
 0x137   : > { %v1268_v40 = vmul.f32 %v8024_v32, %v1229_v38 }
 0x138   : > { %v7224_v31 = vpop.eup %7223  ;;  %v1267_v5 = vmul.f32 %v8024_v32, %v1228_v19 }
 0x139   : > { %v7226_v18 = vpop.eup %7225  ;;  %v1307_v36 = vadd.f32 %v8041_v1, %v1268_v40  ;;  %v1231_v12 = vmul.f32 %v7224_v31, %v1135_v50  ;;  %6692 = vmatpush3.bf16.msra.mxu1 %v7103_v6 }
 0x13a   : > { %v1306_v43 = vadd.f32 %v8041_v1, %v1267_v5  ;;  %v1230_v60 = vmul.f32 %v7226_v18, %v1134_v4  ;;  %6693 = vmatprep.subr.bf16.mxu1 %v7104_v59 }
 0x13b   : > { %v1270_v49 = vmul.f32 %v8024_v32, %v1231_v12 }
 0x13c   : > { %v1324_v58 = vpack.c.bf16 %v1307_v36, %v1306_v43  ;;  %v1269_v7 = vmul.f32 %v8024_v32, %v1230_v60  ;;  %v7106_v32 = vld [vmem:[%s11356_s25 + $0x38] sm:$0xff]  }
 0x13d   : > { %v1309_v54 = vadd.f32 %v8041_v1, %v1270_v49  ;;  %6694 = vmatpush3.bf16.msra.mxu1 %v7104_v59  ;;  %v7108_v59 = vld [vmem:[%s11117_s7 + $0x8] sm:$0xff]  }
 0x13e   : > { %6679 = vmatprep.mubr.bf16.mxu1 %v1324_v58  ;;  %v1308_v41 = vadd.f32 %v8041_v1, %v1269_v7  ;;  %6695 = vmatprep.subr.bf16.mxu1 %v7105_v48  ;;  %v8434_v1 = vld [vmem:[%s11357_s0] ss:$0 sm:$0xff] }
 0x140   : > { %v1325_v35 = vpack.c.bf16 %v1309_v54, %v1308_v41  ;;  %v7107_v41 = vld [vmem:[%s11117_s7] sm:$0xff]  }
 0x141   : > { %6696 = vmatpush3.bf16.msra.mxu1 %v7105_v48  ;;  %6731 = vmatprep.subr.bf16.mxu0 %v7107_v41 }
 0x142   : > { %6680 = vmatmul.mubr.bf16.gmra.mrb[12].mxu1 %v1325_v35  ;;  %6697 = vmatprep.subr.bf16.mxu1 %v7106_v32 }
 0x143   : > { %6732 = vmatpush3.bf16.msra.mxu0 %v7107_v41 }
 0x144   : > { %6733 = vmatprep.subr.bf16.mxu0 %v7108_v59 }
 0x145   : > { %6698 = vmatpush3.bf16.msra.mxu1 %v7106_v32 }
 0x147   : > { %6734 = vmatpush3.bf16.msra.mxu0 %v7108_v59 }
 0x1a5   : > { %v6653_v25 = vpop.f32.mrb[0].mxu0 }
 0x1a6   : > { %v8437_v51 = vadd.f32 %v6653_v25, %v8434_v1  ;;  %v1431_v24 = vpop.f32.mrb[1].mxu0 }
 0x1a7   : > { %v8440_v56 = vadd.f32 %v8434_v1, %v1431_v24  ;;  %v6654_v8 = vpop.f32.mrb[2].mxu0 }
 0x1a8   : > { %v1560_v11 = vmul.f32 %v8437_v51, %v8437_v51  ;;  %v8445_v42 = vadd.f32 %v6654_v8, %v8434_v1  ;;  %v1434_v22 = vpop.f32.mrb[3].mxu0 }
 0x1a9   : > { %v1558_v9 = vmul.f32 %v8440_v56, %v8440_v56  ;;  %v8450_v33 = vadd.f32 %v8434_v1, %v1434_v22 }
 0x1aa   : > { %v1592_v15 = vmul.f32 %v1560_v11, %v8437_v51  ;;  %v1561_v30 = vmul.f32 %v8445_v42, %v8445_v42 }
 0x1ab   : > { %v1590_v57 = vmul.f32 %v1558_v9, %v8440_v56  ;;  %v1559_v38 = vmul.f32 %v8450_v33, %v8450_v33 }
 0x1ac   : > { %v1624_v19 = vmul.f32 0.044715, %v1592_v15  ;;  %v1593_v52 = vmul.f32 %v1561_v30, %v8445_v42  ;;  %v7109_v15 = vld [vmem:[%s11117_s7 + $0x10] sm:$0xff]  }
 0x1ad   : > { %v1622_v50 = vmul.f32 0.044715, %v1590_v57  ;;  %v1591_v40 = vmul.f32 %v1559_v38, %v8450_v33  ;;  %6735 = vmatprep.subr.bf16.mxu0 %v7109_v15 }
 0x1ae   : > { %v1656_v31 = vadd.f32 %v1624_v19, %v8437_v51  ;;  %v1625_v4 = vmul.f32 0.044715, %v1593_v52  ;;  %6736 = vmatpush3.bf16.msra.mxu0 %v7109_v15 }
 0x1af   : > { %v1654_v5 = vadd.f32 %v1622_v50, %v8440_v56  ;;  %v1623_v18 = vmul.f32 0.044715, %v1591_v40 }
 0x1b0   : > { %v1688_v36 = vmul.f32 0.7978846, %v1656_v31  ;;  %v1657_v12 = vadd.f32 %v1625_v4, %v8445_v42 }
 0x1b1   : > { %v1686_v43 = vmul.f32 0.7978846, %v1654_v5  ;;  %v1655_v60 = vadd.f32 %v1623_v18, %v8450_v33 }
 0x1b2   : > { %7227 = vtanh.f32 %v1688_v36  ;;  %v1689_v6 = vmul.f32 0.7978846, %v1657_v12 }
 0x1b3   : > { %7229 = vtanh.f32 %v1686_v43  ;;  %v1687_v49 = vmul.f32 0.7978846, %v1655_v60  ;;  %v7110_v43 = vld [vmem:[%s11117_s7 + $0x18] sm:$0xff]  }
 0x1b4   : > { %7231 = vtanh.f32 %v1689_v6  ;;  %6737 = vmatprep.subr.bf16.mxu0 %v7110_v43 }
 0x1b5   : > { %7233 = vtanh.f32 %v1687_v49  ;;  %v6657_v58 = vpop.f32.mrb[4].mxu0  ;;  %6738 = vmatpush3.bf16.msra.mxu0 %v7110_v43 }
 0x1b6   : > { %v8465_v7 = vadd.f32 %v6657_v58, %v8434_v1  ;;  %v1447_v54 = vpop.f32.mrb[5].mxu0 }
 0x1b7   : > { %v8474_v35 = vadd.f32 %v8434_v1, %v1447_v54  ;;  %v6658_v48 = vpop.f32.mrb[6].mxu0 }
 0x1b8   : > { %v1564_v32 = vmul.f32 %v8465_v7, %v8465_v7  ;;  %v8479_v25 = vadd.f32 %v6658_v48, %v8434_v1  ;;  %v1450_v24 = vpop.f32.mrb[7].mxu0 }
 0x1b9   : > { %v1562_v8 = vmul.f32 %v8474_v35, %v8474_v35  ;;  %v8484_v11 = vadd.f32 %v8434_v1, %v1450_v24 }
 0x1ba   : > { %v1596_v22 = vmul.f32 %v1564_v32, %v8465_v7  ;;  %v1565_v9 = vmul.f32 %v8479_v25, %v8479_v25 }
 0x1bb   : > { %v1594_v30 = vmul.f32 %v1562_v8, %v8474_v35  ;;  %v1563_v57 = vmul.f32 %v8484_v11, %v8484_v11 }
 0x1bc   : > { %v7228_v38 = vpop.eup %7227  ;;  %v1628_v19 = vmul.f32 0.044715, %v1596_v22  ;;  %v1597_v52 = vmul.f32 %v1565_v9, %v8479_v25 }
 0x1bd   : > { %v7230_v50 = vpop.eup %7229  ;;  %v1752_v40 = vadd.f32 1.0, %v7228_v38  ;;  %v1626_v31 = vmul.f32 0.044715, %v1594_v30  ;;  %v1595_v4 = vmul.f32 %v1563_v57, %v8484_v11  ;;  %v7111_v57 = vld [vmem:[%s11117_s7 + $0x20] sm:$0xff]  }
 0x1be   : > { %v7232_v5 = vpop.eup %7231  ;;  %v1660_v18 = vadd.f32 %v1628_v19, %v8465_v7  ;;  %v1629_v36 = vmul.f32 0.044715, %v1597_v52  ;;  %v1750_v12 = vadd.f32 1.0, %v7230_v50  ;;  %6739 = vmatprep.subr.bf16.mxu0 %v7111_v57 }
 0x1bf   : > { %v7234_v60 = vpop.eup %7233  ;;  %v1784_v6 = vmul.f32 0.5, %v1752_v40  ;;  %v1753_v49 = vadd.f32 1.0, %v7232_v5  ;;  %v1658_v58 = vadd.f32 %v1626_v31, %v8474_v35  ;;  %v1627_v54 = vmul.f32 0.044715, %v1595_v4  ;;  %6740 = vmatpush3.bf16.msra.mxu0 %v7111_v57 }
 0x1c0   : > { %v1692_v41 = vmul.f32 0.7978846, %v1660_v18  ;;  %v1661_v48 = vadd.f32 %v1629_v36, %v8479_v25  ;;  %v1751_v59 = vadd.f32 1.0, %v7234_v60  ;;  %v1782_v32 = vmul.f32 0.5, %v1750_v12 }
 0x1c1   : > { %v1785_v24 = vmul.f32 0.5, %v1753_v49  ;;  %v1690_v8 = vmul.f32 0.7978846, %v1658_v58  ;;  %v1659_v22 = vadd.f32 %v1627_v54, %v8484_v11  ;;  %v1816_v38 = vmul.f32 %v1784_v6, %v8437_v51  ;;  %v7112_v51 = vld [vmem:[%s11117_s7 + $0x28] sm:$0xff]  }
 0x1c2   : > { %7235 = vtanh.f32 %v1692_v41  ;;  %v1693_v9 = vmul.f32 0.7978846, %v1661_v48  ;;  %v1783_v30 = vmul.f32 0.5, %v1751_v59  ;;  %v1814_v50 = vmul.f32 %v1782_v32, %v8440_v56  ;;  %6741 = vmatprep.subr.bf16.mxu0 %v7112_v51 }
 0x1c3   : > { %v1817_v19 = vmul.f32 %v1785_v24, %v8445_v42  ;;  %7237 = vtanh.f32 %v1690_v8  ;;  %v1691_v52 = vmul.f32 0.7978846, %v1659_v22  ;;  %6742 = vmatpush3.bf16.msra.mxu0 %v7112_v51 }
 0x1c4   : > { %7239 = vtanh.f32 %v1693_v9  ;;  %v1815_v40 = vmul.f32 %v1783_v30, %v8450_v33 }
 0x1c5   : > { %v1847_v15 = vpack.c.bf16 %v1817_v19, %v1816_v38  ;;  %7241 = vtanh.f32 %v1691_v52  ;;  %v6661_v31 = vpop.f32.mrb[8].mxu0 }
 0x1c6   : > { %v8512_v4 = vadd.f32 %v6661_v31, %v8434_v1  ;;  %v1463_v5 = vpop.f32.mrb[9].mxu0  ;;  %v1846_v18 = vpack.c.bf16 %v1815_v40, %v1814_v50 }
 0x1c7   : > { %v8518_v42 = vadd.f32 %v8434_v1, %v1463_v5  ;;  %v6662_v56 = vpop.f32.mrb[10].mxu0 }
 0x1c8   : > { %v1568_v33 = vmul.f32 %v8512_v4, %v8512_v4  ;;  %v8523_v36 = vadd.f32 %v6662_v56, %v8434_v1  ;;  %v1466_v12 = vpop.f32.mrb[11].mxu0  ;;  %6699 = vmatprep.mubr.bf16.mxu1 %v1846_v18 }
 0x1c9   : > { %v1566_v43 = vmul.f32 %v8518_v42, %v8518_v42  ;;  %v8528_v60 = vadd.f32 %v8434_v1, %v1466_v12  ;;  %6700 = vmatmul.mubr.bf16.vlgmr.msra.gmra.mrb[16].mxu1 %v1847_v15 }
 0x1ca   : > { %v1600_v6 = vmul.f32 %v1568_v33, %v8512_v4  ;;  %v1569_v49 = vmul.f32 %v8523_v36, %v8523_v36 }
 0x1cb   : > { %v1598_v58 = vmul.f32 %v1566_v43, %v8518_v42  ;;  %v1567_v54 = vmul.f32 %v8528_v60, %v8528_v60 }
 0x1cc   : > { %v7236_v41 = vpop.eup %7235  ;;  %v1632_v48 = vmul.f32 0.044715, %v1600_v6  ;;  %v1601_v59 = vmul.f32 %v1569_v49, %v8523_v36 }
 0x1cd   : > { %v7238_v32 = vpop.eup %7237  ;;  %v1630_v24 = vmul.f32 0.044715, %v1598_v58  ;;  %v1599_v8 = vmul.f32 %v1567_v54, %v8528_v60  ;;  %v1756_v22 = vadd.f32 1.0, %v7236_v41 }
 0x1ce   : > { %v7240_v9 = vpop.eup %7239  ;;  %v1664_v30 = vadd.f32 %v1632_v48, %v8512_v4  ;;  %v1633_v57 = vmul.f32 0.044715, %v1601_v59  ;;  %v1754_v38 = vadd.f32 1.0, %v7238_v32 }
 0x1cf   : > { %v7242_v19 = vpop.eup %7241  ;;  %v1662_v52 = vadd.f32 %v1630_v24, %v8518_v42  ;;  %v1631_v50 = vmul.f32 0.044715, %v1599_v8  ;;  %v1757_v40 = vadd.f32 1.0, %v7240_v9  ;;  %v1788_v15 = vmul.f32 0.5, %v1756_v22 }
 0x1d0   : > { %v1696_v31 = vmul.f32 0.7978846, %v1664_v30  ;;  %v1665_v5 = vadd.f32 %v1633_v57, %v8523_v36  ;;  %v1755_v18 = vadd.f32 1.0, %v7242_v19  ;;  %v1786_v56 = vmul.f32 0.5, %v1754_v38 }
 0x1d1   : > { %v1694_v33 = vmul.f32 0.7978846, %v1662_v52  ;;  %v1663_v12 = vadd.f32 %v1631_v50, %v8528_v60  ;;  %v1789_v51 = vmul.f32 0.5, %v1757_v40  ;;  %v1820_v58 = vmul.f32 %v1788_v15, %v8465_v7 }
 0x1d2   : > { %7243 = vtanh.f32 %v1696_v31  ;;  %v1697_v43 = vmul.f32 0.7978846, %v1665_v5  ;;  %v1787_v6 = vmul.f32 0.5, %v1755_v18  ;;  %v1818_v41 = vmul.f32 %v1786_v56, %v8474_v35 }
 0x1d3   : > { %7245 = vtanh.f32 %v1694_v33  ;;  %v1695_v49 = vmul.f32 0.7978846, %v1663_v12  ;;  %v1821_v54 = vmul.f32 %v1789_v51, %v8479_v25 }
 0x1d4   : > { %7247 = vtanh.f32 %v1697_v43  ;;  %v1819_v48 = vmul.f32 %v1787_v6, %v8484_v11 }
 0x1d5   : > { %7249 = vtanh.f32 %v1695_v49  ;;  %v6665_v59 = vpop.f32.mrb[12].mxu0  ;;  %v1849_v32 = vpack.c.bf16 %v1821_v54, %v1820_v58 }
 0x1d6   : > { %v8547_v24 = vadd.f32 %v6665_v59, %v8434_v1  ;;  %v1479_v8 = vpop.f32.mrb[13].mxu0  ;;  %v1848_v22 = vpack.c.bf16 %v1819_v48, %v1818_v41 }
 0x1d7   : > { %v8550_v9 = vadd.f32 %v8434_v1, %v1479_v8  ;;  %v6666_v30 = vpop.f32.mrb[14].mxu0 }
 0x1d8   : > { %v1572_v7 = vmul.f32 %v8547_v24, %v8547_v24  ;;  %v8555_v25 = vadd.f32 %v6666_v30, %v8434_v1  ;;  %v1482_v35 = vpop.f32.mrb[15].mxu0  ;;  %6703 = vmatprep.mubr.bf16.mxu1 %v1848_v22 }
 0x1d9   : > { %v1570_v11 = vmul.f32 %v8550_v9, %v8550_v9  ;;  %v8560_v57 = vadd.f32 %v8434_v1, %v1482_v35  ;;  %6704 = vmatmul.mubr.bf16.gmra.mrb[20].mxu1 %v1849_v32 }
 0x1da   : > { %v1604_v38 = vmul.f32 %v1572_v7, %v8547_v24  ;;  %v1573_v19 = vmul.f32 %v8555_v25, %v8555_v25 }
 0x1db   : > { %v1602_v52 = vmul.f32 %v1570_v11, %v8550_v9  ;;  %v1571_v50 = vmul.f32 %v8560_v57, %v8560_v57 }
 0x1dc   : > { %v7244_v40 = vpop.eup %7243  ;;  %v1636_v15 = vmul.f32 0.044715, %v1604_v38  ;;  %v1605_v31 = vmul.f32 %v1573_v19, %v8555_v25 }
 0x1dd   : > { %v7246_v5 = vpop.eup %7245  ;;  %v1634_v18 = vmul.f32 0.044715, %v1602_v52  ;;  %v1603_v56 = vmul.f32 %v1571_v50, %v8560_v57  ;;  %v1760_v33 = vadd.f32 1.0, %v7244_v40 }
 0x1de   : > { %v7248_v12 = vpop.eup %7247  ;;  %v1668_v51 = vadd.f32 %v1636_v15, %v8547_v24  ;;  %v1637_v43 = vmul.f32 0.044715, %v1605_v31  ;;  %v1758_v6 = vadd.f32 1.0, %v7246_v5 }
 0x1df   : > { %v7250_v49 = vpop.eup %7249  ;;  %v1666_v58 = vadd.f32 %v1634_v18, %v8550_v9  ;;  %v1635_v54 = vmul.f32 0.044715, %v1603_v56  ;;  %v1761_v41 = vadd.f32 1.0, %v7248_v12  ;;  %v1792_v48 = vmul.f32 0.5, %v1760_v33 }
 0x1e0   : > { %v1700_v59 = vmul.f32 0.7978846, %v1668_v51  ;;  %v1669_v32 = vadd.f32 %v1637_v43, %v8555_v25  ;;  %v1759_v8 = vadd.f32 1.0, %v7250_v49  ;;  %v1790_v22 = vmul.f32 0.5, %v1758_v6 }
 0x1e1   : > { %v1698_v30 = vmul.f32 0.7978846, %v1666_v58  ;;  %v1667_v7 = vadd.f32 %v1635_v54, %v8560_v57  ;;  %v1793_v35 = vmul.f32 0.5, %v1761_v41  ;;  %v1824_v52 = vmul.f32 %v1792_v48, %v8512_v4 }
 0x1e2   : > { %7251 = vtanh.f32 %v1700_v59  ;;  %v1701_v11 = vmul.f32 0.7978846, %v1669_v32  ;;  %v1791_v38 = vmul.f32 0.5, %v1759_v8  ;;  %v1822_v40 = vmul.f32 %v1790_v22, %v8518_v42 }
 0x1e3   : > { %7253 = vtanh.f32 %v1698_v30  ;;  %v1699_v19 = vmul.f32 0.7978846, %v1667_v7  ;;  %v1825_v50 = vmul.f32 %v1793_v35, %v8523_v36 }
 0x1e4   : > { %7255 = vtanh.f32 %v1701_v11  ;;  %v1823_v15 = vmul.f32 %v1791_v38, %v8528_v60 }
 0x1e5   : > { %7257 = vtanh.f32 %v1699_v19  ;;  %v6669_v31 = vpop.f32.mrb[0].mxu1  ;;  %v1851_v5 = vpack.c.bf16 %v1825_v50, %v1824_v52 }
 0x1e6   : > { %v8579_v18 = vadd.f32 %v6669_v31, %v8434_v1  ;;  %v1495_v56 = vpop.f32.mrb[1].mxu1  ;;  %v1850_v33 = vpack.c.bf16 %v1823_v15, %v1822_v40 }
 0x1e7   : > { %v8582_v12 = vadd.f32 %v8434_v1, %v1495_v56  ;;  %v6670_v51 = vpop.f32.mrb[2].mxu1 }
 0x1e8   : > { %v1576_v4 = vmul.f32 %v8579_v18, %v8579_v18  ;;  %v8587_v36 = vadd.f32 %v6670_v51, %v8434_v1  ;;  %v1498_v42 = vpop.f32.mrb[3].mxu1  ;;  %6707 = vmatprep.mubr.bf16.mxu1 %v1850_v33 }
 0x1e9   : > { %v1574_v60 = vmul.f32 %v8582_v12, %v8582_v12  ;;  %v8592_v43 = vadd.f32 %v8434_v1, %v1498_v42  ;;  %6708 = vmatmul.mubr.bf16.gmra.mrb[24].mxu1 %v1851_v5 }
 0x1ea   : > { %v1608_v6 = vmul.f32 %v1576_v4, %v8579_v18  ;;  %v1577_v49 = vmul.f32 %v8587_v36, %v8587_v36 }
 0x1eb   : > { %v1606_v58 = vmul.f32 %v1574_v60, %v8582_v12  ;;  %v1575_v54 = vmul.f32 %v8592_v43, %v8592_v43 }
 0x1ec   : > { %v7252_v41 = vpop.eup %7251  ;;  %v1640_v48 = vmul.f32 0.044715, %v1608_v6  ;;  %v1609_v59 = vmul.f32 %v1577_v49, %v8587_v36 }
 0x1ed   : > { %v7254_v32 = vpop.eup %7253  ;;  %v1638_v8 = vmul.f32 0.044715, %v1606_v58  ;;  %v1607_v22 = vmul.f32 %v1575_v54, %v8592_v43  ;;  %v1764_v30 = vadd.f32 1.0, %v7252_v41 }
 0x1ee   : > { %v7256_v7 = vpop.eup %7255  ;;  %v1672_v35 = vadd.f32 %v1640_v48, %v8579_v18  ;;  %v1641_v11 = vmul.f32 0.044715, %v1609_v59  ;;  %v1762_v38 = vadd.f32 1.0, %v7254_v32 }
 0x1ef   : > { %v7258_v19 = vpop.eup %7257  ;;  %v1670_v52 = vadd.f32 %v1638_v8, %v8582_v12  ;;  %v1639_v50 = vmul.f32 0.044715, %v1607_v22  ;;  %v1765_v40 = vadd.f32 1.0, %v7256_v7  ;;  %v1796_v15 = vmul.f32 0.5, %v1764_v30 }
 0x1f0   : > { %v1704_v31 = vmul.f32 0.7978846, %v1672_v35  ;;  %v1673_v5 = vadd.f32 %v1641_v11, %v8587_v36  ;;  %v1763_v56 = vadd.f32 1.0, %v7258_v19  ;;  %v1794_v33 = vmul.f32 0.5, %v1762_v38 }
 0x1f1   : > { %v1702_v51 = vmul.f32 0.7978846, %v1670_v52  ;;  %v1671_v4 = vadd.f32 %v1639_v50, %v8592_v43  ;;  %v1797_v42 = vmul.f32 0.5, %v1765_v40  ;;  %v1828_v58 = vmul.f32 %v1796_v15, %v8547_v24 }
 0x1f2   : > { %7259 = vtanh.f32 %v1704_v31  ;;  %v1705_v60 = vmul.f32 0.7978846, %v1673_v5  ;;  %v1795_v6 = vmul.f32 0.5, %v1763_v56  ;;  %v1826_v41 = vmul.f32 %v1794_v33, %v8550_v9 }
 0x1f3   : > { %7261 = vtanh.f32 %v1702_v51  ;;  %v1703_v49 = vmul.f32 0.7978846, %v1671_v4  ;;  %v1829_v54 = vmul.f32 %v1797_v42, %v8555_v25 }
 0x1f4   : > { %7263 = vtanh.f32 %v1705_v60  ;;  %v1827_v48 = vmul.f32 %v1795_v6, %v8560_v57 }
 0x1f5   : > { %7265 = vtanh.f32 %v1703_v49  ;;  %v6673_v59 = vpop.f32.mrb[4].mxu1  ;;  %v1853_v32 = vpack.c.bf16 %v1829_v54, %v1828_v58 }
 0x1f6   : > { %v8611_v8 = vadd.f32 %v6673_v59, %v8434_v1  ;;  %v1511_v22 = vpop.f32.mrb[5].mxu1  ;;  %v1852_v30 = vpack.c.bf16 %v1827_v48, %v1826_v41 }
 0x1f7   : > { %v8614_v7 = vadd.f32 %v8434_v1, %v1511_v22  ;;  %v6674_v35 = vpop.f32.mrb[6].mxu1 }
 0x1f8   : > { %v1580_v24 = vmul.f32 %v8611_v8, %v8611_v8  ;;  %v8619_v25 = vadd.f32 %v6674_v35, %v8434_v1  ;;  %v1514_v9 = vpop.f32.mrb[7].mxu1  ;;  %6711 = vmatprep.mubr.bf16.mxu1 %v1852_v30 }
 0x1f9   : > { %v1578_v57 = vmul.f32 %v8614_v7, %v8614_v7  ;;  %v8624_v11 = vadd.f32 %v8434_v1, %v1514_v9  ;;  %6712 = vmatmul.mubr.bf16.gmra.mrb[28].mxu1 %v1853_v32 }
 0x1fa   : > { %v1612_v38 = vmul.f32 %v1580_v24, %v8611_v8  ;;  %v1581_v19 = vmul.f32 %v8619_v25, %v8619_v25 }
 0x1fb   : > { %v1610_v52 = vmul.f32 %v1578_v57, %v8614_v7  ;;  %v1579_v50 = vmul.f32 %v8624_v11, %v8624_v11 }
 0x1fc   : > { %v7260_v40 = vpop.eup %7259  ;;  %v1644_v15 = vmul.f32 0.044715, %v1612_v38  ;;  %v1613_v31 = vmul.f32 %v1581_v19, %v8619_v25 }
 0x1fd   : > { %v7262_v5 = vpop.eup %7261  ;;  %v1642_v56 = vmul.f32 0.044715, %v1610_v52  ;;  %v1611_v33 = vmul.f32 %v1579_v50, %v8624_v11  ;;  %v1768_v51 = vadd.f32 1.0, %v7260_v40 }
 0x1fe   : > { %v7264_v4 = vpop.eup %7263  ;;  %v1676_v42 = vadd.f32 %v1644_v15, %v8611_v8  ;;  %v1645_v60 = vmul.f32 0.044715, %v1613_v31  ;;  %v1766_v6 = vadd.f32 1.0, %v7262_v5 }
 0x1ff   : > { %v7266_v49 = vpop.eup %7265  ;;  %v1674_v58 = vadd.f32 %v1642_v56, %v8614_v7  ;;  %v1643_v54 = vmul.f32 0.044715, %v1611_v33  ;;  %v1769_v41 = vadd.f32 1.0, %v7264_v4  ;;  %v1800_v48 = vmul.f32 0.5, %v1768_v51 }
 0x200   : > { %v1708_v59 = vmul.f32 0.7978846, %v1676_v42  ;;  %v1677_v32 = vadd.f32 %v1645_v60, %v8619_v25  ;;  %v1767_v22 = vadd.f32 1.0, %v7266_v49  ;;  %v1798_v30 = vmul.f32 0.5, %v1766_v6 }
 0x201   : > { %v1706_v35 = vmul.f32 0.7978846, %v1674_v58  ;;  %v1675_v24 = vadd.f32 %v1643_v54, %v8624_v11  ;;  %v1801_v9 = vmul.f32 0.5, %v1769_v41  ;;  %v1832_v52 = vmul.f32 %v1800_v48, %v8579_v18 }
 0x202   : > { %7267 = vtanh.f32 %v1708_v59  ;;  %v1709_v57 = vmul.f32 0.7978846, %v1677_v32  ;;  %v1799_v19 = vmul.f32 0.5, %v1767_v22  ;;  %v1830_v33 = vmul.f32 %v1798_v30, %v8582_v12 }
 0x203   : > { %7269 = vtanh.f32 %v1706_v35  ;;  %v1707_v50 = vmul.f32 0.7978846, %v1675_v24  ;;  %v1833_v31 = vmul.f32 %v1801_v9, %v8587_v36 }
 0x204   : > { %7271 = vtanh.f32 %v1709_v57  ;;  %v1831_v51 = vmul.f32 %v1799_v19, %v8592_v43 }
 0x205   : > { %v6677_v38 = vpop.f32.mrb[8].mxu1  ;;  %7273 = vtanh.f32 %v1707_v50  ;;  %v1855_v60 = vpack.c.bf16 %v1833_v31, %v1832_v52 }
 0x206   : > { %v8640_v40 = vadd.f32 %v6677_v38, %v8434_v1  ;;  %v1527_v15 = vpop.f32.mrb[9].mxu1  ;;  %v1854_v49 = vpack.c.bf16 %v1831_v51, %v1830_v33 }
 0x207   : > { %v8644_v5 = vadd.f32 %v8434_v1, %v1527_v15  ;;  %v6678_v56 = vpop.f32.mrb[10].mxu1 }
 0x208   : > { %v1584_v18 = vmul.f32 %v8640_v40, %v8640_v40  ;;  %v8651_v4 = vadd.f32 %v6678_v56, %v8434_v1  ;;  %v1530_v42 = vpop.f32.mrb[11].mxu1  ;;  %6715 = vmatprep.mubr.bf16.mxu1 %v1854_v49 }
 0x209   : > { %v1582_v36 = vmul.f32 %v8644_v5, %v8644_v5  ;;  %v8656_v6 = vadd.f32 %v8434_v1, %v1530_v42  ;;  %6716 = vmatmul.mubr.bf16.gmra.mrb[32].mxu1 %v1855_v60 }
 0x20a   : > { %v1616_v12 = vmul.f32 %v1584_v18, %v8640_v40  ;;  %v1585_v43 = vmul.f32 %v8651_v4, %v8651_v4 }
 0x20b   : > { %v1614_v58 = vmul.f32 %v1582_v36, %v8644_v5  ;;  %v1583_v54 = vmul.f32 %v8656_v6, %v8656_v6 }
 0x20c   : > { %v1648_v41 = vmul.f32 0.044715, %v1616_v12  ;;  %v1617_v48 = vmul.f32 %v1585_v43, %v8651_v4  ;;  %v7268_v35 = vpop.eup %7267 }
 0x20d   : > { %v1646_v59 = vmul.f32 0.044715, %v1614_v58  ;;  %v1615_v32 = vmul.f32 %v1583_v54, %v8656_v6  ;;  %v7270_v57 = vpop.eup %7269  ;;  %v1772_v52 = vadd.f32 1.0, %v7268_v35 }
 0x20e   : > { %v1680_v22 = vadd.f32 %v1648_v41, %v8640_v40  ;;  %v1649_v30 = vmul.f32 0.044715, %v1617_v48  ;;  %v7272_v50 = vpop.eup %7271  ;;  %v1770_v56 = vadd.f32 1.0, %v7270_v57 }
 0x20f   : > { %v1678_v24 = vadd.f32 %v1646_v59, %v8644_v5  ;;  %v1647_v9 = vmul.f32 0.044715, %v1615_v32  ;;  %v7274_v33 = vpop.eup %7273  ;;  %v1773_v18 = vadd.f32 1.0, %v7272_v50  ;;  %v1804_v42 = vmul.f32 0.5, %v1772_v52 }
 0x210   : > { %v1712_v38 = vmul.f32 0.7978846, %v1680_v22  ;;  %v1681_v19 = vadd.f32 %v1649_v30, %v8651_v4  ;;  %v1771_v36 = vadd.f32 1.0, %v7274_v33  ;;  %v1802_v49 = vmul.f32 0.5, %v1770_v56 }
 0x211   : > { %v1710_v15 = vmul.f32 0.7978846, %v1678_v24  ;;  %v1679_v31 = vadd.f32 %v1647_v9, %v8656_v6  ;;  %v1805_v12 = vmul.f32 0.5, %v1773_v18  ;;  %v1836_v48 = vmul.f32 %v1804_v42, %v8611_v8 }
 0x212   : > { %7275 = vtanh.f32 %v1712_v38  ;;  %v1713_v51 = vmul.f32 0.7978846, %v1681_v19  ;;  %v1803_v58 = vmul.f32 0.5, %v1771_v36  ;;  %v1834_v30 = vmul.f32 %v1802_v49, %v8614_v7 }
 0x213   : > { %7277 = vtanh.f32 %v1710_v15  ;;  %v1711_v60 = vmul.f32 0.7978846, %v1679_v31  ;;  %v1837_v59 = vmul.f32 %v1805_v12, %v8619_v25 }
 0x214   : > { %7279 = vtanh.f32 %v1713_v51  ;;  %v1835_v35 = vmul.f32 %v1803_v58, %v8624_v11 }
 0x215   : > { %7281 = vtanh.f32 %v1711_v60  ;;  %v6681_v43 = vpop.f32.mrb[12].mxu1  ;;  %v1857_v38 = vpack.c.bf16 %v1837_v59, %v1836_v48 }
 0x216   : > { %v8671_v54 = vadd.f32 %v6681_v43, %v8434_v1  ;;  %v1543_v41 = vpop.f32.mrb[13].mxu1  ;;  %v1856_v19 = vpack.c.bf16 %v1835_v35, %v1834_v30 }
 0x217   : > { %v8676_v32 = vadd.f32 %v8434_v1, %v1543_v41  ;;  %v6682_v22 = vpop.f32.mrb[14].mxu1 }
 0x218   : > { %v1588_v24 = vmul.f32 %v8671_v54, %v8671_v54  ;;  %v8683_v9 = vadd.f32 %v6682_v22, %v8434_v1  ;;  %v1546_v57 = vpop.f32.mrb[15].mxu1  ;;  %6719 = vmatprep.mubr.bf16.mxu1 %v1856_v19 }
 0x219   : > { %v1586_v8 = vmul.f32 %v8676_v32, %v8676_v32  ;;  %v8688_v25 = vadd.f32 %v8434_v1, %v1546_v57  ;;  %6720 = vmatmul.mubr.bf16.gmra.mrb[36].mxu1 %v1857_v38 }
 0x21a   : > { %v1620_v52 = vmul.f32 %v1588_v24, %v8671_v54  ;;  %v1589_v7 = vmul.f32 %v8683_v9, %v8683_v9  ;;  %v7113_v24 = vld [vmem:[%s11117_s7 + $0x30] sm:$0xff]  }
 0x21b   : > { %v1618_v11 = vmul.f32 %v1586_v8, %v8676_v32  ;;  %v1587_v50 = vmul.f32 %v8688_v25, %v8688_v25  ;;  %6743 = vmatprep.subr.bf16.mxu0 %v7113_v24 }
 0x21c   : > { %v7276_v15 = vpop.eup %7275  ;;  %v1652_v31 = vmul.f32 0.044715, %v1620_v52  ;;  %v1621_v56 = vmul.f32 %v1589_v7, %v8683_v9  ;;  %6744 = vmatpush3.bf16.msra.mxu0 %v7113_v24 }
 0x21d   : > { %v7278_v33 = vpop.eup %7277  ;;  %v1650_v1 = vmul.f32 0.044715, %v1618_v11  ;;  %v1619_v51 = vmul.f32 %v1587_v50, %v8688_v25  ;;  %v1776_v18 = vadd.f32 1.0, %v7276_v15 }
 0x21e   : > { %v7280_v42 = vpop.eup %7279  ;;  %v1684_v60 = vadd.f32 %v1652_v31, %v8671_v54  ;;  %v1653_v36 = vmul.f32 0.044715, %v1621_v56  ;;  %v1774_v49 = vadd.f32 1.0, %v7278_v33  ;;  %v7114_v56 = vld [vmem:[%s11117_s7 + $0x38] sm:$0xff]  }
 0x21f   : > { %v7282_v12 = vpop.eup %7281  ;;  %v1682_v43 = vadd.f32 %v1650_v1, %v8676_v32  ;;  %v1651_v58 = vmul.f32 0.044715, %v1619_v51  ;;  %v1777_v41 = vadd.f32 1.0, %v7280_v42  ;;  %v1808_v48 = vmul.f32 0.5, %v1776_v18  ;;  %6745 = vmatprep.subr.bf16.mxu0 %v7114_v56 }
 0x220   : > { %v1716_v59 = vmul.f32 0.7978846, %v1684_v60  ;;  %v1685_v22 = vadd.f32 %v1653_v36, %v8683_v9  ;;  %v1775_v30 = vadd.f32 1.0, %v7282_v12  ;;  %v1806_v35 = vmul.f32 0.5, %v1774_v49  ;;  %6746 = vmatpush3.bf16.msra.mxu0 %v7114_v56 }
 0x221   : > { %v1714_v57 = vmul.f32 0.7978846, %v1682_v43  ;;  %v1683_v38 = vadd.f32 %v1651_v58, %v8688_v25  ;;  %v1809_v8 = vmul.f32 0.5, %v1777_v41  ;;  %v1840_v11 = vmul.f32 %v1808_v48, %v8640_v40 }
 0x222   : > { %7283 = vtanh.f32 %v1716_v59  ;;  %v1717_v19 = vmul.f32 0.7978846, %v1685_v22  ;;  %v1807_v52 = vmul.f32 0.5, %v1775_v30  ;;  %v1838_v15 = vmul.f32 %v1806_v35, %v8644_v5  ;;  %v8719_v35 = vld [vmem:[%s11358_s4] ss:$0 sm:$0xff] }
 0x223   : > { %7285 = vtanh.f32 %v1714_v57  ;;  %v1715_v7 = vmul.f32 0.7978846, %v1683_v38  ;;  %v1841_v50 = vmul.f32 %v1809_v8, %v8651_v4 }
 0x224   : > { %7287 = vtanh.f32 %v1717_v19  ;;  %v1839_v31 = vmul.f32 %v1807_v52, %v8656_v6  ;;  %v8726_v19 = vld [vmem:[%s7736_s1 + $0x10] sm:$0xff] }
 0x225   : > { %7289 = vtanh.f32 %v1715_v7  ;;  %v1859_v33 = vpack.c.bf16 %v1841_v50, %v1840_v11  ;;  %v8730_v7 = vld [vmem:[%s7736_s1 + $0x18] sm:$0xff]  ;;  %v8734_v50 = vld [vmem:[%s7736_s1] sm:$0xff] }
 0x226   : > { %v1858_v1 = vpack.c.bf16 %v1839_v31, %v1838_v15  ;;  %v8738_v31 = vld [vmem:[%s7736_s1 + $0x8] sm:$0xff] }
 0x228   : > { %6723 = vmatprep.mubr.bf16.mxu1 %v1858_v1 }
 0x229   : > { %6724 = vmatmul.mubr.bf16.gmra.mrb[40].mxu1 %v1859_v33 }
 0x22c   : > { %v7284_v40 = vpop.eup %7283 }
 0x22d   : > { %v7286_v51 = vpop.eup %7285  ;;  %v1780_v4 = vadd.f32 1.0, %v7284_v40 }
 0x22e   : > { %v7288_v18 = vpop.eup %7287  ;;  %v1778_v42 = vadd.f32 1.0, %v7286_v51 }
 0x22f   : > { %v7290_v60 = vpop.eup %7289  ;;  %v1781_v5 = vadd.f32 1.0, %v7288_v18  ;;  %v1812_v36 = vmul.f32 0.5, %v1780_v4 }
 0x230   : > { %v1779_v6 = vadd.f32 1.0, %v7290_v60  ;;  %v1810_v49 = vmul.f32 0.5, %v1778_v42 }
 0x231   : > { %v1813_v12 = vmul.f32 0.5, %v1781_v5  ;;  %v1844_v58 = vmul.f32 %v1812_v36, %v8671_v54 }
 0x232   : > { %v1811_v43 = vmul.f32 0.5, %v1779_v6  ;;  %v1842_v48 = vmul.f32 %v1810_v49, %v8676_v32  ;;  %v8746_v6 = vld [vmem:[%s7736_s1 + $0x30] sm:$0xff] }
 0x233   : > { %v1845_v41 = vmul.f32 %v1813_v12, %v8683_v9  ;;  %v8750_v12 = vld [vmem:[%s7736_s1 + $0x38] sm:$0xff] }
 0x234   : > { %v1843_v59 = vmul.f32 %v1811_v43, %v8688_v25 }
 0x235   : > { %v1861_v22 = vpack.c.bf16 %v1845_v41, %v1844_v58  ;;  %v8754_v58 = vld [vmem:[%s7736_s1 + $0x20] sm:$0xff] }
 0x236   : > { %v1860_v30 = vpack.c.bf16 %v1843_v59, %v1842_v48  ;;  %v8758_v48 = vld [vmem:[%s7736_s1 + $0x28] sm:$0xff] }
 0x238   : > { %6727 = vmatprep.mubr.bf16.mxu1 %v1860_v30 }
 0x239   : > { %6728 = vmatmul.mubr.bf16.gmra.mrb[44].mxu1 %v1861_v22 }
 0x29c   : > { %v6701_v54 = vpop.f32.mrb[16].mxu1 }
 0x29d   : > { %v1976_v9 = vadd.f32 %v6701_v54, %v8719_v35  ;;  %v1967_v24 = vpop.f32.mrb[17].mxu1 }
 0x29e   : > { %v1968_v32 = vadd.f32 %v8719_v35, %v1967_v24  ;;  %v6702_v57 = vpop.f32.mrb[18].mxu1 }
 0x29f   : > { %v1979_v25 = vadd.f32 %v6702_v57, %v8719_v35  ;;  %v1970_v38 = vpop.f32.mrb[19].mxu1  ;;  %v2096_v52 = vadd.f32 %v8726_v19, %v1976_v9 }
 0x2a0   : > { %v1971_v8 = vadd.f32 %v8719_v35, %v1970_v38  ;;  %v2094_v15 = vadd.f32 %v8734_v50, %v1968_v32 }
 0x2a1   : > { %v2097_v11 = vadd.f32 %v8730_v7, %v1979_v25 }
 0x2a2   : > { %v2095_v56 = vadd.f32 %v8738_v31, %v1971_v8 }
 0x2a3   : > { %v2127_v33 = vpack.c.bf16 %v2097_v11, %v2096_v52  ;;  %v8766_v52 = vld [vmem:[%s7736_s1 + $0x50] sm:$0xff] }
 0x2a4   : > { %v2126_v1 = vpack.c.bf16 %v2095_v56, %v2094_v15  ;;  %v8770_v15 = vld [vmem:[%s7736_s1 + $0x58] sm:$0xff] }
 0x2a6   : > { %6747 = vmatprep.mubr.bf16.mxu0 %v2126_v1 }
 0x2a7   : > { %6748 = vmatmul.mubr.bf16.vlgmr.msra.gmra.mrb[16].mxu0 %v2127_v33  ;;  %v8774_v33 = vld [vmem:[%s7736_s1 + $0x40] sm:$0xff] }
 0x2ac   : > { %v6705_v40 = vpop.f32.mrb[20].mxu1 }
 0x2ad   : > { %v1992_v51 = vadd.f32 %v6705_v40, %v8719_v35  ;;  %v1983_v4 = vpop.f32.mrb[21].mxu1  ;;  %v8778_v40 = vld [vmem:[%s7736_s1 + $0x48] sm:$0xff] }
 0x2ae   : > { %v1984_v18 = vadd.f32 %v8719_v35, %v1983_v4  ;;  %v6706_v42 = vpop.f32.mrb[22].mxu1 }
 0x2af   : > { %v1995_v60 = vadd.f32 %v6706_v42, %v8719_v35  ;;  %v1986_v5 = vpop.f32.mrb[23].mxu1  ;;  %v2100_v49 = vadd.f32 %v8746_v6, %v1992_v51 }
 0x2b0   : > { %v1987_v36 = vadd.f32 %v8719_v35, %v1986_v5  ;;  %v2098_v41 = vadd.f32 %v8754_v58, %v1984_v18 }
 0x2b1   : > { %v2101_v43 = vadd.f32 %v8750_v12, %v1995_v60 }
 0x2b2   : > { %v2099_v59 = vadd.f32 %v8758_v48, %v1987_v36 }
 0x2b3   : > { %v2129_v22 = vpack.c.bf16 %v2101_v43, %v2100_v49 }
 0x2b4   : > { %v2128_v30 = vpack.c.bf16 %v2099_v59, %v2098_v41 }
 0x2b6   : > { %6751 = vmatprep.mubr.bf16.mxu0 %v2128_v30 }
 0x2b7   : > { %6752 = vmatmul.mubr.bf16.gmra.mrb[20].mxu0 %v2129_v22  ;;  %v7559_v22 = vld [vmem:[%s7736_s1 + $0x70] sm:$0xff] }
 0x2bc   : > { %v6709_v54 = vpop.f32.mrb[24].mxu1 }
 0x2bd   : > { %v2008_v9 = vadd.f32 %v6709_v54, %v8719_v35  ;;  %v1999_v24 = vpop.f32.mrb[25].mxu1  ;;  %v7560_v54 = vld [vmem:[%s7736_s1 + $0x78] sm:$0xff] }
 0x2be   : > { %v2000_v32 = vadd.f32 %v8719_v35, %v1999_v24  ;;  %v6710_v57 = vpop.f32.mrb[26].mxu1  ;;  %v7561_v24 = vld [vmem:[%s7736_s1 + $0x60] sm:$0xff] }
 0x2bf   : > { %v2011_v25 = vadd.f32 %v6710_v57, %v8719_v35  ;;  %v2002_v38 = vpop.f32.mrb[27].mxu1  ;;  %v2104_v11 = vadd.f32 %v8766_v52, %v2008_v9  ;;  %v7562_v57 = vld [vmem:[%s7736_s1 + $0x68] sm:$0xff] }
 0x2c0   : > { %v2003_v8 = vadd.f32 %v8719_v35, %v2002_v38  ;;  %v2102_v1 = vadd.f32 %v8774_v33, %v2000_v32 }
 0x2c1   : > { %v2105_v56 = vadd.f32 %v8770_v15, %v2011_v25 }
 0x2c2   : > { %v2103_v51 = vadd.f32 %v8778_v40, %v2003_v8 }
 0x2c3   : > { %v2131_v4 = vpack.c.bf16 %v2105_v56, %v2104_v11 }
 0x2c4   : > { %v2130_v18 = vpack.c.bf16 %v2103_v51, %v2102_v1 }
 0x2c6   : > { %6755 = vmatprep.mubr.bf16.mxu0 %v2130_v18 }
 0x2c7   : > { %6756 = vmatmul.mubr.bf16.gmra.mrb[24].mxu0 %v2131_v4 }
 0x2cc   : > { %v6713_v42 = vpop.f32.mrb[28].mxu1 }
 0x2cd   : > { %v2024_v60 = vadd.f32 %v6713_v42, %v8719_v35  ;;  %v2015_v5 = vpop.f32.mrb[29].mxu1 }
 0x2ce   : > { %v2016_v36 = vadd.f32 %v8719_v35, %v2015_v5  ;;  %v6714_v49 = vpop.f32.mrb[30].mxu1  ;;  %v7563_v5 = vld [vmem:[%s7736_s1 + $0x90] sm:$0xff] }
 0x2cf   : > { %v2027_v43 = vadd.f32 %v6714_v49, %v8719_v35  ;;  %v2018_v41 = vpop.f32.mrb[31].mxu1  ;;  %v2108_v30 = vadd.f32 %v7559_v22, %v2024_v60  ;;  %v7564_v49 = vld [vmem:[%s7736_s1 + $0x98] sm:$0xff]  ;;  %v7566_v22 = vld [vmem:[%s7736_s1 + $0x88] sm:$0xff] }
 0x2d0   : > { %v2019_v59 = vadd.f32 %v8719_v35, %v2018_v41  ;;  %v2106_v32 = vadd.f32 %v7561_v24, %v2016_v36  ;;  %v7565_v41 = vld [vmem:[%s7736_s1 + $0x80] sm:$0xff] }
 0x2d1   : > { %v2109_v9 = vadd.f32 %v7560_v54, %v2027_v43 }
 0x2d2   : > { %v2107_v25 = vadd.f32 %v7562_v57, %v2019_v59 }
 0x2d3   : > { %v2133_v38 = vpack.c.bf16 %v2109_v9, %v2108_v30 }
 0x2d4   : > { %v2132_v8 = vpack.c.bf16 %v2107_v25, %v2106_v32 }
 0x2d6   : > { %6759 = vmatprep.mubr.bf16.mxu0 %v2132_v8 }
 0x2d7   : > { %6760 = vmatmul.mubr.bf16.gmra.mrb[28].mxu0 %v2133_v38 }
 0x2dc   : > { %v6717_v11 = vpop.f32.mrb[32].mxu1 }
 0x2dd   : > { %v2040_v56 = vadd.f32 %v6717_v11, %v8719_v35  ;;  %v2031_v1 = vpop.f32.mrb[33].mxu1 }
 0x2de   : > { %v2032_v51 = vadd.f32 %v8719_v35, %v2031_v1  ;;  %v6718_v4 = vpop.f32.mrb[34].mxu1  ;;  %v7567_v1 = vld [vmem:[%s7736_s1 + $0xb0] sm:$0xff] }
 0x2df   : > { %v2043_v18 = vadd.f32 %v6718_v4, %v8719_v35  ;;  %v2034_v42 = vpop.f32.mrb[35].mxu1  ;;  %v2112_v36 = vadd.f32 %v7563_v5, %v2040_v56  ;;  %v7568_v4 = vld [vmem:[%s7736_s1 + $0xb8] sm:$0xff]  ;;  %v7570_v5 = vld [vmem:[%s7736_s1 + $0xa8] sm:$0xff] }
 0x2e0   : > { %v2035_v60 = vadd.f32 %v8719_v35, %v2034_v42  ;;  %v2110_v59 = vadd.f32 %v7565_v41, %v2032_v51  ;;  %v7569_v42 = vld [vmem:[%s7736_s1 + $0xa0] sm:$0xff] }
 0x2e1   : > { %v2113_v43 = vadd.f32 %v7564_v49, %v2043_v18 }
 0x2e2   : > { %v2111_v30 = vadd.f32 %v7566_v22, %v2035_v60 }
 0x2e3   : > { %v2135_v54 = vpack.c.bf16 %v2113_v43, %v2112_v36 }
 0x2e4   : > { %v2134_v9 = vpack.c.bf16 %v2111_v30, %v2110_v59 }
 0x2e6   : > { %6763 = vmatprep.mubr.bf16.mxu0 %v2134_v9 }
 0x2e7   : > { %6764 = vmatmul.mubr.bf16.gmra.mrb[32].mxu0 %v2135_v54 }
 0x2ec   : > { %v6721_v24 = vpop.f32.mrb[36].mxu1 }
 0x2ed   : > { %v2056_v32 = vadd.f32 %v6721_v24, %v8719_v35  ;;  %v2047_v57 = vpop.f32.mrb[37].mxu1 }
 0x2ee   : > { %v2048_v25 = vadd.f32 %v8719_v35, %v2047_v57  ;;  %v6722_v38 = vpop.f32.mrb[38].mxu1  ;;  %v7571_v57 = vld [vmem:[%s7736_s1 + $0xd0] sm:$0xff] }
 0x2ef   : > { %v2059_v8 = vadd.f32 %v6722_v38, %v8719_v35  ;;  %v2050_v11 = vpop.f32.mrb[39].mxu1  ;;  %v2116_v51 = vadd.f32 %v7567_v1, %v2056_v32  ;;  %v7572_v38 = vld [vmem:[%s7736_s1 + $0xd8] sm:$0xff]  ;;  %v7574_v1 = vld [vmem:[%s7736_s1 + $0xc8] sm:$0xff] }
 0x2f0   : > { %v2051_v56 = vadd.f32 %v8719_v35, %v2050_v11  ;;  %v2114_v60 = vadd.f32 %v7569_v42, %v2048_v25  ;;  %v7573_v11 = vld [vmem:[%s7736_s1 + $0xc0] sm:$0xff] }
 0x2f1   : > { %v2117_v18 = vadd.f32 %v7568_v4, %v2059_v8 }
 0x2f2   : > { %v2115_v36 = vadd.f32 %v7570_v5, %v2051_v56 }
 0x2f3   : > { %v2137_v49 = vpack.c.bf16 %v2117_v18, %v2116_v51 }
 0x2f4   : > { %v2136_v43 = vpack.c.bf16 %v2115_v36, %v2114_v60 }
 0x2f6   : > { %6767 = vmatprep.mubr.bf16.mxu0 %v2136_v43 }
 0x2f7   : > { %6768 = vmatmul.mubr.bf16.gmra.mrb[36].mxu0 %v2137_v49 }
 0x2fc   : > { %v6725_v41 = vpop.f32.mrb[40].mxu1 }
 0x2fd   : > { %v2072_v59 = vadd.f32 %v6725_v41, %v8719_v35  ;;  %v2063_v22 = vpop.f32.mrb[41].mxu1 }
 0x2fe   : > { %v2064_v30 = vadd.f32 %v8719_v35, %v2063_v22  ;;  %v6726_v54 = vpop.f32.mrb[42].mxu1  ;;  %v7575_v22 = vld [vmem:[%s7736_s1 + $0xf0] sm:$0xff] }
 0x2ff   : > { %v2075_v9 = vadd.f32 %v6726_v54, %v8719_v35  ;;  %v2066_v24 = vpop.f32.mrb[43].mxu1  ;;  %v2120_v25 = vadd.f32 %v7571_v57, %v2072_v59  ;;  %v7576_v54 = vld [vmem:[%s7736_s1 + $0xf8] sm:$0xff]  ;;  %v7578_v57 = vld [vmem:[%s7736_s1 + $0xe8] sm:$0xff] }
 0x300   : > { %v2067_v32 = vadd.f32 %v8719_v35, %v2066_v24  ;;  %v2118_v56 = vadd.f32 %v7573_v11, %v2064_v30  ;;  %v7577_v24 = vld [vmem:[%s7736_s1 + $0xe0] sm:$0xff] }
 0x301   : > { %v2121_v8 = vadd.f32 %v7572_v38, %v2075_v9  ;;  %v7115_v11 = vld [vmem:[%s11120_s10] sm:$0xff]  }
 0x302   : > { %v2119_v51 = vadd.f32 %v7574_v1, %v2067_v32  ;;  %6779 = vmatprep.subr.bf16.mxu1 %v7115_v11 }
 0x303   : > { %v2139_v4 = vpack.c.bf16 %v2121_v8, %v2120_v25  ;;  %6780 = vmatpush3.bf16.msra.mxu1 %v7115_v11 }
 0x304   : > { %v2138_v18 = vpack.c.bf16 %v2119_v51, %v2118_v56  ;;  %v7117_v56 = vld [vmem:[%s11120_s10 + $0x10] sm:$0xff]  }
 0x306   : > { %6771 = vmatprep.mubr.bf16.mxu0 %v2138_v18 }
 0x307   : > { %6772 = vmatmul.mubr.bf16.gmra.mrb[40].mxu0 %v2139_v4 }
 0x30c   : > { %v6729_v42 = vpop.f32.mrb[44].mxu1 }
 0x30d   : > { %v2088_v60 = vadd.f32 %v6729_v42, %v8719_v35  ;;  %v2079_v5 = vpop.f32.mrb[45].mxu1 }
 0x30e   : > { %v2080_v36 = vadd.f32 %v8719_v35, %v2079_v5  ;;  %v6730_v49 = vpop.f32.mrb[46].mxu1 }
 0x30f   : > { %v2091_v43 = vadd.f32 %v6730_v49, %v8719_v35  ;;  %v2082_v41 = vpop.f32.mrb[47].mxu1  ;;  %v2124_v30 = vadd.f32 %v7575_v22, %v2088_v60  ;;  %v7118_v22 = vld [vmem:[%s11120_s10 + $0x18] sm:$0xff]  }
 0x310   : > { %v2083_v59 = vadd.f32 %v8719_v35, %v2082_v41  ;;  %v2122_v32 = vadd.f32 %v7577_v24, %v2080_v36  ;;  %v7116_v35 = vld [vmem:[%s11120_s10 + $0x8] sm:$0xff]  }
 0x311   : > { %v2125_v9 = vadd.f32 %v7576_v54, %v2091_v43  ;;  %6781 = vmatprep.subr.bf16.mxu1 %v7116_v35 }
 0x312   : > { %v2123_v25 = vadd.f32 %v7578_v57, %v2083_v59  ;;  %6782 = vmatpush3.bf16.msra.mxu1 %v7116_v35  ;;  %v7120_v35 = vld [vmem:[%s11120_s10 + $0x28] sm:$0xff]  }
 0x313   : > { %v2141_v38 = vpack.c.bf16 %v2125_v9, %v2124_v30  ;;  %6783 = vmatprep.subr.bf16.mxu1 %v7117_v56 }
 0x314   : > { %v2140_v8 = vpack.c.bf16 %v2123_v25, %v2122_v32 }
 0x316   : > { %6775 = vmatprep.mubr.bf16.mxu0 %v2140_v8  ;;  %6784 = vmatpush3.bf16.msra.mxu1 %v7117_v56  ;;  %v7119_v8 = vld [vmem:[%s11120_s10 + $0x20] sm:$0xff]  }
 0x317   : > { %6776 = vmatmul.mubr.bf16.gmra.mrb[44].mxu0 %v2141_v38  ;;  %6785 = vmatprep.subr.bf16.mxu1 %v7118_v22 }
 0x31a   : > { %6786 = vmatpush3.bf16.msra.mxu1 %v7118_v22 }
 0x31b   : > { %6787 = vmatprep.subr.bf16.mxu1 %v7119_v8 }
 0x31e   : > { %6788 = vmatpush3.bf16.msra.mxu1 %v7119_v8 }
 0x31f   : > { %6789 = vmatprep.subr.bf16.mxu1 %v7120_v35 }
 0x322   : > { %6790 = vmatpush3.bf16.msra.mxu1 %v7120_v35 }
 0x37a   : > { %v8830_v1 = vpop.f32.mrb[16].mxu0 }
 0x37b   : > { %2435 = vadd.xlane.f32.xlu0 %v8830_v1  ;;  %v8833_v51 = vpop.f32.mrb[17].mxu0  ;;  %v2529_v42 = vmul.f32 %v8830_v1, %v8830_v1 }
 0x37c   : > { %v8835_v4 = vpop.f32.mrb[18].mxu0  ;;  %v2527_v5 = vmul.f32 %v8833_v51, %v8833_v51 }
 0x37d   : > { %2437 = vadd.xlane.f32.xlu1 %v8835_v4  ;;  %v8838_v18 = vpop.f32.mrb[19].mxu0  ;;  %v2530_v60 = vmul.f32 %v8835_v4, %v8835_v4 }
 0x37e   : > { %v2528_v36 = vmul.f32 %v8838_v18, %v8838_v18 }
 0x37f   : > { %2431 = vadd.xlane.f32.xlu0 %v8833_v51 }
 0x381   : > { %2433 = vadd.xlane.f32.xlu1 %v8838_v18 }
 0x383   : > { %2563 = vadd.xlane.f32.xlu0 %v2529_v42 }
 0x385   : > { %2565 = vadd.xlane.f32.xlu1 %v2530_v60 }
 0x387   : > { %2559 = vadd.xlane.f32.xlu0 %v2527_v5 }
 0x389   : > { %2561 = vadd.xlane.f32.xlu1 %v2528_v36 }
 0x38a   : > { %v8850_v49 = vpop.f32.mrb[20].mxu0 }
 0x38b   : > { %2443 = vadd.xlane.f32.xlu0 %v8850_v49  ;;  %v8853_v43 = vpop.f32.mrb[21].mxu0  ;;  %v2533_v30 = vmul.f32 %v8850_v49, %v8850_v49 }
 0x38c   : > { %v8855_v41 = vpop.f32.mrb[22].mxu0  ;;  %v2531_v9 = vmul.f32 %v8853_v43, %v8853_v43 }
 0x38d   : > { %2445 = vadd.xlane.f32.xlu1 %v8855_v41  ;;  %v8858_v59 = vpop.f32.mrb[23].mxu0  ;;  %v2534_v54 = vmul.f32 %v8855_v41, %v8855_v41 }
 0x38e   : > { %v2532_v24 = vmul.f32 %v8858_v59, %v8858_v59 }
 0x38f   : > { %2439 = vadd.xlane.f32.xlu0 %v8853_v43 }
 0x391   : > { %2441 = vadd.xlane.f32.xlu1 %v8858_v59 }
 0x393   : > { %2571 = vadd.xlane.f32.xlu0 %v2533_v30  ;;  %v7121_v30 = vld [vmem:[%s11120_s10 + $0x30] sm:$0xff]  }
 0x394   : > { %6791 = vmatprep.subr.bf16.mxu1 %v7121_v30 }
 0x395   : > { %2573 = vadd.xlane.f32.xlu1 %v2534_v54  ;;  %6792 = vmatpush3.bf16.msra.mxu1 %v7121_v30 }
 0x397   : > { %2567 = vadd.xlane.f32.xlu0 %v2531_v9  ;;  %v7122_v9 = vld [vmem:[%s11120_s10 + $0x38] sm:$0xff]  }
 0x398   : > { %6793 = vmatprep.subr.bf16.mxu1 %v7122_v9 }
 0x399   : > { %2569 = vadd.xlane.f32.xlu1 %v2532_v24  ;;  %6794 = vmatpush3.bf16.msra.mxu1 %v7122_v9 }
 0x39a   : > { %v8873_v32 = vpop.f32.mrb[24].mxu0 }
 0x39b   : > { %2451 = vadd.xlane.f32.xlu0 %v8873_v32  ;;  %v8876_v57 = vpop.f32.mrb[25].mxu0  ;;  %v2537_v11 = vmul.f32 %v8873_v32, %v8873_v32 }
 0x39c   : > { %v8878_v25 = vpop.f32.mrb[26].mxu0  ;;  %v2535_v42 = vmul.f32 %v8876_v57, %v8876_v57 }
 0x39d   : > { %2453 = vadd.xlane.f32.xlu1 %v8878_v25  ;;  %v8881_v38 = vpop.f32.mrb[27].mxu0  ;;  %v2538_v56 = vmul.f32 %v8878_v25, %v8878_v25 }
 0x39e   : > { %v2536_v60 = vmul.f32 %v8881_v38, %v8881_v38 }
 0x39f   : > { %2447 = vadd.xlane.f32.xlu0 %v8876_v57 }
 0x3a1   : > { %2449 = vadd.xlane.f32.xlu1 %v8881_v38 }
 0x3a3   : > { %2579 = vadd.xlane.f32.xlu0 %v2537_v11 }
 0x3a5   : > { %2581 = vadd.xlane.f32.xlu1 %v2538_v56 }
 0x3a7   : > { %2575 = vadd.xlane.f32.xlu0 %v2535_v42 }
 0x3a9   : > { %2577 = vadd.xlane.f32.xlu1 %v2536_v60 }
 0x3aa   : > { %v8899_v5 = vpop.f32.mrb[28].mxu0 }
 0x3ab   : > { %2459 = vadd.xlane.f32.xlu0 %v8899_v5  ;;  %v8902_v36 = vpop.f32.mrb[29].mxu0  ;;  %v2541_v24 = vmul.f32 %v8899_v5, %v8899_v5 }
 0x3ac   : > { %v8904_v22 = vpop.f32.mrb[30].mxu0  ;;  %v2539_v11 = vmul.f32 %v8902_v36, %v8902_v36 }
 0x3ad   : > { %11359 = vst [vmem:[#allocation51_spill] sm:$0xff] %v8904_v22  ;;  %2461 = vadd.xlane.f32.xlu1 %v8904_v22  ;;  %v8910_v54 = vpop.f32.mrb[31].mxu0  ;;  %v2542_v8 = vmul.f32 %v8904_v22, %v8904_v22 }
 0x3ae   : > { %11360 = vst [vmem:[#allocation52_spill] sm:$0xff] %v8910_v54  ;;  %v2540_v35 = vmul.f32 %v8910_v54, %v8910_v54 }
 0x3af   : > { %2455 = vadd.xlane.f32.xlu0 %v8902_v36 }
 0x3b1   : > { %2457 = vadd.xlane.f32.xlu1 %v8910_v54 }
 0x3b3   : > { %2587 = vadd.xlane.f32.xlu0 %v2541_v24 }
 0x3b5   : > { %2589 = vadd.xlane.f32.xlu1 %v2542_v8 }
 0x3b7   : > { %2583 = vadd.xlane.f32.xlu0 %v2539_v11 }
 0x3b9   : > { %2585 = vadd.xlane.f32.xlu1 %v2540_v35 }
 0x3ba   : > { %v8925_v56 = vpop.f32.mrb[32].mxu0 }
 0x3bb   : > { %11361 = vst [vmem:[#allocation53_spill] sm:$0xff] %v8925_v56  ;;  %2467 = vadd.xlane.f32.xlu0 %v8925_v56  ;;  %v8928_v42 = vpop.f32.mrb[33].mxu0  ;;  %v2545_v9 = vmul.f32 %v8925_v56, %v8925_v56 }
 0x3bc   : > { %11362 = vst [vmem:[#allocation54_spill] sm:$0xff] %v8928_v42  ;;  %v8930_v60 = vpop.f32.mrb[34].mxu0  ;;  %v2543_v8 = vmul.f32 %v8928_v42, %v8928_v42 }
 0x3bd   : > { %11363 = vst [vmem:[#allocation55_spill] sm:$0xff] %v8930_v60  ;;  %2469 = vadd.xlane.f32.xlu1 %v8930_v60  ;;  %v8933_v30 = vpop.f32.mrb[35].mxu0  ;;  %v2546_v24 = vmul.f32 %v8930_v60, %v8930_v60 }
 0x3be   : > { %11364 = vst [vmem:[#allocation56_spill] sm:$0xff] %v8933_v30  ;;  %v2544_v11 = vmul.f32 %v8933_v30, %v8933_v30 }
 0x3bf   : > { %2463 = vadd.xlane.f32.xlu0 %v8928_v42 }
 0x3c1   : > { %2465 = vadd.xlane.f32.xlu1 %v8933_v30 }
 0x3c3   : > { %2595 = vadd.xlane.f32.xlu0 %v2545_v9 }
 0x3c5   : > { %2597 = vadd.xlane.f32.xlu1 %v2546_v24 }
 0x3c7   : > { %2591 = vadd.xlane.f32.xlu0 %v2543_v8 }
 0x3c9   : > { %2593 = vadd.xlane.f32.xlu1 %v2544_v11 }
 0x3ca   : > { %v8945_v35 = vpop.f32.mrb[36].mxu0 }
 0x3cb   : > { %11365 = vst [vmem:[#allocation57_spill] sm:$0xff] %v8945_v35  ;;  %2475 = vadd.xlane.f32.xlu0 %v8945_v35  ;;  %v8948_v63 = vpop.f32.mrb[37].mxu0  ;;  %v2549_v24 = vmul.f32 %v8945_v35, %v8945_v35 }
 0x3cc   : > { %11366 = vst [vmem:[#allocation58_spill] sm:$0xff] %v8948_v63  ;;  %v8950_v3 = vpop.f32.mrb[38].mxu0  ;;  %v2547_v11 = vmul.f32 %v8948_v63, %v8948_v63 }
 0x3cd   : > { %11367 = vst [vmem:[#allocation59_spill] sm:$0xff] %v8950_v3  ;;  %2477 = vadd.xlane.f32.xlu1 %v8950_v3  ;;  %v8953_v9 = vpop.f32.mrb[39].mxu0  ;;  %v2550_v8 = vmul.f32 %v8950_v3, %v8950_v3 }
 0x3ce   : > { %11368 = vst [vmem:[#allocation60_spill] sm:$0xff] %v8953_v9  ;;  %v2548_v34 = vmul.f32 %v8953_v9, %v8953_v9 }
 0x3cf   : > { %2471 = vadd.xlane.f32.xlu0 %v8948_v63 }
 0x3d1   : > { %2473 = vadd.xlane.f32.xlu1 %v8953_v9 }
 0x3d3   : > { %2603 = vadd.xlane.f32.xlu0 %v2549_v24 }
 0x3d5   : > { %2605 = vadd.xlane.f32.xlu1 %v2550_v8 }
 0x3d7   : > { %2599 = vadd.xlane.f32.xlu0 %v2547_v11 }
 0x3d9   : > { %2601 = vadd.xlane.f32.xlu1 %v2548_v34 }
 0x3da   : > { %v8965_v21 = vpop.f32.mrb[40].mxu0 }
 0x3db   : > { %11369 = vst [vmem:[#allocation61_spill] sm:$0xff] %v8965_v21  ;;  %v8967_v37 = vpop.f32.mrb[41].mxu0  ;;  %2483 = vadd.xlane.f32.xlu0 %v8965_v21  ;;  %v2553_v24 = vmul.f32 %v8965_v21, %v8965_v21 }
 0x3dc   : > { %11370 = vst [vmem:[#allocation62_spill] sm:$0xff] %v8967_v37  ;;  %v8969_v35 = vpop.f32.mrb[42].mxu0  ;;  %v2551_v34 = vmul.f32 %v8967_v37, %v8967_v37 }
 0x3dd   : > { %11371 = vst [vmem:[#allocation63_spill] sm:$0xff] %v8969_v35  ;;  %v8971_v0 = vpop.f32.mrb[43].mxu0  ;;  %2485 = vadd.xlane.f32.xlu1 %v8969_v35  ;;  %v2554_v8 = vmul.f32 %v8969_v35, %v8969_v35 }
 0x3de   : > { %11372 = vst [vmem:[#allocation64_spill] sm:$0xff] %v8971_v0  ;;  %v2552_v11 = vmul.f32 %v8971_v0, %v8971_v0 }
 0x3df   : > { %2479 = vadd.xlane.f32.xlu0 %v8967_v37 }
 0x3e1   : > { %2481 = vadd.xlane.f32.xlu1 %v8971_v0 }
 0x3e3   : > { %2611 = vadd.xlane.f32.xlu0 %v2553_v24 }
 0x3e5   : > { %2613 = vadd.xlane.f32.xlu1 %v2554_v8 }
 0x3e7   : > { %2607 = vadd.xlane.f32.xlu0 %v2551_v34 }
 0x3e9   : > { %2609 = vadd.xlane.f32.xlu1 %v2552_v11 }
 0x3ea   : > { %v8985_v9 = vpop.f32.mrb[44].mxu0 }
 0x3eb   : > { %11373 = vst [vmem:[#allocation65_spill] sm:$0xff] %v8985_v9  ;;  %v8987_v3 = vpop.f32.mrb[45].mxu0  ;;  %2491 = vadd.xlane.f32.xlu0 %v8985_v9  ;;  %v2557_v34 = vmul.f32 %v8985_v9, %v8985_v9 }
 0x3ec   : > { %11374 = vst [vmem:[#allocation66_spill] sm:$0xff] %v8987_v3  ;;  %v8989_v21 = vpop.f32.mrb[46].mxu0  ;;  %v2555_v24 = vmul.f32 %v8987_v3, %v8987_v3 }
 0x3ed   : > { %11375 = vst [vmem:[#allocation67_spill] sm:$0xff] %v8989_v21  ;;  %v8991_v63 = vpop.f32.mrb[47].mxu0  ;;  %2493 = vadd.xlane.f32.xlu1 %v8989_v21  ;;  %v2558_v11 = vmul.f32 %v8989_v21, %v8989_v21 }
 0x3ee   : > { %11376 = vst [vmem:[#allocation68_spill] sm:$0xff] %v8991_v63  ;;  %v2556_v8 = vmul.f32 %v8991_v63, %v8991_v63 }
 0x3ef   : > { %2487 = vadd.xlane.f32.xlu0 %v8987_v3 }
 0x3f1   : > { %2489 = vadd.xlane.f32.xlu1 %v8991_v63 }
 0x3f3   : > { %2615 = vadd.xlane.f32.xlu0 %v2555_v24 }
 0x3f5   : > { %2617 = vadd.xlane.f32.xlu1 %v2556_v8 }
 0x3f7   : > { %2619 = vadd.xlane.f32.xlu0 %v2557_v34 }
 0x3f9   : > { %2621 = vadd.xlane.f32.xlu1 %v2558_v11 }
 0x408   : > { %v2436_v0 = vpop.xlane.xlu0 %2435 }
 0x409   : > { %v9006_v35 = vadd.f32 %v2436_v0, %v7954_v16  ;;  %v11381_v16 = vld [vmem:[#allocation6_spill] sm:$0xff] }
 0x40a   : > { %v2438_v37 = vpop.xlane.xlu1 %2437 }
 0x40b   : > { %11377 = vst [vmem:[#allocation69_spill] sm:$0xff] %v9006_v35  ;;  %v9009_v29 = vadd.f32 %v2438_v37, %v7958_v20  ;;  %v9015_v8 = vmul.f32 0.020833334, %v9006_v35  ;;  %v11383_v35 = vld [vmem:[#allocation5_spill] sm:$0xff] }
 0x40c   : > { %v2432_v3 = vpop.xlane.xlu0 %2431 }
 0x40d   : > { %11378 = vst [vmem:[#allocation70_spill] sm:$0xff] %v9009_v29  ;;  %v9012_v24 = vadd.f32 %v2432_v3, %v7956_v17  ;;  %v9021_v11 = vmul.f32 0.020833334, %v9009_v29  ;;  %v2753_v17 = vmul.f32 %v9015_v8, %v9015_v8  ;;  %v11385_v29 = vld [vmem:[#allocation4_spill] sm:$0xff] }
 0x40e   : > { %v2434_v63 = vpop.xlane.xlu1 %2433 }
 0x40f   : > { %11379 = vst [vmem:[#allocation71_spill] sm:$0xff] %v9012_v24  ;;  %v9018_v21 = vadd.f32 %v2434_v63, %v7960_v23  ;;  %v9027_v20 = vmul.f32 0.020833334, %v9012_v24 }
 0x410   : > { %v2564_v34 = vpop.xlane.xlu0 %2563 }
 0x411   : > { %11380 = vst [vmem:[#allocation72_spill] sm:$0xff] %v9018_v21  ;;  %v9024_v0 = vadd.f32 %v2564_v34, %v11381_v16  ;;  %v9036_v23 = vmul.f32 0.020833334, %v9018_v21  ;;  %v2754_v34 = vmul.f32 %v9021_v11, %v9021_v11  ;;  %v2751_v42 = vmul.f32 %v9027_v20, %v9027_v20  ;;  %v11387_v21 = vld [vmem:[#allocation3_spill] sm:$0xff] }
 0x412   : > { %v2566_v37 = vpop.xlane.xlu1 %2565 }
 0x413   : > { %11382 = vst [vmem:[#allocation6_spill] sm:$0xff] %v9024_v0  ;;  %v2721_v3 = vmul.f32 0.020833334, %v9024_v0  ;;  %v9033_v9 = vadd.f32 %v2566_v37, %v11383_v35  ;;  %v2752_v56 = vmul.f32 %v9036_v23, %v9036_v23 }
 0x414   : > { %v2560_v63 = vpop.xlane.xlu0 %2559 }
 0x415   : > { %11384 = vst [vmem:[#allocation5_spill] sm:$0xff] %v9033_v9  ;;  %v2785_v16 = vsub.f32 %v2721_v3, %v2753_v17  ;;  %v2722_v24 = vmul.f32 0.020833334, %v9033_v9  ;;  %v9042_v30 = vadd.f32 %v2560_v63, %v11385_v29 }
 0x416   : > { %v2562_v0 = vpop.xlane.xlu1 %2561 }
 0x417   : > { %11386 = vst [vmem:[#allocation4_spill] sm:$0xff] %v9042_v30  ;;  %v2817_v60 = vmax.f32 %v2785_v16, 0.0  ;;  %v2786_v35 = vsub.f32 %v2722_v24, %v2754_v34  ;;  %v2719_v37 = vmul.f32 0.020833334, %v9042_v30  ;;  %v9048_v10 = vadd.f32 %v2562_v0, %v11387_v21  ;;  %v11389_v24 = vld [vmem:[#allocation10_spill] sm:$0xff]  ;;  %v11391_v30 = vld [vmem:[#allocation9_spill] sm:$0xff] }
 0x418   : > { %v2444_v17 = vpop.xlane.xlu0 %2443 }
 0x419   : > { %11388 = vst [vmem:[#allocation3_spill] sm:$0xff] %v9048_v10  ;;  %v2881_v3 = vadd.f32 1e-05, %v2817_v60  ;;  %v2818_v9 = vmax.f32 %v2786_v35, 0.0  ;;  %v2783_v44 = vsub.f32 %v2719_v37, %v2751_v42  ;;  %v2720_v29 = vmul.f32 0.020833334, %v9048_v10 }
 0x41a   : > { %v2446_v63 = vpop.xlane.xlu1 %2445  ;;  %v9054_v34 = vadd.f32 %v2444_v17, %v11389_v24  ;;  %v11393_v35 = vld [vmem:[#allocation8_spill] sm:$0xff]  ;;  %v9082_v24 = vadd.f32 %v8726_v19, %v8830_v1 }
 0x41b   : > { %v2882_v13 = vadd.f32 1e-05, %v2818_v9  ;;  %v2815_v39 = vmax.f32 %v2783_v44, 0.0  ;;  %v2784_v54 = vsub.f32 %v2720_v29, %v2752_v56  ;;  %7291 = vrsqrt.f32 %v2881_v3  ;;  %v11399_v29 = vld [vmem:[#allocation13_spill] sm:$0xff] }
 0x41c   : > { %11390 = vst [vmem:[#allocation10_spill] sm:$0xff] %v9054_v34  ;;  %v2440_v16 = vpop.xlane.xlu0 %2439  ;;  %v9057_v22 = vadd.f32 %v2446_v63, %v11391_v30  ;;  %v9063_v44 = vmul.f32 0.020833334, %v9054_v34 }
 0x41d   : > { %7293 = vrsqrt.f32 %v2882_v13  ;;  %v2879_v21 = vadd.f32 1e-05, %v2815_v39  ;;  %v2816_v0 = vmax.f32 %v2784_v54, 0.0  ;;  %v9060_v37 = vadd.f32 %v2440_v16, %v11393_v35  ;;  %v11395_v13 = vld [vmem:[#allocation7_spill] sm:$0xff]  ;;  %v11397_v54 = vld [vmem:[#allocation14_spill] sm:$0xff]  ;;  %v7124_v35 = vld [vmem:[%s11122_s12 + $0x8] sm:$0xff]  }
 0x41e   : > { %11392 = vst [vmem:[#allocation9_spill] sm:$0xff] %v9057_v22  ;;  %v2442_v60 = vpop.xlane.xlu1 %2441  ;;  %v9066_v9 = vmul.f32 0.020833334, %v9057_v22  ;;  %v9086_v16 = vadd.f32 %v8730_v7, %v8835_v4  ;;  %v11402_v4 = vld [vmem:[#allocation12_spill] sm:$0xff]  ;;  %v11405_v22 = vld [vmem:[#allocation11_spill] sm:$0xff] }
 0x41f   : > { %7295 = vrsqrt.f32 %v2879_v21  ;;  %v2880_v42 = vadd.f32 1e-05, %v2816_v0  ;;  %11394 = vst [vmem:[#allocation8_spill] sm:$0xff] %v9060_v37  ;;  %v9069_v39 = vadd.f32 %v2442_v60, %v11395_v13  ;;  %v9075_v3 = vmul.f32 0.020833334, %v9060_v37 }
 0x420   : > { %v2572_v56 = vpop.xlane.xlu0 %2571  ;;  %11401 = vst [vmem:[#allocation73_spill] sm:$0xff] %v9086_v16  ;;  %v2757_v21 = vmul.f32 %v9063_v44, %v9063_v44  ;;  %v2758_v19 = vmul.f32 %v9066_v9, %v9066_v9 }
 0x421   : > { %7297 = vrsqrt.f32 %v2880_v42  ;;  %11396 = vst [vmem:[#allocation7_spill] sm:$0xff] %v9069_v39  ;;  %v9072_v30 = vadd.f32 %v2572_v56, %v11397_v54  ;;  %v7123_v42 = vld [vmem:[%s11122_s12] sm:$0xff]   ;;  %v9100_v7 = vmul.f32 0.020833334, %v9069_v39  ;;  %v9108_v54 = vadd.f32 %v8734_v50, %v8833_v51 }
 0x422   : > { %v2574_v17 = vpop.xlane.xlu1 %2573  ;;  %6827 = vmatprep.subr.bf16.mxu0 %v7123_v42 }
 0x423   : > { %11398 = vst [vmem:[#allocation14_spill] sm:$0xff] %v9072_v30  ;;  %v9078_v63 = vadd.f32 %v2574_v17, %v11399_v29  ;;  %v2725_v0 = vmul.f32 0.020833334, %v9072_v30  ;;  %11404 = vst [vmem:[#allocation74_spill] sm:$0xff] %v9108_v54  ;;  %v9112_v17 = vadd.f32 %v8738_v31, %v8838_v18  ;;  %v2850_v29 = vsub.f32 %v9086_v16, %v9021_v11 }
 0x424   : > { %v2568_v60 = vpop.xlane.xlu0 %2567  ;;  %6828 = vmatpush3.bf16.msra.mxu0 %v7123_v42  ;;  %v2849_v31 = vsub.f32 %v9082_v24, %v9015_v8  ;;  %v2847_v51 = vsub.f32 %v9108_v54, %v9027_v20 }
 0x425   : > { %11400 = vst [vmem:[#allocation13_spill] sm:$0xff] %v9078_v63  ;;  %v2726_v1 = vmul.f32 0.020833334, %v9078_v63  ;;  %v9104_v56 = vadd.f32 %v2568_v60, %v11402_v4  ;;  %v7292_v13 = vpop.eup %7291  ;;  %v2789_v30 = vsub.f32 %v2725_v0, %v2757_v21  ;;  %v2755_v60 = vmul.f32 %v9075_v3, %v9075_v3  ;;  %6829 = vmatprep.subr.bf16.mxu0 %v7124_v35  ;;  %v7125_v0 = vld [vmem:[%s11122_s12 + $0x10] sm:$0xff]  }
 0x426   : > { %v2570_v39 = vpop.xlane.xlu1 %2569  ;;  %v2848_v8 = vsub.f32 %v9112_v17, %v9036_v23 }
 0x427   : > { %11403 = vst [vmem:[#allocation12_spill] sm:$0xff] %v9104_v56  ;;  %v7294_v37 = vpop.eup %7293  ;;  %v2790_v4 = vsub.f32 %v2726_v1, %v2758_v19  ;;  %v2723_v63 = vmul.f32 0.020833334, %v9104_v56  ;;  %v9120_v50 = vadd.f32 %v2570_v39, %v11405_v22  ;;  %v2821_v18 = vmax.f32 %v2789_v30, 0.0 }
 0x428   : > { %v2452_v11 = vpop.xlane.xlu0 %2451  ;;  %v2946_v21 = vmul.f32 %v7294_v37, %v2850_v29  ;;  %v2756_v22 = vmul.f32 %v9100_v7, %v9100_v7  ;;  %v2945_v37 = vmul.f32 %v7292_v13, %v2849_v31  ;;  %6830 = vmatpush3.bf16.msra.mxu0 %v7124_v35  ;;  %v7126_v31 = vld [vmem:[%s11122_s12 + $0x18] sm:$0xff]  }
 0x429   : > { %v7296_v19 = vpop.eup %7295  ;;  %v2822_v39 = vmax.f32 %v2790_v4, 0.0  ;;  %v2787_v42 = vsub.f32 %v2723_v63, %v2755_v60  ;;  %v2724_v1 = vmul.f32 0.020833334, %v9120_v50  ;;  %v2885_v20 = vadd.f32 1e-05, %v2821_v18  ;;  %6831 = vmatprep.subr.bf16.mxu0 %v7125_v0 }
 0x42a   : > { %v2454_v30 = vpop.xlane.xlu1 %2453  ;;  %v2943_v56 = vmul.f32 %v7296_v19, %v2847_v51  ;;  %v9135_v16 = vadd.f32 %v2452_v11, %v8057_v26  ;;  %v9140_v63 = vld [vmem:[%s11118_s8] ss:$0 sm:$0xff]  ;;  %v11408_v11 = vld [vmem:[#allocation16_spill] sm:$0xff] }
 0x42b   : > { %v7298_v29 = vpop.eup %7297  ;;  %v2886_v34 = vadd.f32 1e-05, %v2822_v39  ;;  %v2819_v10 = vmax.f32 %v2787_v42, 0.0  ;;  %v2788_v54 = vsub.f32 %v2724_v1, %v2756_v22  ;;  %7299 = vrsqrt.f32 %v2885_v20 }
 0x42c   : > { %11406 = vst [vmem:[#allocation11_spill] sm:$0xff] %v9135_v16  ;;  %v2448_v60 = vpop.xlane.xlu0 %2447  ;;  %v2944_v23 = vmul.f32 %v7298_v29, %v2848_v8  ;;  %v2982_v4 = vmul.f32 %v9140_v63, %v2943_v56  ;;  %v2985_v13 = vmul.f32 %v9140_v63, %v2946_v21  ;;  %v9148_v18 = vadd.f32 %v2454_v30, %v8055_v55  ;;  %v11410_v55 = vld [vmem:[#allocation15_spill] sm:$0xff] }
 0x42d   : > { %7301 = vrsqrt.f32 %v2886_v34  ;;  %v2883_v26 = vadd.f32 1e-05, %v2819_v10  ;;  %v2820_v51 = vmax.f32 %v2788_v54, 0.0  ;;  %v9151_v35 = vadd.f32 %v2448_v60, %v11408_v11  ;;  %v9161_v10 = vld [vmem:[%s11119_s9] ss:$0 sm:$0xff]  ;;  %6832 = vmatpush3.bf16.msra.mxu0 %v7125_v0 }
 0x42e   : > { %11407 = vst [vmem:[#allocation75_spill] sm:$0xff] %v9148_v18  ;;  %v2450_v19 = vpop.xlane.xlu1 %2449  ;;  %v2983_v22 = vmul.f32 %v9140_v63, %v2944_v23  ;;  %v2984_v56 = vmul.f32 %v9140_v63, %v2945_v37  ;;  %v9156_v39 = vmul.f32 0.020833334, %v9135_v16  ;;  %v3021_v42 = vadd.f32 %v9161_v10, %v2982_v4  ;;  %6833 = vmatprep.subr.bf16.mxu0 %v7126_v31 }
 0x42f   : > { %11409 = vst [vmem:[#allocation16_spill] sm:$0xff] %v9151_v35  ;;  %7303 = vrsqrt.f32 %v2883_v26  ;;  %v2884_v21 = vadd.f32 1e-05, %v2820_v51  ;;  %v9164_v34 = vadd.f32 %v2450_v19, %v11410_v55  ;;  %v9169_v8 = vmul.f32 0.020833334, %v9148_v18 }
 0x430   : > { %v2580_v54 = vpop.xlane.xlu0 %2579  ;;  %v3022_v1 = vadd.f32 %v9161_v10, %v2983_v22  ;;  %v3024_v30 = vadd.f32 %v9161_v10, %v2985_v13  ;;  %v9176_v0 = vmul.f32 0.020833334, %v9151_v35  ;;  %v3023_v60 = vadd.f32 %v9161_v10, %v2984_v56 }
 0x431   : > { %11411 = vst [vmem:[#allocation15_spill] sm:$0xff] %v9164_v34  ;;  %7305 = vrsqrt.f32 %v2884_v21  ;;  %v9172_v20 = vadd.f32 %v2580_v54, %v8095_v61  ;;  %v2761_v23 = vmul.f32 %v9156_v39, %v9156_v39  ;;  %6834 = vmatpush3.bf16.msra.mxu0 %v7126_v31  ;;  %v9187_v61 = vadd.f32 %v8746_v6, %v8850_v49  ;;  %v11414_v21 = vld [vmem:[#allocation18_spill] sm:$0xff] }
 0x432   : > { %v2582_v37 = vpop.xlane.xlu1 %2581  ;;  %v3053_v29 = vpack.c.bf16 %v3022_v1, %v3021_v42  ;;  %v9190_v13 = vmul.f32 0.020833334, %v9164_v34  ;;  %v3054_v11 = vpack.c.bf16 %v3024_v30, %v3023_v60  ;;  %v2762_v19 = vmul.f32 %v9169_v8, %v9169_v8 }
 0x433   : > { %11412 = vst [vmem:[#allocation76_spill] sm:$0xff] %v9172_v20  ;;  %v2729_v4 = vmul.f32 0.020833334, %v9172_v20  ;;  %v9183_v26 = vadd.f32 %v2582_v37, %v8093_v28  ;;  %v9200_v6 = vadd.f32 %v8754_v58, %v8853_v43  ;;  %v9204_v49 = vadd.f32 %v8750_v12, %v8855_v41  ;;  %v11416_v58 = vld [vmem:[#allocation17_spill] sm:$0xff] }
 0x434   : > { %v2576_v51 = vpop.xlane.xlu0 %2575  ;;  %6795 = vmatprep.mubr.bf16.mxu1 %v3053_v29  ;;  %v9208_v55 = vadd.f32 %v8758_v48, %v8858_v59  ;;  %v2759_v54 = vmul.f32 %v9176_v0, %v9176_v0  ;;  %v2853_v12 = vsub.f32 %v9187_v61, %v9063_v44  ;;  %v2760_v59 = vmul.f32 %v9190_v13, %v9190_v13 }
 0x435   : > { %11413 = vst [vmem:[#allocation77_spill] sm:$0xff] %v9183_v26  ;;  %v2793_v22 = vsub.f32 %v2729_v4, %v2761_v23  ;;  %v2730_v56 = vmul.f32 0.020833334, %v9183_v26  ;;  %v9196_v28 = vadd.f32 %v2576_v51, %v11414_v21  ;;  %v7300_v31 = vpop.eup %7299  ;;  %6796 = vmatmul.mubr.bf16.vlgmr.msra.gmra.mrb[48].mxu1 %v3054_v11  ;;  %v2854_v48 = vsub.f32 %v9204_v49, %v9066_v9 }
 0x436   : > { %v2578_v42 = vpop.xlane.xlu1 %2577  ;;  %v2851_v41 = vsub.f32 %v9200_v6, %v9075_v3  ;;  %v2949_v21 = vmul.f32 %v7300_v31, %v2853_v12 }
 0x437   : > { %11415 = vst [vmem:[#allocation18_spill] sm:$0xff] %v9196_v28  ;;  %v7302_v1 = vpop.eup %7301  ;;  %v2825_v30 = vmax.f32 %v2793_v22, 0.0  ;;  %v2794_v37 = vsub.f32 %v2730_v56, %v2762_v19  ;;  %v2727_v29 = vmul.f32 0.020833334, %v9196_v28  ;;  %v9214_v43 = vadd.f32 %v2578_v42, %v11416_v58 }
 0x438   : > { %v2460_v60 = vpop.xlane.xlu0 %2459  ;;  %v2852_v22 = vsub.f32 %v9208_v55, %v9100_v7  ;;  %v2950_v9 = vmul.f32 %v7302_v1, %v2854_v48  ;;  %v2988_v12 = vmul.f32 %v9140_v63, %v2949_v21  ;;  %v9258_v21 = vadd.f32 %v8766_v52, %v8873_v32 }
 0x439   : > { %11417 = vst [vmem:[#allocation17_spill] sm:$0xff] %v9214_v43  ;;  %v7304_v23 = vpop.eup %7303  ;;  %v2889_v4 = vadd.f32 1e-05, %v2825_v30  ;;  %v2826_v51 = vmax.f32 %v2794_v37, 0.0  ;;  %v2791_v11 = vsub.f32 %v2727_v29, %v2759_v54  ;;  %v2728_v19 = vmul.f32 0.020833334, %v9214_v43 }
 0x43a   : > { %v2462_v44 = vpop.xlane.xlu1 %2461  ;;  %v2947_v56 = vmul.f32 %v7304_v23, %v2851_v41  ;;  %v9228_v26 = vadd.f32 %v2460_v60, %v8113_v45  ;;  %v2989_v48 = vmul.f32 %v9140_v63, %v2950_v9  ;;  %v11420_v41 = vld [vmem:[#allocation20_spill] sm:$0xff] }
 0x43b   : > { %v7306_v42 = vpop.eup %7305  ;;  %v2890_v58 = vadd.f32 1e-05, %v2826_v51  ;;  %v2823_v3 = vmax.f32 %v2791_v11, 0.0  ;;  %v2792_v28 = vsub.f32 %v2728_v19, %v2760_v59  ;;  %7307 = vrsqrt.f32 %v2889_v4  ;;  %v11422_v51 = vld [vmem:[#allocation19_spill] sm:$0xff] }
 0x43c   : > { %11418 = vst [vmem:[#allocation78_spill] sm:$0xff] %v9228_v26  ;;  %v2456_v30 = vpop.xlane.xlu0 %2455  ;;  %v2948_v37 = vmul.f32 %v7306_v42, %v2852_v22  ;;  %v2986_v54 = vmul.f32 %v9140_v63, %v2947_v56  ;;  %v9232_v7 = vadd.f32 %v2462_v44, %v8111_v47  ;;  %v9241_v60 = vmul.f32 0.020833334, %v9228_v26 }
 0x43d   : > { %7309 = vrsqrt.f32 %v2890_v58  ;;  %v2887_v29 = vadd.f32 1e-05, %v2823_v3  ;;  %v2824_v43 = vmax.f32 %v2792_v28, 0.0  ;;  %v9238_v59 = vadd.f32 %v2456_v30, %v11420_v41 }
 0x43e   : > { %11419 = vst [vmem:[#allocation79_spill] sm:$0xff] %v9232_v7  ;;  %v2458_v31 = vpop.xlane.xlu1 %2457  ;;  %v2987_v1 = vmul.f32 %v9140_v63, %v2948_v37  ;;  %v3025_v28 = vadd.f32 %v9161_v10, %v2986_v54  ;;  %v9246_v4 = vmul.f32 0.020833334, %v9232_v7  ;;  %v3027_v44 = vadd.f32 %v9161_v10, %v2988_v12  ;;  %v11426_v54 = vld [vmem:[#allocation22_spill] sm:$0xff] }
 0x43f   : > { %7311 = vrsqrt.f32 %v2887_v29  ;;  %v2888_v45 = vadd.f32 1e-05, %v2824_v43  ;;  %11421 = vst [vmem:[#allocation20_spill] sm:$0xff] %v9238_v59  ;;  %v9249_v11 = vadd.f32 %v2458_v31, %v11422_v51  ;;  %v3028_v56 = vadd.f32 %v9161_v10, %v2989_v48 }
 0x440   : > { %v2588_v23 = vpop.xlane.xlu0 %2587  ;;  %v3026_v47 = vadd.f32 %v9161_v10, %v2987_v1  ;;  %v9261_v9 = vmul.f32 0.020833334, %v9238_v59  ;;  %v2765_v58 = vmul.f32 %v9241_v60, %v9241_v60  ;;  %v2766_v52 = vmul.f32 %v9246_v4, %v9246_v4 }
 0x441   : > { %7313 = vrsqrt.f32 %v2888_v45  ;;  %11423 = vst [vmem:[#allocation19_spill] sm:$0xff] %v9249_v11  ;;  %v9252_v43 = vadd.f32 %v2588_v23, %v8151_v14  ;;  %v9268_v14 = vadd.f32 %v8770_v15, %v8878_v25  ;;  %v3056_v37 = vpack.c.bf16 %v3028_v56, %v3027_v44 }
 0x442   : > { %v2590_v19 = vpop.xlane.xlu1 %2589  ;;  %v3055_v22 = vpack.c.bf16 %v3026_v47, %v3025_v28  ;;  %v9276_v32 = vmul.f32 0.020833334, %v9249_v11  ;;  %v9284_v25 = vadd.f32 %v8774_v33, %v8876_v57  ;;  %v9288_v31 = vadd.f32 %v8778_v40, %v8881_v38  ;;  %v11428_v47 = vld [vmem:[#allocation21_spill] sm:$0xff] }
 0x443   : > { %11424 = vst [vmem:[#allocation80_spill] sm:$0xff] %v9252_v43  ;;  %v9264_v42 = vadd.f32 %v2590_v19, %v8149_v62  ;;  %v2733_v3 = vmul.f32 0.020833334, %v9252_v43  ;;  %v2858_v1 = vsub.f32 %v9268_v14, %v9169_v8  ;;  %v2763_v41 = vmul.f32 %v9261_v9, %v9261_v9 }
 0x444   : > { %v2584_v30 = vpop.xlane.xlu0 %2583  ;;  %6799 = vmatprep.mubr.bf16.mxu1 %v3055_v22  ;;  %v2857_v40 = vsub.f32 %v9258_v21, %v9156_v39  ;;  %v2855_v57 = vsub.f32 %v9284_v25, %v9176_v0  ;;  %v2764_v22 = vmul.f32 %v9276_v32, %v9276_v32 }
 0x445   : > { %11425 = vst [vmem:[#allocation81_spill] sm:$0xff] %v9264_v42  ;;  %v2734_v62 = vmul.f32 0.020833334, %v9264_v42  ;;  %v9280_v29 = vadd.f32 %v2584_v30, %v11426_v54  ;;  %v7308_v15 = vpop.eup %7307  ;;  %v2797_v12 = vsub.f32 %v2733_v3, %v2765_v58  ;;  %6800 = vmatmul.mubr.bf16.gmra.mrb[52].mxu1 %v3056_v37  ;;  %v2856_v3 = vsub.f32 %v9288_v31, %v9190_v13 }
 0x446   : > { %v2586_v48 = vpop.xlane.xlu1 %2585 }
 0x447   : > { %11427 = vst [vmem:[#allocation22_spill] sm:$0xff] %v9280_v29  ;;  %v7310_v45 = vpop.eup %7309  ;;  %v2798_v23 = vsub.f32 %v2734_v62, %v2766_v52  ;;  %v2731_v28 = vmul.f32 0.020833334, %v9280_v29  ;;  %v9296_v33 = vadd.f32 %v2586_v48, %v11428_v47  ;;  %v2829_v38 = vmax.f32 %v2797_v12, 0.0 }
 0x448   : > { %v2468_v8 = vpop.xlane.xlu0 %2467  ;;  %v2954_v51 = vmul.f32 %v7310_v45, %v2858_v1  ;;  %v2953_v52 = vmul.f32 %v7308_v15, %v2857_v40  ;;  %v11432_v15 = vld [vmem:[#allocation24_spill] sm:$0xff] }
 0x449   : > { %11429 = vst [vmem:[#allocation21_spill] sm:$0xff] %v9296_v33  ;;  %v7312_v19 = vpop.eup %7311  ;;  %v2830_v44 = vmax.f32 %v2798_v23, 0.0  ;;  %v2795_v56 = vsub.f32 %v2731_v28, %v2763_v41  ;;  %v2732_v58 = vmul.f32 0.020833334, %v9296_v33  ;;  %v2893_v30 = vadd.f32 1e-05, %v2829_v38 }
 0x44a   : > { %v2470_v37 = vpop.xlane.xlu1 %2469  ;;  %v2951_v39 = vmul.f32 %v7312_v19, %v2855_v57  ;;  %v9308_v1 = vadd.f32 %v2468_v8, %v8169_v53  ;;  %v2993_v23 = vmul.f32 %v9140_v63, %v2954_v51  ;;  %v2992_v38 = vmul.f32 %v9140_v63, %v2953_v52  ;;  %v11434_v51 = vld [vmem:[#allocation23_spill] sm:$0xff] }
 0x44b   : > { %v7314_v62 = vpop.eup %7313  ;;  %v2894_v0 = vadd.f32 1e-05, %v2830_v44  ;;  %v2827_v54 = vmax.f32 %v2795_v56, 0.0  ;;  %v2796_v12 = vsub.f32 %v2732_v58, %v2764_v22  ;;  %7315 = vrsqrt.f32 %v2893_v30 }
 0x44c   : > { %11430 = vst [vmem:[#allocation82_spill] sm:$0xff] %v9308_v1  ;;  %v2464_v48 = vpop.xlane.xlu0 %2463  ;;  %v2952_v45 = vmul.f32 %v7314_v62, %v2856_v3  ;;  %v2990_v41 = vmul.f32 %v9140_v63, %v2951_v39  ;;  %v9313_v47 = vadd.f32 %v2470_v37, %v8167_v46  ;;  %v9321_v19 = vmul.f32 0.020833334, %v9308_v1 }
 0x44d   : > { %7317 = vrsqrt.f32 %v2894_v0  ;;  %v2891_v13 = vadd.f32 1e-05, %v2827_v54  ;;  %v2828_v28 = vmax.f32 %v2796_v12, 0.0  ;;  %v9316_v40 = vadd.f32 %v2464_v48, %v11432_v15 }
 0x44e   : > { %11431 = vst [vmem:[#allocation83_spill] sm:$0xff] %v9313_v47  ;;  %v2466_v57 = vpop.xlane.xlu1 %2465  ;;  %v2991_v53 = vmul.f32 %v9140_v63, %v2952_v45  ;;  %v3029_v46 = vadd.f32 %v9161_v10, %v2990_v41  ;;  %v9329_v58 = vmul.f32 0.020833334, %v9313_v47  ;;  %v3032_v30 = vadd.f32 %v9161_v10, %v2993_v23 }
 0x44f   : > { %11433 = vst [vmem:[#allocation24_spill] sm:$0xff] %v9316_v40  ;;  %7319 = vrsqrt.f32 %v2891_v13  ;;  %v2892_v8 = vadd.f32 1e-05, %v2828_v28  ;;  %v9324_v22 = vadd.f32 %v2466_v57, %v11434_v51  ;;  %v9336_v37 = vmul.f32 0.020833334, %v9316_v40  ;;  %v11438_v57 = vld [vmem:[#allocation26_spill] sm:$0xff] }
 0x450   : > { %v2596_v44 = vpop.xlane.xlu0 %2595  ;;  %v3030_v56 = vadd.f32 %v9161_v10, %v2991_v53  ;;  %v3031_v62 = vadd.f32 %v9161_v10, %v2992_v38  ;;  %v2769_v0 = vmul.f32 %v9321_v19, %v9321_v19  ;;  %v2770_v13 = vmul.f32 %v9329_v58, %v9329_v58  ;;  %v7580_v38 = vld [vmem:[%s7736_s1 + $0x60] sm:$0xff]  ;;  %v11444_v40 = vld [vmem:[#allocation30_spill] sm:$0xff] }
 0x451   : > { %11435 = vst [vmem:[#allocation23_spill] sm:$0xff] %v9324_v22  ;;  %7321 = vrsqrt.f32 %v2892_v8  ;;  %v9332_v3 = vadd.f32 %v2596_v44, %v8207_v27  ;;  %v7579_v27 = vld [vmem:[%s7736_s1 + $0x70] sm:$0xff]  ;;  %v9350_v45 = vmul.f32 0.020833334, %v9324_v22  ;;  %v7581_v8 = vld [vmem:[%s7736_s1 + $0x78] sm:$0xff]  ;;  %v11440_v51 = vld [vmem:[#allocation51_spill] sm:$0xff] }
 0x452   : > { %v2598_v39 = vpop.xlane.xlu1 %2597  ;;  %v3057_v52 = vpack.c.bf16 %v3030_v56, %v3029_v46  ;;  %v9347_v48 = vadd.f32 %v7579_v27, %v8899_v5  ;;  %v3058_v23 = vpack.c.bf16 %v3032_v30, %v3031_v62  ;;  %v9360_v5 = vadd.f32 %v7580_v38, %v8902_v36  ;;  %v7582_v46 = vld [vmem:[%s7736_s1 + $0x68] sm:$0xff]  ;;  %v11442_v36 = vld [vmem:[#allocation25_spill] sm:$0xff] }
 0x453   : > { %11436 = vst [vmem:[#allocation84_spill] sm:$0xff] %v9332_v3  ;;  %v2737_v54 = vmul.f32 0.020833334, %v9332_v3  ;;  %v9343_v12 = vadd.f32 %v2598_v39, %v8205_v2  ;;  %v9364_v44 = vadd.f32 %v7581_v8, %v11440_v51  ;;  %v11441_v56 = vld [vmem:[#allocation52_spill] sm:$0xff]  ;;  %v2767_v39 = vmul.f32 %v9336_v37, %v9336_v37 }
 0x454   : > { %v2592_v41 = vpop.xlane.xlu0 %2591  ;;  %6803 = vmatprep.mubr.bf16.mxu1 %v3057_v52  ;;  %v9368_v30 = vadd.f32 %v7582_v46, %v11441_v56  ;;  %v2859_v8 = vsub.f32 %v9360_v5, %v9261_v9 }
 0x455   : > { %11437 = vst [vmem:[#allocation85_spill] sm:$0xff] %v9343_v12  ;;  %v2801_v28 = vsub.f32 %v2737_v54, %v2769_v0  ;;  %v2738_v15 = vmul.f32 0.020833334, %v9343_v12  ;;  %v9356_v2 = vadd.f32 %v2592_v41, %v11438_v57  ;;  %v7316_v53 = vpop.eup %7315  ;;  %6804 = vmatmul.mubr.bf16.gmra.mrb[56].mxu1 %v3058_v23  ;;  %v2861_v57 = vsub.f32 %v9347_v48, %v9241_v60 }
 0x456   : > { %v2594_v52 = vpop.xlane.xlu1 %2593  ;;  %v2862_v38 = vsub.f32 %v9364_v44, %v9246_v4  ;;  %v2768_v23 = vmul.f32 %v9350_v45, %v9350_v45 }
 0x457   : > { %11439 = vst [vmem:[#allocation26_spill] sm:$0xff] %v9356_v2  ;;  %v7318_v62 = vpop.eup %7317  ;;  %v2833_v0 = vmax.f32 %v2801_v28, 0.0  ;;  %v2802_v54 = vsub.f32 %v2738_v15, %v2770_v13  ;;  %v2735_v27 = vmul.f32 0.020833334, %v9356_v2  ;;  %v9374_v41 = vadd.f32 %v2594_v52, %v11442_v36 }
 0x458   : > { %v2476_v51 = vpop.xlane.xlu0 %2475  ;;  %v2860_v52 = vsub.f32 %v9368_v30, %v9276_v32  ;;  %v2957_v2 = vmul.f32 %v7316_v53, %v2861_v57  ;;  %v2958_v4 = vmul.f32 %v7318_v62, %v2862_v38  ;;  %v11446_v32 = vld [vmem:[#allocation29_spill] sm:$0xff] }
 0x459   : > { %11443 = vst [vmem:[#allocation51_spill] sm:$0xff] %v9374_v41  ;;  %v7320_v28 = vpop.eup %7319  ;;  %v2897_v13 = vadd.f32 1e-05, %v2833_v0  ;;  %v2834_v15 = vmax.f32 %v2802_v54, 0.0  ;;  %v2799_v46 = vsub.f32 %v2735_v27, %v2767_v39  ;;  %v2736_v56 = vmul.f32 0.020833334, %v9374_v41 }
 0x45a   : > { %v2478_v60 = vpop.xlane.xlu1 %2477  ;;  %v2955_v36 = vmul.f32 %v7320_v28, %v2859_v8  ;;  %v9388_v47 = vadd.f32 %v2476_v51, %v11444_v40  ;;  %v2996_v57 = vmul.f32 %v9140_v63, %v2957_v2  ;;  %v2997_v38 = vmul.f32 %v9140_v63, %v2958_v4  ;;  %v11448_v8 = vld [vmem:[#allocation28_spill] sm:$0xff]  ;;  %v11450_v28 = vld [vmem:[#allocation27_spill] sm:$0xff]  ;;  %v11454_v4 = vld [vmem:[#allocation53_spill] sm:$0xff] }
 0x45b   : > { %v7322_v12 = vpop.eup %7321  ;;  %v2898_v3 = vadd.f32 1e-05, %v2834_v15  ;;  %v2831_v9 = vmax.f32 %v2799_v46, 0.0  ;;  %v2800_v22 = vsub.f32 %v2736_v56, %v2768_v23  ;;  %7323 = vrsqrt.f32 %v2897_v13 }
 0x45c   : > { %11445 = vst [vmem:[#allocation52_spill] sm:$0xff] %v9388_v47  ;;  %v2472_v0 = vpop.xlane.xlu0 %2471  ;;  %v2956_v54 = vmul.f32 %v7322_v12, %v2860_v52  ;;  %v2994_v39 = vmul.f32 %v9140_v63, %v2955_v36  ;;  %v9392_v1 = vadd.f32 %v2478_v60, %v11446_v32  ;;  %v3035_v52 = vadd.f32 %v9161_v10, %v2996_v57  ;;  %v7583_v36 = vld [vmem:[%s7736_s1 + $0x90] sm:$0xff]  ;;  %v11457_v32 = vld [vmem:[#allocation55_spill] sm:$0xff] }
 0x45d   : > { %7325 = vrsqrt.f32 %v2898_v3  ;;  %v2895_v27 = vadd.f32 1e-05, %v2831_v9  ;;  %v2832_v41 = vmax.f32 %v2800_v22, 0.0  ;;  %v9398_v12 = vadd.f32 %v2472_v0, %v11448_v8 }
 0x45e   : > { %11447 = vst [vmem:[#allocation25_spill] sm:$0xff] %v9392_v1  ;;  %v2474_v53 = vpop.xlane.xlu1 %2473  ;;  %v2995_v62 = vmul.f32 %v9140_v63, %v2956_v54  ;;  %v9401_v3 = vmul.f32 0.020833334, %v9388_v47  ;;  %v3033_v23 = vadd.f32 %v9161_v10, %v2994_v39  ;;  %v9406_v2 = vmul.f32 0.020833334, %v9392_v1  ;;  %v11455_v54 = vld [vmem:[#allocation33_spill] sm:$0xff] }
 0x45f   : > { %7327 = vrsqrt.f32 %v2895_v27  ;;  %v2896_v40 = vadd.f32 1e-05, %v2832_v41  ;;  %11449 = vst [vmem:[#allocation30_spill] sm:$0xff] %v9398_v12  ;;  %v9409_v13 = vadd.f32 %v2474_v53, %v11450_v28  ;;  %v11452_v41 = vld [vmem:[#allocation34_spill] sm:$0xff]  ;;  %v3036_v60 = vadd.f32 %v9161_v10, %v2997_v38 }
 0x460   : > { %v2604_v22 = vpop.xlane.xlu0 %2603  ;;  %v3034_v51 = vadd.f32 %v9161_v10, %v2995_v62  ;;  %v9418_v9 = vadd.f32 %v7583_v36, %v11454_v4  ;;  %v9421_v0 = vmul.f32 0.020833334, %v9398_v12  ;;  %v7584_v27 = vld [vmem:[%s7736_s1 + $0x98] sm:$0xff]  ;;  %v2773_v62 = vmul.f32 %v9401_v3, %v9401_v3 }
 0x461   : > { %7329 = vrsqrt.f32 %v2896_v40  ;;  %11451 = vst [vmem:[#allocation29_spill] sm:$0xff] %v9409_v13  ;;  %v9412_v15 = vadd.f32 %v2604_v22, %v11452_v41  ;;  %v9428_v53 = vadd.f32 %v7584_v27, %v11457_v32  ;;  %v3060_v40 = vpack.c.bf16 %v3036_v60, %v3035_v52  ;;  %v11460_v36 = vld [vmem:[#allocation54_spill] sm:$0xff]  ;;  %v11462_v27 = vld [vmem:[#allocation56_spill] sm:$0xff] }
 0x462   : > { %v2606_v46 = vpop.xlane.xlu1 %2605  ;;  %v3059_v56 = vpack.c.bf16 %v3034_v51, %v3033_v23  ;;  %v2774_v8 = vmul.f32 %v9406_v2, %v9406_v2  ;;  %v9436_v22 = vmul.f32 0.020833334, %v9409_v13  ;;  %v11458_v51 = vld [vmem:[#allocation32_spill] sm:$0xff]  ;;  %v11464_v13 = vld [vmem:[#allocation31_spill] sm:$0xff] }
 0x463   : > { %11453 = vst [vmem:[#allocation28_spill] sm:$0xff] %v9412_v15  ;;  %v9424_v39 = vadd.f32 %v2606_v46, %v11455_v54  ;;  %v2741_v57 = vmul.f32 0.020833334, %v9412_v15  ;;  %v7585_v46 = vld [vmem:[%s7736_s1 + $0x80] sm:$0xff]  ;;  %v7586_v54 = vld [vmem:[%s7736_s1 + $0x88] sm:$0xff]  ;;  %v2866_v52 = vsub.f32 %v9428_v53, %v9329_v58 }
 0x464   : > { %v2600_v38 = vpop.xlane.xlu0 %2599  ;;  %6807 = vmatprep.mubr.bf16.mxu1 %v3059_v56  ;;  %v9444_v4 = vadd.f32 %v7585_v46, %v11460_v36  ;;  %v9448_v56 = vadd.f32 %v7586_v54, %v11462_v27  ;;  %v2865_v36 = vsub.f32 %v9418_v9, %v9321_v19  ;;  %v2772_v27 = vmul.f32 %v9436_v22, %v9436_v22 }
 0x465   : > { %11456 = vst [vmem:[#allocation27_spill] sm:$0xff] %v9424_v39  ;;  %v2742_v23 = vmul.f32 0.020833334, %v9424_v39  ;;  %v9440_v28 = vadd.f32 %v2600_v38, %v11458_v51  ;;  %v7324_v41 = vpop.eup %7323  ;;  %v2805_v60 = vsub.f32 %v2741_v57, %v2773_v62  ;;  %6808 = vmatmul.mubr.bf16.gmra.mrb[60].mxu1 %v3060_v40  ;;  %v2771_v38 = vmul.f32 %v9421_v0, %v9421_v0 }
 0x466   : > { %11461 = vst [vmem:[#allocation53_spill] sm:$0xff] %v9444_v4  ;;  %11463 = vst [vmem:[#allocation33_spill] sm:$0xff] %v9448_v56  ;;  %v2602_v32 = vpop.xlane.xlu1 %2601  ;;  %v2863_v54 = vsub.f32 %v9444_v4, %v9336_v37  ;;  %v2961_v1 = vmul.f32 %v7324_v41, %v2865_v36  ;;  %v11470_v41 = vld [vmem:[#allocation36_spill] sm:$0xff] }
 0x467   : > { %11459 = vst [vmem:[#allocation34_spill] sm:$0xff] %v9440_v28  ;;  %v7326_v15 = vpop.eup %7325  ;;  %v2806_v51 = vsub.f32 %v2742_v23, %v2774_v8  ;;  %v2739_v39 = vmul.f32 0.020833334, %v9440_v28  ;;  %v9456_v46 = vadd.f32 %v2602_v32, %v11464_v13  ;;  %v2837_v58 = vmax.f32 %v2805_v60, 0.0 }
 0x468   : > { %v2484_v62 = vpop.xlane.xlu0 %2483  ;;  %v2962_v57 = vmul.f32 %v7326_v15, %v2866_v52  ;;  %v2864_v13 = vsub.f32 %v9448_v56, %v9350_v45  ;;  %v11466_v15 = vld [vmem:[#allocation38_spill] sm:$0xff] }
 0x469   : > { %11465 = vst [vmem:[#allocation55_spill] sm:$0xff] %v9456_v46  ;;  %v7328_v40 = vpop.eup %7327  ;;  %v2838_v12 = vmax.f32 %v2806_v51, 0.0  ;;  %v2803_v8 = vsub.f32 %v2739_v39, %v2771_v38  ;;  %v2740_v23 = vmul.f32 0.020833334, %v9456_v46  ;;  %v2901_v32 = vadd.f32 1e-05, %v2837_v58 }
 0x46a   : > { %v2486_v28 = vpop.xlane.xlu1 %2485  ;;  %v2959_v19 = vmul.f32 %v7328_v40, %v2863_v54  ;;  %v9468_v52 = vadd.f32 %v2484_v62, %v11466_v15  ;;  %v3001_v38 = vmul.f32 %v9140_v63, %v2962_v57  ;;  %v11468_v46 = vld [vmem:[#allocation37_spill] sm:$0xff]  ;;  %v3000_v40 = vmul.f32 %v9140_v63, %v2961_v1  ;;  %v11472_v57 = vld [vmem:[#allocation35_spill] sm:$0xff] }
 0x46b   : > { %v7330_v47 = vpop.eup %7329  ;;  %v2902_v37 = vadd.f32 1e-05, %v2838_v12  ;;  %v2835_v60 = vmax.f32 %v2803_v8, 0.0  ;;  %v2804_v33 = vsub.f32 %v2740_v23, %v2772_v27  ;;  %7331 = vrsqrt.f32 %v2901_v32  ;;  %v11474_v23 = vld [vmem:[#allocation42_spill] sm:$0xff] }
 0x46c   : > { %11467 = vst [vmem:[#allocation32_spill] sm:$0xff] %v9468_v52  ;;  %v2480_v29 = vpop.xlane.xlu0 %2479  ;;  %v2960_v51 = vmul.f32 %v7330_v47, %v2864_v13  ;;  %v2998_v39 = vmul.f32 %v9140_v63, %v2959_v19  ;;  %v9473_v54 = vadd.f32 %v2486_v28, %v11468_v46  ;;  %v9481_v27 = vmul.f32 0.020833334, %v9468_v52 }
 0x46d   : > { %7333 = vrsqrt.f32 %v2902_v37  ;;  %v2899_v45 = vadd.f32 1e-05, %v2835_v60  ;;  %v2836_v58 = vmax.f32 %v2804_v33, 0.0  ;;  %v9476_v12 = vadd.f32 %v2480_v29, %v11470_v41 }
 0x46e   : > { %11469 = vst [vmem:[#allocation54_spill] sm:$0xff] %v9473_v54  ;;  %v2482_v36 = vpop.xlane.xlu1 %2481  ;;  %v2999_v62 = vmul.f32 %v9140_v63, %v2960_v51  ;;  %v3037_v28 = vadd.f32 %v9161_v10, %v2998_v39  ;;  %v9489_v46 = vmul.f32 0.020833334, %v9473_v54  ;;  %v3040_v13 = vadd.f32 %v9161_v10, %v3001_v38  ;;  %v11476_v39 = vld [vmem:[#allocation41_spill] sm:$0xff] }
 0x46f   : > { %11471 = vst [vmem:[#allocation56_spill] sm:$0xff] %v9476_v12  ;;  %7335 = vrsqrt.f32 %v2899_v45  ;;  %v2900_v47 = vadd.f32 1e-05, %v2836_v58  ;;  %v9484_v8 = vadd.f32 %v2482_v36, %v11472_v57  ;;  %v9496_v32 = vmul.f32 0.020833334, %v9476_v12  ;;  %v7587_v58 = vld [vmem:[%s7736_s1 + $0xb0] sm:$0xff] }
 0x470   : > { %v2612_v33 = vpop.xlane.xlu0 %2611  ;;  %v3038_v29 = vadd.f32 %v9161_v10, %v2999_v62  ;;  %v3039_v60 = vadd.f32 %v9161_v10, %v3000_v40  ;;  %v2777_v15 = vmul.f32 %v9481_v27, %v9481_v27  ;;  %v11478_v38 = vld [vmem:[#allocation57_spill] sm:$0xff] }
 0x471   : > { %11473 = vst [vmem:[#allocation31_spill] sm:$0xff] %v9484_v8  ;;  %7337 = vrsqrt.f32 %v2900_v47  ;;  %v9492_v1 = vadd.f32 %v2612_v33, %v11474_v23  ;;  %v9507_v41 = vadd.f32 %v7587_v58, %v11478_v38  ;;  %v9510_v36 = vmul.f32 0.020833334, %v9484_v8  ;;  %v7589_v38 = vld [vmem:[%s7736_s1 + $0xb8] sm:$0xff] }
 0x472   : > { %v2614_v19 = vpop.xlane.xlu1 %2613  ;;  %v3061_v37 = vpack.c.bf16 %v3038_v29, %v3037_v28  ;;  %v3062_v40 = vpack.c.bf16 %v3040_v13, %v3039_v60  ;;  %v2778_v47 = vmul.f32 %v9489_v46, %v9489_v46  ;;  %v11480_v28 = vld [vmem:[#allocation40_spill] sm:$0xff] }
 0x473   : > { %11475 = vst [vmem:[#allocation38_spill] sm:$0xff] %v9492_v1  ;;  %v2745_v51 = vmul.f32 0.020833334, %v9492_v1  ;;  %v9503_v45 = vadd.f32 %v2614_v19, %v11476_v39  ;;  %11479 = vst [vmem:[#allocation36_spill] sm:$0xff] %v9507_v41  ;;  %v7588_v19 = vld [vmem:[%s7736_s1 + $0xa0] sm:$0xff]  ;;  %v11482_v39 = vld [vmem:[#allocation58_spill] sm:$0xff] }
 0x474   : > { %v2608_v62 = vpop.xlane.xlu0 %2607  ;;  %6811 = vmatprep.mubr.bf16.mxu1 %v3061_v37  ;;  %v9520_v58 = vadd.f32 %v7588_v19, %v11482_v39  ;;  %v11484_v1 = vld [vmem:[#allocation59_spill] sm:$0xff]  ;;  %v7590_v37 = vld [vmem:[%s7736_s1 + $0xa8] sm:$0xff] }
 0x475   : > { %11477 = vst [vmem:[#allocation37_spill] sm:$0xff] %v9503_v45  ;;  %v2809_v57 = vsub.f32 %v2745_v51, %v2777_v15  ;;  %v2746_v33 = vmul.f32 0.020833334, %v9503_v45  ;;  %v9516_v29 = vadd.f32 %v2608_v62, %v11480_v28  ;;  %v7332_v23 = vpop.eup %7331  ;;  %v9524_v8 = vadd.f32 %v7589_v38, %v11484_v1  ;;  %v11486_v13 = vld [vmem:[#allocation60_spill] sm:$0xff]  ;;  %6812 = vmatmul.mubr.bf16.gmra.mrb[64].mxu1 %v3062_v40  ;;  %v11488_v19 = vld [vmem:[#allocation39_spill] sm:$0xff] }
 0x476   : > { %11483 = vst [vmem:[#allocation42_spill] sm:$0xff] %v9520_v58  ;;  %v9528_v60 = vadd.f32 %v7590_v37, %v11486_v13  ;;  %v2775_v15 = vmul.f32 %v9496_v32, %v9496_v32  ;;  %v2610_v51 = vpop.xlane.xlu1 %2609  ;;  %v2869_v1 = vsub.f32 %v9507_v41, %v9401_v3  ;;  %v2867_v37 = vsub.f32 %v9520_v58, %v9421_v0 }
 0x477   : > { %11481 = vst [vmem:[#allocation35_spill] sm:$0xff] %v9516_v29  ;;  %11485 = vst [vmem:[#allocation41_spill] sm:$0xff] %v9524_v8  ;;  %v7334_v62 = vpop.eup %7333  ;;  %v2841_v28 = vmax.f32 %v2809_v57, 0.0  ;;  %v2810_v45 = vsub.f32 %v2746_v33, %v2778_v47  ;;  %v2743_v12 = vmul.f32 0.020833334, %v9516_v29  ;;  %v9534_v39 = vadd.f32 %v2610_v51, %v11488_v19 }
 0x478   : > { %11487 = vst [vmem:[#allocation57_spill] sm:$0xff] %v9528_v60  ;;  %v2870_v38 = vsub.f32 %v9524_v8, %v9406_v2  ;;  %v2776_v40 = vmul.f32 %v9510_v36, %v9510_v36  ;;  %v2492_v13 = vpop.xlane.xlu0 %2491  ;;  %v2868_v19 = vsub.f32 %v9528_v60, %v9436_v22  ;;  %v2965_v52 = vmul.f32 %v7332_v23, %v2869_v1  ;;  %v11492_v1 = vld [vmem:[#allocation46_spill] sm:$0xff] }
 0x479   : > { %11489 = vst [vmem:[#allocation40_spill] sm:$0xff] %v9534_v39  ;;  %v7336_v57 = vpop.eup %7335  ;;  %v2905_v47 = vadd.f32 1e-05, %v2841_v28  ;;  %v2842_v33 = vmax.f32 %v2810_v45, 0.0  ;;  %v2807_v29 = vsub.f32 %v2743_v12, %v2775_v15  ;;  %v2744_v51 = vmul.f32 0.020833334, %v9534_v39 }
 0x47a   : > { %v2494_v3 = vpop.xlane.xlu1 %2493  ;;  %v2963_v54 = vmul.f32 %v7336_v57, %v2867_v37  ;;  %v2966_v2 = vmul.f32 %v7334_v62, %v2870_v38  ;;  %v11490_v15 = vld [vmem:[#allocation44_spill] sm:$0xff]  ;;  %v3004_v23 = vmul.f32 %v9140_v63, %v2965_v52 }
 0x47b   : > { %v7338_v42 = vpop.eup %7337  ;;  %v2906_v43 = vadd.f32 1e-05, %v2842_v33  ;;  %v2839_v0 = vmax.f32 %v2807_v29, 0.0  ;;  %v2808_v11 = vsub.f32 %v2744_v51, %v2776_v40  ;;  %7339 = vrsqrt.f32 %v2905_v47 }
 0x47c   : > { %v2488_v59 = vpop.xlane.xlu0 %2487  ;;  %v2964_v7 = vmul.f32 %v7338_v42, %v2868_v19  ;;  %v3002_v28 = vmul.f32 %v9140_v63, %v2963_v54  ;;  %v3005_v62 = vmul.f32 %v9140_v63, %v2966_v2  ;;  %v9555_v42 = vadd.f32 %v2492_v13, %v11492_v1  ;;  %v11494_v54 = vld [vmem:[#allocation43_spill] sm:$0xff]  ;;  %v11498_v13 = vld [vmem:[#allocation48_spill] sm:$0xff]  ;;  %v7591_v2 = vld [vmem:[%s7736_s1 + $0xd0] sm:$0xff] }
 0x47d   : > { %7341 = vrsqrt.f32 %v2906_v43  ;;  %v2903_v12 = vadd.f32 1e-05, %v2839_v0  ;;  %v2840_v45 = vmax.f32 %v2808_v11, 0.0  ;;  %v9549_v39 = vadd.f32 %v2488_v59, %v11490_v15  ;;  %v11496_v11 = vld [vmem:[#allocation45_spill] sm:$0xff] }
 0x47e   : > { %v2490_v22 = vpop.xlane.xlu1 %2489  ;;  %v3003_v37 = vmul.f32 %v9140_v63, %v2964_v7  ;;  %11493 = vst [vmem:[#allocation59_spill] sm:$0xff] %v9555_v42  ;;  %v9561_v59 = vadd.f32 %v2494_v3, %v11496_v11  ;;  %v3041_v52 = vadd.f32 %v9161_v10, %v3002_v28  ;;  %v3043_v19 = vadd.f32 %v9161_v10, %v3004_v23  ;;  %v11500_v0 = vld [vmem:[#allocation61_spill] sm:$0xff]  ;;  %v7592_v28 = vld [vmem:[%s7736_s1 + $0xd8] sm:$0xff] }
 0x47f   : > { %11491 = vst [vmem:[#allocation58_spill] sm:$0xff] %v9549_v39  ;;  %7343 = vrsqrt.f32 %v2903_v12  ;;  %v2904_v29 = vadd.f32 1e-05, %v2840_v45  ;;  %v9558_v43 = vadd.f32 %v2490_v22, %v11494_v54  ;;  %v9564_v38 = vmul.f32 0.020833334, %v9549_v39  ;;  %v11502_v45 = vld [vmem:[#allocation63_spill] sm:$0xff] }
 0x480   : > { %11497 = vst [vmem:[#allocation39_spill] sm:$0xff] %v9561_v59  ;;  %v2616_v7 = vpop.xlane.xlu0 %2615  ;;  %v3042_v40 = vadd.f32 %v9161_v10, %v3003_v37  ;;  %v3044_v3 = vadd.f32 %v9161_v10, %v3005_v62  ;;  %v9578_v12 = vadd.f32 %v7591_v2, %v11500_v0  ;;  %v9582_v15 = vadd.f32 %v7592_v28, %v11502_v45  ;;  %v11504_v37 = vld [vmem:[#allocation47_spill] sm:$0xff]  ;;  %v11508_v2 = vld [vmem:[#allocation50_spill] sm:$0xff]  ;;  %v7594_v45 = vld [vmem:[%s7736_s1 + $0xc8] sm:$0xff] }
 0x481   : > { %11495 = vst [vmem:[#allocation60_spill] sm:$0xff] %v9558_v43  ;;  %7345 = vrsqrt.f32 %v2904_v29  ;;  %v9569_v57 = vmul.f32 0.020833334, %v9558_v43  ;;  %v9572_v47 = vadd.f32 %v2616_v7, %v11498_v13  ;;  %v9585_v22 = vmul.f32 0.020833334, %v9555_v42  ;;  %v7593_v7 = vld [vmem:[%s7736_s1 + $0xc0] sm:$0xff] }
 0x482   : > { %v2618_v33 = vpop.xlane.xlu1 %2617  ;;  %v3063_v51 = vpack.c.bf16 %v3042_v40, %v3041_v52  ;;  %11501 = vst [vmem:[#allocation46_spill] sm:$0xff] %v9578_v12  ;;  %11503 = vst [vmem:[#allocation43_spill] sm:$0xff] %v9582_v15  ;;  %v9591_v1 = vmul.f32 0.020833334, %v9561_v59  ;;  %v2779_v23 = vmul.f32 %v9564_v38, %v9564_v38  ;;  %v3064_v11 = vpack.c.bf16 %v3044_v3, %v3043_v19  ;;  %v11506_v52 = vld [vmem:[#allocation62_spill] sm:$0xff] }
 0x483   : > { %11499 = vst [vmem:[#allocation44_spill] sm:$0xff] %v9572_v47  ;;  %v9588_v29 = vadd.f32 %v2618_v33, %v11504_v37  ;;  %v2747_v62 = vmul.f32 0.020833334, %v9572_v47  ;;  %v9598_v40 = vadd.f32 %v7593_v7, %v11506_v52  ;;  %v2780_v13 = vmul.f32 %v9569_v57, %v9569_v57  ;;  %v11510_v37 = vld [vmem:[#allocation64_spill] sm:$0xff]  ;;  %v11512_v47 = vld [vmem:[#allocation49_spill] sm:$0xff] }
 0x484   : > { %6815 = vmatprep.mubr.bf16.mxu1 %v3063_v51  ;;  %v2620_v54 = vpop.xlane.xlu0 %2619  ;;  %v9608_v59 = vadd.f32 %v7594_v45, %v11510_v37  ;;  %v2873_v51 = vsub.f32 %v9578_v12, %v9481_v27  ;;  %v2874_v19 = vsub.f32 %v9582_v15, %v9489_v46  ;;  %v2782_v27 = vmul.f32 %v9591_v1, %v9591_v1 }
 0x485   : > { %11505 = vst [vmem:[#allocation45_spill] sm:$0xff] %v9588_v29  ;;  %11507 = vst [vmem:[#allocation48_spill] sm:$0xff] %v9598_v40  ;;  %v2748_v33 = vmul.f32 0.020833334, %v9588_v29  ;;  %v9604_v0 = vadd.f32 %v2620_v54, %v11508_v2  ;;  %v7340_v28 = vpop.eup %7339  ;;  %v2811_v3 = vsub.f32 %v2747_v62, %v2779_v23  ;;  %6816 = vmatmul.mubr.bf16.gmra.mrb[68].mxu1 %v3064_v11 }
 0x486   : > { %11511 = vst [vmem:[#allocation63_spill] sm:$0xff] %v9608_v59  ;;  %v2622_v7 = vpop.xlane.xlu1 %2621  ;;  %v2781_v29 = vmul.f32 %v9585_v22, %v9585_v22  ;;  %v2871_v45 = vsub.f32 %v9598_v40, %v9496_v32  ;;  %v2969_v39 = vmul.f32 %v7340_v28, %v2873_v51 }
 0x487   : > { %11509 = vst [vmem:[#allocation61_spill] sm:$0xff] %v9604_v0  ;;  %v7342_v52 = vpop.eup %7341  ;;  %v2812_v54 = vsub.f32 %v2748_v33, %v2780_v13  ;;  %v2749_v2 = vmul.f32 0.020833334, %v9604_v0  ;;  %v9618_v43 = vadd.f32 %v2622_v7, %v11512_v47  ;;  %v2843_v46 = vmax.f32 %v2811_v3, 0.0 }
 0x488   : > { %v2970_v23 = vmul.f32 %v7342_v52, %v2874_v19  ;;  %v2872_v13 = vsub.f32 %v9608_v59, %v9510_v36  ;;  %v3008_v51 = vmul.f32 %v9140_v63, %v2969_v39 }
 0x489   : > { %11513 = vst [vmem:[#allocation47_spill] sm:$0xff] %v9618_v43  ;;  %v7344_v62 = vpop.eup %7343  ;;  %v2844_v11 = vmax.f32 %v2812_v54, 0.0  ;;  %v2813_v37 = vsub.f32 %v2749_v2, %v2781_v29  ;;  %v2750_v42 = vmul.f32 0.020833334, %v9618_v43  ;;  %v2907_v33 = vadd.f32 1e-05, %v2843_v46 }
 0x48a   : > { %v2967_v47 = vmul.f32 %v7344_v62, %v2871_v45  ;;  %v3009_v20 = vmul.f32 %v9140_v63, %v2970_v23  ;;  %v3047_v45 = vadd.f32 %v9161_v10, %v3008_v51  ;;  %v7596_v23 = vld [vmem:[%s7736_s1 + $0xe8] sm:$0xff] }
 0x48b   : > { %v7346_v7 = vpop.eup %7345  ;;  %v2908_v0 = vadd.f32 1e-05, %v2844_v11  ;;  %v2845_v26 = vmax.f32 %v2813_v37, 0.0  ;;  %v2814_v32 = vsub.f32 %v2750_v42, %v2782_v27  ;;  %7347 = vrsqrt.f32 %v2907_v33  ;;  %v11514_v27 = vld [vmem:[#allocation66_spill] sm:$0xff]  ;;  %v11516_v62 = vld [vmem:[#allocation68_spill] sm:$0xff]  ;;  %v11518_v33 = vld [vmem:[#allocation65_spill] sm:$0xff] }
 0x48c   : > { %v2968_v19 = vmul.f32 %v7346_v7, %v2872_v13  ;;  %v3006_v3 = vmul.f32 %v9140_v63, %v2967_v47  ;;  %v3048_v42 = vadd.f32 %v9161_v10, %v3009_v20  ;;  %v9641_v11 = vadd.f32 %v7596_v23, %v11516_v62  ;;  %v7597_v13 = vld [vmem:[%s7736_s1 + $0xf0] sm:$0xff] }
 0x48d   : > { %7349 = vrsqrt.f32 %v2908_v0  ;;  %v2909_v29 = vadd.f32 1e-05, %v2845_v26  ;;  %v2846_v28 = vmax.f32 %v2814_v32, 0.0  ;;  %v7595_v26 = vld [vmem:[%s7736_s1 + $0xe0] sm:$0xff]  ;;  %v9647_v47 = vadd.f32 %v7597_v13, %v11518_v33 }
 0x48e   : > { %v3007_v36 = vmul.f32 %v9140_v63, %v2968_v19  ;;  %v3045_v54 = vadd.f32 %v9161_v10, %v3006_v3  ;;  %v9637_v46 = vadd.f32 %v7595_v26, %v11514_v27  ;;  %v3066_v39 = vpack.c.bf16 %v3048_v42, %v3047_v45  ;;  %11517 = vst [vmem:[#allocation50_spill] sm:$0xff] %v9641_v11  ;;  %v7598_v3 = vld [vmem:[%s7736_s1 + $0xf8] sm:$0xff]  ;;  %v9682_v13 = vld [vmem:[%s11121_s11] ss:$0 sm:$0xff] }
 0x48f   : > { %7351 = vrsqrt.f32 %v2909_v29  ;;  %v2910_v52 = vadd.f32 1e-05, %v2846_v28  ;;  %11519 = vst [vmem:[#allocation64_spill] sm:$0xff] %v9647_v47  ;;  %v2876_v7 = vsub.f32 %v9641_v11, %v9569_v57  ;;  %v11520_v29 = vld [vmem:[#allocation67_spill] sm:$0xff]  ;;  %v2877_v51 = vsub.f32 %v9647_v47, %v9585_v22 }
 0x490   : > { %v3046_v2 = vadd.f32 %v9161_v10, %v3007_v36  ;;  %11515 = vst [vmem:[#allocation62_spill] sm:$0xff] %v9637_v46  ;;  %v2875_v20 = vsub.f32 %v9637_v46, %v9564_v38  ;;  %v9653_v28 = vadd.f32 %v7598_v3, %v11520_v29 }
 0x491   : > { %7353 = vrsqrt.f32 %v2910_v52 }
 0x492   : > { %v3065_v0 = vpack.c.bf16 %v3046_v2, %v3045_v54  ;;  %11521 = vst [vmem:[#allocation49_spill] sm:$0xff] %v9653_v28  ;;  %v2878_v42 = vsub.f32 %v9653_v28, %v9591_v1 }
 0x494   : > { %6819 = vmatprep.mubr.bf16.mxu1 %v3065_v0 }
 0x495   : > { %6820 = vmatmul.mubr.bf16.gmra.mrb[72].mxu1 %v3066_v39  ;;  %v7348_v37 = vpop.eup %7347 }
 0x496   : > { %v2971_v19 = vmul.f32 %v7348_v37, %v2875_v20  ;;  %v7127_v20 = vld [vmem:[%s11122_s12 + $0x20] sm:$0xff]   ;;  %v7128_v37 = vld [vmem:[%s11122_s12 + $0x28] sm:$0xff]  }
 0x497   : > { %v7350_v32 = vpop.eup %7349  ;;  %6835 = vmatprep.subr.bf16.mxu0 %v7127_v20 }
 0x498   : > { %v2972_v36 = vmul.f32 %v7350_v32, %v2876_v7  ;;  %v3010_v52 = vmul.f32 %v9140_v63, %v2971_v19  ;;  %6836 = vmatpush3.bf16.msra.mxu0 %v7127_v20 }
 0x499   : > { %v7352_v38 = vpop.eup %7351  ;;  %6837 = vmatprep.subr.bf16.mxu0 %v7128_v37 }
 0x49a   : > { %v3011_v54 = vmul.f32 %v9140_v63, %v2972_v36  ;;  %v2973_v2 = vmul.f32 %v7352_v38, %v2877_v51  ;;  %v3049_v45 = vadd.f32 %v9161_v10, %v3010_v52 }
 0x49b   : > { %v7354_v57 = vpop.eup %7353 }
 0x49c   : > { %v3050_v0 = vadd.f32 %v9161_v10, %v3011_v54  ;;  %v2974_v26 = vmul.f32 %v7354_v57, %v2878_v42  ;;  %v3012_v27 = vmul.f32 %v9140_v63, %v2973_v2  ;;  %6838 = vmatpush3.bf16.msra.mxu0 %v7128_v37 }
 0x49e   : > { %v3067_v39 = vpack.c.bf16 %v3050_v0, %v3049_v45  ;;  %v3013_v22 = vmul.f32 %v9140_v63, %v2974_v26  ;;  %v3051_v23 = vadd.f32 %v9161_v10, %v3012_v27  ;;  %v7129_v63 = vld [vmem:[%s11122_s12 + $0x30] sm:$0xff]  }
 0x49f   : > { %6839 = vmatprep.subr.bf16.mxu0 %v7129_v63 }
 0x4a0   : > { %6823 = vmatprep.mubr.bf16.mxu1 %v3067_v39  ;;  %v3052_v62 = vadd.f32 %v9161_v10, %v3013_v22  ;;  %v7130_v10 = vld [vmem:[%s11122_s12 + $0x38] sm:$0xff]   ;;  %6840 = vmatpush3.bf16.msra.mxu0 %v7129_v63 }
 0x4a1   : > { %6841 = vmatprep.subr.bf16.mxu0 %v7130_v10 }
 0x4a2   : > { %v3068_v1 = vpack.c.bf16 %v3052_v62, %v3051_v23 }
 0x4a4   : > { %6824 = vmatmul.mubr.bf16.gmra.mrb[76].mxu1 %v3068_v1  ;;  %6842 = vmatpush3.bf16.msra.mxu0 %v7130_v10 }
 0x508   : > { %v6797_v33 = vpop.f32.mrb[48].mxu1 }
 0x509   : > { %v9685_v7 = vadd.f32 %v6797_v33, %v9682_v13  ;;  %v3174_v32 = vpop.f32.mrb[49].mxu1 }
 0x50a   : > { %v9688_v19 = vadd.f32 %v9682_v13, %v3174_v32  ;;  %v6798_v3 = vpop.f32.mrb[50].mxu1 }
 0x50b   : > { %v3303_v29 = vmul.f32 %v9685_v7, %v9685_v7  ;;  %v9693_v51 = vadd.f32 %v6798_v3, %v9682_v13  ;;  %v3177_v36 = vpop.f32.mrb[51].mxu1 }
 0x50c   : > { %v3301_v38 = vmul.f32 %v9688_v19, %v9688_v19  ;;  %v9698_v52 = vadd.f32 %v9682_v13, %v3177_v36 }
 0x50d   : > { %v3335_v42 = vmul.f32 %v3303_v29, %v9685_v7  ;;  %v3304_v54 = vmul.f32 %v9693_v51, %v9693_v51 }
 0x50e   : > { %v3333_v2 = vmul.f32 %v3301_v38, %v9688_v19  ;;  %v3302_v57 = vmul.f32 %v9698_v52, %v9698_v52 }
 0x50f   : > { %v3367_v45 = vmul.f32 0.044715, %v3335_v42  ;;  %v3336_v0 = vmul.f32 %v3304_v54, %v9693_v51  ;;  %v7131_v42 = vld [vmem:[%s11124_s14] sm:$0xff]   ;;  %v7132_v54 = vld [vmem:[%s11124_s14 + $0x8] sm:$0xff]  }
 0x510   : > { %v3365_v26 = vmul.f32 0.044715, %v3333_v2  ;;  %v3334_v27 = vmul.f32 %v3302_v57, %v9698_v52  ;;  %6875 = vmatprep.subr.bf16.mxu1 %v7131_v42 }
 0x511   : > { %v3399_v39 = vadd.f32 %v3367_v45, %v9685_v7  ;;  %v3368_v22 = vmul.f32 0.044715, %v3336_v0  ;;  %6876 = vmatpush3.bf16.msra.mxu1 %v7131_v42 }
 0x512   : > { %v3397_v23 = vadd.f32 %v3365_v26, %v9688_v19  ;;  %v3366_v62 = vmul.f32 0.044715, %v3334_v27  ;;  %6877 = vmatprep.subr.bf16.mxu1 %v7132_v54 }
 0x513   : > { %v3431_v1 = vmul.f32 0.7978846, %v3399_v39  ;;  %v3400_v20 = vadd.f32 %v3368_v22, %v9693_v51 }
 0x514   : > { %v3429_v37 = vmul.f32 0.7978846, %v3397_v23  ;;  %v3398_v63 = vadd.f32 %v3366_v62, %v9698_v52  ;;  %v7133_v62 = vld [vmem:[%s11124_s14 + $0x10] sm:$0xff]  }
 0x515   : > { %7355 = vtanh.f32 %v3431_v1  ;;  %v3432_v10 = vmul.f32 0.7978846, %v3400_v20  ;;  %6878 = vmatpush3.bf16.msra.mxu1 %v7132_v54 }
 0x516   : > { %7357 = vtanh.f32 %v3429_v37  ;;  %v3430_v33 = vmul.f32 0.7978846, %v3398_v63  ;;  %6879 = vmatprep.subr.bf16.mxu1 %v7133_v62 }
 0x517   : > { %7359 = vtanh.f32 %v3432_v10 }
 0x518   : > { %7361 = vtanh.f32 %v3430_v33  ;;  %v6801_v32 = vpop.f32.mrb[52].mxu1 }
 0x519   : > { %v9713_v3 = vadd.f32 %v6801_v32, %v9682_v13  ;;  %v3190_v29 = vpop.f32.mrb[53].mxu1  ;;  %6880 = vmatpush3.bf16.msra.mxu1 %v7133_v62 }
 0x51a   : > { %v9716_v36 = vadd.f32 %v9682_v13, %v3190_v29  ;;  %v6802_v38 = vpop.f32.mrb[54].mxu1 }
 0x51b   : > { %v3307_v2 = vmul.f32 %v9713_v3, %v9713_v3  ;;  %v9727_v57 = vadd.f32 %v6802_v38, %v9682_v13  ;;  %v3193_v45 = vpop.f32.mrb[55].mxu1 }
 0x51c   : > { %v3305_v0 = vmul.f32 %v9716_v36, %v9716_v36  ;;  %v9732_v26 = vadd.f32 %v9682_v13, %v3193_v45 }
 0x51d   : > { %v3339_v27 = vmul.f32 %v3307_v2, %v9713_v3  ;;  %v3308_v39 = vmul.f32 %v9727_v57, %v9727_v57 }
 0x51e   : > { %v3337_v22 = vmul.f32 %v3305_v0, %v9716_v36  ;;  %v3306_v23 = vmul.f32 %v9732_v26, %v9732_v26 }
 0x51f   : > { %v7356_v1 = vpop.eup %7355  ;;  %v3371_v20 = vmul.f32 0.044715, %v3339_v27  ;;  %v3340_v37 = vmul.f32 %v3308_v39, %v9727_v57  ;;  %v7134_v27 = vld [vmem:[%s11124_s14 + $0x18] sm:$0xff]  }
 0x520   : > { %v7358_v63 = vpop.eup %7357  ;;  %v3495_v10 = vadd.f32 1.0, %v7356_v1  ;;  %v3369_v33 = vmul.f32 0.044715, %v3337_v22  ;;  %v3338_v32 = vmul.f32 %v3306_v23, %v9732_v26  ;;  %6881 = vmatprep.subr.bf16.mxu1 %v7134_v27 }
 0x521   : > { %v7360_v29 = vpop.eup %7359  ;;  %v3403_v38 = vadd.f32 %v3371_v20, %v9713_v3  ;;  %v3372_v42 = vmul.f32 0.044715, %v3340_v37  ;;  %v3493_v2 = vadd.f32 1.0, %v7358_v63  ;;  %6882 = vmatpush3.bf16.msra.mxu1 %v7134_v27 }
 0x522   : > { %v7362_v45 = vpop.eup %7361  ;;  %v3527_v0 = vmul.f32 0.5, %v3495_v10  ;;  %v3496_v43 = vadd.f32 1.0, %v7360_v29  ;;  %v3401_v34 = vadd.f32 %v3369_v33, %v9716_v36  ;;  %v3370_v35 = vmul.f32 0.044715, %v3338_v32 }
 0x523   : > { %v3435_v39 = vmul.f32 0.7978846, %v3403_v38  ;;  %v3404_v22 = vadd.f32 %v3372_v42, %v9727_v57  ;;  %v3494_v23 = vadd.f32 1.0, %v7362_v45  ;;  %v3525_v1 = vmul.f32 0.5, %v3493_v2  ;;  %v7135_v38 = vld [vmem:[%s11124_s14 + $0x20] sm:$0xff]  }
 0x524   : > { %v3528_v20 = vmul.f32 0.5, %v3496_v43  ;;  %v3433_v37 = vmul.f32 0.7978846, %v3401_v34  ;;  %v3402_v54 = vadd.f32 %v3370_v35, %v9732_v26  ;;  %v3559_v33 = vmul.f32 %v3527_v0, %v9685_v7  ;;  %6883 = vmatprep.subr.bf16.mxu1 %v7135_v38 }
 0x525   : > { %7363 = vtanh.f32 %v3435_v39  ;;  %v3436_v63 = vmul.f32 0.7978846, %v3404_v22  ;;  %v3526_v10 = vmul.f32 0.5, %v3494_v23  ;;  %v3557_v34 = vmul.f32 %v3525_v1, %v9688_v19  ;;  %v7136_v19 = vld [vmem:[%s11124_s14 + $0x28] sm:$0xff]   ;;  %6884 = vmatpush3.bf16.msra.mxu1 %v7135_v38 }
 0x526   : > { %v3560_v32 = vmul.f32 %v3528_v20, %v9693_v51  ;;  %7365 = vtanh.f32 %v3433_v37  ;;  %v3434_v29 = vmul.f32 0.7978846, %v3402_v54  ;;  %6885 = vmatprep.subr.bf16.mxu1 %v7136_v19  ;;  %v7137_v54 = vld [vmem:[%s11124_s14 + $0x30] sm:$0xff]  }
 0x527   : > { %7367 = vtanh.f32 %v3436_v63  ;;  %v3558_v35 = vmul.f32 %v3526_v10, %v9698_v52 }
 0x528   : > { %v3590_v43 = vpack.c.bf16 %v3560_v32, %v3559_v33  ;;  %7369 = vtanh.f32 %v3434_v29  ;;  %v6805_v42 = vpop.f32.mrb[56].mxu1 }
 0x529   : > { %v9760_v62 = vadd.f32 %v6805_v42, %v9682_v13  ;;  %v3206_v7 = vpop.f32.mrb[57].mxu1  ;;  %v3589_v51 = vpack.c.bf16 %v3558_v35, %v3557_v34  ;;  %6886 = vmatpush3.bf16.msra.mxu1 %v7136_v19 }
 0x52a   : > { %v9763_v2 = vadd.f32 %v9682_v13, %v3206_v7  ;;  %v6806_v45 = vpop.f32.mrb[58].mxu1  ;;  %6887 = vmatprep.subr.bf16.mxu1 %v7137_v54 }
 0x52b   : > { %v3311_v52 = vmul.f32 %v9760_v62, %v9760_v62  ;;  %v9771_v0 = vadd.f32 %v6806_v45, %v9682_v13  ;;  %v3209_v39 = vpop.f32.mrb[59].mxu1  ;;  %6843 = vmatprep.mubr.bf16.mxu0 %v3589_v51 }
 0x52c   : > { %v3309_v27 = vmul.f32 %v9763_v2, %v9763_v2  ;;  %v9776_v22 = vadd.f32 %v9682_v13, %v3209_v39  ;;  %6844 = vmatmul.mubr.bf16.vlgmr.msra.gmra.mrb[48].mxu0 %v3590_v43 }
 0x52d   : > { %v3343_v23 = vmul.f32 %v3311_v52, %v9760_v62  ;;  %v3312_v1 = vmul.f32 %v9771_v0, %v9771_v0  ;;  %6888 = vmatpush3.bf16.msra.mxu1 %v7137_v54 }
 0x52e   : > { %v3341_v20 = vmul.f32 %v3309_v27, %v9763_v2  ;;  %v3310_v37 = vmul.f32 %v9776_v22, %v9776_v22 }
 0x52f   : > { %v7364_v63 = vpop.eup %7363  ;;  %v3375_v10 = vmul.f32 0.044715, %v3343_v23  ;;  %v3344_v33 = vmul.f32 %v3312_v1, %v9771_v0 }
 0x530   : > { %v7366_v32 = vpop.eup %7365  ;;  %v3373_v29 = vmul.f32 0.044715, %v3341_v20  ;;  %v3342_v34 = vmul.f32 %v3310_v37, %v9776_v22  ;;  %v3499_v35 = vadd.f32 1.0, %v7364_v63 }
 0x531   : > { %v7368_v38 = vpop.eup %7367  ;;  %v3407_v43 = vadd.f32 %v3375_v10, %v9760_v62  ;;  %v3376_v42 = vmul.f32 0.044715, %v3344_v33  ;;  %v3497_v7 = vadd.f32 1.0, %v7366_v32 }
 0x532   : > { %v7370_v51 = vpop.eup %7369  ;;  %v3405_v45 = vadd.f32 %v3373_v29, %v9763_v2  ;;  %v3374_v52 = vmul.f32 0.044715, %v3342_v34  ;;  %v3500_v39 = vadd.f32 1.0, %v7368_v38  ;;  %v3531_v27 = vmul.f32 0.5, %v3499_v35 }
 0x533   : > { %v3439_v23 = vmul.f32 0.7978846, %v3407_v43  ;;  %v3408_v1 = vadd.f32 %v3376_v42, %v9771_v0  ;;  %v3498_v20 = vadd.f32 1.0, %v7370_v51  ;;  %v3529_v18 = vmul.f32 0.5, %v3497_v7 }
 0x534   : > { %v3437_v37 = vmul.f32 0.7978846, %v3405_v45  ;;  %v3406_v63 = vadd.f32 %v3374_v52, %v9776_v22  ;;  %v3532_v16 = vmul.f32 0.5, %v3500_v39  ;;  %v3563_v32 = vmul.f32 %v3531_v27, %v9713_v3 }
 0x535   : > { %7371 = vtanh.f32 %v3439_v23  ;;  %v3440_v10 = vmul.f32 0.7978846, %v3408_v1  ;;  %v3530_v33 = vmul.f32 0.5, %v3498_v20  ;;  %v3561_v34 = vmul.f32 %v3529_v18, %v9716_v36 }
 0x536   : > { %7373 = vtanh.f32 %v3437_v37  ;;  %v3438_v19 = vmul.f32 0.7978846, %v3406_v63  ;;  %v3564_v29 = vmul.f32 %v3532_v16, %v9727_v57 }
 0x537   : > { %7375 = vtanh.f32 %v3440_v10  ;;  %v3562_v35 = vmul.f32 %v3530_v33, %v9732_v26 }
 0x538   : > { %7377 = vtanh.f32 %v3438_v19  ;;  %v6809_v38 = vpop.f32.mrb[60].mxu1  ;;  %v3592_v43 = vpack.c.bf16 %v3564_v29, %v3563_v32 }
 0x539   : > { %v9798_v42 = vadd.f32 %v6809_v38, %v9682_v13  ;;  %v3222_v7 = vpop.f32.mrb[61].mxu1  ;;  %v3591_v51 = vpack.c.bf16 %v3562_v35, %v3561_v34 }
 0x53a   : > { %v9801_v54 = vadd.f32 %v9682_v13, %v3222_v7  ;;  %v6810_v45 = vpop.f32.mrb[62].mxu1 }
 0x53b   : > { %v3315_v16 = vmul.f32 %v9798_v42, %v9798_v42  ;;  %v9806_v3 = vadd.f32 %v6810_v45, %v9682_v13  ;;  %v3225_v18 = vpop.f32.mrb[63].mxu1  ;;  %6847 = vmatprep.mubr.bf16.mxu0 %v3591_v51 }
 0x53c   : > { %v3313_v36 = vmul.f32 %v9801_v54, %v9801_v54  ;;  %v9811_v57 = vadd.f32 %v9682_v13, %v3225_v18  ;;  %6848 = vmatmul.mubr.bf16.gmra.mrb[52].mxu0 %v3592_v43 }
 0x53d   : > { %v3347_v26 = vmul.f32 %v3315_v16, %v9798_v42  ;;  %v3316_v52 = vmul.f32 %v9806_v3, %v9806_v3 }
 0x53e   : > { %v3345_v39 = vmul.f32 %v3313_v36, %v9801_v54  ;;  %v3314_v27 = vmul.f32 %v9811_v57, %v9811_v57 }
 0x53f   : > { %v7372_v23 = vpop.eup %7371  ;;  %v3379_v1 = vmul.f32 0.044715, %v3347_v26  ;;  %v3348_v20 = vmul.f32 %v3316_v52, %v9806_v3 }
 0x540   : > { %v7374_v37 = vpop.eup %7373  ;;  %v3377_v63 = vmul.f32 0.044715, %v3345_v39  ;;  %v3346_v10 = vmul.f32 %v3314_v27, %v9811_v57  ;;  %v3503_v33 = vadd.f32 1.0, %v7372_v23 }
 0x541   : > { %v7376_v19 = vpop.eup %7375  ;;  %v3411_v32 = vadd.f32 %v3379_v1, %v9798_v42  ;;  %v3380_v29 = vmul.f32 0.044715, %v3348_v20  ;;  %v3501_v34 = vadd.f32 1.0, %v7374_v37 }
 0x542   : > { %v7378_v35 = vpop.eup %7377  ;;  %v3409_v38 = vadd.f32 %v3377_v63, %v9801_v54  ;;  %v3378_v43 = vmul.f32 0.044715, %v3346_v10  ;;  %v3504_v7 = vadd.f32 1.0, %v7376_v19  ;;  %v3535_v51 = vmul.f32 0.5, %v3503_v33 }
 0x543   : > { %v3443_v45 = vmul.f32 0.7978846, %v3411_v32  ;;  %v3412_v16 = vadd.f32 %v3380_v29, %v9806_v3  ;;  %v3502_v18 = vadd.f32 1.0, %v7378_v35  ;;  %v3533_v36 = vmul.f32 0.5, %v3501_v34 }
 0x544   : > { %v3441_v26 = vmul.f32 0.7978846, %v3409_v38  ;;  %v3410_v52 = vadd.f32 %v3378_v43, %v9811_v57  ;;  %v3536_v39 = vmul.f32 0.5, %v3504_v7  ;;  %v3567_v20 = vmul.f32 %v3535_v51, %v9760_v62 }
 0x545   : > { %7379 = vtanh.f32 %v3443_v45  ;;  %v3444_v27 = vmul.f32 0.7978846, %v3412_v16  ;;  %v3534_v23 = vmul.f32 0.5, %v3502_v18  ;;  %v3565_v63 = vmul.f32 %v3533_v36, %v9763_v2 }
 0x546   : > { %7381 = vtanh.f32 %v3441_v26  ;;  %v3442_v1 = vmul.f32 0.7978846, %v3410_v52  ;;  %v3568_v37 = vmul.f32 %v3536_v39, %v9771_v0 }
 0x547   : > { %7383 = vtanh.f32 %v3444_v27  ;;  %v3566_v10 = vmul.f32 %v3534_v23, %v9776_v22 }
 0x548   : > { %7385 = vtanh.f32 %v3442_v1  ;;  %v6813_v33 = vpop.f32.mrb[64].mxu1  ;;  %v3594_v19 = vpack.c.bf16 %v3568_v37, %v3567_v20 }
 0x549   : > { %v9830_v32 = vadd.f32 %v6813_v33, %v9682_v13  ;;  %v3238_v29 = vpop.f32.mrb[65].mxu1  ;;  %v3593_v34 = vpack.c.bf16 %v3566_v10, %v3565_v63 }
 0x54a   : > { %v9833_v35 = vadd.f32 %v9682_v13, %v3238_v29  ;;  %v6814_v38 = vpop.f32.mrb[66].mxu1 }
 0x54b   : > { %v3319_v62 = vmul.f32 %v9830_v32, %v9830_v32  ;;  %v9838_v0 = vadd.f32 %v6814_v38, %v9682_v13  ;;  %v3241_v2 = vpop.f32.mrb[67].mxu1  ;;  %6851 = vmatprep.mubr.bf16.mxu0 %v3593_v34 }
 0x54c   : > { %v3317_v22 = vmul.f32 %v9833_v35, %v9833_v35  ;;  %v9843_v43 = vadd.f32 %v9682_v13, %v3241_v2  ;;  %6852 = vmatmul.mubr.bf16.gmra.mrb[56].mxu0 %v3594_v19 }
 0x54d   : > { %v3351_v7 = vmul.f32 %v3319_v62, %v9830_v32  ;;  %v3320_v51 = vmul.f32 %v9838_v0, %v9838_v0 }
 0x54e   : > { %v3349_v45 = vmul.f32 %v3317_v22, %v9833_v35  ;;  %v3318_v16 = vmul.f32 %v9843_v43, %v9843_v43 }
 0x54f   : > { %v7380_v18 = vpop.eup %7379  ;;  %v3383_v36 = vmul.f32 0.044715, %v3351_v7  ;;  %v3352_v26 = vmul.f32 %v3320_v51, %v9838_v0 }
 0x550   : > { %v7382_v52 = vpop.eup %7381  ;;  %v3381_v39 = vmul.f32 0.044715, %v3349_v45  ;;  %v3350_v27 = vmul.f32 %v3318_v16, %v9843_v43  ;;  %v3507_v23 = vadd.f32 1.0, %v7380_v18 }
 0x551   : > { %v7384_v1 = vpop.eup %7383  ;;  %v3415_v20 = vadd.f32 %v3383_v36, %v9830_v32  ;;  %v3384_v37 = vmul.f32 0.044715, %v3352_v26  ;;  %v3505_v63 = vadd.f32 1.0, %v7382_v52 }
 0x552   : > { %v7386_v10 = vpop.eup %7385  ;;  %v3413_v33 = vadd.f32 %v3381_v39, %v9833_v35  ;;  %v3382_v19 = vmul.f32 0.044715, %v3350_v27  ;;  %v3508_v29 = vadd.f32 1.0, %v7384_v1  ;;  %v3539_v34 = vmul.f32 0.5, %v3507_v23 }
 0x553   : > { %v3447_v38 = vmul.f32 0.7978846, %v3415_v20  ;;  %v3416_v62 = vadd.f32 %v3384_v37, %v9838_v0  ;;  %v3506_v2 = vadd.f32 1.0, %v7386_v10  ;;  %v3537_v22 = vmul.f32 0.5, %v3505_v63 }
 0x554   : > { %v3445_v7 = vmul.f32 0.7978846, %v3413_v33  ;;  %v3414_v51 = vadd.f32 %v3382_v19, %v9843_v43  ;;  %v3540_v45 = vmul.f32 0.5, %v3508_v29  ;;  %v3571_v26 = vmul.f32 %v3539_v34, %v9798_v42 }
 0x555   : > { %7387 = vtanh.f32 %v3447_v38  ;;  %v3448_v16 = vmul.f32 0.7978846, %v3416_v62  ;;  %v3538_v18 = vmul.f32 0.5, %v3506_v2  ;;  %v3569_v39 = vmul.f32 %v3537_v22, %v9801_v54 }
 0x556   : > { %7389 = vtanh.f32 %v3445_v7  ;;  %v3446_v36 = vmul.f32 0.7978846, %v3414_v51  ;;  %v3572_v52 = vmul.f32 %v3540_v45, %v9806_v3 }
 0x557   : > { %7391 = vtanh.f32 %v3448_v16  ;;  %v3570_v27 = vmul.f32 %v3538_v18, %v9811_v57 }
 0x558   : > { %7393 = vtanh.f32 %v3446_v36  ;;  %v6817_v23 = vpop.f32.mrb[68].mxu1  ;;  %v3596_v1 = vpack.c.bf16 %v3572_v52, %v3571_v26 }
 0x559   : > { %v9862_v20 = vadd.f32 %v6817_v23, %v9682_v13  ;;  %v3254_v37 = vpop.f32.mrb[69].mxu1  ;;  %v3595_v63 = vpack.c.bf16 %v3570_v27, %v3569_v39 }
 0x55a   : > { %v9865_v10 = vadd.f32 %v9682_v13, %v3254_v37  ;;  %v6818_v33 = vpop.f32.mrb[70].mxu1 }
 0x55b   : > { %v3323_v42 = vmul.f32 %v9862_v20, %v9862_v20  ;;  %v9870_v3 = vadd.f32 %v6818_v33, %v9682_v13  ;;  %v3257_v54 = vpop.f32.mrb[71].mxu1  ;;  %6855 = vmatprep.mubr.bf16.mxu0 %v3595_v63 }
 0x55c   : > { %v3321_v57 = vmul.f32 %v9865_v10, %v9865_v10  ;;  %v9875_v19 = vadd.f32 %v9682_v13, %v3257_v54  ;;  %6856 = vmatmul.mubr.bf16.gmra.mrb[60].mxu0 %v3596_v1 }
 0x55d   : > { %v3355_v29 = vmul.f32 %v3323_v42, %v9862_v20  ;;  %v3324_v34 = vmul.f32 %v9870_v3, %v9870_v3 }
 0x55e   : > { %v3353_v38 = vmul.f32 %v3321_v57, %v9865_v10  ;;  %v3322_v62 = vmul.f32 %v9875_v19, %v9875_v19 }
 0x55f   : > { %v7388_v2 = vpop.eup %7387  ;;  %v3387_v22 = vmul.f32 0.044715, %v3355_v29  ;;  %v3356_v7 = vmul.f32 %v3324_v34, %v9870_v3 }
 0x560   : > { %v7390_v51 = vpop.eup %7389  ;;  %v3385_v45 = vmul.f32 0.044715, %v3353_v38  ;;  %v3354_v16 = vmul.f32 %v3322_v62, %v9875_v19  ;;  %v3511_v18 = vadd.f32 1.0, %v7388_v2 }
 0x561   : > { %v7392_v36 = vpop.eup %7391  ;;  %v3419_v26 = vadd.f32 %v3387_v22, %v9862_v20  ;;  %v3388_v52 = vmul.f32 0.044715, %v3356_v7  ;;  %v3509_v39 = vadd.f32 1.0, %v7390_v51 }
 0x562   : > { %v7394_v27 = vpop.eup %7393  ;;  %v3417_v23 = vadd.f32 %v3385_v45, %v9865_v10  ;;  %v3386_v1 = vmul.f32 0.044715, %v3354_v16  ;;  %v3512_v37 = vadd.f32 1.0, %v7392_v36  ;;  %v3543_v63 = vmul.f32 0.5, %v3511_v18 }
 0x563   : > { %v3451_v33 = vmul.f32 0.7978846, %v3419_v26  ;;  %v3420_v42 = vadd.f32 %v3388_v52, %v9870_v3  ;;  %v3510_v54 = vadd.f32 1.0, %v7394_v27  ;;  %v3541_v57 = vmul.f32 0.5, %v3509_v39 }
 0x564   : > { %v3449_v29 = vmul.f32 0.7978846, %v3417_v23  ;;  %v3418_v34 = vadd.f32 %v3386_v1, %v9875_v19  ;;  %v3544_v38 = vmul.f32 0.5, %v3512_v37  ;;  %v3575_v7 = vmul.f32 %v3543_v63, %v9830_v32 }
 0x565   : > { %7395 = vtanh.f32 %v3451_v33  ;;  %v3452_v62 = vmul.f32 0.7978846, %v3420_v42  ;;  %v3542_v2 = vmul.f32 0.5, %v3510_v54  ;;  %v3573_v16 = vmul.f32 %v3541_v57, %v9833_v35 }
 0x566   : > { %7397 = vtanh.f32 %v3449_v29  ;;  %v3450_v22 = vmul.f32 0.7978846, %v3418_v34  ;;  %v3576_v51 = vmul.f32 %v3544_v38, %v9838_v0 }
 0x567   : > { %7399 = vtanh.f32 %v3452_v62  ;;  %v3574_v18 = vmul.f32 %v3542_v2, %v9843_v43 }
 0x568   : > { %v6821_v45 = vpop.f32.mrb[72].mxu1  ;;  %7401 = vtanh.f32 %v3450_v22  ;;  %v3598_v52 = vpack.c.bf16 %v3576_v51, %v3575_v7 }
 0x569   : > { %v9894_v36 = vadd.f32 %v6821_v45, %v9682_v13  ;;  %v3270_v26 = vpop.f32.mrb[73].mxu1  ;;  %v3597_v23 = vpack.c.bf16 %v3574_v18, %v3573_v16 }
 0x56a   : > { %v9897_v39 = vadd.f32 %v9682_v13, %v3270_v26  ;;  %v6822_v27 = vpop.f32.mrb[74].mxu1 }
 0x56b   : > { %v3327_v32 = vmul.f32 %v9894_v36, %v9894_v36  ;;  %v9902_v0 = vadd.f32 %v6822_v27, %v9682_v13  ;;  %v3273_v35 = vpop.f32.mrb[75].mxu1  ;;  %6859 = vmatprep.mubr.bf16.mxu0 %v3597_v23 }
 0x56c   : > { %v3325_v43 = vmul.f32 %v9897_v39, %v9897_v39  ;;  %v9907_v1 = vadd.f32 %v9682_v13, %v3273_v35  ;;  %6860 = vmatmul.mubr.bf16.gmra.mrb[64].mxu0 %v3598_v52 }
 0x56d   : > { %v3359_v37 = vmul.f32 %v3327_v32, %v9894_v36  ;;  %v3328_v63 = vmul.f32 %v9902_v0, %v9902_v0 }
 0x56e   : > { %v3357_v33 = vmul.f32 %v3325_v43, %v9897_v39  ;;  %v3326_v42 = vmul.f32 %v9907_v1, %v9907_v1 }
 0x56f   : > { %v3391_v54 = vmul.f32 0.044715, %v3359_v37  ;;  %v3360_v57 = vmul.f32 %v3328_v63, %v9902_v0  ;;  %v7396_v29 = vpop.eup %7395 }
 0x570   : > { %v3389_v34 = vmul.f32 0.044715, %v3357_v33  ;;  %v3358_v38 = vmul.f32 %v3326_v42, %v9907_v1  ;;  %v7398_v62 = vpop.eup %7397  ;;  %v3515_v7 = vadd.f32 1.0, %v7396_v29 }
 0x571   : > { %v3423_v2 = vadd.f32 %v3391_v54, %v9894_v36  ;;  %v3392_v22 = vmul.f32 0.044715, %v3360_v57  ;;  %v7400_v51 = vpop.eup %7399  ;;  %v3513_v18 = vadd.f32 1.0, %v7398_v62 }
 0x572   : > { %v3421_v45 = vadd.f32 %v3389_v34, %v9897_v39  ;;  %v3390_v16 = vmul.f32 0.044715, %v3358_v38  ;;  %v7402_v26 = vpop.eup %7401  ;;  %v3516_v23 = vadd.f32 1.0, %v7400_v51  ;;  %v3547_v32 = vmul.f32 0.5, %v3515_v7 }
 0x573   : > { %v3455_v52 = vmul.f32 0.7978846, %v3423_v2  ;;  %v3424_v27 = vadd.f32 %v3392_v22, %v9902_v0  ;;  %v3514_v37 = vadd.f32 1.0, %v7402_v26  ;;  %v3545_v63 = vmul.f32 0.5, %v3513_v18 }
 0x574   : > { %v3453_v35 = vmul.f32 0.7978846, %v3421_v45  ;;  %v3422_v43 = vadd.f32 %v3390_v16, %v9907_v1  ;;  %v3548_v42 = vmul.f32 0.5, %v3516_v23  ;;  %v3579_v34 = vmul.f32 %v3547_v32, %v9862_v20 }
 0x575   : > { %7403 = vtanh.f32 %v3455_v52  ;;  %v3456_v33 = vmul.f32 0.7978846, %v3424_v27  ;;  %v3546_v57 = vmul.f32 0.5, %v3514_v37  ;;  %v3577_v22 = vmul.f32 %v3545_v63, %v9865_v10 }
 0x576   : > { %7405 = vtanh.f32 %v3453_v35  ;;  %v3454_v54 = vmul.f32 0.7978846, %v3422_v43  ;;  %v3580_v38 = vmul.f32 %v3548_v42, %v9870_v3 }
 0x577   : > { %7407 = vtanh.f32 %v3456_v33  ;;  %v6825_v29 = vpop.f32.mrb[76].mxu1  ;;  %v3578_v7 = vmul.f32 %v3546_v57, %v9875_v19 }
 0x578   : > { %7409 = vtanh.f32 %v3454_v54  ;;  %v9924_v62 = vadd.f32 %v6825_v29, %v9682_v13  ;;  %v3286_v2 = vpop.f32.mrb[77].mxu1  ;;  %v3600_v16 = vpack.c.bf16 %v3580_v38, %v3579_v34 }
 0x579   : > { %v9929_v51 = vadd.f32 %v9682_v13, %v3286_v2  ;;  %v6826_v45 = vpop.f32.mrb[78].mxu1  ;;  %v3599_v26 = vpack.c.bf16 %v3578_v7, %v3577_v22 }
 0x57a   : > { %v3331_v18 = vmul.f32 %v9924_v62, %v9924_v62  ;;  %v9934_v20 = vadd.f32 %v6826_v45, %v9682_v13  ;;  %v3289_v3 = vpop.f32.mrb[79].mxu1 }
 0x57b   : > { %v3329_v52 = vmul.f32 %v9929_v51, %v9929_v51  ;;  %v9939_v10 = vadd.f32 %v9682_v13, %v3289_v3  ;;  %6863 = vmatprep.mubr.bf16.mxu0 %v3599_v26 }
 0x57c   : > { %v3363_v19 = vmul.f32 %v3331_v18, %v9924_v62  ;;  %v3332_v27 = vmul.f32 %v9934_v20, %v9934_v20  ;;  %6864 = vmatmul.mubr.bf16.gmra.mrb[68].mxu0 %v3600_v16 }
 0x57d   : > { %v3361_v23 = vmul.f32 %v3329_v52, %v9929_v51  ;;  %v3330_v32 = vmul.f32 %v9939_v10, %v9939_v10 }
 0x57e   : > { %v3395_v35 = vmul.f32 0.044715, %v3363_v19  ;;  %v3364_v43 = vmul.f32 %v3332_v27, %v9934_v20 }
 0x57f   : > { %v7404_v37 = vpop.eup %7403  ;;  %v3393_v63 = vmul.f32 0.044715, %v3361_v23  ;;  %v3362_v13 = vmul.f32 %v3330_v32, %v9939_v10 }
 0x580   : > { %v7406_v33 = vpop.eup %7405  ;;  %v3427_v42 = vadd.f32 %v3395_v35, %v9924_v62  ;;  %v3396_v54 = vmul.f32 0.044715, %v3364_v43  ;;  %v3519_v57 = vadd.f32 1.0, %v7404_v37 }
 0x581   : > { %v7408_v29 = vpop.eup %7407  ;;  %v3425_v34 = vadd.f32 %v3393_v63, %v9929_v51  ;;  %v3394_v38 = vmul.f32 0.044715, %v3362_v13  ;;  %v3517_v2 = vadd.f32 1.0, %v7406_v33  ;;  %v7138_v33 = vld [vmem:[%s11124_s14 + $0x38] sm:$0xff]  }
 0x582   : > { %v7410_v22 = vpop.eup %7409  ;;  %v3459_v7 = vmul.f32 0.7978846, %v3427_v42  ;;  %v3428_v45 = vadd.f32 %v3396_v54, %v9934_v20  ;;  %v3520_v16 = vadd.f32 1.0, %v7408_v29  ;;  %v3551_v18 = vmul.f32 0.5, %v3519_v57  ;;  %6889 = vmatprep.subr.bf16.mxu1 %v7138_v33 }
 0x583   : > { %v3457_v3 = vmul.f32 0.7978846, %v3425_v34  ;;  %v3426_v26 = vadd.f32 %v3394_v38, %v9939_v10  ;;  %v3518_v52 = vadd.f32 1.0, %v7410_v22  ;;  %v3549_v19 = vmul.f32 0.5, %v3517_v2  ;;  %6890 = vmatpush3.bf16.msra.mxu1 %v7138_v33  ;;  %v11523_v33 = vld [vmem:[#allocation74_spill] sm:$0xff] }
 0x584   : > { %7411 = vtanh.f32 %v3459_v7  ;;  %v3460_v27 = vmul.f32 0.7978846, %v3428_v45  ;;  %v3552_v23 = vmul.f32 0.5, %v3520_v16  ;;  %v3583_v43 = vmul.f32 %v3551_v18, %v9894_v36 }
 0x585   : > { %7413 = vtanh.f32 %v3457_v3  ;;  %v3458_v32 = vmul.f32 0.7978846, %v3426_v26  ;;  %v3550_v35 = vmul.f32 0.5, %v3518_v52  ;;  %v3581_v63 = vmul.f32 %v3549_v19, %v9897_v39 }
 0x586   : > { %7415 = vtanh.f32 %v3460_v27  ;;  %v3584_v37 = vmul.f32 %v3552_v23, %v9902_v0  ;;  %v9967_v27 = vld [vmem:[%s11123_s13] ss:$0 sm:$0xff] }
 0x587   : > { %7417 = vtanh.f32 %v3458_v32  ;;  %v3582_v13 = vmul.f32 %v3550_v35, %v9907_v1 }
 0x588   : > { %v3602_v42 = vpack.c.bf16 %v3584_v37, %v3583_v43 }
 0x589   : > { %v3601_v54 = vpack.c.bf16 %v3582_v13, %v3581_v63  ;;  %v11522_v63 = vld [vmem:[#allocation73_spill] sm:$0xff] }
 0x58b   : > { %6867 = vmatprep.mubr.bf16.mxu0 %v3601_v54 }
 0x58c   : > { %6868 = vmatmul.mubr.bf16.gmra.mrb[72].mxu0 %v3602_v42 }
 0x58e   : > { %v7412_v57 = vpop.eup %7411 }
 0x58f   : > { %v7414_v29 = vpop.eup %7413  ;;  %v3523_v36 = vadd.f32 1.0, %v7412_v57 }
 0x590   : > { %v7416_v34 = vpop.eup %7415  ;;  %v3521_v0 = vadd.f32 1.0, %v7414_v29 }
 0x591   : > { %v7418_v38 = vpop.eup %7417  ;;  %v3524_v2 = vadd.f32 1.0, %v7416_v34  ;;  %v3555_v39 = vmul.f32 0.5, %v3523_v36 }
 0x592   : > { %v3522_v22 = vadd.f32 1.0, %v7418_v38  ;;  %v3553_v1 = vmul.f32 0.5, %v3521_v0 }
 0x593   : > { %v3556_v7 = vmul.f32 0.5, %v3524_v2  ;;  %v3587_v16 = vmul.f32 %v3555_v39, %v9924_v62 }
 0x594   : > { %v3554_v45 = vmul.f32 0.5, %v3522_v22  ;;  %v3585_v3 = vmul.f32 %v3553_v1, %v9929_v51 }
 0x595   : > { %v3588_v18 = vmul.f32 %v3556_v7, %v9934_v20 }
 0x596   : > { %v3586_v26 = vmul.f32 %v3554_v45, %v9939_v10 }
 0x597   : > { %v3604_v52 = vpack.c.bf16 %v3588_v18, %v3587_v16 }
 0x598   : > { %v3603_v19 = vpack.c.bf16 %v3586_v26, %v3585_v3 }
 0x59a   : > { %6871 = vmatprep.mubr.bf16.mxu0 %v3603_v19 }
 0x59b   : > { %6872 = vmatmul.mubr.bf16.gmra.mrb[76].mxu0 %v3604_v52 }
 0x5ff   : > { %v6845_v23 = vpop.f32.mrb[48].mxu0 }
 0x600   : > { %v3719_v32 = vadd.f32 %v6845_v23, %v9967_v27  ;;  %v3710_v35 = vpop.f32.mrb[49].mxu0 }
 0x601   : > { %v3711_v62 = vadd.f32 %v9967_v27, %v3710_v35  ;;  %v6846_v20 = vpop.f32.mrb[50].mxu0 }
 0x602   : > { %v3722_v51 = vadd.f32 %v6846_v20, %v9967_v27  ;;  %v3713_v43 = vpop.f32.mrb[51].mxu0  ;;  %v3839_v37 = vadd.f32 %v3719_v32, %v9082_v24 }
 0x603   : > { %v3714_v10 = vadd.f32 %v9967_v27, %v3713_v43  ;;  %v3837_v42 = vadd.f32 %v3711_v62, %v11523_v33 }
 0x604   : > { %v3840_v13 = vadd.f32 %v3722_v51, %v11522_v63 }
 0x605   : > { %v3838_v54 = vadd.f32 %v3714_v10, %v9112_v17 }
 0x606   : > { %v3870_v57 = vpack.c.bf16 %v3840_v13, %v3839_v37 }
 0x607   : > { %v3869_v29 = vpack.c.bf16 %v3838_v54, %v3837_v42 }
 0x609   : > { %6891 = vmatprep.mubr.bf16.mxu1 %v3869_v29 }
 0x60a   : > { %6892 = vmatmul.mubr.bf16.vlgmr.msra.gmra.mrb[80].mxu1 %v3870_v57 }
 0x60f   : > { %v6849_v36 = vpop.f32.mrb[52].mxu0 }
 0x610   : > { %v3735_v34 = vadd.f32 %v6849_v36, %v9967_v27  ;;  %v3726_v0 = vpop.f32.mrb[53].mxu0 }
 0x611   : > { %v3727_v38 = vadd.f32 %v9967_v27, %v3726_v0  ;;  %v6850_v2 = vpop.f32.mrb[54].mxu0 }
 0x612   : > { %v3738_v39 = vadd.f32 %v6850_v2, %v9967_v27  ;;  %v3729_v22 = vpop.f32.mrb[55].mxu0  ;;  %v3843_v7 = vadd.f32 %v3735_v34, %v9187_v61 }
 0x613   : > { %v3730_v1 = vadd.f32 %v9967_v27, %v3729_v22  ;;  %v3841_v16 = vadd.f32 %v3727_v38, %v9200_v6 }
 0x614   : > { %v3844_v45 = vadd.f32 %v3738_v39, %v9204_v49 }
 0x615   : > { %v3842_v18 = vadd.f32 %v3730_v1, %v9208_v55 }
 0x616   : > { %v3872_v3 = vpack.c.bf16 %v3844_v45, %v3843_v7 }
 0x617   : > { %v3871_v26 = vpack.c.bf16 %v3842_v18, %v3841_v16 }
 0x619   : > { %6895 = vmatprep.mubr.bf16.mxu1 %v3871_v26 }
 0x61a   : > { %6896 = vmatmul.mubr.bf16.gmra.mrb[84].mxu1 %v3872_v3 }
 0x61f   : > { %v6853_v52 = vpop.f32.mrb[56].mxu0 }
 0x620   : > { %v3751_v19 = vadd.f32 %v6853_v52, %v9967_v27  ;;  %v3742_v23 = vpop.f32.mrb[57].mxu0 }
 0x621   : > { %v3743_v32 = vadd.f32 %v9967_v27, %v3742_v23  ;;  %v6854_v35 = vpop.f32.mrb[58].mxu0 }
 0x622   : > { %v3754_v62 = vadd.f32 %v6854_v35, %v9967_v27  ;;  %v3745_v20 = vpop.f32.mrb[59].mxu0  ;;  %v3847_v43 = vadd.f32 %v3751_v19, %v9258_v21 }
 0x623   : > { %v3746_v51 = vadd.f32 %v9967_v27, %v3745_v20  ;;  %v3845_v37 = vadd.f32 %v3743_v32, %v9284_v25 }
 0x624   : > { %v3848_v10 = vadd.f32 %v3754_v62, %v9268_v14 }
 0x625   : > { %v3846_v13 = vadd.f32 %v3746_v51, %v9288_v31 }
 0x626   : > { %v3874_v42 = vpack.c.bf16 %v3848_v10, %v3847_v43 }
 0x627   : > { %v3873_v54 = vpack.c.bf16 %v3846_v13, %v3845_v37 }
 0x629   : > { %6899 = vmatprep.mubr.bf16.mxu1 %v3873_v54 }
 0x62a   : > { %6900 = vmatmul.mubr.bf16.gmra.mrb[88].mxu1 %v3874_v42 }
 0x62f   : > { %v6857_v57 = vpop.f32.mrb[60].mxu0 }
 0x630   : > { %v3767_v29 = vadd.f32 %v6857_v57, %v9967_v27  ;;  %v3758_v36 = vpop.f32.mrb[61].mxu0 }
 0x631   : > { %v3759_v34 = vadd.f32 %v9967_v27, %v3758_v36  ;;  %v6858_v0 = vpop.f32.mrb[62].mxu0 }
 0x632   : > { %v3770_v38 = vadd.f32 %v6858_v0, %v9967_v27  ;;  %v3761_v2 = vpop.f32.mrb[63].mxu0  ;;  %v3851_v22 = vadd.f32 %v3767_v29, %v9347_v48 }
 0x633   : > { %v3762_v39 = vadd.f32 %v9967_v27, %v3761_v2  ;;  %v3849_v7 = vadd.f32 %v3759_v34, %v9360_v5 }
 0x634   : > { %v3852_v1 = vadd.f32 %v3770_v38, %v9364_v44 }
 0x635   : > { %v3850_v45 = vadd.f32 %v3762_v39, %v9368_v30 }
 0x636   : > { %v3876_v16 = vpack.c.bf16 %v3852_v1, %v3851_v22 }
 0x637   : > { %v3875_v18 = vpack.c.bf16 %v3850_v45, %v3849_v7 }
 0x639   : > { %6903 = vmatprep.mubr.bf16.mxu1 %v3875_v18 }
 0x63a   : > { %6904 = vmatmul.mubr.bf16.gmra.mrb[92].mxu1 %v3876_v16 }
 0x63f   : > { %v6861_v3 = vpop.f32.mrb[64].mxu0 }
 0x640   : > { %v3783_v26 = vadd.f32 %v6861_v3, %v9967_v27  ;;  %v3774_v52 = vpop.f32.mrb[65].mxu0 }
 0x641   : > { %v3775_v19 = vadd.f32 %v9967_v27, %v3774_v52  ;;  %v6862_v23 = vpop.f32.mrb[66].mxu0 }
 0x642   : > { %v3786_v32 = vadd.f32 %v6862_v23, %v9967_v27  ;;  %v3777_v35 = vpop.f32.mrb[67].mxu0  ;;  %v3855_v20 = vadd.f32 %v3783_v26, %v9418_v9 }
 0x643   : > { %v3778_v62 = vadd.f32 %v9967_v27, %v3777_v35  ;;  %v3853_v43 = vadd.f32 %v3775_v19, %v9444_v4 }
 0x644   : > { %v3856_v51 = vadd.f32 %v3786_v32, %v9428_v53 }
 0x645   : > { %v3854_v10 = vadd.f32 %v3778_v62, %v9448_v56 }
 0x646   : > { %v3878_v37 = vpack.c.bf16 %v3856_v51, %v3855_v20 }
 0x647   : > { %v3877_v13 = vpack.c.bf16 %v3854_v10, %v3853_v43 }
 0x649   : > { %6907 = vmatprep.mubr.bf16.mxu1 %v3877_v13 }
 0x64a   : > { %6908 = vmatmul.mubr.bf16.gmra.mrb[96].mxu1 %v3878_v37 }
 0x64f   : > { %v6865_v42 = vpop.f32.mrb[68].mxu0 }
 0x650   : > { %v3799_v54 = vadd.f32 %v6865_v42, %v9967_v27  ;;  %v3790_v57 = vpop.f32.mrb[69].mxu0 }
 0x651   : > { %v3791_v29 = vadd.f32 %v9967_v27, %v3790_v57  ;;  %v6866_v36 = vpop.f32.mrb[70].mxu0 }
 0x652   : > { %v3802_v34 = vadd.f32 %v6866_v36, %v9967_v27  ;;  %v3793_v0 = vpop.f32.mrb[71].mxu0  ;;  %v3859_v2 = vadd.f32 %v3799_v54, %v9507_v41 }
 0x653   : > { %v3794_v38 = vadd.f32 %v9967_v27, %v3793_v0  ;;  %v3857_v22 = vadd.f32 %v3791_v29, %v9520_v58 }
 0x654   : > { %v3860_v39 = vadd.f32 %v3802_v34, %v9524_v8 }
 0x655   : > { %v3858_v1 = vadd.f32 %v3794_v38, %v9528_v60  ;;  %v11542_v60 = vld [vmem:[#allocation72_spill] sm:$0xff] }
 0x656   : > { %v3880_v7 = vpack.c.bf16 %v3860_v39, %v3859_v2 }
 0x657   : > { %v3879_v45 = vpack.c.bf16 %v3858_v1, %v3857_v22 }
 0x659   : > { %6911 = vmatprep.mubr.bf16.mxu1 %v3879_v45 }
 0x65a   : > { %6912 = vmatmul.mubr.bf16.gmra.mrb[100].mxu1 %v3880_v7 }
 0x65f   : > { %v6869_v16 = vpop.f32.mrb[72].mxu0 }
 0x660   : > { %v3815_v18 = vadd.f32 %v6869_v16, %v9967_v27  ;;  %v3806_v3 = vpop.f32.mrb[73].mxu0 }
 0x661   : > { %v3807_v26 = vadd.f32 %v9967_v27, %v3806_v3  ;;  %v6870_v52 = vpop.f32.mrb[74].mxu0 }
 0x662   : > { %v3818_v19 = vadd.f32 %v6870_v52, %v9967_v27  ;;  %v3809_v23 = vpop.f32.mrb[75].mxu0  ;;  %v3863_v35 = vadd.f32 %v3815_v18, %v9578_v12  ;;  %v11541_v12 = vld [vmem:[#allocation71_spill] sm:$0xff] }
 0x663   : > { %v3810_v32 = vadd.f32 %v9967_v27, %v3809_v23  ;;  %v3861_v20 = vadd.f32 %v3807_v26, %v9598_v40  ;;  %v11539_v40 = vld [vmem:[#allocation69_spill] sm:$0xff] }
 0x664   : > { %v3864_v62 = vadd.f32 %v3818_v19, %v9582_v15  ;;  %v11540_v15 = vld [vmem:[#allocation70_spill] sm:$0xff] }
 0x665   : > { %v3862_v51 = vadd.f32 %v3810_v32, %v9608_v59 }
 0x666   : > { %v3882_v43 = vpack.c.bf16 %v3864_v62, %v3863_v35 }
 0x667   : > { %v3881_v10 = vpack.c.bf16 %v3862_v51, %v3861_v20 }
 0x669   : > { %6915 = vmatprep.mubr.bf16.mxu1 %v3881_v10 }
 0x66a   : > { %6916 = vmatmul.mubr.bf16.gmra.mrb[104].mxu1 %v3882_v43 }
 0x66e   : > { %v6873_v37 = vpop.f32.mrb[76].mxu0 }
 0x66f   : > { %v3831_v13 = vadd.f32 %v6873_v37, %v9967_v27  ;;  %v3822_v42 = vpop.f32.mrb[77].mxu0  ;;  %v7139_v37 = vld [vmem:[%s11127_s17] sm:$0xff]  }
 0x670   : > { %v3823_v54 = vadd.f32 %v9967_v27, %v3822_v42  ;;  %v6874_v57 = vpop.f32.mrb[78].mxu0  ;;  %6923 = vmatprep.subr.bf16.mxu0 %v7139_v37 }
 0x671   : > { %v3834_v29 = vadd.f32 %v6874_v57, %v9967_v27  ;;  %v3825_v36 = vpop.f32.mrb[79].mxu0  ;;  %v3867_v0 = vadd.f32 %v3831_v13, %v9647_v47  ;;  %6924 = vmatpush3.bf16.msra.mxu0 %v7139_v37  ;;  %v7140_v57 = vld [vmem:[%s11127_s17 + $0x8] sm:$0xff]  }
 0x672   : > { %v3826_v34 = vadd.f32 %v9967_v27, %v3825_v36  ;;  %v3865_v2 = vadd.f32 %v3823_v54, %v9637_v46  ;;  %6925 = vmatprep.subr.bf16.mxu0 %v7140_v57  ;;  %v7141_v36 = vld [vmem:[%s11127_s17 + $0x10] sm:$0xff]  }
 0x673   : > { %v3868_v38 = vadd.f32 %v3834_v29, %v9653_v28 }
 0x674   : > { %v3866_v39 = vadd.f32 %v3826_v34, %v9641_v11 }
 0x675   : > { %v3884_v22 = vpack.c.bf16 %v3868_v38, %v3867_v0  ;;  %6926 = vmatpush3.bf16.msra.mxu0 %v7140_v57  ;;  %v7142_v38 = vld [vmem:[%s11127_s17 + $0x18] sm:$0xff]  }
 0x676   : > { %v3883_v1 = vpack.c.bf16 %v3866_v39, %v3865_v2  ;;  %6927 = vmatprep.subr.bf16.mxu0 %v7141_v36 }
 0x678   : > { %6919 = vmatprep.mubr.bf16.mxu1 %v3883_v1 }
 0x679   : > { %6920 = vmatmul.mubr.bf16.gmra.mrb[108].mxu1 %v3884_v22  ;;  %6928 = vmatpush3.bf16.msra.mxu0 %v7141_v36  ;;  %v7143_v22 = vld [vmem:[%s11127_s17 + $0x20] sm:$0xff]  }
 0x67a   : > { %6929 = vmatprep.subr.bf16.mxu0 %v7142_v38 }
 0x67d   : > { %6930 = vmatpush3.bf16.msra.mxu0 %v7142_v38 }
 0x67e   : > { %6931 = vmatprep.subr.bf16.mxu0 %v7143_v22 }
 0x681   : > { %6932 = vmatpush3.bf16.msra.mxu0 %v7143_v22 }
 0x6dd   : > { %v10033_v7 = vpop.f32.mrb[80].mxu1 }
 0x6de   : > { %4178 = vadd.xlane.f32.xlu0 %v10033_v7  ;;  %v10036_v45 = vpop.f32.mrb[81].mxu1  ;;  %v4272_v18 = vmul.f32 %v10033_v7, %v10033_v7 }
 0x6df   : > { %v10038_v16 = vpop.f32.mrb[82].mxu1  ;;  %v4270_v26 = vmul.f32 %v10036_v45, %v10036_v45 }
 0x6e0   : > { %4180 = vadd.xlane.f32.xlu1 %v10038_v16  ;;  %v10041_v27 = vpop.f32.mrb[83].mxu1  ;;  %v4273_v3 = vmul.f32 %v10038_v16, %v10038_v16 }
 0x6e1   : > { %v4271_v52 = vmul.f32 %v10041_v27, %v10041_v27 }
 0x6e2   : > { %4174 = vadd.xlane.f32.xlu0 %v10036_v45 }
 0x6e4   : > { %4176 = vadd.xlane.f32.xlu1 %v10041_v27 }
 0x6e6   : > { %4306 = vadd.xlane.f32.xlu0 %v4272_v18 }
 0x6e8   : > { %4308 = vadd.xlane.f32.xlu1 %v4273_v3 }
 0x6ea   : > { %4302 = vadd.xlane.f32.xlu0 %v4270_v26  ;;  %v7144_v26 = vld [vmem:[%s11127_s17 + $0x28] sm:$0xff]  }
 0x6eb   : > { %6933 = vmatprep.subr.bf16.mxu0 %v7144_v26 }
 0x6ec   : > { %4304 = vadd.xlane.f32.xlu1 %v4271_v52  ;;  %6934 = vmatpush3.bf16.msra.mxu0 %v7144_v26 }
 0x6ed   : > { %v10053_v19 = vpop.f32.mrb[84].mxu1 }
 0x6ee   : > { %4186 = vadd.xlane.f32.xlu0 %v10053_v19  ;;  %v10056_v23 = vpop.f32.mrb[85].mxu1  ;;  %v4276_v62 = vmul.f32 %v10053_v19, %v10053_v19 }
 0x6ef   : > { %v10058_v32 = vpop.f32.mrb[86].mxu1  ;;  %v4274_v51 = vmul.f32 %v10056_v23, %v10056_v23 }
 0x6f0   : > { %4188 = vadd.xlane.f32.xlu1 %v10058_v32  ;;  %v10061_v35 = vpop.f32.mrb[87].mxu1  ;;  %v4277_v20 = vmul.f32 %v10058_v32, %v10058_v32 }
 0x6f1   : > { %v4275_v43 = vmul.f32 %v10061_v35, %v10061_v35 }
 0x6f2   : > { %4182 = vadd.xlane.f32.xlu0 %v10056_v23 }
 0x6f4   : > { %4184 = vadd.xlane.f32.xlu1 %v10061_v35 }
 0x6f6   : > { %4314 = vadd.xlane.f32.xlu0 %v4276_v62  ;;  %v7145_v62 = vld [vmem:[%s11127_s17 + $0x30] sm:$0xff]  }
 0x6f7   : > { %6935 = vmatprep.subr.bf16.mxu0 %v7145_v62 }
 0x6f8   : > { %4316 = vadd.xlane.f32.xlu1 %v4277_v20  ;;  %6936 = vmatpush3.bf16.msra.mxu0 %v7145_v62 }
 0x6fa   : > { %4310 = vadd.xlane.f32.xlu0 %v4274_v51 }
 0x6fc   : > { %4312 = vadd.xlane.f32.xlu1 %v4275_v43  ;;  %v7146_v43 = vld [vmem:[%s11127_s17 + $0x38] sm:$0xff]  }
 0x6fd   : > { %v10073_v10 = vpop.f32.mrb[88].mxu1  ;;  %6937 = vmatprep.subr.bf16.mxu0 %v7146_v43 }
 0x6fe   : > { %4194 = vadd.xlane.f32.xlu0 %v10073_v10  ;;  %v10079_v13 = vpop.f32.mrb[89].mxu1  ;;  %v4280_v29 = vmul.f32 %v10073_v10, %v10073_v10  ;;  %6938 = vmatpush3.bf16.msra.mxu0 %v7146_v43 }
 0x6ff   : > { %v10081_v42 = vpop.f32.mrb[90].mxu1  ;;  %v4278_v0 = vmul.f32 %v10079_v13, %v10079_v13 }
 0x700   : > { %4196 = vadd.xlane.f32.xlu1 %v10081_v42  ;;  %v10084_v54 = vpop.f32.mrb[91].mxu1  ;;  %v4281_v34 = vmul.f32 %v10081_v42, %v10081_v42 }
 0x701   : > { %v4279_v2 = vmul.f32 %v10084_v54, %v10084_v54 }
 0x702   : > { %4190 = vadd.xlane.f32.xlu0 %v10079_v13 }
 0x704   : > { %4192 = vadd.xlane.f32.xlu1 %v10084_v54 }
 0x706   : > { %4322 = vadd.xlane.f32.xlu0 %v4280_v29 }
 0x708   : > { %4324 = vadd.xlane.f32.xlu1 %v4281_v34 }
 0x70a   : > { %4318 = vadd.xlane.f32.xlu0 %v4278_v0 }
 0x70c   : > { %4320 = vadd.xlane.f32.xlu1 %v4279_v2 }
 0x70d   : > { %v10105_v39 = vpop.f32.mrb[92].mxu1 }
 0x70e   : > { %4202 = vadd.xlane.f32.xlu0 %v10105_v39  ;;  %v10111_v1 = vpop.f32.mrb[93].mxu1  ;;  %v4284_v52 = vmul.f32 %v10105_v39, %v10105_v39 }
 0x70f   : > { %v10113_v18 = vpop.f32.mrb[94].mxu1  ;;  %v4282_v51 = vmul.f32 %v10111_v1, %v10111_v1 }
 0x710   : > { %4204 = vadd.xlane.f32.xlu1 %v10113_v18  ;;  %v10116_v3 = vpop.f32.mrb[95].mxu1  ;;  %v4285_v20 = vmul.f32 %v10113_v18, %v10113_v18 }
 0x711   : > { %v4283_v37 = vmul.f32 %v10116_v3, %v10116_v3 }
 0x712   : > { %4198 = vadd.xlane.f32.xlu0 %v10111_v1 }
 0x714   : > { %4200 = vadd.xlane.f32.xlu1 %v10116_v3 }
 0x716   : > { %4330 = vadd.xlane.f32.xlu0 %v4284_v52 }
 0x718   : > { %4332 = vadd.xlane.f32.xlu1 %v4285_v20 }
 0x71a   : > { %4326 = vadd.xlane.f32.xlu0 %v4282_v51 }
 0x71c   : > { %4328 = vadd.xlane.f32.xlu1 %v4283_v37 }
 0x71d   : > { %v10137_v57 = vpop.f32.mrb[96].mxu1 }
 0x71e   : > { %4210 = vadd.xlane.f32.xlu0 %v10137_v57  ;;  %v10140_v29 = vpop.f32.mrb[97].mxu1  ;;  %v4288_v0 = vmul.f32 %v10137_v57, %v10137_v57 }
 0x71f   : > { %11524 = vst [vmem:[#allocation66_spill] sm:$0xff] %v10140_v29  ;;  %v10142_v36 = vpop.f32.mrb[98].mxu1  ;;  %v4286_v2 = vmul.f32 %v10140_v29, %v10140_v29 }
 0x720   : > { %11525 = vst [vmem:[#allocation68_spill] sm:$0xff] %v10142_v36  ;;  %4212 = vadd.xlane.f32.xlu1 %v10142_v36  ;;  %v10145_v34 = vpop.f32.mrb[99].mxu1  ;;  %v4289_v38 = vmul.f32 %v10142_v36, %v10142_v36 }
 0x721   : > { %11526 = vst [vmem:[#allocation65_spill] sm:$0xff] %v10145_v34  ;;  %v4287_v22 = vmul.f32 %v10145_v34, %v10145_v34 }
 0x722   : > { %4206 = vadd.xlane.f32.xlu0 %v10140_v29  ;;  %v11547_v29 = vld [vmem:[#allocation10_spill] sm:$0xff] }
 0x724   : > { %4208 = vadd.xlane.f32.xlu1 %v10145_v34 }
 0x726   : > { %4338 = vadd.xlane.f32.xlu0 %v4288_v0 }
 0x728   : > { %4340 = vadd.xlane.f32.xlu1 %v4289_v38 }
 0x72a   : > { %4334 = vadd.xlane.f32.xlu0 %v4286_v2 }
 0x72c   : > { %4336 = vadd.xlane.f32.xlu1 %v4287_v22 }
 0x72d   : > { %v10157_v26 = vpop.f32.mrb[100].mxu1 }
 0x72e   : > { %11527 = vst [vmem:[#allocation67_spill] sm:$0xff] %v10157_v26  ;;  %4218 = vadd.xlane.f32.xlu0 %v10157_v26  ;;  %v10160_v52 = vpop.f32.mrb[101].mxu1  ;;  %v4292_v51 = vmul.f32 %v10157_v26, %v10157_v26 }
 0x72f   : > { %11528 = vst [vmem:[#allocation73_spill] sm:$0xff] %v10160_v52  ;;  %v10162_v62 = vpop.f32.mrb[102].mxu1  ;;  %v4290_v37 = vmul.f32 %v10160_v52, %v10160_v52 }
 0x730   : > { %11529 = vst [vmem:[#allocation74_spill] sm:$0xff] %v10162_v62  ;;  %4220 = vadd.xlane.f32.xlu1 %v10162_v62  ;;  %v10165_v20 = vpop.f32.mrb[103].mxu1  ;;  %v4293_v43 = vmul.f32 %v10162_v62, %v10162_v62 }
 0x731   : > { %11530 = vst [vmem:[#allocation86_spill] sm:$0xff] %v10165_v20  ;;  %v4291_v0 = vmul.f32 %v10165_v20, %v10165_v20 }
 0x732   : > { %4214 = vadd.xlane.f32.xlu0 %v10160_v52 }
 0x734   : > { %4216 = vadd.xlane.f32.xlu1 %v10165_v20 }
 0x736   : > { %4346 = vadd.xlane.f32.xlu0 %v4292_v51 }
 0x738   : > { %4348 = vadd.xlane.f32.xlu1 %v4293_v43 }
 0x73a   : > { %4342 = vadd.xlane.f32.xlu0 %v4290_v37 }
 0x73c   : > { %4344 = vadd.xlane.f32.xlu1 %v4291_v0 }
 0x73d   : > { %v10177_v38 = vpop.f32.mrb[104].mxu1 }
 0x73e   : > { %11531 = vst [vmem:[#allocation87_spill] sm:$0xff] %v10177_v38  ;;  %v10179_v2 = vpop.f32.mrb[105].mxu1  ;;  %4226 = vadd.xlane.f32.xlu0 %v10177_v38  ;;  %v4296_v51 = vmul.f32 %v10177_v38, %v10177_v38 }
 0x73f   : > { %11532 = vst [vmem:[#allocation88_spill] sm:$0xff] %v10179_v2  ;;  %v10182_v22 = vpop.f32.mrb[106].mxu1  ;;  %v4294_v37 = vmul.f32 %v10179_v2, %v10179_v2 }
 0x740   : > { %11533 = vst [vmem:[#allocation89_spill] sm:$0xff] %v10182_v22  ;;  %v10184_v28 = vpop.f32.mrb[107].mxu1  ;;  %4228 = vadd.xlane.f32.xlu1 %v10182_v22  ;;  %v4297_v43 = vmul.f32 %v10182_v22, %v10182_v22 }
 0x741   : > { %11534 = vst [vmem:[#allocation90_spill] sm:$0xff] %v10184_v28  ;;  %v4295_v0 = vmul.f32 %v10184_v28, %v10184_v28 }
 0x742   : > { %4222 = vadd.xlane.f32.xlu0 %v10179_v2 }
 0x744   : > { %4224 = vadd.xlane.f32.xlu1 %v10184_v28 }
 0x746   : > { %4354 = vadd.xlane.f32.xlu0 %v4296_v51 }
 0x748   : > { %4356 = vadd.xlane.f32.xlu1 %v4297_v43 }
 0x74a   : > { %4350 = vadd.xlane.f32.xlu0 %v4294_v37 }
 0x74c   : > { %v10197_v47 = vpop.f32.mrb[108].mxu1  ;;  %4352 = vadd.xlane.f32.xlu1 %v4295_v0 }
 0x74d   : > { %11535 = vst [vmem:[#allocation91_spill] sm:$0xff] %v10197_v47  ;;  %v10199_v11 = vpop.f32.mrb[109].mxu1  ;;  %v4300_v37 = vmul.f32 %v10197_v47, %v10197_v47 }
 0x74e   : > { %11536 = vst [vmem:[#allocation92_spill] sm:$0xff] %v10199_v11  ;;  %v10201_v46 = vpop.f32.mrb[110].mxu1  ;;  %4234 = vadd.xlane.f32.xlu0 %v10197_v47  ;;  %v4298_v51 = vmul.f32 %v10199_v11, %v10199_v11 }
 0x74f   : > { %11537 = vst [vmem:[#allocation93_spill] sm:$0xff] %v10201_v46  ;;  %v10204_v59 = vpop.f32.mrb[111].mxu1  ;;  %v4301_v0 = vmul.f32 %v10201_v46, %v10201_v46 }
 0x750   : > { %11538 = vst [vmem:[#allocation94_spill] sm:$0xff] %v10204_v59  ;;  %4236 = vadd.xlane.f32.xlu1 %v10201_v46  ;;  %v4299_v43 = vmul.f32 %v10204_v59, %v10204_v59  ;;  %v11543_v46 = vld [vmem:[#allocation6_spill] sm:$0xff] }
 0x752   : > { %4230 = vadd.xlane.f32.xlu0 %v10199_v11 }
 0x754   : > { %4232 = vadd.xlane.f32.xlu1 %v10204_v59 }
 0x756   : > { %4358 = vadd.xlane.f32.xlu0 %v4298_v51 }
 0x758   : > { %4360 = vadd.xlane.f32.xlu1 %v4299_v43 }
 0x75a   : > { %4362 = vadd.xlane.f32.xlu0 %v4300_v37 }
 0x75c   : > { %4364 = vadd.xlane.f32.xlu1 %v4301_v0 }
 0x76b   : > { %v4179_v28 = vpop.xlane.xlu0 %4178 }
 0x76c   : > { %v4240_v22 = vadd.f32 %v4179_v28, %v11539_v40 }
 0x76d   : > { %v4181_v2 = vpop.xlane.xlu1 %4180 }
 0x76e   : > { %v4241_v38 = vadd.f32 %v4181_v2, %v11540_v15  ;;  %v10220_v51 = vmul.f32 0.0125, %v4240_v22  ;;  %v11544_v15 = vld [vmem:[#allocation5_spill] sm:$0xff]  ;;  %v11545_v22 = vld [vmem:[#allocation4_spill] sm:$0xff] }
 0x76f   : > { %v4175_v11 = vpop.xlane.xlu0 %4174 }
 0x770   : > { %v4238_v20 = vadd.f32 %v4175_v11, %v11541_v12  ;;  %v10223_v62 = vmul.f32 0.0125, %v4241_v38  ;;  %v4496_v40 = vmul.f32 %v10220_v51, %v10220_v51 }
 0x771   : > { %v4177_v59 = vpop.xlane.xlu1 %4176 }
 0x772   : > { %v4239_v47 = vadd.f32 %v4177_v59, %v11542_v60  ;;  %v10226_v0 = vmul.f32 0.0125, %v4238_v20  ;;  %v4497_v60 = vmul.f32 %v10223_v62, %v10223_v62 }
 0x773   : > { %v4307_v43 = vpop.xlane.xlu0 %4306 }
 0x774   : > { %v4368_v37 = vadd.f32 %v4307_v43, %v11543_v46  ;;  %v10231_v12 = vmul.f32 0.0125, %v4239_v47  ;;  %v4494_v46 = vmul.f32 %v10226_v0, %v10226_v0 }
 0x775   : > { %v4309_v8 = vpop.xlane.xlu1 %4308 }
 0x776   : > { %v4464_v28 = vmul.f32 0.0125, %v4368_v37  ;;  %v4369_v2 = vadd.f32 %v4309_v8, %v11544_v15  ;;  %v11546_v37 = vld [vmem:[#allocation3_spill] sm:$0xff]  ;;  %v4495_v8 = vmul.f32 %v10231_v12, %v10231_v12 }
 0x777   : > { %v4303_v11 = vpop.xlane.xlu0 %4302 }
 0x778   : > { %v4528_v59 = vsub.f32 %v4464_v28, %v4496_v40  ;;  %v4465_v38 = vmul.f32 0.0125, %v4369_v2  ;;  %v4366_v52 = vadd.f32 %v4303_v11, %v11545_v22 }
 0x779   : > { %v4305_v20 = vpop.xlane.xlu1 %4304 }
 0x77a   : > { %v4560_v43 = vmax.f32 %v4528_v59, 0.0  ;;  %v4529_v58 = vsub.f32 %v4465_v38, %v4497_v60  ;;  %v4462_v26 = vmul.f32 0.0125, %v4366_v52  ;;  %v4367_v41 = vadd.f32 %v4305_v20, %v11546_v37  ;;  %v11548_v38 = vld [vmem:[#allocation9_spill] sm:$0xff] }
 0x77b   : > { %v4187_v47 = vpop.xlane.xlu0 %4186 }
 0x77c   : > { %v4624_v15 = vadd.f32 1e-05, %v4560_v43  ;;  %v4561_v34 = vmax.f32 %v4529_v58, 0.0  ;;  %v4526_v56 = vsub.f32 %v4462_v26, %v4494_v46  ;;  %v4463_v40 = vmul.f32 0.0125, %v4367_v41  ;;  %v11549_v43 = vld [vmem:[#allocation8_spill] sm:$0xff] }
 0x77d   : > { %v4189_v28 = vpop.xlane.xlu1 %4188  ;;  %v4244_v4 = vadd.f32 %v4187_v47, %v11547_v29  ;;  %v11551_v29 = vld [vmem:[#allocation14_spill] sm:$0xff] }
 0x77e   : > { %v4625_v2 = vadd.f32 1e-05, %v4561_v34  ;;  %v4558_v11 = vmax.f32 %v4526_v56, 0.0  ;;  %v4527_v22 = vsub.f32 %v4463_v40, %v4495_v8  ;;  %7419 = vrsqrt.f32 %v4624_v15  ;;  %v11550_v34 = vld [vmem:[#allocation7_spill] sm:$0xff]  ;;  %v11552_v40 = vld [vmem:[#allocation13_spill] sm:$0xff] }
 0x77f   : > { %v4183_v59 = vpop.xlane.xlu0 %4182  ;;  %v4245_v20 = vadd.f32 %v4189_v28, %v11548_v38  ;;  %v10244_v26 = vmul.f32 0.0125, %v4244_v4  ;;  %v10259_v4 = vadd.f32 %v10038_v16, %v11522_v63  ;;  %v11553_v38 = vld [vmem:[#allocation12_spill] sm:$0xff]  ;;  %v10274_v63 = vadd.f32 %v10041_v27, %v9112_v17 }
 0x780   : > { %7421 = vrsqrt.f32 %v4625_v2  ;;  %v4622_v52 = vadd.f32 1e-05, %v4558_v11  ;;  %v4559_v60 = vmax.f32 %v4527_v22, 0.0  ;;  %v4242_v58 = vadd.f32 %v4183_v59, %v11549_v43 }
 0x781   : > { %v4185_v37 = vpop.xlane.xlu1 %4184  ;;  %v10246_v56 = vmul.f32 0.0125, %v4245_v20  ;;  %v10255_v2 = vadd.f32 %v10033_v7, %v9082_v24  ;;  %v10270_v24 = vadd.f32 %v10036_v45, %v11523_v33  ;;  %v4593_v7 = vsub.f32 %v10259_v4, %v10223_v62 }
 0x782   : > { %7423 = vrsqrt.f32 %v4622_v52  ;;  %v4623_v36 = vadd.f32 1e-05, %v4559_v60  ;;  %v4243_v46 = vadd.f32 %v4185_v37, %v11550_v34  ;;  %v10250_v15 = vmul.f32 0.0125, %v4242_v58 }
 0x783   : > { %v4315_v41 = vpop.xlane.xlu0 %4314  ;;  %v4501_v59 = vmul.f32 %v10246_v56, %v10246_v56  ;;  %v4592_v33 = vsub.f32 %v10255_v2, %v10220_v51  ;;  %v4590_v17 = vsub.f32 %v10270_v24, %v10226_v0 }
 0x784   : > { %7425 = vrsqrt.f32 %v4623_v36  ;;  %v4372_v8 = vadd.f32 %v4315_v41, %v11551_v29  ;;  %v4500_v36 = vmul.f32 %v10244_v26, %v10244_v26  ;;  %v10265_v52 = vmul.f32 0.0125, %v4243_v46 }
 0x785   : > { %v4317_v47 = vpop.xlane.xlu1 %4316  ;;  %v4498_v41 = vmul.f32 %v10250_v15, %v10250_v15 }
 0x786   : > { %v4373_v28 = vadd.f32 %v4317_v47, %v11552_v40  ;;  %v4468_v11 = vmul.f32 0.0125, %v4372_v8  ;;  %v4499_v47 = vmul.f32 %v10265_v52, %v10265_v52 }
 0x787   : > { %v4311_v22 = vpop.xlane.xlu0 %4310 }
 0x788   : > { %v4469_v60 = vmul.f32 0.0125, %v4373_v28  ;;  %v4370_v20 = vadd.f32 %v4311_v22, %v11553_v38  ;;  %v7420_v37 = vpop.eup %7419  ;;  %v4532_v16 = vsub.f32 %v4468_v11, %v4500_v36  ;;  %v4591_v11 = vsub.f32 %v10274_v63, %v10231_v12 }
 0x789   : > { %v4313_v43 = vpop.xlane.xlu1 %4312 }
 0x78a   : > { %v7422_v58 = vpop.eup %7421  ;;  %v4533_v34 = vsub.f32 %v4469_v60, %v4501_v59  ;;  %v4466_v46 = vmul.f32 0.0125, %v4370_v20  ;;  %v4371_v29 = vadd.f32 %v4313_v43, %v9120_v50  ;;  %v4564_v27 = vmax.f32 %v4532_v16, 0.0  ;;  %v10293_v43 = vld [vmem:[%s11125_s15] ss:$0 sm:$0xff] }
 0x78b   : > { %v4689_v45 = vmul.f32 %v7422_v58, %v4593_v7  ;;  %v4195_v8 = vpop.xlane.xlu0 %4194  ;;  %v4688_v50 = vmul.f32 %v7420_v37, %v4592_v33  ;;  %v11554_v7 = vld [vmem:[#allocation11_spill] sm:$0xff] }
 0x78c   : > { %v7424_v62 = vpop.eup %7423  ;;  %v4565_v40 = vmax.f32 %v4533_v34, 0.0  ;;  %v4530_v28 = vsub.f32 %v4466_v46, %v4498_v41  ;;  %v4467_v36 = vmul.f32 0.0125, %v4371_v29  ;;  %v4628_v22 = vadd.f32 1e-05, %v4564_v27  ;;  %v11555_v29 = vld [vmem:[#allocation75_spill] sm:$0xff] }
 0x78d   : > { %v4197_v59 = vpop.xlane.xlu1 %4196  ;;  %v4686_v51 = vmul.f32 %v7424_v62, %v4590_v17  ;;  %v4248_v16 = vadd.f32 %v4195_v8, %v11554_v7  ;;  %v4728_v37 = vmul.f32 %v10293_v43, %v4689_v45  ;;  %v11556_v17 = vld [vmem:[#allocation16_spill] sm:$0xff]  ;;  %v10306_v45 = vld [vmem:[%s11126_s16] ss:$0 sm:$0xff] }
 0x78e   : > { %v7426_v60 = vpop.eup %7425  ;;  %v4629_v38 = vadd.f32 1e-05, %v4565_v40  ;;  %v4562_v0 = vmax.f32 %v4530_v28, 0.0  ;;  %v4531_v20 = vsub.f32 %v4467_v36, %v4499_v47  ;;  %7427 = vrsqrt.f32 %v4628_v22  ;;  %v11557_v36 = vld [vmem:[#allocation15_spill] sm:$0xff] }
 0x78f   : > { %v4191_v58 = vpop.xlane.xlu0 %4190  ;;  %v4687_v41 = vmul.f32 %v7426_v60, %v4591_v11  ;;  %v4725_v12 = vmul.f32 %v10293_v43, %v4686_v51  ;;  %v4249_v33 = vadd.f32 %v4197_v59, %v11555_v29  ;;  %v4727_v47 = vmul.f32 %v10293_v43, %v4688_v50  ;;  %v11558_v50 = vld [vmem:[#allocation76_spill] sm:$0xff] }
 0x790   : > { %7429 = vrsqrt.f32 %v4629_v38  ;;  %v4626_v34 = vadd.f32 1e-05, %v4562_v0  ;;  %v4563_v46 = vmax.f32 %v4531_v20, 0.0  ;;  %v4246_v27 = vadd.f32 %v4191_v58, %v11556_v17 }
 0x791   : > { %v4193_v8 = vpop.xlane.xlu1 %4192  ;;  %v4726_v62 = vmul.f32 %v10293_v43, %v4687_v41  ;;  %v10301_v28 = vmul.f32 0.0125, %v4248_v16  ;;  %v4764_v59 = vadd.f32 %v10306_v45, %v4725_v12  ;;  %v10311_v60 = vmul.f32 0.0125, %v4249_v33  ;;  %v11559_v12 = vld [vmem:[#allocation77_spill] sm:$0xff] }
 0x792   : > { %7431 = vrsqrt.f32 %v4626_v34  ;;  %v4627_v40 = vadd.f32 1e-05, %v4563_v46  ;;  %v4247_v11 = vadd.f32 %v4193_v8, %v11557_v36  ;;  %v4767_v0 = vadd.f32 %v10306_v45, %v4728_v37 }
 0x793   : > { %v4323_v22 = vpop.xlane.xlu0 %4322  ;;  %v4765_v51 = vadd.f32 %v10306_v45, %v4726_v62  ;;  %v10315_v20 = vmul.f32 0.0125, %v4246_v27  ;;  %v4766_v58 = vadd.f32 %v10306_v45, %v4727_v47  ;;  %v4504_v41 = vmul.f32 %v10301_v28, %v10301_v28  ;;  %v11560_v47 = vld [vmem:[#allocation18_spill] sm:$0xff] }
 0x794   : > { %7433 = vrsqrt.f32 %v4627_v40  ;;  %v4376_v38 = vadd.f32 %v4323_v22, %v11558_v50  ;;  %v10323_v29 = vadd.f32 %v10053_v19, %v9187_v61  ;;  %v10325_v33 = vmul.f32 0.0125, %v4247_v11 }
 0x795   : > { %v4325_v7 = vpop.xlane.xlu1 %4324  ;;  %v4796_v16 = vpack.c.bf16 %v4765_v51, %v4764_v59  ;;  %v4797_v37 = vpack.c.bf16 %v4767_v0, %v4766_v58  ;;  %v4505_v27 = vmul.f32 %v10311_v60, %v10311_v60  ;;  %v10332_v22 = vadd.f32 %v10056_v23, %v9200_v6 }
 0x796   : > { %v4472_v34 = vmul.f32 0.0125, %v4376_v38  ;;  %v4377_v46 = vadd.f32 %v4325_v7, %v11559_v12  ;;  %v10336_v61 = vadd.f32 %v10058_v32, %v9204_v49  ;;  %v10340_v19 = vadd.f32 %v10061_v35, %v9208_v55  ;;  %v11561_v7 = vld [vmem:[#allocation17_spill] sm:$0xff] }
 0x797   : > { %v4319_v17 = vpop.xlane.xlu0 %4318  ;;  %6939 = vmatprep.mubr.bf16.mxu0 %v4796_v16  ;;  %v4502_v11 = vmul.f32 %v10315_v20, %v10315_v20  ;;  %v4596_v23 = vsub.f32 %v10323_v29, %v10244_v26  ;;  %v4594_v55 = vsub.f32 %v10332_v22, %v10250_v15  ;;  %v4503_v32 = vmul.f32 %v10325_v33, %v10325_v33 }
 0x798   : > { %v4536_v8 = vsub.f32 %v4472_v34, %v4504_v41  ;;  %v4473_v62 = vmul.f32 0.0125, %v4377_v46  ;;  %v4374_v40 = vadd.f32 %v4319_v17, %v11560_v47  ;;  %v7428_v36 = vpop.eup %7427  ;;  %6940 = vmatmul.mubr.bf16.vlgmr.msra.gmra.mrb[80].mxu0 %v4797_v37  ;;  %v4597_v49 = vsub.f32 %v10336_v61, %v10246_v56  ;;  %v11562_v47 = vld [vmem:[#allocation78_spill] sm:$0xff] }
 0x799   : > { %v4321_v59 = vpop.xlane.xlu1 %4320  ;;  %v4595_v46 = vsub.f32 %v10340_v19, %v10265_v52  ;;  %v4692_v37 = vmul.f32 %v7428_v36, %v4596_v23 }
 0x79a   : > { %v7430_v51 = vpop.eup %7429  ;;  %v4568_v50 = vmax.f32 %v4536_v8, 0.0  ;;  %v4537_v38 = vsub.f32 %v4473_v62, %v4505_v27  ;;  %v4470_v0 = vmul.f32 0.0125, %v4374_v40  ;;  %v4375_v6 = vadd.f32 %v4321_v59, %v11561_v7 }
 0x79b   : > { %v4203_v35 = vpop.xlane.xlu0 %4202  ;;  %v4693_v27 = vmul.f32 %v7430_v51, %v4597_v49  ;;  %v4731_v51 = vmul.f32 %v10293_v43, %v4692_v37 }
 0x79c   : > { %v7432_v16 = vpop.eup %7431  ;;  %v4632_v58 = vadd.f32 1e-05, %v4568_v50  ;;  %v4569_v41 = vmax.f32 %v4537_v38, 0.0  ;;  %v4534_v34 = vsub.f32 %v4470_v0, %v4502_v11  ;;  %v4471_v12 = vmul.f32 0.0125, %v4375_v6  ;;  %v11563_v0 = vld [vmem:[#allocation79_spill] sm:$0xff] }
 0x79d   : > { %v4205_v17 = vpop.xlane.xlu1 %4204  ;;  %v4690_v26 = vmul.f32 %v7432_v16, %v4594_v55  ;;  %v4252_v40 = vadd.f32 %v4203_v35, %v11562_v47  ;;  %v4732_v23 = vmul.f32 %v10293_v43, %v4693_v27  ;;  %v11564_v55 = vld [vmem:[#allocation20_spill] sm:$0xff]  ;;  %v11567_v47 = vld [vmem:[#allocation81_spill] sm:$0xff] }
 0x79e   : > { %v7434_v56 = vpop.eup %7433  ;;  %v4633_v8 = vadd.f32 1e-05, %v4569_v41  ;;  %v4566_v62 = vmax.f32 %v4534_v34, 0.0  ;;  %v4535_v15 = vsub.f32 %v4471_v12, %v4503_v32  ;;  %7435 = vrsqrt.f32 %v4632_v58  ;;  %v11565_v12 = vld [vmem:[#allocation19_spill] sm:$0xff] }
 0x79f   : > { %v4199_v59 = vpop.xlane.xlu0 %4198  ;;  %v4691_v7 = vmul.f32 %v7434_v56, %v4595_v46  ;;  %v4729_v50 = vmul.f32 %v10293_v43, %v4690_v26  ;;  %v4253_v52 = vadd.f32 %v4205_v17, %v11563_v0  ;;  %v10362_v35 = vmul.f32 0.0125, %v4252_v40  ;;  %v11566_v17 = vld [vmem:[#allocation80_spill] sm:$0xff] }
 0x7a0   : > { %7437 = vrsqrt.f32 %v4633_v8  ;;  %v4630_v11 = vadd.f32 1e-05, %v4566_v62  ;;  %v4567_v38 = vmax.f32 %v4535_v15, 0.0  ;;  %v4250_v32 = vadd.f32 %v4199_v59, %v11564_v55 }
 0x7a1   : > { %v4201_v6 = vpop.xlane.xlu1 %4200  ;;  %v4730_v36 = vmul.f32 %v10293_v43, %v4691_v7  ;;  %v4768_v58 = vadd.f32 %v10306_v45, %v4729_v50  ;;  %v10366_v34 = vmul.f32 0.0125, %v4253_v52  ;;  %v4770_v56 = vadd.f32 %v10306_v45, %v4731_v51  ;;  %v11568_v52 = vld [vmem:[#allocation22_spill] sm:$0xff] }
 0x7a2   : > { %7439 = vrsqrt.f32 %v4630_v11  ;;  %v4631_v49 = vadd.f32 1e-05, %v4567_v38  ;;  %v4251_v46 = vadd.f32 %v4201_v6, %v11565_v12  ;;  %v4771_v8 = vadd.f32 %v10306_v45, %v4732_v23 }
 0x7a3   : > { %v4331_v16 = vpop.xlane.xlu0 %4330  ;;  %v4769_v41 = vadd.f32 %v10306_v45, %v4730_v36  ;;  %v10374_v62 = vadd.f32 %v10073_v10, %v9258_v21  ;;  %v10376_v15 = vmul.f32 0.0125, %v4250_v32  ;;  %v10381_v59 = vadd.f32 %v10081_v42, %v9268_v14 }
 0x7a4   : > { %7441 = vrsqrt.f32 %v4631_v49  ;;  %v4380_v26 = vadd.f32 %v4331_v16, %v11566_v17  ;;  %v4508_v7 = vmul.f32 %v10362_v35, %v10362_v35  ;;  %v4799_v38 = vpack.c.bf16 %v4771_v8, %v4770_v56 }
 0x7a5   : > { %v4333_v37 = vpop.xlane.xlu1 %4332  ;;  %v4798_v27 = vpack.c.bf16 %v4769_v41, %v4768_v58  ;;  %v4509_v0 = vmul.f32 %v10366_v34, %v10366_v34  ;;  %v10387_v21 = vmul.f32 0.0125, %v4251_v46  ;;  %v10392_v14 = vadd.f32 %v10079_v13, %v9284_v25  ;;  %v11569_v41 = vld [vmem:[#allocation21_spill] sm:$0xff] }
 0x7a6   : > { %v4381_v40 = vadd.f32 %v4333_v37, %v11567_v47  ;;  %v4476_v50 = vmul.f32 0.0125, %v4380_v26  ;;  %v10396_v42 = vadd.f32 %v10084_v54, %v9288_v31  ;;  %v4601_v51 = vsub.f32 %v10381_v59, %v10311_v60 }
 0x7a7   : > { %v4327_v11 = vpop.xlane.xlu0 %4326  ;;  %6943 = vmatprep.mubr.bf16.mxu0 %v4798_v27  ;;  %v4506_v32 = vmul.f32 %v10376_v15, %v10376_v15  ;;  %v4600_v25 = vsub.f32 %v10374_v62, %v10301_v28  ;;  %v4598_v31 = vsub.f32 %v10392_v14, %v10315_v20  ;;  %v4507_v17 = vmul.f32 %v10387_v21, %v10387_v21 }
 0x7a8   : > { %v4477_v10 = vmul.f32 0.0125, %v4381_v40  ;;  %v4378_v6 = vadd.f32 %v4327_v11, %v11568_v52  ;;  %v7436_v36 = vpop.eup %7435  ;;  %v4540_v23 = vsub.f32 %v4476_v50, %v4508_v7  ;;  %6944 = vmatmul.mubr.bf16.gmra.mrb[84].mxu0 %v4799_v38  ;;  %v4599_v56 = vsub.f32 %v10396_v42, %v10325_v33  ;;  %v11570_v38 = vld [vmem:[#allocation82_spill] sm:$0xff] }
 0x7a9   : > { %v4329_v49 = vpop.xlane.xlu1 %4328  ;;  %v4696_v28 = vmul.f32 %v7436_v36, %v4600_v25 }
 0x7aa   : > { %v7438_v55 = vpop.eup %7437  ;;  %v4541_v16 = vsub.f32 %v4477_v10, %v4509_v0  ;;  %v4474_v58 = vmul.f32 0.0125, %v4378_v6  ;;  %v4379_v12 = vadd.f32 %v4329_v49, %v11569_v41  ;;  %v4572_v13 = vmax.f32 %v4540_v23, 0.0  ;;  %v11571_v49 = vld [vmem:[#allocation83_spill] sm:$0xff] }
 0x7ab   : > { %v4211_v54 = vpop.xlane.xlu0 %4210  ;;  %v4697_v60 = vmul.f32 %v7438_v55, %v4601_v51  ;;  %v4735_v41 = vmul.f32 %v10293_v43, %v4696_v28 }
 0x7ac   : > { %v7440_v46 = vpop.eup %7439  ;;  %v4573_v26 = vmax.f32 %v4541_v16, 0.0  ;;  %v4538_v37 = vsub.f32 %v4474_v58, %v4506_v32  ;;  %v4475_v27 = vmul.f32 0.0125, %v4379_v12  ;;  %v4636_v8 = vadd.f32 1e-05, %v4572_v13  ;;  %v11572_v32 = vld [vmem:[#allocation24_spill] sm:$0xff] }
 0x7ad   : > { %v4213_v47 = vpop.xlane.xlu1 %4212  ;;  %v4694_v40 = vmul.f32 %v7440_v46, %v4598_v31  ;;  %v4256_v0 = vadd.f32 %v4211_v54, %v11570_v38  ;;  %v4736_v51 = vmul.f32 %v10293_v43, %v4697_v60  ;;  %v11573_v31 = vld [vmem:[#allocation23_spill] sm:$0xff] }
 0x7ae   : > { %v7442_v7 = vpop.eup %7441  ;;  %v4637_v50 = vadd.f32 1e-05, %v4573_v26  ;;  %v4570_v20 = vmax.f32 %v4538_v37, 0.0  ;;  %v4539_v11 = vsub.f32 %v4475_v27, %v4507_v17  ;;  %7443 = vrsqrt.f32 %v4636_v8  ;;  %v11574_v26 = vld [vmem:[#allocation84_spill] sm:$0xff] }
 0x7af   : > { %v4207_v10 = vpop.xlane.xlu0 %4206  ;;  %v4695_v52 = vmul.f32 %v7442_v7, %v4599_v56  ;;  %v4733_v6 = vmul.f32 %v10293_v43, %v4694_v40  ;;  %v4257_v55 = vadd.f32 %v4213_v47, %v11571_v49  ;;  %v10418_v25 = vmul.f32 0.0125, %v4256_v0 }
 0x7b0   : > { %7445 = vrsqrt.f32 %v4637_v50  ;;  %v4634_v23 = vadd.f32 1e-05, %v4570_v20  ;;  %v4571_v33 = vmax.f32 %v4539_v11, 0.0  ;;  %v4254_v36 = vadd.f32 %v4207_v10, %v11572_v32  ;;  %v11575_v50 = vld [vmem:[#allocation85_spill] sm:$0xff] }
 0x7b1   : > { %v4209_v16 = vpop.xlane.xlu1 %4208  ;;  %v4734_v58 = vmul.f32 %v10293_v43, %v4695_v52  ;;  %v4772_v60 = vadd.f32 %v10306_v45, %v4733_v6  ;;  %v10423_v17 = vmul.f32 0.0125, %v4257_v55  ;;  %v4775_v27 = vadd.f32 %v10306_v45, %v4736_v51 }
 0x7b2   : > { %7447 = vrsqrt.f32 %v4634_v23  ;;  %v4635_v12 = vadd.f32 1e-05, %v4571_v33  ;;  %v4255_v13 = vadd.f32 %v4209_v16, %v11573_v31  ;;  %v10427_v56 = vmul.f32 0.0125, %v4254_v36  ;;  %v11576_v23 = vld [vmem:[#allocation26_spill] sm:$0xff]  ;;  %v11577_v31 = vld [vmem:[#allocation51_spill] sm:$0xff] }
 0x7b3   : > { %v4339_v54 = vpop.xlane.xlu0 %4338  ;;  %v4773_v46 = vadd.f32 %v10306_v45, %v4734_v58  ;;  %v4774_v40 = vadd.f32 %v10306_v45, %v4735_v41  ;;  %v4512_v28 = vmul.f32 %v10418_v25, %v10418_v25  ;;  %v10435_v11 = vadd.f32 %v10105_v39, %v9347_v48 }
 0x7b4   : > { %7449 = vrsqrt.f32 %v4635_v12  ;;  %v4384_v37 = vadd.f32 %v4339_v54, %v11574_v26  ;;  %v10437_v38 = vmul.f32 0.0125, %v4255_v13  ;;  %v4513_v52 = vmul.f32 %v10423_v17, %v10423_v17 }
 0x7b5   : > { %v4341_v8 = vpop.xlane.xlu1 %4340  ;;  %v4800_v47 = vpack.c.bf16 %v4773_v46, %v4772_v60  ;;  %v4801_v10 = vpack.c.bf16 %v4775_v27, %v4774_v40  ;;  %v10444_v55 = vadd.f32 %v10111_v1, %v9360_v5  ;;  %v10448_v48 = vadd.f32 %v10113_v18, %v9364_v44 }
 0x7b6   : > { %v4480_v7 = vmul.f32 0.0125, %v4384_v37  ;;  %v4385_v20 = vadd.f32 %v4341_v8, %v11575_v50  ;;  %v10452_v39 = vadd.f32 %v10116_v3, %v9368_v30  ;;  %v4510_v32 = vmul.f32 %v10427_v56, %v10427_v56 }
 0x7b7   : > { %v4335_v0 = vpop.xlane.xlu0 %4334  ;;  %6947 = vmatprep.mubr.bf16.mxu0 %v4800_v47  ;;  %v4604_v1 = vsub.f32 %v10435_v11, %v10362_v35  ;;  %v4605_v44 = vsub.f32 %v10448_v48, %v10366_v34  ;;  %v4602_v30 = vsub.f32 %v10444_v55, %v10376_v15  ;;  %v4511_v18 = vmul.f32 %v10437_v38, %v10437_v38 }
 0x7b8   : > { %v4544_v6 = vsub.f32 %v4480_v7, %v4512_v28  ;;  %v4481_v51 = vmul.f32 0.0125, %v4385_v20  ;;  %v4382_v33 = vadd.f32 %v4335_v0, %v11576_v23  ;;  %v7444_v49 = vpop.eup %7443  ;;  %6948 = vmatmul.mubr.bf16.gmra.mrb[88].mxu0 %v4801_v10  ;;  %v4603_v37 = vsub.f32 %v10452_v39, %v10387_v21  ;;  %v11578_v7 = vld [vmem:[#allocation52_spill] sm:$0xff] }
 0x7b9   : > { %v4337_v36 = vpop.xlane.xlu1 %4336  ;;  %v4700_v8 = vmul.f32 %v7444_v49, %v4604_v1 }
 0x7ba   : > { %v7446_v16 = vpop.eup %7445  ;;  %v4576_v58 = vmax.f32 %v4544_v6, 0.0  ;;  %v4545_v41 = vsub.f32 %v4481_v51, %v4513_v52  ;;  %v4478_v12 = vmul.f32 0.0125, %v4382_v33  ;;  %v4383_v5 = vadd.f32 %v4337_v36, %v11577_v31  ;;  %v11579_v51 = vld [vmem:[#allocation25_spill] sm:$0xff] }
 0x7bb   : > { %v4219_v3 = vpop.xlane.xlu0 %4218  ;;  %v4701_v47 = vmul.f32 %v7446_v16, %v4605_v44  ;;  %v4739_v49 = vmul.f32 %v10293_v43, %v4700_v8  ;;  %v11580_v16 = vld [vmem:[#allocation30_spill] sm:$0xff]  ;;  %v11581_v44 = vld [vmem:[#allocation29_spill] sm:$0xff]  ;;  %v11584_v8 = vld [vmem:[#allocation68_spill] sm:$0xff] }
 0x7bc   : > { %v7448_v13 = vpop.eup %7447  ;;  %v4640_v54 = vadd.f32 1e-05, %v4576_v58  ;;  %v4577_v60 = vmax.f32 %v4545_v41, 0.0  ;;  %v4542_v46 = vsub.f32 %v4478_v12, %v4510_v32  ;;  %v4479_v26 = vmul.f32 0.0125, %v4383_v5 }
 0x7bd   : > { %v4221_v27 = vpop.xlane.xlu1 %4220  ;;  %v4698_v35 = vmul.f32 %v7448_v13, %v4602_v30  ;;  %v4260_v50 = vadd.f32 %v4219_v3, %v11578_v7  ;;  %v4740_v32 = vmul.f32 %v10293_v43, %v4701_v47  ;;  %v10493_v47 = vadd.f32 %v11584_v8, %v9428_v53 }
 0x7be   : > { %v7450_v34 = vpop.eup %7449  ;;  %v4641_v40 = vadd.f32 1e-05, %v4577_v60  ;;  %v4574_v28 = vmax.f32 %v4542_v46, 0.0  ;;  %v4543_v15 = vsub.f32 %v4479_v26, %v4511_v18  ;;  %7451 = vrsqrt.f32 %v4640_v54  ;;  %v11582_v18 = vld [vmem:[#allocation28_spill] sm:$0xff] }
 0x7bf   : > { %v4215_v20 = vpop.xlane.xlu0 %4214  ;;  %v4699_v0 = vmul.f32 %v7450_v34, %v4603_v37  ;;  %v4737_v10 = vmul.f32 %v10293_v43, %v4698_v35  ;;  %v4261_v21 = vadd.f32 %v4221_v27, %v11579_v51  ;;  %v10474_v41 = vmul.f32 0.0125, %v4260_v50  ;;  %v11583_v27 = vld [vmem:[#allocation27_spill] sm:$0xff]  ;;  %v11585_v50 = vld [vmem:[#allocation34_spill] sm:$0xff]  ;;  %v11589_v51 = vld [vmem:[#allocation65_spill] sm:$0xff] }
 0x7c0   : > { %7453 = vrsqrt.f32 %v4641_v40  ;;  %v4638_v52 = vadd.f32 1e-05, %v4574_v28  ;;  %v4575_v6 = vmax.f32 %v4543_v15, 0.0  ;;  %v4258_v58 = vadd.f32 %v4215_v20, %v11580_v16 }
 0x7c1   : > { %v4217_v23 = vpop.xlane.xlu1 %4216  ;;  %v4738_v33 = vmul.f32 %v10293_v43, %v4699_v0  ;;  %v4776_v31 = vadd.f32 %v10306_v45, %v4737_v10  ;;  %v10478_v1 = vmul.f32 0.0125, %v4261_v21  ;;  %v4778_v60 = vadd.f32 %v10306_v45, %v4739_v49  ;;  %v11586_v10 = vld [vmem:[#allocation53_spill] sm:$0xff] }
 0x7c2   : > { %7455 = vrsqrt.f32 %v4638_v52  ;;  %v4639_v36 = vadd.f32 1e-05, %v4575_v6  ;;  %v4259_v30 = vadd.f32 %v4217_v23, %v11581_v44  ;;  %v4779_v46 = vadd.f32 %v10306_v45, %v4740_v32  ;;  %v11587_v52 = vld [vmem:[#allocation66_spill] sm:$0xff]  ;;  %v11588_v6 = vld [vmem:[#allocation33_spill] sm:$0xff] }
 0x7c3   : > { %v4347_v12 = vpop.xlane.xlu0 %4346  ;;  %v4777_v5 = vadd.f32 %v10306_v45, %v4738_v33  ;;  %v10486_v26 = vadd.f32 %v10137_v57, %v9418_v9  ;;  %v10488_v37 = vmul.f32 0.0125, %v4258_v58  ;;  %v4516_v34 = vmul.f32 %v10474_v41, %v10474_v41 }
 0x7c4   : > { %7457 = vrsqrt.f32 %v4639_v36  ;;  %v4388_v3 = vadd.f32 %v4347_v12, %v11582_v18  ;;  %v4803_v15 = vpack.c.bf16 %v4779_v46, %v4778_v60  ;;  %v4517_v7 = vmul.f32 %v10478_v1, %v10478_v1  ;;  %v11590_v12 = vld [vmem:[#allocation55_spill] sm:$0xff] }
 0x7c5   : > { %v4349_v13 = vpop.xlane.xlu1 %4348  ;;  %v4802_v54 = vpack.c.bf16 %v4777_v5, %v4776_v31  ;;  %v10499_v9 = vmul.f32 0.0125, %v4259_v30  ;;  %v10504_v53 = vadd.f32 %v11587_v52, %v11586_v10  ;;  %v10508_v21 = vadd.f32 %v11589_v51, %v11588_v6  ;;  %v11592_v51 = vld [vmem:[#allocation54_spill] sm:$0xff] }
 0x7c6   : > { %v4389_v35 = vadd.f32 %v4349_v13, %v11583_v27  ;;  %v4484_v40 = vmul.f32 0.0125, %v4388_v3  ;;  %v4609_v23 = vsub.f32 %v10493_v47, %v10423_v17  ;;  %v4514_v36 = vmul.f32 %v10488_v37, %v10488_v37 }
 0x7c7   : > { %v4343_v28 = vpop.xlane.xlu0 %4342  ;;  %6951 = vmatprep.mubr.bf16.mxu0 %v4802_v54  ;;  %v4608_v5 = vsub.f32 %v10486_v26, %v10418_v25  ;;  %v4606_v44 = vsub.f32 %v10504_v53, %v10427_v56  ;;  %v4515_v13 = vmul.f32 %v10499_v9, %v10499_v9  ;;  %v4607_v27 = vsub.f32 %v10508_v21, %v10437_v38 }
 0x7c8   : > { %v4485_v57 = vmul.f32 0.0125, %v4389_v35  ;;  %v4386_v20 = vadd.f32 %v4343_v28, %v11585_v50  ;;  %v7452_v0 = vpop.eup %7451  ;;  %v4548_v33 = vsub.f32 %v4484_v40, %v4516_v34  ;;  %6952 = vmatmul.mubr.bf16.gmra.mrb[92].mxu0 %v4803_v15 }
 0x7c9   : > { %v4345_v49 = vpop.xlane.xlu1 %4344  ;;  %v4704_v25 = vmul.f32 %v7452_v0, %v4608_v5 }
 0x7ca   : > { %v7454_v32 = vpop.eup %7453  ;;  %v4549_v16 = vsub.f32 %v4485_v57, %v4517_v7  ;;  %v4482_v58 = vmul.f32 0.0125, %v4386_v20  ;;  %v4387_v31 = vadd.f32 %v4345_v49, %v11590_v12  ;;  %v4580_v30 = vmax.f32 %v4548_v33, 0.0  ;;  %v11591_v7 = vld [vmem:[#allocation32_spill] sm:$0xff]  ;;  %v11594_v12 = vld [vmem:[#allocation31_spill] sm:$0xff] }
 0x7cb   : > { %v4227_v18 = vpop.xlane.xlu0 %4226  ;;  %v4705_v17 = vmul.f32 %v7454_v32, %v4609_v23  ;;  %v11593_v33 = vld [vmem:[#allocation56_spill] sm:$0xff] }
 0x7cc   : > { %v7456_v3 = vpop.eup %7455  ;;  %v4581_v54 = vmax.f32 %v4549_v16, 0.0  ;;  %v4546_v60 = vsub.f32 %v4482_v58, %v4514_v36  ;;  %v4483_v46 = vmul.f32 0.0125, %v4387_v31  ;;  %v4644_v35 = vadd.f32 1e-05, %v4580_v30 }
 0x7cd   : > { %v4229_v8 = vpop.xlane.xlu1 %4228  ;;  %v4702_v34 = vmul.f32 %v7456_v3, %v4606_v44  ;;  %v4264_v57 = vadd.f32 %v4227_v18, %v11591_v7  ;;  %v4744_v52 = vmul.f32 %v10293_v43, %v4705_v17  ;;  %v4743_v36 = vmul.f32 %v10293_v43, %v4704_v25  ;;  %v11595_v17 = vld [vmem:[#allocation38_spill] sm:$0xff] }
 0x7ce   : > { %v7458_v40 = vpop.eup %7457  ;;  %v4645_v28 = vadd.f32 1e-05, %v4581_v54  ;;  %v4578_v56 = vmax.f32 %v4546_v60, 0.0  ;;  %v4547_v15 = vsub.f32 %v4483_v46, %v4515_v13  ;;  %7459 = vrsqrt.f32 %v4644_v35 }
 0x7cf   : > { %v4223_v50 = vpop.xlane.xlu0 %4222  ;;  %v4703_v20 = vmul.f32 %v7458_v40, %v4607_v27  ;;  %v4741_v10 = vmul.f32 %v10293_v43, %v4702_v34  ;;  %v4265_v23 = vadd.f32 %v4229_v8, %v11592_v51  ;;  %v10530_v58 = vmul.f32 0.0125, %v4264_v57  ;;  %v11596_v34 = vld [vmem:[#allocation37_spill] sm:$0xff]  ;;  %v11597_v40 = vld [vmem:[#allocation36_spill] sm:$0xff]  ;;  %v11600_v51 = vld [vmem:[#allocation42_spill] sm:$0xff] }
 0x7d0   : > { %7461 = vrsqrt.f32 %v4645_v28  ;;  %v4642_v6 = vadd.f32 1e-05, %v4578_v56  ;;  %v4579_v38 = vmax.f32 %v4547_v15, 0.0  ;;  %v4262_v0 = vadd.f32 %v4223_v50, %v11593_v33  ;;  %v11598_v28 = vld [vmem:[#allocation67_spill] sm:$0xff] }
 0x7d1   : > { %v4225_v49 = vpop.xlane.xlu1 %4224  ;;  %v4742_v32 = vmul.f32 %v10293_v43, %v4703_v20  ;;  %v4780_v44 = vadd.f32 %v10306_v45, %v4741_v10  ;;  %v10535_v18 = vmul.f32 0.0125, %v4265_v23  ;;  %v4783_v13 = vadd.f32 %v10306_v45, %v4744_v52  ;;  %v11599_v52 = vld [vmem:[#allocation35_spill] sm:$0xff]  ;;  %v11601_v23 = vld [vmem:[#allocation73_spill] sm:$0xff] }
 0x7d2   : > { %7463 = vrsqrt.f32 %v4642_v6  ;;  %v4643_v16 = vadd.f32 1e-05, %v4579_v38  ;;  %v4263_v31 = vadd.f32 %v4225_v49, %v11594_v12  ;;  %v10539_v54 = vmul.f32 0.0125, %v4262_v0  ;;  %v11602_v0 = vld [vmem:[#allocation41_spill] sm:$0xff]  ;;  %v11603_v49 = vld [vmem:[#allocation74_spill] sm:$0xff] }
 0x7d3   : > { %v4355_v5 = vpop.xlane.xlu0 %4354  ;;  %v4781_v30 = vadd.f32 %v10306_v45, %v4742_v32  ;;  %v4782_v27 = vadd.f32 %v10306_v45, %v4743_v36  ;;  %v4520_v35 = vmul.f32 %v10530_v58, %v10530_v58  ;;  %v10547_v56 = vadd.f32 %v11598_v28, %v11597_v40  ;;  %v11604_v36 = vld [vmem:[#allocation57_spill] sm:$0xff] }
 0x7d4   : > { %7465 = vrsqrt.f32 %v4643_v16  ;;  %v4392_v3 = vadd.f32 %v4355_v5, %v11595_v17  ;;  %v10549_v15 = vmul.f32 0.0125, %v4263_v31  ;;  %v4521_v50 = vmul.f32 %v10535_v18, %v10535_v18  ;;  %v11605_v16 = vld [vmem:[#allocation86_spill] sm:$0xff] }
 0x7d5   : > { %v4357_v60 = vpop.xlane.xlu1 %4356  ;;  %v4804_v46 = vpack.c.bf16 %v4781_v30, %v4780_v44  ;;  %v4805_v57 = vpack.c.bf16 %v4783_v13, %v4782_v27  ;;  %v10556_v33 = vadd.f32 %v11601_v23, %v11600_v51  ;;  %v10560_v32 = vadd.f32 %v11603_v49, %v11602_v0  ;;  %v11606_v13 = vld [vmem:[#allocation40_spill] sm:$0xff] }
 0x7d6   : > { %v4488_v8 = vmul.f32 0.0125, %v4392_v3  ;;  %v4393_v25 = vadd.f32 %v4357_v60, %v11596_v34  ;;  %v10564_v12 = vadd.f32 %v11605_v16, %v11604_v36  ;;  %v4518_v31 = vmul.f32 %v10539_v54, %v10539_v54 }
 0x7d7   : > { %v4351_v7 = vpop.xlane.xlu0 %4350  ;;  %6955 = vmatprep.mubr.bf16.mxu0 %v4804_v46  ;;  %v4612_v46 = vsub.f32 %v10547_v56, %v10474_v41  ;;  %v4613_v27 = vsub.f32 %v10560_v32, %v10478_v1 }
 0x7d8   : > { %v4552_v20 = vsub.f32 %v4488_v8, %v4520_v35  ;;  %v4489_v10 = vmul.f32 0.0125, %v4393_v25  ;;  %v4390_v6 = vadd.f32 %v4351_v7, %v11599_v52  ;;  %v7460_v38 = vpop.eup %7459  ;;  %6956 = vmatmul.mubr.bf16.gmra.mrb[96].mxu0 %v4805_v57  ;;  %v4610_v35 = vsub.f32 %v10556_v33, %v10488_v37 }
 0x7d9   : > { %v4353_v5 = vpop.xlane.xlu1 %4352  ;;  %v4519_v8 = vmul.f32 %v10549_v15, %v10549_v15 }
 0x7da   : > { %v7462_v44 = vpop.eup %7461  ;;  %v4584_v30 = vmax.f32 %v4552_v20, 0.0  ;;  %v4553_v17 = vsub.f32 %v4489_v10, %v4521_v50  ;;  %v4486_v3 = vmul.f32 0.0125, %v4390_v6  ;;  %v4391_v60 = vadd.f32 %v4353_v5, %v11606_v13 }
 0x7db   : > { %v4235_v34 = vpop.xlane.xlu0 %4234  ;;  %v4611_v50 = vsub.f32 %v10564_v12, %v10499_v9  ;;  %v4708_v10 = vmul.f32 %v7460_v38, %v4612_v46  ;;  %v4709_v52 = vmul.f32 %v7462_v44, %v4613_v27  ;;  %v11610_v27 = vld [vmem:[#allocation39_spill] sm:$0xff] }
 0x7dc   : > { %v7464_v25 = vpop.eup %7463  ;;  %v4648_v40 = vadd.f32 1e-05, %v4584_v30  ;;  %v4585_v28 = vmax.f32 %v4553_v17, 0.0  ;;  %v4550_v7 = vsub.f32 %v4486_v3, %v4518_v31  ;;  %v4487_v57 = vmul.f32 0.0125, %v4391_v60  ;;  %v11607_v31 = vld [vmem:[#allocation58_spill] sm:$0xff] }
 0x7dd   : > { %v4237_v20 = vpop.xlane.xlu1 %4236  ;;  %v4706_v41 = vmul.f32 %v7464_v25, %v4610_v35  ;;  %v4747_v38 = vmul.f32 %v10293_v43, %v4708_v10  ;;  %v4748_v44 = vmul.f32 %v10293_v43, %v4709_v52  ;;  %v11608_v3 = vld [vmem:[#allocation59_spill] sm:$0xff]  ;;  %v11609_v60 = vld [vmem:[#allocation60_spill] sm:$0xff] }
 0x7de   : > { %v7466_v1 = vpop.eup %7465  ;;  %v4649_v6 = vadd.f32 1e-05, %v4585_v28  ;;  %v4582_v51 = vmax.f32 %v4550_v7, 0.0  ;;  %v4551_v37 = vsub.f32 %v4487_v57, %v4519_v8  ;;  %7467 = vrsqrt.f32 %v4648_v40  ;;  %v11611_v57 = vld [vmem:[#allocation44_spill] sm:$0xff] }
 0x7df   : > { %v4231_v23 = vpop.xlane.xlu0 %4230  ;;  %v4707_v0 = vmul.f32 %v7466_v1, %v4611_v50  ;;  %v4745_v49 = vmul.f32 %v10293_v43, %v4706_v41  ;;  %v4268_v13 = vadd.f32 %v4235_v34, %v11608_v3  ;;  %v4269_v35 = vadd.f32 %v4237_v20, %v11610_v27  ;;  %v11612_v1 = vld [vmem:[#allocation46_spill] sm:$0xff]  ;;  %v11613_v20 = vld [vmem:[#allocation87_spill] sm:$0xff] }
 0x7e0   : > { %7469 = vrsqrt.f32 %v4649_v6  ;;  %v4646_v36 = vadd.f32 1e-05, %v4582_v51  ;;  %v4583_v16 = vmax.f32 %v4551_v37, 0.0  ;;  %v4266_v5 = vadd.f32 %v4231_v23, %v11607_v31  ;;  %v11614_v51 = vld [vmem:[#allocation43_spill] sm:$0xff]  ;;  %v11615_v37 = vld [vmem:[#allocation89_spill] sm:$0xff] }
 0x7e1   : > { %v4233_v30 = vpop.xlane.xlu1 %4232  ;;  %v4746_v9 = vmul.f32 %v10293_v43, %v4707_v0  ;;  %v4784_v40 = vadd.f32 %v10306_v45, %v4745_v49  ;;  %v4786_v34 = vadd.f32 %v10306_v45, %v4747_v38  ;;  %v4787_v52 = vadd.f32 %v10306_v45, %v4748_v44  ;;  %v11616_v49 = vld [vmem:[#allocation45_spill] sm:$0xff]  ;;  %v11617_v38 = vld [vmem:[#allocation48_spill] sm:$0xff] }
 0x7e2   : > { %7471 = vrsqrt.f32 %v4646_v36  ;;  %v4647_v17 = vadd.f32 1e-05, %v4583_v16  ;;  %v4267_v46 = vadd.f32 %v4233_v30, %v11609_v60  ;;  %v10587_v8 = vmul.f32 0.0125, %v4266_v5  ;;  %v11618_v44 = vld [vmem:[#allocation88_spill] sm:$0xff]  ;;  %v11619_v60 = vld [vmem:[#allocation61_spill] sm:$0xff] }
 0x7e3   : > { %v4359_v25 = vpop.xlane.xlu0 %4358  ;;  %v4785_v28 = vadd.f32 %v10306_v45, %v4746_v9  ;;  %v10598_v6 = vadd.f32 %v11613_v20, %v11612_v1  ;;  %v10602_v23 = vadd.f32 %v11615_v37, %v11614_v51  ;;  %v10604_v0 = vmul.f32 0.0125, %v4268_v13  ;;  %v11622_v20 = vld [vmem:[#allocation47_spill] sm:$0xff] }
 0x7e4   : > { %7473 = vrsqrt.f32 %v4647_v17  ;;  %v10591_v7 = vmul.f32 0.0125, %v4267_v46  ;;  %v4394_v50 = vadd.f32 %v4359_v25, %v11611_v57  ;;  %v10607_v16 = vmul.f32 0.0125, %v4269_v35  ;;  %v11620_v35 = vld [vmem:[#allocation63_spill] sm:$0xff]  ;;  %v11621_v25 = vld [vmem:[#allocation90_spill] sm:$0xff] }
 0x7e5   : > { %v4361_v41 = vpop.xlane.xlu1 %4360  ;;  %v4806_v10 = vpack.c.bf16 %v4785_v28, %v4784_v40  ;;  %v4522_v31 = vmul.f32 %v10587_v8, %v10587_v8  ;;  %v4807_v9 = vpack.c.bf16 %v4787_v52, %v4786_v34  ;;  %v10613_v17 = vadd.f32 %v11618_v44, %v11617_v38 }
 0x7e6   : > { %v4395_v36 = vadd.f32 %v4361_v41, %v11616_v49  ;;  %v4490_v5 = vmul.f32 0.0125, %v4394_v50  ;;  %v4523_v3 = vmul.f32 %v10591_v7, %v10591_v7  ;;  %v10620_v40 = vadd.f32 %v11621_v25, %v11620_v35 }
 0x7e7   : > { %6959 = vmatprep.mubr.bf16.mxu0 %v4806_v10  ;;  %v4363_v30 = vpop.xlane.xlu0 %4362  ;;  %v4616_v28 = vsub.f32 %v10598_v6, %v10530_v58  ;;  %v4617_v57 = vsub.f32 %v10602_v23, %v10535_v18  ;;  %v4524_v34 = vmul.f32 %v10604_v0, %v10604_v0  ;;  %v4614_v37 = vsub.f32 %v10613_v17, %v10539_v54 }
 0x7e8   : > { %v4491_v13 = vmul.f32 0.0125, %v4395_v36  ;;  %v4396_v46 = vadd.f32 %v4363_v30, %v11619_v60  ;;  %v7468_v27 = vpop.eup %7467  ;;  %v4554_v50 = vsub.f32 %v4490_v5, %v4522_v31  ;;  %6960 = vmatmul.mubr.bf16.gmra.mrb[100].mxu0 %v4807_v9  ;;  %v4525_v58 = vmul.f32 %v10607_v16, %v10607_v16 }
 0x7e9   : > { %v4365_v41 = vpop.xlane.xlu1 %4364  ;;  %v4712_v9 = vmul.f32 %v7468_v27, %v4616_v28  ;;  %v4615_v38 = vsub.f32 %v10620_v40, %v10549_v15 }
 0x7ea   : > { %v7470_v10 = vpop.eup %7469  ;;  %v4555_v52 = vsub.f32 %v4491_v13, %v4523_v3  ;;  %v4492_v1 = vmul.f32 0.0125, %v4396_v46  ;;  %v4397_v51 = vadd.f32 %v4365_v41, %v11622_v20  ;;  %v4586_v49 = vmax.f32 %v4554_v50, 0.0 }
 0x7eb   : > { %v4713_v36 = vmul.f32 %v7470_v10, %v4617_v57  ;;  %v4751_v27 = vmul.f32 %v10293_v43, %v4712_v9 }
 0x7ec   : > { %v7472_v18 = vpop.eup %7471  ;;  %v4587_v31 = vmax.f32 %v4555_v52, 0.0  ;;  %v4556_v5 = vsub.f32 %v4492_v1, %v4524_v34  ;;  %v4493_v30 = vmul.f32 0.0125, %v4397_v51  ;;  %v4650_v44 = vadd.f32 1e-05, %v4586_v49  ;;  %v7147_v51 = vld [vmem:[%s11129_s19] sm:$0xff]  }
 0x7ed   : > { %v4710_v3 = vmul.f32 %v7472_v18, %v4614_v37  ;;  %v4752_v54 = vmul.f32 %v10293_v43, %v4713_v36  ;;  %v4790_v1 = vadd.f32 %v10306_v45, %v4751_v27  ;;  %v11623_v37 = vld [vmem:[#allocation62_spill] sm:$0xff]  ;;  %6971 = vmatprep.subr.bf16.mxu1 %v7147_v51 }
 0x7ee   : > { %v7474_v13 = vpop.eup %7473  ;;  %v4651_v60 = vadd.f32 1e-05, %v4587_v31  ;;  %v4588_v46 = vmax.f32 %v4556_v5, 0.0  ;;  %v4557_v35 = vsub.f32 %v4493_v30, %v4525_v58  ;;  %7475 = vrsqrt.f32 %v4650_v44  ;;  %v11624_v58 = vld [vmem:[#allocation92_spill] sm:$0xff]  ;;  %v11625_v18 = vld [vmem:[#allocation50_spill] sm:$0xff]  ;;  %6972 = vmatpush3.bf16.msra.mxu1 %v7147_v51  ;;  %v11628_v44 = vld [vmem:[#allocation91_spill] sm:$0xff] }
 0x7ef   : > { %v4711_v25 = vmul.f32 %v7474_v13, %v4615_v38  ;;  %v4749_v57 = vmul.f32 %v10293_v43, %v4710_v3  ;;  %v4791_v10 = vadd.f32 %v10306_v45, %v4752_v54  ;;  %v10648_v49 = vadd.f32 %v11624_v58, %v11623_v37  ;;  %v11626_v31 = vld [vmem:[#allocation94_spill] sm:$0xff]  ;;  %v11627_v38 = vld [vmem:[#allocation64_spill] sm:$0xff]  ;;  %v11629_v54 = vld [vmem:[#allocation49_spill] sm:$0xff] }
 0x7f0   : > { %7477 = vrsqrt.f32 %v4651_v60  ;;  %v4652_v50 = vadd.f32 1e-05, %v4588_v46  ;;  %v4589_v41 = vmax.f32 %v4557_v35, 0.0  ;;  %v10652_v5 = vadd.f32 %v11626_v31, %v11625_v18  ;;  %v7148_v60 = vld [vmem:[%s11129_s19 + $0x8] sm:$0xff]   ;;  %v7150_v37 = vld [vmem:[%s11129_s19 + $0x18] sm:$0xff]   ;;  %v7151_v31 = vld [vmem:[%s11129_s19 + $0x20] sm:$0xff]  }
 0x7f1   : > { %v4750_v28 = vmul.f32 %v10293_v43, %v4711_v25  ;;  %v4788_v34 = vadd.f32 %v10306_v45, %v4749_v57  ;;  %v4809_v36 = vpack.c.bf16 %v4791_v10, %v4790_v1  ;;  %v4618_v30 = vsub.f32 %v10648_v49, %v10587_v8  ;;  %v11630_v25 = vld [vmem:[#allocation93_spill] sm:$0xff]  ;;  %6973 = vmatprep.subr.bf16.mxu1 %v7148_v60 }
 0x7f2   : > { %7479 = vrsqrt.f32 %v4652_v50  ;;  %v4653_v15 = vadd.f32 1e-05, %v4589_v41  ;;  %v10658_v3 = vadd.f32 %v11628_v44, %v11627_v38  ;;  %v4619_v13 = vsub.f32 %v10652_v5, %v10591_v7  ;;  %6974 = vmatpush3.bf16.msra.mxu1 %v7148_v60  ;;  %v7149_v10 = vld [vmem:[%s11129_s19 + $0x10] sm:$0xff]  }
 0x7f3   : > { %v4789_v52 = vadd.f32 %v10306_v45, %v4750_v28  ;;  %v10667_v57 = vadd.f32 %v11630_v25, %v11629_v54  ;;  %6975 = vmatprep.subr.bf16.mxu1 %v7149_v10 }
 0x7f4   : > { %7481 = vrsqrt.f32 %v4653_v15  ;;  %v4620_v8 = vsub.f32 %v10658_v3, %v10604_v0 }
 0x7f5   : > { %v4808_v20 = vpack.c.bf16 %v4789_v52, %v4788_v34  ;;  %v4621_v7 = vsub.f32 %v10667_v57, %v10607_v16 }
 0x7f6   : > { %6976 = vmatpush3.bf16.msra.mxu1 %v7149_v10 }
 0x7f7   : > { %6963 = vmatprep.mubr.bf16.mxu0 %v4808_v20  ;;  %6977 = vmatprep.subr.bf16.mxu1 %v7150_v37 }
 0x7f8   : > { %6964 = vmatmul.mubr.bf16.gmra.mrb[104].mxu0 %v4809_v36  ;;  %v7476_v9 = vpop.eup %7475 }
 0x7f9   : > { %v4714_v35 = vmul.f32 %v7476_v9, %v4618_v30  ;;  %v7154_v30 = vld [vmem:[%s11129_s19 + $0x38] sm:$0xff]   ;;  %v10702_v9 = vld [vmem:[%s11128_s18] ss:$0 sm:$0xff] }
 0x7fa   : > { %v7478_v46 = vpop.eup %7477  ;;  %6978 = vmatpush3.bf16.msra.mxu1 %v7150_v37 }
 0x7fb   : > { %v4715_v50 = vmul.f32 %v7478_v46, %v4619_v13  ;;  %v4753_v27 = vmul.f32 %v10293_v43, %v4714_v35  ;;  %6979 = vmatprep.subr.bf16.mxu1 %v7151_v31 }
 0x7fc   : > { %v7480_v41 = vpop.eup %7479 }
 0x7fd   : > { %v4754_v28 = vmul.f32 %v10293_v43, %v4715_v50  ;;  %v4716_v15 = vmul.f32 %v7480_v41, %v4620_v8  ;;  %v4792_v52 = vadd.f32 %v10306_v45, %v4753_v27 }
 0x7fe   : > { %v7482_v34 = vpop.eup %7481  ;;  %6980 = vmatpush3.bf16.msra.mxu1 %v7151_v31 }
 0x7ff   : > { %v4793_v0 = vadd.f32 %v10306_v45, %v4754_v28  ;;  %v4717_v1 = vmul.f32 %v7482_v34, %v4621_v7  ;;  %v4755_v20 = vmul.f32 %v10293_v43, %v4716_v15 }
 0x801   : > { %v4810_v51 = vpack.c.bf16 %v4793_v0, %v4792_v52  ;;  %v4756_v16 = vmul.f32 %v10293_v43, %v4717_v1  ;;  %v4794_v58 = vadd.f32 %v10306_v45, %v4755_v20  ;;  %v7152_v43 = vld [vmem:[%s11129_s19 + $0x28] sm:$0xff]  }
 0x802   : > { %6981 = vmatprep.subr.bf16.mxu1 %v7152_v43 }
 0x803   : > { %6967 = vmatprep.mubr.bf16.mxu0 %v4810_v51  ;;  %v4795_v36 = vadd.f32 %v10306_v45, %v4756_v16  ;;  %6982 = vmatpush3.bf16.msra.mxu1 %v7152_v43  ;;  %v7153_v45 = vld [vmem:[%s11129_s19 + $0x30] sm:$0xff]  }
 0x804   : > { %6983 = vmatprep.subr.bf16.mxu1 %v7153_v45 }
 0x805   : > { %v4811_v18 = vpack.c.bf16 %v4795_v36, %v4794_v58 }
 0x807   : > { %6968 = vmatmul.mubr.bf16.gmra.mrb[108].mxu0 %v4811_v18  ;;  %6984 = vmatpush3.bf16.msra.mxu1 %v7153_v45 }
 0x808   : > { %6985 = vmatprep.subr.bf16.mxu1 %v7154_v30 }
 0x80b   : > { %6986 = vmatpush3.bf16.msra.mxu1 %v7154_v30 }
 0x86b   : > { %v6941_v38 = vpop.f32.mrb[80].mxu0 }
 0x86c   : > { %v10705_v44 = vadd.f32 %v6941_v38, %v10702_v9  ;;  %v4917_v13 = vpop.f32.mrb[81].mxu0 }
 0x86d   : > { %v10708_v60 = vadd.f32 %v10702_v9, %v4917_v13  ;;  %v6942_v46 = vpop.f32.mrb[82].mxu0 }
 0x86e   : > { %v5046_v35 = vmul.f32 %v10705_v44, %v10705_v44  ;;  %v10713_v54 = vadd.f32 %v6942_v46, %v10702_v9  ;;  %v4920_v25 = vpop.f32.mrb[83].mxu0  ;;  %v7155_v46 = vld [vmem:[%s11131_s21] sm:$0xff]  }
 0x86f   : > { %v5044_v8 = vmul.f32 %v10708_v60, %v10708_v60  ;;  %v10718_v50 = vadd.f32 %v10702_v9, %v4920_v25  ;;  %7019 = vmatprep.subr.bf16.mxu0 %v7155_v46 }
 0x870   : > { %v5078_v41 = vmul.f32 %v5046_v35, %v10705_v44  ;;  %v5047_v27 = vmul.f32 %v10713_v54, %v10713_v54  ;;  %v7156_v35 = vld [vmem:[%s11131_s21 + $0x8] sm:$0xff]   ;;  %7020 = vmatpush3.bf16.msra.mxu0 %v7155_v46 }
 0x871   : > { %v5076_v7 = vmul.f32 %v5044_v8, %v10708_v60  ;;  %v5045_v28 = vmul.f32 %v10718_v50, %v10718_v50  ;;  %7021 = vmatprep.subr.bf16.mxu0 %v7156_v35 }
 0x872   : > { %v5110_v15 = vmul.f32 0.044715, %v5078_v41  ;;  %v5079_v10 = vmul.f32 %v5047_v27, %v10713_v54 }
 0x873   : > { %v5108_v34 = vmul.f32 0.044715, %v5076_v7  ;;  %v5077_v52 = vmul.f32 %v5045_v28, %v10718_v50 }
 0x874   : > { %v5142_v0 = vadd.f32 %v5110_v15, %v10705_v44  ;;  %v5111_v1 = vmul.f32 0.044715, %v5079_v10  ;;  %7022 = vmatpush3.bf16.msra.mxu0 %v7156_v35 }
 0x875   : > { %v5140_v20 = vadd.f32 %v5108_v34, %v10708_v60  ;;  %v5109_v51 = vmul.f32 0.044715, %v5077_v52  ;;  %v7157_v52 = vld [vmem:[%s11131_s21 + $0x10] sm:$0xff]  }
 0x876   : > { %v5174_v16 = vmul.f32 0.7978846, %v5142_v0  ;;  %v5143_v37 = vadd.f32 %v5111_v1, %v10713_v54  ;;  %7023 = vmatprep.subr.bf16.mxu0 %v7157_v52 }
 0x877   : > { %v5172_v58 = vmul.f32 0.7978846, %v5140_v20  ;;  %v5141_v36 = vadd.f32 %v5109_v51, %v10718_v50 }
 0x878   : > { %7483 = vtanh.f32 %v5174_v16  ;;  %v5175_v18 = vmul.f32 0.7978846, %v5143_v37  ;;  %7024 = vmatpush3.bf16.msra.mxu0 %v7157_v52 }
 0x879   : > { %7485 = vtanh.f32 %v5172_v58  ;;  %v5173_v31 = vmul.f32 0.7978846, %v5141_v36 }
 0x87a   : > { %7487 = vtanh.f32 %v5175_v18 }
 0x87b   : > { %7489 = vtanh.f32 %v5173_v31  ;;  %v6945_v43 = vpop.f32.mrb[84].mxu0 }
 0x87c   : > { %v10733_v45 = vadd.f32 %v6945_v43, %v10702_v9  ;;  %v4933_v30 = vpop.f32.mrb[85].mxu0 }
 0x87d   : > { %v10736_v38 = vadd.f32 %v10702_v9, %v4933_v30  ;;  %v6946_v13 = vpop.f32.mrb[86].mxu0 }
 0x87e   : > { %v5050_v25 = vmul.f32 %v10733_v45, %v10733_v45  ;;  %v10747_v8 = vadd.f32 %v6946_v13, %v10702_v9  ;;  %v4936_v41 = vpop.f32.mrb[87].mxu0 }
 0x87f   : > { %v5048_v27 = vmul.f32 %v10736_v38, %v10736_v38  ;;  %v10752_v7 = vadd.f32 %v10702_v9, %v4936_v41 }
 0x880   : > { %v5082_v28 = vmul.f32 %v5050_v25, %v10733_v45  ;;  %v5051_v15 = vmul.f32 %v10747_v8, %v10747_v8 }
 0x881   : > { %v5080_v10 = vmul.f32 %v5048_v27, %v10736_v38  ;;  %v5049_v34 = vmul.f32 %v10752_v7, %v10752_v7  ;;  %v7158_v27 = vld [vmem:[%s11131_s21 + $0x18] sm:$0xff]  }
 0x882   : > { %v7484_v0 = vpop.eup %7483  ;;  %v5114_v1 = vmul.f32 0.044715, %v5082_v28  ;;  %v5083_v20 = vmul.f32 %v5051_v15, %v10747_v8  ;;  %7025 = vmatprep.subr.bf16.mxu0 %v7158_v27 }
 0x883   : > { %v7486_v51 = vpop.eup %7485  ;;  %v5238_v16 = vadd.f32 1.0, %v7484_v0  ;;  %v5112_v37 = vmul.f32 0.044715, %v5080_v10  ;;  %v5081_v58 = vmul.f32 %v5049_v34, %v10752_v7  ;;  %7026 = vmatpush3.bf16.msra.mxu0 %v7158_v27 }
 0x884   : > { %v7488_v36 = vpop.eup %7487  ;;  %v5146_v18 = vadd.f32 %v5114_v1, %v10733_v45  ;;  %v5115_v31 = vmul.f32 0.044715, %v5083_v20  ;;  %v5236_v43 = vadd.f32 1.0, %v7486_v51 }
 0x885   : > { %v7490_v30 = vpop.eup %7489  ;;  %v5270_v13 = vmul.f32 0.5, %v5238_v16  ;;  %v5239_v46 = vadd.f32 1.0, %v7488_v36  ;;  %v5144_v25 = vadd.f32 %v5112_v37, %v10736_v38  ;;  %v5113_v41 = vmul.f32 0.044715, %v5081_v58  ;;  %v7159_v36 = vld [vmem:[%s11131_s21 + $0x20] sm:$0xff]  }
 0x886   : > { %v5178_v28 = vmul.f32 0.7978846, %v5146_v18  ;;  %v5147_v15 = vadd.f32 %v5115_v31, %v10747_v8  ;;  %v5237_v10 = vadd.f32 1.0, %v7490_v30  ;;  %v5268_v34 = vmul.f32 0.5, %v5236_v43  ;;  %7027 = vmatprep.subr.bf16.mxu0 %v7159_v36 }
 0x887   : > { %v5271_v0 = vmul.f32 0.5, %v5239_v46  ;;  %v5176_v1 = vmul.f32 0.7978846, %v5144_v25  ;;  %v5145_v35 = vadd.f32 %v5113_v41, %v10752_v7  ;;  %v5302_v16 = vmul.f32 %v5270_v13, %v10705_v44  ;;  %7028 = vmatpush3.bf16.msra.mxu0 %v7159_v36 }
 0x888   : > { %7491 = vtanh.f32 %v5178_v28  ;;  %v5179_v20 = vmul.f32 0.7978846, %v5147_v15  ;;  %v5269_v51 = vmul.f32 0.5, %v5237_v10  ;;  %v5300_v18 = vmul.f32 %v5268_v34, %v10708_v60  ;;  %v7160_v60 = vld [vmem:[%s11131_s21 + $0x28] sm:$0xff]  }
 0x889   : > { %v5303_v37 = vmul.f32 %v5271_v0, %v10713_v54  ;;  %7493 = vtanh.f32 %v5176_v1  ;;  %v5177_v58 = vmul.f32 0.7978846, %v5145_v35  ;;  %7029 = vmatprep.subr.bf16.mxu0 %v7160_v60 }
 0x88a   : > { %7495 = vtanh.f32 %v5179_v20  ;;  %v5301_v31 = vmul.f32 %v5269_v51, %v10718_v50 }
 0x88b   : > { %v5333_v43 = vpack.c.bf16 %v5303_v37, %v5302_v16  ;;  %7497 = vtanh.f32 %v5177_v58  ;;  %v6949_v30 = vpop.f32.mrb[88].mxu0  ;;  %7030 = vmatpush3.bf16.msra.mxu0 %v7160_v60 }
 0x88c   : > { %v10780_v52 = vadd.f32 %v6949_v30, %v10702_v9  ;;  %v4949_v44 = vpop.f32.mrb[89].mxu0  ;;  %v5332_v54 = vpack.c.bf16 %v5301_v31, %v5300_v18 }
 0x88d   : > { %v10783_v13 = vadd.f32 %v10702_v9, %v4949_v44  ;;  %v6950_v46 = vpop.f32.mrb[90].mxu0 }
 0x88e   : > { %v5054_v50 = vmul.f32 %v10780_v52, %v10780_v52  ;;  %v10791_v25 = vadd.f32 %v6950_v46, %v10702_v9  ;;  %v4952_v41 = vpop.f32.mrb[91].mxu0  ;;  %6987 = vmatprep.mubr.bf16.mxu1 %v5332_v54 }
 0x88f   : > { %v5052_v27 = vmul.f32 %v10783_v13, %v10783_v13  ;;  %v10796_v28 = vadd.f32 %v10702_v9, %v4952_v41  ;;  %6988 = vmatmul.mubr.bf16.vlgmr.msra.gmra.mrb[112].mxu1 %v5333_v43 }
 0x890   : > { %v5086_v15 = vmul.f32 %v5054_v50, %v10780_v52  ;;  %v5055_v10 = vmul.f32 %v10791_v25, %v10791_v25 }
 0x891   : > { %v5084_v34 = vmul.f32 %v5052_v27, %v10783_v13  ;;  %v5053_v0 = vmul.f32 %v10796_v28, %v10796_v28 }
 0x892   : > { %v7492_v1 = vpop.eup %7491  ;;  %v5118_v35 = vmul.f32 0.044715, %v5086_v15  ;;  %v5087_v20 = vmul.f32 %v5055_v10, %v10791_v25 }
 0x893   : > { %v7494_v51 = vpop.eup %7493  ;;  %v5116_v16 = vmul.f32 0.044715, %v5084_v34  ;;  %v5085_v37 = vmul.f32 %v5053_v0, %v10796_v28  ;;  %v5242_v58 = vadd.f32 1.0, %v7492_v1 }
 0x894   : > { %v7496_v18 = vpop.eup %7495  ;;  %v5150_v31 = vadd.f32 %v5118_v35, %v10780_v52  ;;  %v5119_v43 = vmul.f32 0.044715, %v5087_v20  ;;  %v5240_v36 = vadd.f32 1.0, %v7494_v51 }
 0x895   : > { %v7498_v30 = vpop.eup %7497  ;;  %v5148_v44 = vadd.f32 %v5116_v16, %v10783_v13  ;;  %v5117_v54 = vmul.f32 0.044715, %v5085_v37  ;;  %v5243_v46 = vadd.f32 1.0, %v7496_v18  ;;  %v5274_v50 = vmul.f32 0.5, %v5242_v58 }
 0x896   : > { %v5182_v41 = vmul.f32 0.7978846, %v5150_v31  ;;  %v5151_v27 = vadd.f32 %v5119_v43, %v10791_v25  ;;  %v5241_v15 = vadd.f32 1.0, %v7498_v30  ;;  %v5272_v10 = vmul.f32 0.5, %v5240_v36 }
 0x897   : > { %v5180_v34 = vmul.f32 0.7978846, %v5148_v44  ;;  %v5149_v0 = vadd.f32 %v5117_v54, %v10796_v28  ;;  %v5275_v1 = vmul.f32 0.5, %v5243_v46  ;;  %v5306_v51 = vmul.f32 %v5274_v50, %v10733_v45 }
 0x898   : > { %7499 = vtanh.f32 %v5182_v41  ;;  %v5183_v35 = vmul.f32 0.7978846, %v5151_v27  ;;  %v5273_v20 = vmul.f32 0.5, %v5241_v15  ;;  %v5304_v37 = vmul.f32 %v5272_v10, %v10736_v38 }
 0x899   : > { %7501 = vtanh.f32 %v5180_v34  ;;  %v5181_v60 = vmul.f32 0.7978846, %v5149_v0  ;;  %v5307_v16 = vmul.f32 %v5275_v1, %v10747_v8 }
 0x89a   : > { %7503 = vtanh.f32 %v5183_v35  ;;  %v5305_v58 = vmul.f32 %v5273_v20, %v10752_v7 }
 0x89b   : > { %7505 = vtanh.f32 %v5181_v60  ;;  %v6953_v18 = vpop.f32.mrb[92].mxu0  ;;  %v5335_v31 = vpack.c.bf16 %v5307_v16, %v5306_v51 }
 0x89c   : > { %v10815_v43 = vadd.f32 %v6953_v18, %v10702_v9  ;;  %v4965_v36 = vpop.f32.mrb[93].mxu0  ;;  %v5334_v30 = vpack.c.bf16 %v5305_v58, %v5304_v37 }
 0x89d   : > { %v10818_v44 = vadd.f32 %v10702_v9, %v4965_v36  ;;  %v6954_v54 = vpop.f32.mrb[94].mxu0 }
 0x89e   : > { %v5058_v45 = vmul.f32 %v10815_v43, %v10815_v43  ;;  %v10823_v8 = vadd.f32 %v6954_v54, %v10702_v9  ;;  %v4968_v38 = vpop.f32.mrb[95].mxu0  ;;  %6991 = vmatprep.mubr.bf16.mxu1 %v5334_v30 }
 0x89f   : > { %v5056_v7 = vmul.f32 %v10818_v44, %v10818_v44  ;;  %v10828_v46 = vadd.f32 %v10702_v9, %v4968_v38  ;;  %6992 = vmatmul.mubr.bf16.gmra.mrb[116].mxu1 %v5335_v31 }
 0x8a0   : > { %v5090_v50 = vmul.f32 %v5058_v45, %v10815_v43  ;;  %v5059_v41 = vmul.f32 %v10823_v8, %v10823_v8 }
 0x8a1   : > { %v5088_v27 = vmul.f32 %v5056_v7, %v10818_v44  ;;  %v5057_v15 = vmul.f32 %v10828_v46, %v10828_v46 }
 0x8a2   : > { %v7500_v10 = vpop.eup %7499  ;;  %v5122_v34 = vmul.f32 0.044715, %v5090_v50  ;;  %v5091_v0 = vmul.f32 %v5059_v41, %v10823_v8 }
 0x8a3   : > { %v7502_v1 = vpop.eup %7501  ;;  %v5120_v35 = vmul.f32 0.044715, %v5088_v27  ;;  %v5089_v20 = vmul.f32 %v5057_v15, %v10828_v46  ;;  %v5246_v60 = vadd.f32 1.0, %v7500_v10 }
 0x8a4   : > { %v7504_v51 = vpop.eup %7503  ;;  %v5154_v16 = vadd.f32 %v5122_v34, %v10815_v43  ;;  %v5123_v37 = vmul.f32 0.044715, %v5091_v0  ;;  %v5244_v58 = vadd.f32 1.0, %v7502_v1 }
 0x8a5   : > { %v7506_v18 = vpop.eup %7505  ;;  %v5152_v31 = vadd.f32 %v5120_v35, %v10818_v44  ;;  %v5121_v36 = vmul.f32 0.044715, %v5089_v20  ;;  %v5247_v30 = vadd.f32 1.0, %v7504_v51  ;;  %v5278_v54 = vmul.f32 0.5, %v5246_v60 }
 0x8a6   : > { %v5186_v45 = vmul.f32 0.7978846, %v5154_v16  ;;  %v5155_v38 = vadd.f32 %v5123_v37, %v10823_v8  ;;  %v5245_v7 = vadd.f32 1.0, %v7506_v18  ;;  %v5276_v50 = vmul.f32 0.5, %v5244_v58 }
 0x8a7   : > { %v5184_v41 = vmul.f32 0.7978846, %v5152_v31  ;;  %v5153_v27 = vadd.f32 %v5121_v36, %v10828_v46  ;;  %v5279_v15 = vmul.f32 0.5, %v5247_v30  ;;  %v5310_v1 = vmul.f32 %v5278_v54, %v10780_v52 }
 0x8a8   : > { %7507 = vtanh.f32 %v5186_v45  ;;  %v5187_v10 = vmul.f32 0.7978846, %v5155_v38  ;;  %v5277_v34 = vmul.f32 0.5, %v5245_v7  ;;  %v5308_v20 = vmul.f32 %v5276_v50, %v10783_v13 }
 0x8a9   : > { %7509 = vtanh.f32 %v5184_v41  ;;  %v5185_v0 = vmul.f32 0.7978846, %v5153_v27  ;;  %v5311_v35 = vmul.f32 %v5279_v15, %v10791_v25 }
 0x8aa   : > { %7511 = vtanh.f32 %v5187_v10  ;;  %v5309_v60 = vmul.f32 %v5277_v34, %v10796_v28 }
 0x8ab   : > { %7513 = vtanh.f32 %v5185_v0  ;;  %v6957_v51 = vpop.f32.mrb[96].mxu0  ;;  %v5337_v16 = vpack.c.bf16 %v5311_v35, %v5310_v1 }
 0x8ac   : > { %v10847_v37 = vadd.f32 %v6957_v51, %v10702_v9  ;;  %v4981_v58 = vpop.f32.mrb[97].mxu0  ;;  %v5336_v18 = vpack.c.bf16 %v5309_v60, %v5308_v20 }
 0x8ad   : > { %v10850_v31 = vadd.f32 %v10702_v9, %v4981_v58  ;;  %v6958_v36 = vpop.f32.mrb[98].mxu0 }
 0x8ae   : > { %v5062_v52 = vmul.f32 %v10847_v37, %v10847_v37  ;;  %v10855_v25 = vadd.f32 %v6958_v36, %v10702_v9  ;;  %v4984_v13 = vpop.f32.mrb[99].mxu0  ;;  %6995 = vmatprep.mubr.bf16.mxu1 %v5336_v18 }
 0x8af   : > { %v5060_v28 = vmul.f32 %v10850_v31, %v10850_v31  ;;  %v10860_v30 = vadd.f32 %v10702_v9, %v4984_v13  ;;  %6996 = vmatmul.mubr.bf16.gmra.mrb[120].mxu1 %v5337_v16 }
 0x8b0   : > { %v5094_v54 = vmul.f32 %v5062_v52, %v10847_v37  ;;  %v5063_v45 = vmul.f32 %v10855_v25, %v10855_v25 }
 0x8b1   : > { %v5092_v38 = vmul.f32 %v5060_v28, %v10850_v31  ;;  %v5061_v7 = vmul.f32 %v10860_v30, %v10860_v30 }
 0x8b2   : > { %v7508_v50 = vpop.eup %7507  ;;  %v5126_v41 = vmul.f32 0.044715, %v5094_v54  ;;  %v5095_v27 = vmul.f32 %v5063_v45, %v10855_v25 }
 0x8b3   : > { %v7510_v15 = vpop.eup %7509  ;;  %v5124_v10 = vmul.f32 0.044715, %v5092_v38  ;;  %v5093_v34 = vmul.f32 %v5061_v7, %v10860_v30  ;;  %v5250_v0 = vadd.f32 1.0, %v7508_v50 }
 0x8b4   : > { %v7512_v1 = vpop.eup %7511  ;;  %v5158_v35 = vadd.f32 %v5126_v41, %v10847_v37  ;;  %v5127_v20 = vmul.f32 0.044715, %v5095_v27  ;;  %v5248_v60 = vadd.f32 1.0, %v7510_v15 }
 0x8b5   : > { %v7514_v51 = vpop.eup %7513  ;;  %v5156_v16 = vadd.f32 %v5124_v10, %v10850_v31  ;;  %v5125_v58 = vmul.f32 0.044715, %v5093_v34  ;;  %v5251_v18 = vadd.f32 1.0, %v7512_v1  ;;  %v5282_v36 = vmul.f32 0.5, %v5250_v0 }
 0x8b6   : > { %v5190_v52 = vmul.f32 0.7978846, %v5158_v35  ;;  %v5159_v13 = vadd.f32 %v5127_v20, %v10855_v25  ;;  %v5249_v28 = vadd.f32 1.0, %v7514_v51  ;;  %v5280_v54 = vmul.f32 0.5, %v5248_v60 }
 0x8b7   : > { %v5188_v45 = vmul.f32 0.7978846, %v5156_v16  ;;  %v5157_v38 = vadd.f32 %v5125_v58, %v10860_v30  ;;  %v5283_v7 = vmul.f32 0.5, %v5251_v18  ;;  %v5314_v15 = vmul.f32 %v5282_v36, %v10815_v43 }
 0x8b8   : > { %7515 = vtanh.f32 %v5190_v52  ;;  %v5191_v50 = vmul.f32 0.7978846, %v5159_v13  ;;  %v5281_v41 = vmul.f32 0.5, %v5249_v28  ;;  %v5312_v34 = vmul.f32 %v5280_v54, %v10818_v44 }
 0x8b9   : > { %7517 = vtanh.f32 %v5188_v45  ;;  %v5189_v27 = vmul.f32 0.7978846, %v5157_v38  ;;  %v5315_v10 = vmul.f32 %v5283_v7, %v10823_v8 }
 0x8ba   : > { %7519 = vtanh.f32 %v5191_v50  ;;  %v5313_v0 = vmul.f32 %v5281_v41, %v10828_v46 }
 0x8bb   : > { %7521 = vtanh.f32 %v5189_v27  ;;  %v6961_v1 = vpop.f32.mrb[100].mxu0  ;;  %v5339_v35 = vpack.c.bf16 %v5315_v10, %v5314_v15 }
 0x8bc   : > { %v10879_v20 = vadd.f32 %v6961_v1, %v10702_v9  ;;  %v4997_v60 = vpop.f32.mrb[101].mxu0  ;;  %v5338_v51 = vpack.c.bf16 %v5313_v0, %v5312_v34 }
 0x8bd   : > { %v10882_v16 = vadd.f32 %v10702_v9, %v4997_v60  ;;  %v6962_v58 = vpop.f32.mrb[102].mxu0 }
 0x8be   : > { %v5066_v43 = vmul.f32 %v10879_v20, %v10879_v20  ;;  %v10887_v8 = vadd.f32 %v6962_v58, %v10702_v9  ;;  %v5000_v44 = vpop.f32.mrb[103].mxu0  ;;  %6999 = vmatprep.mubr.bf16.mxu1 %v5338_v51 }
 0x8bf   : > { %v5064_v46 = vmul.f32 %v10882_v16, %v10882_v16  ;;  %v10892_v18 = vadd.f32 %v10702_v9, %v5000_v44  ;;  %7000 = vmatmul.mubr.bf16.gmra.mrb[124].mxu1 %v5339_v35 }
 0x8c0   : > { %v5098_v36 = vmul.f32 %v5066_v43, %v10879_v20  ;;  %v5067_v52 = vmul.f32 %v10887_v8, %v10887_v8 }
 0x8c1   : > { %v5096_v13 = vmul.f32 %v5064_v46, %v10882_v16  ;;  %v5065_v28 = vmul.f32 %v10892_v18, %v10892_v18 }
 0x8c2   : > { %v7516_v54 = vpop.eup %7515  ;;  %v5130_v45 = vmul.f32 0.044715, %v5098_v36  ;;  %v5099_v38 = vmul.f32 %v5067_v52, %v10887_v8 }
 0x8c3   : > { %v7518_v7 = vpop.eup %7517  ;;  %v5128_v50 = vmul.f32 0.044715, %v5096_v13  ;;  %v5097_v41 = vmul.f32 %v5065_v28, %v10892_v18  ;;  %v5254_v27 = vadd.f32 1.0, %v7516_v54 }
 0x8c4   : > { %v7520_v15 = vpop.eup %7519  ;;  %v5162_v10 = vadd.f32 %v5130_v45, %v10879_v20  ;;  %v5131_v34 = vmul.f32 0.044715, %v5099_v38  ;;  %v5252_v0 = vadd.f32 1.0, %v7518_v7 }
 0x8c5   : > { %v7522_v1 = vpop.eup %7521  ;;  %v5160_v35 = vadd.f32 %v5128_v50, %v10882_v16  ;;  %v5129_v60 = vmul.f32 0.044715, %v5097_v41  ;;  %v5255_v51 = vadd.f32 1.0, %v7520_v15  ;;  %v5286_v58 = vmul.f32 0.5, %v5254_v27 }
 0x8c6   : > { %v5194_v43 = vmul.f32 0.7978846, %v5162_v10  ;;  %v5163_v44 = vadd.f32 %v5131_v34, %v10887_v8  ;;  %v5253_v46 = vadd.f32 1.0, %v7522_v1  ;;  %v5284_v36 = vmul.f32 0.5, %v5252_v0 }
 0x8c7   : > { %v5192_v52 = vmul.f32 0.7978846, %v5160_v35  ;;  %v5161_v13 = vadd.f32 %v5129_v60, %v10892_v18  ;;  %v5287_v28 = vmul.f32 0.5, %v5255_v51  ;;  %v5318_v7 = vmul.f32 %v5286_v58, %v10847_v37 }
 0x8c8   : > { %7523 = vtanh.f32 %v5194_v43  ;;  %v5195_v54 = vmul.f32 0.7978846, %v5163_v44  ;;  %v5285_v45 = vmul.f32 0.5, %v5253_v46  ;;  %v5316_v27 = vmul.f32 %v5284_v36, %v10850_v31 }
 0x8c9   : > { %7525 = vtanh.f32 %v5192_v52  ;;  %v5193_v38 = vmul.f32 0.7978846, %v5161_v13  ;;  %v5319_v50 = vmul.f32 %v5287_v28, %v10855_v25 }
 0x8ca   : > { %7527 = vtanh.f32 %v5195_v54  ;;  %v5317_v15 = vmul.f32 %v5285_v45, %v10860_v30 }
 0x8cb   : > { %v6965_v41 = vpop.f32.mrb[104].mxu0  ;;  %7529 = vtanh.f32 %v5193_v38  ;;  %v5341_v0 = vpack.c.bf16 %v5319_v50, %v5318_v7 }
 0x8cc   : > { %v10911_v10 = vadd.f32 %v6965_v41, %v10702_v9  ;;  %v5013_v34 = vpop.f32.mrb[105].mxu0  ;;  %v5340_v60 = vpack.c.bf16 %v5317_v15, %v5316_v27 }
 0x8cd   : > { %v10914_v1 = vadd.f32 %v10702_v9, %v5013_v34  ;;  %v6966_v35 = vpop.f32.mrb[106].mxu0 }
 0x8ce   : > { %v5070_v37 = vmul.f32 %v10911_v10, %v10911_v10  ;;  %v10919_v25 = vadd.f32 %v6966_v35, %v10702_v9  ;;  %v5016_v31 = vpop.f32.mrb[107].mxu0  ;;  %7003 = vmatprep.mubr.bf16.mxu1 %v5340_v60 }
 0x8cf   : > { %v5068_v30 = vmul.f32 %v10914_v1, %v10914_v1  ;;  %v10924_v51 = vadd.f32 %v10702_v9, %v5016_v31  ;;  %7004 = vmatmul.mubr.bf16.gmra.mrb[128].mxu1 %v5341_v0 }
 0x8d0   : > { %v5102_v58 = vmul.f32 %v5070_v37, %v10911_v10  ;;  %v5071_v43 = vmul.f32 %v10919_v25, %v10919_v25 }
 0x8d1   : > { %v5100_v44 = vmul.f32 %v5068_v30, %v10914_v1  ;;  %v5069_v46 = vmul.f32 %v10924_v51, %v10924_v51 }
 0x8d2   : > { %v5134_v36 = vmul.f32 0.044715, %v5102_v58  ;;  %v5103_v52 = vmul.f32 %v5071_v43, %v10919_v25  ;;  %v7524_v13 = vpop.eup %7523 }
 0x8d3   : > { %v5132_v28 = vmul.f32 0.044715, %v5100_v44  ;;  %v5101_v54 = vmul.f32 %v5069_v46, %v10924_v51  ;;  %v7526_v45 = vpop.eup %7525  ;;  %v5258_v50 = vadd.f32 1.0, %v7524_v13 }
 0x8d4   : > { %v5166_v38 = vadd.f32 %v5134_v36, %v10911_v10  ;;  %v5135_v7 = vmul.f32 0.044715, %v5103_v52  ;;  %v7528_v41 = vpop.eup %7527  ;;  %v5256_v34 = vadd.f32 1.0, %v7526_v45 }
 0x8d5   : > { %v5164_v27 = vadd.f32 %v5132_v28, %v10914_v1  ;;  %v5133_v15 = vmul.f32 0.044715, %v5101_v54  ;;  %v7530_v0 = vpop.eup %7529  ;;  %v5259_v37 = vadd.f32 1.0, %v7528_v41  ;;  %v5290_v31 = vmul.f32 0.5, %v5258_v50 }
 0x8d6   : > { %v5198_v35 = vmul.f32 0.7978846, %v5166_v38  ;;  %v5167_v60 = vadd.f32 %v5135_v7, %v10919_v25  ;;  %v5257_v43 = vadd.f32 1.0, %v7530_v0  ;;  %v5288_v44 = vmul.f32 0.5, %v5256_v34 }
 0x8d7   : > { %v5196_v30 = vmul.f32 0.7978846, %v5164_v27  ;;  %v5165_v58 = vadd.f32 %v5133_v15, %v10924_v51  ;;  %v5291_v36 = vmul.f32 0.5, %v5259_v37  ;;  %v5322_v54 = vmul.f32 %v5290_v31, %v10879_v20 }
 0x8d8   : > { %7531 = vtanh.f32 %v5198_v35  ;;  %v5199_v46 = vmul.f32 0.7978846, %v5167_v60  ;;  %v5289_v13 = vmul.f32 0.5, %v5257_v43  ;;  %v5320_v50 = vmul.f32 %v5288_v44, %v10882_v16 }
 0x8d9   : > { %7533 = vtanh.f32 %v5196_v30  ;;  %v5197_v52 = vmul.f32 0.7978846, %v5165_v58  ;;  %v5323_v45 = vmul.f32 %v5291_v36, %v10887_v8 }
 0x8da   : > { %7535 = vtanh.f32 %v5199_v46  ;;  %v6969_v28 = vpop.f32.mrb[108].mxu0  ;;  %v5321_v41 = vmul.f32 %v5289_v13, %v10892_v18 }
 0x8db   : > { %7537 = vtanh.f32 %v5197_v52  ;;  %v10941_v38 = vadd.f32 %v6969_v28, %v10702_v9  ;;  %v5029_v7 = vpop.f32.mrb[109].mxu0  ;;  %v5343_v34 = vpack.c.bf16 %v5323_v45, %v5322_v54 }
 0x8dc   : > { %v10946_v27 = vadd.f32 %v10702_v9, %v5029_v7  ;;  %v6970_v15 = vpop.f32.mrb[110].mxu0  ;;  %v5342_v35 = vpack.c.bf16 %v5321_v41, %v5320_v50 }
 0x8dd   : > { %v5074_v0 = vmul.f32 %v10941_v38, %v10941_v38  ;;  %v10951_v20 = vadd.f32 %v6970_v15, %v10702_v9  ;;  %v5032_v8 = vpop.f32.mrb[111].mxu0 }
 0x8de   : > { %v5072_v60 = vmul.f32 %v10946_v27, %v10946_v27  ;;  %v10956_v16 = vadd.f32 %v10702_v9, %v5032_v8  ;;  %7007 = vmatprep.mubr.bf16.mxu1 %v5342_v35 }
 0x8df   : > { %v5106_v18 = vmul.f32 %v5074_v0, %v10941_v38  ;;  %v5075_v37 = vmul.f32 %v10951_v20, %v10951_v20  ;;  %7008 = vmatmul.mubr.bf16.gmra.mrb[132].mxu1 %v5343_v34 }
 0x8e0   : > { %v5104_v31 = vmul.f32 %v5072_v60, %v10946_v27  ;;  %v5073_v30 = vmul.f32 %v10956_v16, %v10956_v16 }
 0x8e1   : > { %v5138_v58 = vmul.f32 0.044715, %v5106_v18  ;;  %v5107_v43 = vmul.f32 %v5075_v37, %v10951_v20 }
 0x8e2   : > { %v7532_v44 = vpop.eup %7531  ;;  %v5136_v46 = vmul.f32 0.044715, %v5104_v31  ;;  %v5105_v9 = vmul.f32 %v5073_v30, %v10956_v16 }
 0x8e3   : > { %v7534_v36 = vpop.eup %7533  ;;  %v5170_v52 = vadd.f32 %v5138_v58, %v10941_v38  ;;  %v5139_v13 = vmul.f32 0.044715, %v5107_v43  ;;  %v5262_v28 = vadd.f32 1.0, %v7532_v44 }
 0x8e4   : > { %v7536_v54 = vpop.eup %7535  ;;  %v5168_v45 = vadd.f32 %v5136_v46, %v10946_v27  ;;  %v5137_v7 = vmul.f32 0.044715, %v5105_v9  ;;  %v5260_v50 = vadd.f32 1.0, %v7534_v36 }
 0x8e5   : > { %v7538_v41 = vpop.eup %7537  ;;  %v5202_v15 = vmul.f32 0.7978846, %v5170_v52  ;;  %v5171_v34 = vadd.f32 %v5139_v13, %v10951_v20  ;;  %v5263_v0 = vadd.f32 1.0, %v7536_v54  ;;  %v5294_v8 = vmul.f32 0.5, %v5262_v28  ;;  %v7161_v52 = vld [vmem:[%s11131_s21 + $0x30] sm:$0xff]   ;;  %v7162_v13 = vld [vmem:[%s11131_s21 + $0x38] sm:$0xff]  }
 0x8e6   : > { %v5200_v35 = vmul.f32 0.7978846, %v5168_v45  ;;  %v5169_v60 = vadd.f32 %v5137_v7, %v10956_v16  ;;  %v5261_v18 = vadd.f32 1.0, %v7538_v41  ;;  %v5292_v37 = vmul.f32 0.5, %v5260_v50  ;;  %7031 = vmatprep.subr.bf16.mxu0 %v7161_v52 }
 0x8e7   : > { %7539 = vtanh.f32 %v5202_v15  ;;  %v5203_v31 = vmul.f32 0.7978846, %v5171_v34  ;;  %v5295_v30 = vmul.f32 0.5, %v5263_v0  ;;  %v5326_v44 = vmul.f32 %v5294_v8, %v10911_v10  ;;  %7032 = vmatpush3.bf16.msra.mxu0 %v7161_v52 }
 0x8e8   : > { %7541 = vtanh.f32 %v5200_v35  ;;  %v5201_v58 = vmul.f32 0.7978846, %v5169_v60  ;;  %v5293_v43 = vmul.f32 0.5, %v5261_v18  ;;  %v5324_v9 = vmul.f32 %v5292_v37, %v10914_v1  ;;  %7033 = vmatprep.subr.bf16.mxu0 %v7162_v13 }
 0x8e9   : > { %7543 = vtanh.f32 %v5203_v31  ;;  %v5327_v46 = vmul.f32 %v5295_v30, %v10919_v25 }
 0x8ea   : > { %7545 = vtanh.f32 %v5201_v58  ;;  %v5325_v36 = vmul.f32 %v5293_v43, %v10924_v51  ;;  %v10987_v58 = vld [vmem:[%s11130_s20] ss:$0 sm:$0xff] }
 0x8eb   : > { %v5345_v28 = vpack.c.bf16 %v5327_v46, %v5326_v44  ;;  %7034 = vmatpush3.bf16.msra.mxu0 %v7162_v13 }
 0x8ec   : > { %v5344_v54 = vpack.c.bf16 %v5325_v36, %v5324_v9 }
 0x8ee   : > { %7011 = vmatprep.mubr.bf16.mxu1 %v5344_v54 }
 0x8ef   : > { %7012 = vmatmul.mubr.bf16.gmra.mrb[136].mxu1 %v5345_v28 }
 0x8f1   : > { %v7540_v10 = vpop.eup %7539 }
 0x8f2   : > { %v7542_v1 = vpop.eup %7541  ;;  %v5266_v25 = vadd.f32 1.0, %v7540_v10 }
 0x8f3   : > { %v7544_v51 = vpop.eup %7543  ;;  %v5264_v45 = vadd.f32 1.0, %v7542_v1 }
 0x8f4   : > { %v7546_v7 = vpop.eup %7545  ;;  %v5267_v50 = vadd.f32 1.0, %v7544_v51  ;;  %v5298_v41 = vmul.f32 0.5, %v5266_v25 }
 0x8f5   : > { %v5265_v15 = vadd.f32 1.0, %v7546_v7  ;;  %v5296_v34 = vmul.f32 0.5, %v5264_v45 }
 0x8f6   : > { %v5299_v0 = vmul.f32 0.5, %v5267_v50  ;;  %v5330_v35 = vmul.f32 %v5298_v41, %v10941_v38 }
 0x8f7   : > { %v5297_v8 = vmul.f32 0.5, %v5265_v15  ;;  %v5328_v18 = vmul.f32 %v5296_v34, %v10946_v27 }
 0x8f8   : > { %v5331_v60 = vmul.f32 %v5299_v0, %v10951_v20 }
 0x8f9   : > { %v5329_v37 = vmul.f32 %v5297_v8, %v10956_v16 }
 0x8fa   : > { %v5347_v31 = vpack.c.bf16 %v5331_v60, %v5330_v35 }
 0x8fb   : > { %v5346_v30 = vpack.c.bf16 %v5329_v37, %v5328_v18 }
 0x8fd   : > { %7015 = vmatprep.mubr.bf16.mxu1 %v5346_v30 }
 0x8fe   : > { %7016 = vmatmul.mubr.bf16.gmra.mrb[140].mxu1 %v5347_v31 }
 0x962   : > { %v6989_v43 = vpop.f32.mrb[112].mxu1 }
 0x963   : > { %v5462_v44 = vadd.f32 %v6989_v43, %v10987_v58  ;;  %v5453_v46 = vpop.f32.mrb[113].mxu1 }
 0x964   : > { %v5454_v38 = vadd.f32 %v10987_v58, %v5453_v46  ;;  %v6990_v20 = vpop.f32.mrb[114].mxu1 }
 0x965   : > { %v5465_v27 = vadd.f32 %v6990_v20, %v10987_v58  ;;  %v5456_v9 = vpop.f32.mrb[115].mxu1  ;;  %v5582_v36 = vadd.f32 %v5462_v44, %v10255_v2 }
 0x966   : > { %v5457_v16 = vadd.f32 %v10987_v58, %v5456_v9  ;;  %v5580_v13 = vadd.f32 %v5454_v38, %v10270_v24 }
 0x967   : > { %v5583_v52 = vadd.f32 %v5465_v27, %v10259_v4 }
 0x968   : > { %v5581_v28 = vadd.f32 %v5457_v16, %v10274_v63 }
 0x969   : > { %v5613_v54 = vpack.c.bf16 %v5583_v52, %v5582_v36 }
 0x96a   : > { %v5612_v10 = vpack.c.bf16 %v5581_v28, %v5580_v13 }
 0x96c   : > { %7035 = vmatprep.mubr.bf16.mxu0 %v5612_v10 }
 0x96d   : > { %7036 = vmatmul.mubr.bf16.vlgmr.msra.gmra.mrb[112].mxu0 %v5613_v54 }
 0x972   : > { %v6993_v1 = vpop.f32.mrb[116].mxu1 }
 0x973   : > { %v5478_v25 = vadd.f32 %v6993_v1, %v10987_v58  ;;  %v5469_v51 = vpop.f32.mrb[117].mxu1 }
 0x974   : > { %v5470_v45 = vadd.f32 %v10987_v58, %v5469_v51  ;;  %v6994_v7 = vpop.f32.mrb[118].mxu1 }
 0x975   : > { %v5481_v50 = vadd.f32 %v6994_v7, %v10987_v58  ;;  %v5472_v41 = vpop.f32.mrb[119].mxu1  ;;  %v5586_v34 = vadd.f32 %v5478_v25, %v10323_v29 }
 0x976   : > { %v5473_v15 = vadd.f32 %v10987_v58, %v5472_v41  ;;  %v5584_v8 = vadd.f32 %v5470_v45, %v10332_v22 }
 0x977   : > { %v5587_v0 = vadd.f32 %v5481_v50, %v10336_v61 }
 0x978   : > { %v5585_v35 = vadd.f32 %v5473_v15, %v10340_v19 }
 0x979   : > { %v5615_v60 = vpack.c.bf16 %v5587_v0, %v5586_v34 }
 0x97a   : > { %v5614_v18 = vpack.c.bf16 %v5585_v35, %v5584_v8 }
 0x97c   : > { %7039 = vmatprep.mubr.bf16.mxu0 %v5614_v18 }
 0x97d   : > { %7040 = vmatmul.mubr.bf16.gmra.mrb[116].mxu0 %v5615_v60 }
 0x982   : > { %v6997_v37 = vpop.f32.mrb[120].mxu1 }
 0x983   : > { %v5494_v31 = vadd.f32 %v6997_v37, %v10987_v58  ;;  %v5485_v30 = vpop.f32.mrb[121].mxu1 }
 0x984   : > { %v5486_v43 = vadd.f32 %v10987_v58, %v5485_v30  ;;  %v6998_v44 = vpop.f32.mrb[122].mxu1 }
 0x985   : > { %v5497_v46 = vadd.f32 %v6998_v44, %v10987_v58  ;;  %v5488_v38 = vpop.f32.mrb[123].mxu1  ;;  %v5590_v27 = vadd.f32 %v5494_v31, %v10374_v62 }
 0x986   : > { %v5489_v20 = vadd.f32 %v10987_v58, %v5488_v38  ;;  %v5588_v16 = vadd.f32 %v5486_v43, %v10392_v14 }
 0x987   : > { %v5591_v9 = vadd.f32 %v5497_v46, %v10381_v59 }
 0x988   : > { %v5589_v36 = vadd.f32 %v5489_v20, %v10396_v42 }
 0x989   : > { %v5617_v52 = vpack.c.bf16 %v5591_v9, %v5590_v27 }
 0x98a   : > { %v5616_v13 = vpack.c.bf16 %v5589_v36, %v5588_v16 }
 0x98c   : > { %7043 = vmatprep.mubr.bf16.mxu0 %v5616_v13 }
 0x98d   : > { %7044 = vmatmul.mubr.bf16.gmra.mrb[120].mxu0 %v5617_v52 }
 0x992   : > { %v7001_v28 = vpop.f32.mrb[124].mxu1 }
 0x993   : > { %v5510_v54 = vadd.f32 %v7001_v28, %v10987_v58  ;;  %v5501_v10 = vpop.f32.mrb[125].mxu1 }
 0x994   : > { %v5502_v1 = vadd.f32 %v10987_v58, %v5501_v10  ;;  %v7002_v25 = vpop.f32.mrb[126].mxu1 }
 0x995   : > { %v5513_v51 = vadd.f32 %v7002_v25, %v10987_v58  ;;  %v5504_v45 = vpop.f32.mrb[127].mxu1  ;;  %v5594_v50 = vadd.f32 %v5510_v54, %v10435_v11 }
 0x996   : > { %v5505_v7 = vadd.f32 %v10987_v58, %v5504_v45  ;;  %v5592_v15 = vadd.f32 %v5502_v1, %v10444_v55 }
 0x997   : > { %v5595_v41 = vadd.f32 %v5513_v51, %v10448_v48 }
 0x998   : > { %v5593_v34 = vadd.f32 %v5505_v7, %v10452_v39 }
 0x999   : > { %v5619_v0 = vpack.c.bf16 %v5595_v41, %v5594_v50 }
 0x99a   : > { %v5618_v8 = vpack.c.bf16 %v5593_v34, %v5592_v15 }
 0x99c   : > { %7047 = vmatprep.mubr.bf16.mxu0 %v5618_v8 }
 0x99d   : > { %7048 = vmatmul.mubr.bf16.gmra.mrb[124].mxu0 %v5619_v0 }
 0x9a2   : > { %v7005_v35 = vpop.f32.mrb[128].mxu1 }
 0x9a3   : > { %v5526_v60 = vadd.f32 %v7005_v35, %v10987_v58  ;;  %v5517_v18 = vpop.f32.mrb[129].mxu1 }
 0x9a4   : > { %v5518_v37 = vadd.f32 %v10987_v58, %v5517_v18  ;;  %v7006_v31 = vpop.f32.mrb[130].mxu1 }
 0x9a5   : > { %v5529_v30 = vadd.f32 %v7006_v31, %v10987_v58  ;;  %v5520_v43 = vpop.f32.mrb[131].mxu1  ;;  %v5598_v46 = vadd.f32 %v5526_v60, %v10486_v26 }
 0x9a6   : > { %v5521_v44 = vadd.f32 %v10987_v58, %v5520_v43  ;;  %v5596_v20 = vadd.f32 %v5518_v37, %v10504_v53 }
 0x9a7   : > { %v5599_v38 = vadd.f32 %v5529_v30, %v10493_v47 }
 0x9a8   : > { %v5597_v27 = vadd.f32 %v5521_v44, %v10508_v21 }
 0x9a9   : > { %v5621_v9 = vpack.c.bf16 %v5599_v38, %v5598_v46 }
 0x9aa   : > { %v5620_v16 = vpack.c.bf16 %v5597_v27, %v5596_v20 }
 0x9ac   : > { %7051 = vmatprep.mubr.bf16.mxu0 %v5620_v16 }
 0x9ad   : > { %7052 = vmatmul.mubr.bf16.gmra.mrb[128].mxu0 %v5621_v9 }
 0x9b2   : > { %v7009_v36 = vpop.f32.mrb[132].mxu1 }
 0x9b3   : > { %v5542_v52 = vadd.f32 %v7009_v36, %v10987_v58  ;;  %v5533_v13 = vpop.f32.mrb[133].mxu1 }
 0x9b4   : > { %v5534_v28 = vadd.f32 %v10987_v58, %v5533_v13  ;;  %v7010_v54 = vpop.f32.mrb[134].mxu1 }
 0x9b5   : > { %v5545_v10 = vadd.f32 %v7010_v54, %v10987_v58  ;;  %v5536_v1 = vpop.f32.mrb[135].mxu1  ;;  %v5602_v51 = vadd.f32 %v5542_v52, %v10547_v56 }
 0x9b6   : > { %v5537_v25 = vadd.f32 %v10987_v58, %v5536_v1  ;;  %v5600_v7 = vadd.f32 %v5534_v28, %v10556_v33 }
 0x9b7   : > { %v5603_v45 = vadd.f32 %v5545_v10, %v10560_v32 }
 0x9b8   : > { %v5601_v50 = vadd.f32 %v5537_v25, %v10564_v12 }
 0x9b9   : > { %v5623_v41 = vpack.c.bf16 %v5603_v45, %v5602_v51 }
 0x9ba   : > { %v5622_v15 = vpack.c.bf16 %v5601_v50, %v5600_v7 }
 0x9bc   : > { %7055 = vmatprep.mubr.bf16.mxu0 %v5622_v15 }
 0x9bd   : > { %7056 = vmatmul.mubr.bf16.gmra.mrb[132].mxu0 %v5623_v41 }
 0x9c2   : > { %v7013_v34 = vpop.f32.mrb[136].mxu1 }
 0x9c3   : > { %v5558_v0 = vadd.f32 %v7013_v34, %v10987_v58  ;;  %v5549_v8 = vpop.f32.mrb[137].mxu1 }
 0x9c4   : > { %v5550_v35 = vadd.f32 %v10987_v58, %v5549_v8  ;;  %v7014_v60 = vpop.f32.mrb[138].mxu1 }
 0x9c5   : > { %v5561_v18 = vadd.f32 %v7014_v60, %v10987_v58  ;;  %v5552_v37 = vpop.f32.mrb[139].mxu1  ;;  %v5606_v30 = vadd.f32 %v5558_v0, %v10598_v6 }
 0x9c6   : > { %v5553_v31 = vadd.f32 %v10987_v58, %v5552_v37  ;;  %v5604_v44 = vadd.f32 %v5550_v35, %v10613_v17 }
 0x9c7   : > { %v5607_v43 = vadd.f32 %v5561_v18, %v10602_v23 }
 0x9c8   : > { %v5605_v46 = vadd.f32 %v5553_v31, %v10620_v40 }
 0x9c9   : > { %v5625_v38 = vpack.c.bf16 %v5607_v43, %v5606_v30 }
 0x9ca   : > { %v5624_v20 = vpack.c.bf16 %v5605_v46, %v5604_v44 }
 0x9cc   : > { %7059 = vmatprep.mubr.bf16.mxu0 %v5624_v20 }
 0x9cd   : > { %7060 = vmatmul.mubr.bf16.gmra.mrb[136].mxu0 %v5625_v38 }
 0x9d1   : > { %v7017_v27 = vpop.f32.mrb[140].mxu1 }
 0x9d2   : > { %v5574_v9 = vadd.f32 %v7017_v27, %v10987_v58  ;;  %v5565_v16 = vpop.f32.mrb[141].mxu1 }
 0x9d3   : > { %v5566_v36 = vadd.f32 %v10987_v58, %v5565_v16  ;;  %v7018_v52 = vpop.f32.mrb[142].mxu1 }
 0x9d4   : > { %v5577_v13 = vadd.f32 %v7018_v52, %v10987_v58  ;;  %v5568_v28 = vpop.f32.mrb[143].mxu1  ;;  %v5610_v10 = vadd.f32 %v5574_v9, %v10658_v3 }
 0x9d5   : > { %v5569_v54 = vadd.f32 %v10987_v58, %v5568_v28  ;;  %v5608_v25 = vadd.f32 %v5566_v36, %v10648_v49 }
 0x9d6   : > { %v5611_v1 = vadd.f32 %v5577_v13, %v10667_v57 }
 0x9d7   : > { %v5609_v51 = vadd.f32 %v5569_v54, %v10652_v5 }
 0x9d8   : > { %v5627_v45 = vpack.c.bf16 %v5611_v1, %v5610_v10 }
 0x9d9   : > { %v5626_v7 = vpack.c.bf16 %v5609_v51, %v5608_v25 }
 0x9db   : > { %7063 = vmatprep.mubr.bf16.mxu0 %v5626_v7 }
 0x9dc   : > { %7064 = vmatmul.mubr.bf16.gmra.mrb[140].mxu0 %v5627_v45 }
 0xa40   : > { %v7037_v50 = vpop.f32.mrb[112].mxu0 }
 0xa41   : > { %v5726_v41 = vpop.f32.mrb[113].mxu0  ;;  %v5855_v34 = vadd.f32 %v7037_v50, %v10255_v2 }
 0xa42   : > { %v7038_v15 = vpop.f32.mrb[114].mxu0  ;;  %v5853_v8 = vadd.f32 %v5726_v41, %v10270_v24 }
 0xa43   : > { %v5856_v58 = vadd.f32 %v7038_v15, %v10259_v4  ;;  %v5729_v0 = vpop.f32.mrb[115].mxu0 }
 0xa44   : > { %v5854_v35 = vadd.f32 %v5729_v0, %v10274_v63 }
 0xa45   : > { %v6332_v60 = vpack.c.bf16 %v5856_v58, %v5855_v34 }
 0xa46   : > { %v6327_v18 = vpack.c.bf16 %v5854_v35, %v5853_v8 }
 0xa47   : > { %6404 = vst [vmem:[%s11060_s28 + $0x8] sm:$0xff] %v6332_v60  }
 0xa48   : > { %6328 = vst [vmem:[%s11060_s28] sm:$0xff] %v6327_v18  }
 0xa50   : > { %v7041_v2 = vpop.f32.mrb[116].mxu0 }
 0xa51   : > { %v5742_v4 = vpop.f32.mrb[117].mxu0  ;;  %v5859_v24 = vadd.f32 %v7041_v2, %v10323_v29 }
 0xa52   : > { %v7042_v37 = vpop.f32.mrb[118].mxu0  ;;  %v5857_v43 = vadd.f32 %v5742_v4, %v10332_v22 }
 0xa53   : > { %v5860_v31 = vadd.f32 %v7042_v37, %v10336_v61  ;;  %v5745_v30 = vpop.f32.mrb[119].mxu0 }
 0xa54   : > { %v5858_v44 = vadd.f32 %v5745_v30, %v10340_v19 }
 0xa55   : > { %v6342_v63 = vpack.c.bf16 %v5860_v31, %v5859_v24 }
 0xa56   : > { %v6337_v46 = vpack.c.bf16 %v5858_v44, %v5857_v43 }
 0xa57   : > { %6406 = vst [vmem:[%s11060_s28 + $0x18] sm:$0xff] %v6342_v63  }
 0xa58   : > { %6405 = vst [vmem:[%s11060_s28 + $0x10] sm:$0xff] %v6337_v46  }
 0xa60   : > { %v7045_v38 = vpop.f32.mrb[120].mxu0 }
 0xa61   : > { %v5758_v20 = vpop.f32.mrb[121].mxu0  ;;  %v5863_v9 = vadd.f32 %v7045_v38, %v10374_v62 }
 0xa62   : > { %v7046_v27 = vpop.f32.mrb[122].mxu0  ;;  %v5861_v61 = vadd.f32 %v5758_v20, %v10392_v14 }
 0xa63   : > { %v5864_v29 = vadd.f32 %v7046_v27, %v10381_v59  ;;  %v5761_v16 = vpop.f32.mrb[123].mxu0 }
 0xa64   : > { %v5862_v22 = vadd.f32 %v5761_v16, %v10396_v42 }
 0xa65   : > { %v6352_v19 = vpack.c.bf16 %v5864_v29, %v5863_v9 }
 0xa66   : > { %v6347_v36 = vpack.c.bf16 %v5862_v22, %v5861_v61 }
 0xa67   : > { %6408 = vst [vmem:[%s11060_s28 + $0x28] sm:$0xff] %v6352_v19  }
 0xa68   : > { %6407 = vst [vmem:[%s11060_s28 + $0x20] sm:$0xff] %v6347_v36  }
 0xa70   : > { %v7049_v52 = vpop.f32.mrb[124].mxu0 }
 0xa71   : > { %v5774_v13 = vpop.f32.mrb[125].mxu0  ;;  %v5867_v54 = vadd.f32 %v7049_v52, %v10435_v11 }
 0xa72   : > { %v7050_v28 = vpop.f32.mrb[126].mxu0  ;;  %v5865_v59 = vadd.f32 %v5774_v13, %v10444_v55 }
 0xa73   : > { %v5868_v62 = vadd.f32 %v7050_v28, %v10448_v48  ;;  %v5777_v10 = vpop.f32.mrb[127].mxu0 }
 0xa74   : > { %v5866_v14 = vadd.f32 %v5777_v10, %v10452_v39 }
 0xa75   : > { %v6362_v42 = vpack.c.bf16 %v5868_v62, %v5867_v54 }
 0xa76   : > { %v6357_v1 = vpack.c.bf16 %v5866_v14, %v5865_v59 }
 0xa77   : > { %6410 = vst [vmem:[%s11060_s28 + $0x38] sm:$0xff] %v6362_v42  }
 0xa78   : > { %6409 = vst [vmem:[%s11060_s28 + $0x30] sm:$0xff] %v6357_v1  }
 0xa80   : > { %v7053_v25 = vpop.f32.mrb[128].mxu0 }
 0xa81   : > { %v5790_v51 = vpop.f32.mrb[129].mxu0  ;;  %v5871_v7 = vadd.f32 %v7053_v25, %v10486_v26 }
 0xa82   : > { %v7054_v45 = vpop.f32.mrb[130].mxu0  ;;  %v5869_v48 = vadd.f32 %v5790_v51, %v10504_v53 }
 0xa83   : > { %v5872_v11 = vadd.f32 %v7054_v45, %v10493_v47  ;;  %v5793_v50 = vpop.f32.mrb[131].mxu0 }
 0xa84   : > { %v5870_v55 = vadd.f32 %v5793_v50, %v10508_v21 }
 0xa85   : > { %v6372_v39 = vpack.c.bf16 %v5872_v11, %v5871_v7 }
 0xa86   : > { %v6367_v41 = vpack.c.bf16 %v5870_v55, %v5869_v48 }
 0xa87   : > { %6412 = vst [vmem:[%s11060_s28 + $0x48] sm:$0xff] %v6372_v39  }
 0xa88   : > { %6411 = vst [vmem:[%s11060_s28 + $0x40] sm:$0xff] %v6367_v41  }
 0xa90   : > { %v7057_v15 = vpop.f32.mrb[132].mxu0 }
 0xa91   : > { %v5806_v34 = vpop.f32.mrb[133].mxu0  ;;  %v5875_v0 = vadd.f32 %v7057_v15, %v10547_v56 }
 0xa92   : > { %v7058_v58 = vpop.f32.mrb[134].mxu0  ;;  %v5873_v47 = vadd.f32 %v5806_v34, %v10556_v33 }
 0xa93   : > { %v5876_v26 = vadd.f32 %v7058_v58, %v10560_v32  ;;  %v5809_v8 = vpop.f32.mrb[135].mxu0 }
 0xa94   : > { %v5874_v53 = vadd.f32 %v5809_v8, %v10564_v12 }
 0xa95   : > { %v6382_v21 = vpack.c.bf16 %v5876_v26, %v5875_v0 }
 0xa96   : > { %v6377_v35 = vpack.c.bf16 %v5874_v53, %v5873_v47 }
 0xa97   : > { %6414 = vst [vmem:[%s11060_s28 + $0x58] sm:$0xff] %v6382_v21  }
 0xa98   : > { %6413 = vst [vmem:[%s11060_s28 + $0x50] sm:$0xff] %v6377_v35  }
 0xaa0   : > { %v7061_v60 = vpop.f32.mrb[136].mxu0 }
 0xaa1   : > { %v5822_v18 = vpop.f32.mrb[137].mxu0  ;;  %v5879_v4 = vadd.f32 %v7061_v60, %v10598_v6 }
 0xaa2   : > { %v7062_v2 = vpop.f32.mrb[138].mxu0  ;;  %v5877_v32 = vadd.f32 %v5822_v18, %v10613_v17 }
 0xaa3   : > { %v5880_v56 = vadd.f32 %v7062_v2, %v10602_v23  ;;  %v5825_v37 = vpop.f32.mrb[139].mxu0 }
 0xaa4   : > { %v5878_v33 = vadd.f32 %v5825_v37, %v10620_v40 }
 0xaa5   : > { %v6392_v12 = vpack.c.bf16 %v5880_v56, %v5879_v4 }
 0xaa6   : > { %v6387_v24 = vpack.c.bf16 %v5878_v33, %v5877_v32 }
 0xaa7   : > { %6416 = vst [vmem:[%s11060_s28 + $0x68] sm:$0xff] %v6392_v12  }
 0xaa8   : > { %6415 = vst [vmem:[%s11060_s28 + $0x60] sm:$0xff] %v6387_v24  }
 0xaaf   : > { %v7065_v31 = vpop.f32.mrb[140].mxu0 }
 0xab0   : > { %v5838_v30 = vpop.f32.mrb[141].mxu0  ;;  %v5883_v44 = vadd.f32 %v7065_v31, %v10658_v3 }
 0xab1   : > { %v7066_v43 = vpop.f32.mrb[142].mxu0  ;;  %v5881_v23 = vadd.f32 %v5838_v30, %v10648_v49 }
 0xab2   : > { %v5884_v6 = vadd.f32 %v7066_v43, %v10667_v57  ;;  %v5841_v63 = vpop.f32.mrb[143].mxu0 }
 0xab3   : > { %v5882_v17 = vadd.f32 %v5841_v63, %v10652_v5 }
 0xab4   : > { %v6402_v46 = vpack.c.bf16 %v5884_v6, %v5883_v44 }
 0xab5   : > { %v6397_v38 = vpack.c.bf16 %v5882_v17, %v5881_v23 }
 0xab6   : > { %6418 = vst [vmem:[%s11060_s28 + $0x78] sm:$0xff] %v6402_v46  }
 0xab7   : > { %6417 = vst [vmem:[%s11060_s28 + $0x70] sm:$0xff] %v6397_v38  }
 0xab8 PF: > { %s32_s3 = sadd.s32 1, %s7605_s3  }
 0xab9   : > { %p29_p4 = scmp.ge.s32.totalorder %s32_s3, 4  }
 0xabb   :  { %31 = sbr.rel (!%p29_p4) target bundleno = 8 (0x8), region = 138 }

</bundles_post_ra>
